<compile_context>
chip_gen: v7x
topology: tpu7x:2x2x1
jax: 0.10.0
libtpu: 0.0.40
codegen_flags: <defaults>
</compile_context>

<pallas_src>
import jax
import jax.numpy as jnp
from jax import lax
from jax.experimental import pallas as pl
from jax.experimental.pallas import tpu as pltpu

CONTENT_DIM = 128
SPEAKER_DIM = 64
HIDDEN_DIM = 256
OUTPUT_DIM = 80
OUTPUT_PAD = 128          # lane-dense output width written by the kernel
DEFAULT_CHUNK = 128       # time chunk (VMEM budget ~15 MiB incl. weights at B=8)


def _voice_decoder_kernel(
    content_ref,   # (Tc, B, Dc)  f32   streamed per chunk
    spk_ref,       # (B, Ds)      f32   resident
    w_in_c_ref,    # (Dc, H)      bf16
    w_in_s_ref,    # (Ds, H)      bf16
    b_in_ref,      # (1, H)       f32
    w_ih1_ref,     # (H, 4H)      bf16
    b1_ref,        # (1, 4H)      f32   (= b_ih1 + b_hh1)
    w_big_ref,     # (3H, 8H)     bf16  block-diag [w_hh1 | w_ih2 ; w_hh2]
    b2_ref,        # (1, 4H)      f32   (= b_ih2 + b_hh2)
    w_o1_ref,      # (H, 256)     bf16
    b_o1_ref,      # (1, 256)     f32
    w_o2_ref,      # (256, 128)   bf16  (lane-padded from 80)
    b_o2_ref,      # (1, 128)     f32
    out_ref,       # (Tc, B, 128) f32   streamed per chunk
    xg1_scr,       # VMEM (Tc, B, 4H) f32 : layer-1 input-path gates for the chunk
    y2_scr,        # VMEM (Tc, B, H)  f32 : layer-2 hidden outputs for the chunk
    h1_scr, c1_scr, h2_scr, c2_scr,  # VMEM (B, H) f32 : persistent LSTM state
):
    tc, B, Dc = content_ref.shape
    H = w_in_s_ref.shape[1]
    Dop = out_ref.shape[-1]

    # ---- zero persistent LSTM state on the first chunk --------------------------
    @pl.when(pl.program_id(0) == 0)
    def _():
        h1_scr[...] = jnp.zeros_like(h1_scr)
        c1_scr[...] = jnp.zeros_like(c1_scr)
        h2_scr[...] = jnp.zeros_like(h2_scr)
        c2_scr[...] = jnp.zeros_like(c2_scr)

    # ---- input projection + layer-1 input-path gates for the whole chunk (MXU) --
    content = content_ref[...].reshape(tc * B, Dc).astype(jnp.bfloat16)
    sp = jnp.dot(spk_ref[...].astype(jnp.bfloat16), w_in_s_ref[...],
                 preferred_element_type=jnp.float32)                     # (B, H)
    x = jnp.dot(content, w_in_c_ref[...],
                preferred_element_type=jnp.float32)                      # (Tc*B, H)
    x = x.reshape(tc, B, H) + (sp + b_in_ref[...])[None, :, :]
    xg1 = jnp.dot(x.reshape(tc * B, H).astype(jnp.bfloat16), w_ih1_ref[...],
                  preferred_element_type=jnp.float32)
    xg1_scr[...] = xg1.reshape(tc, B, 4 * H) + b1_ref[...][None, :, :]

    w_big = w_big_ref[...]          # bf16, hoisted out of the recurrence
    b2 = b2_ref[...]                # f32 (1, 4H)

    def lstm_gates(g, c_prev):
        # PyTorch gate order: i, f, g, o.  All gate math kept in f32.
        i = jax.nn.sigmoid(g[:, 0 * H:1 * H])
        f = jax.nn.sigmoid(g[:, 1 * H:2 * H])
        gg = jnp.tanh(g[:, 2 * H:3 * H])
        o = jax.nn.sigmoid(g[:, 3 * H:4 * H])
        c = f * c_prev + i * gg
        h = o * jnp.tanh(c)
        return h, c

    # ---- fused recurrence: layer-2 runs one step behind layer-1 ------------------
    # Iteration s computes layer-1 step s (valid while s < tc) and layer-2 step s-1
    # (valid once s >= 1), using a single (B, 3H) @ (3H, 8H) MXU op per iteration.
    def step(s, carry):
        h1, c1, h2, c2, h1p = carry
        stacked = jnp.concatenate([h1, h1p, h2], axis=-1).astype(jnp.bfloat16)
        g_all = jnp.dot(stacked, w_big, preferred_element_type=jnp.float32)  # (B, 8H)

        # layer-1, step s
        g1 = g_all[:, :4 * H] + xg1_scr[jnp.minimum(s, tc - 1)]
        h1n, c1n = lstm_gates(g1, c1)

        # layer-2, step s-1 (input-path = h1_prev @ w_ih2, baked into w_big)
        g2 = g_all[:, 4 * H:] + b2
        h2n, c2n = lstm_gates(g2, c2)

        do1 = s < tc
        do2 = s >= 1
        h1 = jnp.where(do1, h1n, h1)
        c1 = jnp.where(do1, c1n, c1)
        h2 = jnp.where(do2, h2n, h2)
        c2 = jnp.where(do2, c2n, c2)
        # At s == 0 this writes a stale value to row 0 which s == 1 overwrites.
        y2_scr[jnp.maximum(s - 1, 0)] = h2
        h1p = jnp.where(do1, h1n, h1p)
        return (h1, c1, h2, c2, h1p)

    h1_0 = h1_scr[...]
    carry0 = (h1_0, c1_scr[...], h2_scr[...], c2_scr[...], h1_0)
    h1, c1, h2, c2, _ = lax.fori_loop(0, tc + 1, step, carry0)
    h1_scr[...] = h1
    c1_scr[...] = c1
    h2_scr[...] = h2
    c2_scr[...] = c2

    # ---- output MLP over the whole chunk (MXU, lane-dense 128-wide store) -------
    y2 = y2_scr[...].reshape(tc * B, H).astype(jnp.bfloat16)
    z = jnp.dot(y2, w_o1_ref[...], preferred_element_type=jnp.float32) + b_o1_ref[...]
    z = jnp.maximum(z, 0.0).astype(jnp.bfloat16)
    mel = jnp.dot(z, w_o2_ref[...], preferred_element_type=jnp.float32) + b_o2_ref[...]
    out_ref[...] = mel.reshape(tc, B, Dop)


def voice_decoder_forward(content_features, speaker_embedding, params,
                          *, chunk=DEFAULT_CHUNK):
    """content_features: (B, T, content_dim); speaker_embedding: (B, speaker_dim)."""
    B, T, Dc = content_features.shape
    Ds = speaker_embedding.shape[-1]
    H = HIDDEN_DIM
    Do = OUTPUT_DIM
    Dop = OUTPUT_PAD

    tc = min(chunk, T)
    n_chunks = -(-T // tc)
    T_pad = n_chunks * tc

    f32, bf16 = jnp.float32, jnp.bfloat16

    content_tm = jnp.transpose(content_features.astype(f32), (1, 0, 2))   # (T, B, Dc)
    if T_pad != T:
        content_tm = jnp.pad(content_tm, ((0, T_pad - T), (0, 0), (0, 0)))

    # ---- weight preparation (pre-transposed, bf16 MXU operands, f32 biases) -----
    w_in = params["w_in"].astype(f32)
    w_in_c = w_in[:, :Dc].T.astype(bf16)                   # (Dc, H)
    w_in_s = w_in[:, Dc:].T.astype(bf16)                   # (Ds, H)
    b_in = params["b_in"][None, :].astype(f32)
    w_ih1 = params["w_ih1"].T.astype(bf16)                 # (H, 4H)
    b1 = (params["b_ih1"] + params["b_hh1"])[None, :].astype(f32)
    # fused hidden-path weight: [h1 | h1_prev | h2] @ w_big -> [gates1_h | gates2_h]
    w_big = jnp.zeros((3 * H, 8 * H), f32)
    w_big = w_big.at[0:H, 0:4 * H].set(params["w_hh1"].T)
    w_big = w_big.at[H:2 * H, 4 * H:8 * H].set(params["w_ih2"].T)
    w_big = w_big.at[2 * H:3 * H, 4 * H:8 * H].set(params["w_hh2"].T)
    w_big = w_big.astype(bf16)
    b2 = (params["b_ih2"] + params["b_hh2"])[None, :].astype(f32)
    w_o1 = params["w_o1"].T.astype(bf16)                   # (H, 256)
    b_o1 = params["b_o1"][None, :].astype(f32)
    w_o2 = jnp.zeros((params["w_o2"].shape[1], Dop), f32)
    w_o2 = w_o2.at[:, :Do].set(params["w_o2"].T).astype(bf16)      # (256, 128)
    b_o2 = jnp.zeros((1, Dop), f32).at[:, :Do].set(params["b_o2"][None, :])

    args = (content_tm, speaker_embedding.astype(f32), w_in_c, w_in_s, b_in,
            w_ih1, b1, w_big, b2, w_o1, b_o1, w_o2, b_o2)

    def resident(shape):
        nd = len(shape)
        return pl.BlockSpec(shape, lambda t, _nd=nd: (0,) * _nd)

    in_specs = [
        pl.BlockSpec((tc, B, Dc), lambda t: (t, 0, 0)),    # content, streamed
        resident((B, Ds)),
        resident(w_in_c.shape), resident(w_in_s.shape), resident(b_in.shape),
        resident(w_ih1.shape), resident(b1.shape),
        resident(w_big.shape), resident(b2.shape),
        resident(w_o1.shape), resident(b_o1.shape),
        resident(w_o2.shape), resident(b_o2.shape),
    ]

    out_tm = pl.pallas_call(
        _voice_decoder_kernel,
        out_shape=jax.ShapeDtypeStruct((T_pad, B, Dop), jnp.float32),
        grid_spec=pltpu.PrefetchScalarGridSpec(
            num_scalar_prefetch=0,
            grid=(n_chunks,),
            in_specs=in_specs,
            out_specs=pl.BlockSpec((tc, B, Dop), lambda t: (t, 0, 0)),
            scratch_shapes=[
                pltpu.VMEM((tc, B, 4 * H), jnp.float32),   # xg1 (layer-1 input gates)
                pltpu.VMEM((tc, B, H), jnp.float32),       # layer-2 hidden outputs
                pltpu.VMEM((B, H), jnp.float32),           # h1
                pltpu.VMEM((B, H), jnp.float32),           # c1
                pltpu.VMEM((B, H), jnp.float32),           # h2
                pltpu.VMEM((B, H), jnp.float32),           # c2
            ]),
        compiler_params=pltpu.CompilerParams(
            dimension_semantics=("arbitrary",),
            vmem_limit_bytes=32 * 1024 * 1024),
    )(*args)

    out = jnp.transpose(out_tm, (1, 0, 2))                 # (B, T_pad, 128)
    return out[:, :T, :Do]


# ----------------------- pure-JAX f32 reference (for validation) -----------------
def reference_forward(content, spk, params):
    B, T, _ = content.shape
    spk_exp = jnp.broadcast_to(spk[:, None, :], (B, T, spk.shape[-1]))
    combined = jnp.concatenate([content, spk_exp], axis=2)
    x = combined @ params["w_in"].T + params["b_in"]

    def lstm(x, w_ih, w_hh, b_ih, b_hh):
        H = w_hh.shape[1]

        def step(carry, x_t):
            h, c = carry
            g = x_t @ w_ih.T + b_ih + h @ w_hh.T + b_hh
            i, f, gg, o = jnp.split(g, 4, axis=-1)
            i, f, o = jax.nn.sigmoid(i), jax.nn.sigmoid(f), jax.nn.sigmoid(o)
            gg = jnp.tanh(gg)
            c = f * c + i * gg
            h = o * jnp.tanh(c)
            return (h, c), h

        h0 = jnp.zeros((x.shape[0], H), jnp.float32)
        (_, _), ys = lax.scan(step, (h0, h0), jnp.transpose(x, (1, 0, 2)))
        return jnp.transpose(ys, (1, 0, 2))

    x = lstm(x, params["w_ih1"], params["w_hh1"], params["b_ih1"], params["b_hh1"])
    x = lstm(x, params["w_ih2"], params["w_hh2"], params["b_ih2"], params["b_hh2"])
    z = jnp.maximum(x @ params["w_o1"].T + params["b_o1"], 0.0)
    return z @ params["w_o2"].T + params["b_o2"]


def init_params(key, content_dim, speaker_dim, hidden_dim, output_dim):
    ks = jax.random.split(key, 12)
    s = 0.1
    H = hidden_dim
    return {
        "w_in":  s * jax.random.normal(ks[0], (H, content_dim + speaker_dim), jnp.float32),
        "b_in":  s * jax.random.normal(ks[1], (H,), jnp.float32),
        "w_ih1": s * jax.random.normal(ks[2], (4 * H, H), jnp.float32),
        "w_hh1": s * jax.random.normal(ks[3], (4 * H, H), jnp.float32),
        "b_ih1": s * jax.random.normal(ks[4], (4 * H,), jnp.float32),
        "b_hh1": s * jax.random.normal(ks[5], (4 * H,), jnp.float32),
        "w_ih2": s * jax.random.normal(ks[6], (4 * H, H), jnp.float32),
        "w_hh2": s * jax.random.normal(ks[7], (4 * H, H), jnp.float32),
        "b_ih2": s * jax.random.normal(ks[8], (4 * H,), jnp.float32),
        "b_hh2": s * jax.random.normal(ks[9], (4 * H,), jnp.float32),
        "w_o1":  s * jax.random.normal(ks[10], (256, H), jnp.float32),
        "b_o1":  jnp.zeros((256,), jnp.float32),
        "w_o2":  s * jax.random.normal(ks[11], (output_dim, 256), jnp.float32),
        "b_o2":  jnp.zeros((output_dim,), jnp.float32),
    }


if __name__ == "__main__":
    key = jax.random.PRNGKey(0)
    k_c, k_s, k_p = jax.random.split(key, 3)

    # B multiple of 8 (sublane-friendly); T chosen to exercise multi-chunk state
    # carry AND the T-padding path (T=12 with chunk=8 -> 2 chunks, 4 padded steps).
    B, T = 8, 12
    content = jax.random.normal(k_c, (B, T, CONTENT_DIM), jnp.float32)
    speaker = jax.random.normal(k_s, (B, SPEAKER_DIM), jnp.float32)
    params = init_params(k_p, CONTENT_DIM, SPEAKER_DIM, HIDDEN_DIM, OUTPUT_DIM)

    out = voice_decoder_forward(content, speaker, params, chunk=8)
    out = jax.block_until_ready(out)
    assert out.shape == (B, T, OUTPUT_DIM), out.shape

    ref = jax.block_until_ready(reference_forward(content, speaker, params))
    max_err = float(jnp.max(jnp.abs(out - ref)))
    # bf16 MXU operands (f32 accumulation / f32 state) -> small rounding vs f32 ref.
    assert max_err < 5e-2, f"mismatch vs reference: max abs err {max_err}"

    print("KERNEL_OK")
</pallas_src>

<mosaic_0001>
module attributes {stable_mosaic.version = 11 : i64} {
  func.func @_voice_decoder_kernel(%arg0: i32, %arg1: memref<8x8x128xf32, #tpu.memory_space<vmem>>, %arg2: memref<8x64xf32, #tpu.memory_space<vmem>>, %arg3: memref<128x256xbf16, #tpu.memory_space<vmem>>, %arg4: memref<64x256xbf16, #tpu.memory_space<vmem>>, %arg5: memref<1x256xf32, #tpu.memory_space<vmem>>, %arg6: memref<256x1024xbf16, #tpu.memory_space<vmem>>, %arg7: memref<1x1024xf32, #tpu.memory_space<vmem>>, %arg8: memref<768x2048xbf16, #tpu.memory_space<vmem>>, %arg9: memref<1x1024xf32, #tpu.memory_space<vmem>>, %arg10: memref<256x256xbf16, #tpu.memory_space<vmem>>, %arg11: memref<1x256xf32, #tpu.memory_space<vmem>>, %arg12: memref<256x128xbf16, #tpu.memory_space<vmem>>, %arg13: memref<1x128xf32, #tpu.memory_space<vmem>>, %arg14: memref<8x8x128xf32, #tpu.memory_space<vmem>>, %arg15: memref<8x8x1024xf32, #tpu.memory_space<vmem>>, %arg16: memref<8x8x256xf32, #tpu.memory_space<vmem>>, %arg17: memref<8x256xf32, #tpu.memory_space<vmem>>, %arg18: memref<8x256xf32, #tpu.memory_space<vmem>>, %arg19: memref<8x256xf32, #tpu.memory_space<vmem>>, %arg20: memref<8x256xf32, #tpu.memory_space<vmem>>) attributes {dimension_semantics = [#tpu.dimension_semantics<arbitrary>], iteration_bounds = array<i64: 2>, scalar_prefetch = 0 : i64, scratch_operands = 6 : i64, tpu.core_type = #tpu.core_type<tc>, window_params = [{transform_indices = @transform_0, window_bounds = array<i64: 8, 8, 128>}, {pipeline_mode = #tpu.pipeline_mode<synchronous>, transform_indices = @transform_1, window_bounds = array<i64: 8, 64>}, {pipeline_mode = #tpu.pipeline_mode<synchronous>, transform_indices = @transform_2, window_bounds = array<i64: 128, 256>}, {pipeline_mode = #tpu.pipeline_mode<synchronous>, transform_indices = @transform_3, window_bounds = array<i64: 64, 256>}, {pipeline_mode = #tpu.pipeline_mode<synchronous>, transform_indices = @transform_4, window_bounds = array<i64: 1, 256>}, {pipeline_mode = #tpu.pipeline_mode<synchronous>, transform_indices = @transform_5, window_bounds = array<i64: 256, 1024>}, {pipeline_mode = #tpu.pipeline_mode<synchronous>, transform_indices = @transform_6, window_bounds = array<i64: 1, 1024>}, {pipeline_mode = #tpu.pipeline_mode<synchronous>, transform_indices = @transform_7, window_bounds = array<i64: 768, 2048>}, {pipeline_mode = #tpu.pipeline_mode<synchronous>, transform_indices = @transform_8, window_bounds = array<i64: 1, 1024>}, {pipeline_mode = #tpu.pipeline_mode<synchronous>, transform_indices = @transform_9, window_bounds = array<i64: 256, 256>}, {pipeline_mode = #tpu.pipeline_mode<synchronous>, transform_indices = @transform_10, window_bounds = array<i64: 1, 256>}, {pipeline_mode = #tpu.pipeline_mode<synchronous>, transform_indices = @transform_11, window_bounds = array<i64: 256, 128>}, {pipeline_mode = #tpu.pipeline_mode<synchronous>, transform_indices = @transform_12, window_bounds = array<i64: 1, 128>}, {transform_indices = @transform_13, window_bounds = array<i64: 8, 8, 128>}]} {
    %c0_i32 = arith.constant 0 : i32
    %0 = arith.cmpi eq, %arg0, %c0_i32 : i32
    %1 = arith.extui %0 : i1 to i32
    %c0_i32_0 = arith.constant 0 : i32
    %2 = arith.cmpi ne, %1, %c0_i32_0 : i32
    scf.if %2 {
      %cst_59 = arith.constant 0.000000e+00 : f32
      %59 = vector.broadcast %cst_59 : f32 to vector<8x256xf32>
      %c0_60 = arith.constant 0 : index
      %c0_61 = arith.constant 0 : index
      %60 = vector.load %arg17[%c0_60, %c0_61] : memref<8x256xf32, #tpu.memory_space<vmem>>, vector<8x256xf32>
      tpu.vector_store %arg17[%c0_60, %c0_61], %59 {strides = array<i32>} : memref<8x256xf32, #tpu.memory_space<vmem>>, vector<8x256xf32>,
      %cst_62 = arith.constant 0.000000e+00 : f32
      %61 = vector.broadcast %cst_62 : f32 to vector<8x256xf32>
      %c0_63 = arith.constant 0 : index
      %c0_64 = arith.constant 0 : index
      %62 = vector.load %arg18[%c0_63, %c0_64] : memref<8x256xf32, #tpu.memory_space<vmem>>, vector<8x256xf32>
      tpu.vector_store %arg18[%c0_63, %c0_64], %61 {strides = array<i32>} : memref<8x256xf32, #tpu.memory_space<vmem>>, vector<8x256xf32>,
      %cst_65 = arith.constant 0.000000e+00 : f32
      %63 = vector.broadcast %cst_65 : f32 to vector<8x256xf32>
      %c0_66 = arith.constant 0 : index
      %c0_67 = arith.constant 0 : index
      %64 = vector.load %arg19[%c0_66, %c0_67] : memref<8x256xf32, #tpu.memory_space<vmem>>, vector<8x256xf32>
      tpu.vector_store %arg19[%c0_66, %c0_67], %63 {strides = array<i32>} : memref<8x256xf32, #tpu.memory_space<vmem>>, vector<8x256xf32>,
      %cst_68 = arith.constant 0.000000e+00 : f32
      %65 = vector.broadcast %cst_68 : f32 to vector<8x256xf32>
      %c0_69 = arith.constant 0 : index
      %c0_70 = arith.constant 0 : index
      %66 = vector.load %arg20[%c0_69, %c0_70] : memref<8x256xf32, #tpu.memory_space<vmem>>, vector<8x256xf32>
      tpu.vector_store %arg20[%c0_69, %c0_70], %65 {strides = array<i32>} : memref<8x256xf32, #tpu.memory_space<vmem>>, vector<8x256xf32>,
    } else {
    }
    %c0 = arith.constant 0 : index
    %c0_1 = arith.constant 0 : index
    %c0_2 = arith.constant 0 : index
    %3 = vector.load %arg1[%c0, %c0_1, %c0_2] : memref<8x8x128xf32, #tpu.memory_space<vmem>>, vector<8x8x128xf32>
    %4 = vector.shape_cast %3 : vector<8x8x128xf32> to vector<64x128xf32>
    %5 = arith.truncf %4 : vector<64x128xf32> to vector<64x128xbf16>
    %c0_3 = arith.constant 0 : index
    %c0_4 = arith.constant 0 : index
    %6 = vector.load %arg2[%c0_3, %c0_4] : memref<8x64xf32, #tpu.memory_space<vmem>>, vector<8x64xf32>
    %7 = arith.truncf %6 : vector<8x64xf32> to vector<8x64xbf16>
    %c0_5 = arith.constant 0 : index
    %c0_6 = arith.constant 0 : index
    %8 = vector.load %arg4[%c0_5, %c0_6] : memref<64x256xbf16, #tpu.memory_space<vmem>>, vector<64x256xbf16>
    %cst = arith.constant dense<0.000000e+00> : vector<8x256xf32>
    %9 = tpu.matmul %7, %8, %cst {dimension_numbers = #tpu.dot_dimension_numbers<[1], [0], [0], [1], [0, 0, 1, 1], [], []>} : vector<8x64xbf16>, vector<64x256xbf16>, vector<8x256xf32> -> vector<8x256xf32>
    %c0_7 = arith.constant 0 : index
    %c0_8 = arith.constant 0 : index
    %10 = vector.load %arg3[%c0_7, %c0_8] : memref<128x256xbf16, #tpu.memory_space<vmem>>, vector<128x256xbf16>
    %cst_9 = arith.constant dense<0.000000e+00> : vector<64x256xf32>
    %11 = tpu.matmul %5, %10, %cst_9 {dimension_numbers = #tpu.dot_dimension_numbers<[1], [0], [0], [1], [0, 0, 1, 1], [], []>} : vector<64x128xbf16>, vector<128x256xbf16>, vector<64x256xf32> -> vector<64x256xf32>
    %12 = vector.shape_cast %11 : vector<64x256xf32> to vector<8x8x256xf32>
    %c0_10 = arith.constant 0 : index
    %c0_11 = arith.constant 0 : index
    %13 = vector.load %arg5[%c0_10, %c0_11] : memref<1x256xf32, #tpu.memory_space<vmem>>, vector<1x256xf32>
    %14 = vector.broadcast %13 : vector<1x256xf32> to vector<8x256xf32>
    %15 = arith.addf %9, %14 : vector<8x256xf32>
    %16 = vector.shape_cast %15 : vector<8x256xf32> to vector<1x8x256xf32>
    %17 = vector.broadcast %16 : vector<1x8x256xf32> to vector<8x8x256xf32>
    %18 = arith.addf %12, %17 : vector<8x8x256xf32>
    %19 = vector.shape_cast %18 : vector<8x8x256xf32> to vector<64x256xf32>
    %20 = arith.truncf %19 : vector<64x256xf32> to vector<64x256xbf16>
    %c0_12 = arith.constant 0 : index
    %c0_13 = arith.constant 0 : index
    %21 = vector.load %arg6[%c0_12, %c0_13] : memref<256x1024xbf16, #tpu.memory_space<vmem>>, vector<256x1024xbf16>
    %cst_14 = arith.constant dense<0.000000e+00> : vector<64x1024xf32>
    %22 = tpu.matmul %20, %21, %cst_14 {dimension_numbers = #tpu.dot_dimension_numbers<[1], [0], [0], [1], [0, 0, 1, 1], [], []>} : vector<64x256xbf16>, vector<256x1024xbf16>, vector<64x1024xf32> -> vector<64x1024xf32>
    %23 = vector.shape_cast %22 : vector<64x1024xf32> to vector<8x8x1024xf32>
    %c0_15 = arith.constant 0 : index
    %c0_16 = arith.constant 0 : index
    %24 = vector.load %arg7[%c0_15, %c0_16] : memref<1x1024xf32, #tpu.memory_space<vmem>>, vector<1x1024xf32>
    %25 = vector.shape_cast %24 : vector<1x1024xf32> to vector<1x1x1024xf32>
    %26 = vector.broadcast %25 : vector<1x1x1024xf32> to vector<8x8x1024xf32>
    %27 = arith.addf %23, %26 : vector<8x8x1024xf32>
    %c0_17 = arith.constant 0 : index
    %c0_18 = arith.constant 0 : index
    %c0_19 = arith.constant 0 : index
    %28 = vector.load %arg15[%c0_17, %c0_18, %c0_19] : memref<8x8x1024xf32, #tpu.memory_space<vmem>>, vector<8x8x1024xf32>
    tpu.vector_store %arg15[%c0_17, %c0_18, %c0_19], %27 {strides = array<i32>} : memref<8x8x1024xf32, #tpu.memory_space<vmem>>, vector<8x8x1024xf32>,
    %c0_20 = arith.constant 0 : index
    %c0_21 = arith.constant 0 : index
    %29 = vector.load %arg8[%c0_20, %c0_21] : memref<768x2048xbf16, #tpu.memory_space<vmem>>, vector<768x2048xbf16>
    %c0_22 = arith.constant 0 : index
    %c0_23 = arith.constant 0 : index
    %30 = vector.load %arg9[%c0_22, %c0_23] : memref<1x1024xf32, #tpu.memory_space<vmem>>, vector<1x1024xf32>
    %c0_24 = arith.constant 0 : index
    %c0_25 = arith.constant 0 : index
    %31 = vector.load %arg17[%c0_24, %c0_25] : memref<8x256xf32, #tpu.memory_space<vmem>>, vector<8x256xf32>
    %c0_26 = arith.constant 0 : index
    %c0_27 = arith.constant 0 : index
    %32 = vector.load %arg18[%c0_26, %c0_27] : memref<8x256xf32, #tpu.memory_space<vmem>>, vector<8x256xf32>
    %c0_28 = arith.constant 0 : index
    %c0_29 = arith.constant 0 : index
    %33 = vector.load %arg19[%c0_28, %c0_29] : memref<8x256xf32, #tpu.memory_space<vmem>>, vector<8x256xf32>
    %c0_30 = arith.constant 0 : index
    %c0_31 = arith.constant 0 : index
    %34 = vector.load %arg20[%c0_30, %c0_31] : memref<8x256xf32, #tpu.memory_space<vmem>>, vector<8x256xf32>
    %c0_i32_32 = arith.constant 0 : i32
    %c9_i32 = arith.constant 9 : i32
    %35 = arith.addi %c0_i32_32, %c9_i32 : i32
    %c1_i32 = arith.constant 1 : i32
    %36:5 = scf.for %arg21 = %c0_i32_32 to %35 step %c1_i32 iter_args(%arg22 = %31, %arg23 = %32, %arg24 = %33, %arg25 = %34, %arg26 = %31) -> (vector<8x256xf32>, vector<8x256xf32>, vector<8x256xf32>, vector<8x256xf32>, vector<8x256xf32>)  : i32 {
      %59 = tpu.concatenate %arg22, %arg26, %arg24 in 1 : vector<8x256xf32>, vector<8x256xf32>, vector<8x256xf32> -> vector<8x768xf32>
      %60 = arith.truncf %59 : vector<8x768xf32> to vector<8x768xbf16>
      %cst_59 = arith.constant dense<0.000000e+00> : vector<8x2048xf32>
      %61 = tpu.matmul %60, %29, %cst_59 {dimension_numbers = #tpu.dot_dimension_numbers<[1], [0], [0], [1], [0, 0, 1, 1], [], []>} : vector<8x768xbf16>, vector<768x2048xbf16>, vector<8x2048xf32> -> vector<8x2048xf32>
      %62 = vector.extract_strided_slice %61 {offsets = [0, 0], sizes = [8, 1024], strides = [1, 1]} : vector<8x2048xf32> to vector<8x1024xf32>
      %c7_i32 = arith.constant 7 : i32
      %63 = arith.minsi %arg21, %c7_i32 : i32
      %64 = arith.index_cast %63 : i32 to index
      %c0_60 = arith.constant 0 : index
      %c0_61 = arith.constant 0 : index
      %65 = vector.load %arg15[%64, %c0_60, %c0_61] : memref<8x8x1024xf32, #tpu.memory_space<vmem>>, vector<1x8x1024xf32>
      %66 = vector.shape_cast %65 : vector<1x8x1024xf32> to vector<8x1024xf32>
      %67 = arith.addf %62, %66 : vector<8x1024xf32>
      %68 = vector.extract_strided_slice %67 {offsets = [0, 0], sizes = [8, 256], strides = [1, 1]} : vector<8x1024xf32> to vector<8x256xf32>
      %69 = arith.negf %68 : vector<8x256xf32>
      %70 = math.exp %69 : vector<8x256xf32>
      %cst_62 = arith.constant 1.000000e+00 : f32
      %71 = vector.broadcast %cst_62 : f32 to vector<8x256xf32>
      %72 = arith.addf %71, %70 : vector<8x256xf32>
      %73 = arith.divf %71, %72 : vector<8x256xf32>
      %74 = vector.extract_strided_slice %67 {offsets = [0, 256], sizes = [8, 256], strides = [1, 1]} : vector<8x1024xf32> to vector<8x256xf32>
      %75 = arith.negf %74 : vector<8x256xf32>
      %76 = math.exp %75 : vector<8x256xf32>
      %cst_63 = arith.constant 1.000000e+00 : f32
      %77 = vector.broadcast %cst_63 : f32 to vector<8x256xf32>
      %78 = arith.addf %77, %76 : vector<8x256xf32>
      %79 = arith.divf %77, %78 : vector<8x256xf32>
      %80 = vector.extract_strided_slice %67 {offsets = [0, 512], sizes = [8, 256], strides = [1, 1]} : vector<8x1024xf32> to vector<8x256xf32>
      %81 = math.tanh %80 : vector<8x256xf32>
      %82 = vector.extract_strided_slice %67 {offsets = [0, 768], sizes = [8, 256], strides = [1, 1]} : vector<8x1024xf32> to vector<8x256xf32>
      %83 = arith.negf %82 : vector<8x256xf32>
      %84 = math.exp %83 : vector<8x256xf32>
      %cst_64 = arith.constant 1.000000e+00 : f32
      %85 = vector.broadcast %cst_64 : f32 to vector<8x256xf32>
      %86 = arith.addf %85, %84 : vector<8x256xf32>
      %87 = arith.divf %85, %86 : vector<8x256xf32>
      %88 = arith.mulf %79, %arg23 : vector<8x256xf32>
      %89 = arith.mulf %73, %81 : vector<8x256xf32>
      %90 = arith.addf %88, %89 : vector<8x256xf32>
      %91 = math.tanh %90 : vector<8x256xf32>
      %92 = arith.mulf %87, %91 : vector<8x256xf32>
      %93 = vector.extract_strided_slice %61 {offsets = [0, 1024], sizes = [8, 1024], strides = [1, 1]} : vector<8x2048xf32> to vector<8x1024xf32>
      %94 = vector.broadcast %30 : vector<1x1024xf32> to vector<8x1024xf32>
      %95 = arith.addf %93, %94 : vector<8x1024xf32>
      %96 = vector.extract_strided_slice %95 {offsets = [0, 0], sizes = [8, 256], strides = [1, 1]} : vector<8x1024xf32> to vector<8x256xf32>
      %97 = arith.negf %96 : vector<8x256xf32>
      %98 = math.exp %97 : vector<8x256xf32>
      %cst_65 = arith.constant 1.000000e+00 : f32
      %99 = vector.broadcast %cst_65 : f32 to vector<8x256xf32>
      %100 = arith.addf %99, %98 : vector<8x256xf32>
      %101 = arith.divf %99, %100 : vector<8x256xf32>
      %102 = vector.extract_strided_slice %95 {offsets = [0, 256], sizes = [8, 256], strides = [1, 1]} : vector<8x1024xf32> to vector<8x256xf32>
      %103 = arith.negf %102 : vector<8x256xf32>
      %104 = math.exp %103 : vector<8x256xf32>
      %cst_66 = arith.constant 1.000000e+00 : f32
      %105 = vector.broadcast %cst_66 : f32 to vector<8x256xf32>
      %106 = arith.addf %105, %104 : vector<8x256xf32>
      %107 = arith.divf %105, %106 : vector<8x256xf32>
      %108 = vector.extract_strided_slice %95 {offsets = [0, 512], sizes = [8, 256], strides = [1, 1]} : vector<8x1024xf32> to vector<8x256xf32>
      %109 = math.tanh %108 : vector<8x256xf32>
      %110 = vector.extract_strided_slice %95 {offsets = [0, 768], sizes = [8, 256], strides = [1, 1]} : vector<8x1024xf32> to vector<8x256xf32>
      %111 = arith.negf %110 : vector<8x256xf32>
      %112 = math.exp %111 : vector<8x256xf32>
      %cst_67 = arith.constant 1.000000e+00 : f32
      %113 = vector.broadcast %cst_67 : f32 to vector<8x256xf32>
      %114 = arith.addf %113, %112 : vector<8x256xf32>
      %115 = arith.divf %113, %114 : vector<8x256xf32>
      %116 = arith.mulf %107, %arg25 : vector<8x256xf32>
      %117 = arith.mulf %101, %109 : vector<8x256xf32>
      %118 = arith.addf %116, %117 : vector<8x256xf32>
      %119 = math.tanh %118 : vector<8x256xf32>
      %120 = arith.mulf %115, %119 : vector<8x256xf32>
      %c8_i32 = arith.constant 8 : i32
      %121 = arith.cmpi slt, %arg21, %c8_i32 : i32
      %c1_i32_68 = arith.constant 1 : i32
      %122 = arith.cmpi sge, %arg21, %c1_i32_68 : i32
      %123 = arith.select %121, %92, %arg22 : vector<8x256xf32>
      %124 = arith.select %121, %90, %arg23 : vector<8x256xf32>
      %125 = arith.select %122, %120, %arg24 : vector<8x256xf32>
      %126 = arith.select %122, %118, %arg25 : vector<8x256xf32>
      %c1_i32_69 = arith.constant 1 : i32
      %127 = arith.subi %arg21, %c1_i32_69 : i32
      %c0_i32_70 = arith.constant 0 : i32
      %128 = arith.maxsi %127, %c0_i32_70 : i32
      %129 = arith.index_cast %128 : i32 to index
      %c0_71 = arith.constant 0 : index
      %c0_72 = arith.constant 0 : index
      %130 = vector.load %arg16[%129, %c0_71, %c0_72] : memref<8x8x256xf32, #tpu.memory_space<vmem>>, vector<1x8x256xf32>
      %131 = vector.shape_cast %130 : vector<1x8x256xf32> to vector<8x256xf32>
      %132 = vector.shape_cast %125 : vector<8x256xf32> to vector<1x8x256xf32>
      tpu.vector_store %arg16[%129, %c0_71, %c0_72], %132 {strides = array<i32>} : memref<8x8x256xf32, #tpu.memory_space<vmem>>, vector<1x8x256xf32>,
      %133 = arith.select %121, %92, %arg26 : vector<8x256xf32>
      scf.yield %123, %124, %125, %126, %133 : vector<8x256xf32>, vector<8x256xf32>, vector<8x256xf32>, vector<8x256xf32>, vector<8x256xf32>
    }
    %c9_i32_33 = arith.constant 9 : i32
    %c0_34 = arith.constant 0 : index
    %c0_35 = arith.constant 0 : index
    %37 = vector.load %arg17[%c0_34, %c0_35] : memref<8x256xf32, #tpu.memory_space<vmem>>, vector<8x256xf32>
    tpu.vector_store %arg17[%c0_34, %c0_35], %36#0 {strides = array<i32>} : memref<8x256xf32, #tpu.memory_space<vmem>>, vector<8x256xf32>,
    %c0_36 = arith.constant 0 : index
    %c0_37 = arith.constant 0 : index
    %38 = vector.load %arg18[%c0_36, %c0_37] : memref<8x256xf32, #tpu.memory_space<vmem>>, vector<8x256xf32>
    tpu.vector_store %arg18[%c0_36, %c0_37], %36#1 {strides = array<i32>} : memref<8x256xf32, #tpu.memory_space<vmem>>, vector<8x256xf32>,
    %c0_38 = arith.constant 0 : index
    %c0_39 = arith.constant 0 : index
    %39 = vector.load %arg19[%c0_38, %c0_39] : memref<8x256xf32, #tpu.memory_space<vmem>>, vector<8x256xf32>
    tpu.vector_store %arg19[%c0_38, %c0_39], %36#2 {strides = array<i32>} : memref<8x256xf32, #tpu.memory_space<vmem>>, vector<8x256xf32>,
    %c0_40 = arith.constant 0 : index
    %c0_41 = arith.constant 0 : index
    %40 = vector.load %arg20[%c0_40, %c0_41] : memref<8x256xf32, #tpu.memory_space<vmem>>, vector<8x256xf32>
    tpu.vector_store %arg20[%c0_40, %c0_41], %36#3 {strides = array<i32>} : memref<8x256xf32, #tpu.memory_space<vmem>>, vector<8x256xf32>,
    %c0_42 = arith.constant 0 : index
    %c0_43 = arith.constant 0 : index
    %c0_44 = arith.constant 0 : index
    %41 = vector.load %arg16[%c0_42, %c0_43, %c0_44] : memref<8x8x256xf32, #tpu.memory_space<vmem>>, vector<8x8x256xf32>
    %42 = vector.shape_cast %41 : vector<8x8x256xf32> to vector<64x256xf32>
    %43 = arith.truncf %42 : vector<64x256xf32> to vector<64x256xbf16>
    %c0_45 = arith.constant 0 : index
    %c0_46 = arith.constant 0 : index
    %44 = vector.load %arg10[%c0_45, %c0_46] : memref<256x256xbf16, #tpu.memory_space<vmem>>, vector<256x256xbf16>
    %cst_47 = arith.constant dense<0.000000e+00> : vector<64x256xf32>
    %45 = tpu.matmul %43, %44, %cst_47 {dimension_numbers = #tpu.dot_dimension_numbers<[1], [0], [0], [1], [0, 0, 1, 1], [], []>} : vector<64x256xbf16>, vector<256x256xbf16>, vector<64x256xf32> -> vector<64x256xf32>
    %c0_48 = arith.constant 0 : index
    %c0_49 = arith.constant 0 : index
    %46 = vector.load %arg11[%c0_48, %c0_49] : memref<1x256xf32, #tpu.memory_space<vmem>>, vector<1x256xf32>
    %47 = vector.broadcast %46 : vector<1x256xf32> to vector<64x256xf32>
    %48 = arith.addf %45, %47 : vector<64x256xf32>
    %cst_50 = arith.constant 0.000000e+00 : f32
    %49 = vector.broadcast %cst_50 : f32 to vector<64x256xf32>
    %50 = arith.maximumf %48, %49 : vector<64x256xf32>
    %51 = arith.truncf %50 : vector<64x256xf32> to vector<64x256xbf16>
    %c0_51 = arith.constant 0 : index
    %c0_52 = arith.constant 0 : index
    %52 = vector.load %arg12[%c0_51, %c0_52] : memref<256x128xbf16, #tpu.memory_space<vmem>>, vector<256x128xbf16>
    %cst_53 = arith.constant dense<0.000000e+00> : vector<64x128xf32>
    %53 = tpu.matmul %51, %52, %cst_53 {dimension_numbers = #tpu.dot_dimension_numbers<[1], [0], [0], [1], [0, 0, 1, 1], [], []>} : vector<64x256xbf16>, vector<256x128xbf16>, vector<64x128xf32> -> vector<64x128xf32>
    %c0_54 = arith.constant 0 : index
    %c0_55 = arith.constant 0 : index
    %54 = vector.load %arg13[%c0_54, %c0_55] : memref<1x128xf32, #tpu.memory_space<vmem>>, vector<1x128xf32>
    %55 = vector.broadcast %54 : vector<1x128xf32> to vector<64x128xf32>
    %56 = arith.addf %53, %55 : vector<64x128xf32>
    %57 = vector.shape_cast %56 : vector<64x128xf32> to vector<8x8x128xf32>
    %c0_56 = arith.constant 0 : index
    %c0_57 = arith.constant 0 : index
    %c0_58 = arith.constant 0 : index
    %58 = vector.load %arg14[%c0_56, %c0_57, %c0_58] : memref<8x8x128xf32, #tpu.memory_space<vmem>>, vector<8x8x128xf32>
    tpu.vector_store %arg14[%c0_56, %c0_57, %c0_58], %57 {strides = array<i32>} : memref<8x8x128xf32, #tpu.memory_space<vmem>>, vector<8x8x128xf32>,
    return
  }
  func.func @transform_0(%arg0: i32) -> (i32, i32, i32) {
    %c0_i32 = arith.constant 0 : i32
    %c0_i32_0 = arith.constant 0 : i32
    %c0_i32_1 = arith.constant 0 : i32
    return %arg0, %c0_i32, %c0_i32_0 : i32, i32, i32
  }
  func.func @transform_1(%arg0: i32) -> (i32, i32) {
    %c0_i32 = arith.constant 0 : i32
    %c0_i32_0 = arith.constant 0 : i32
    %c0_i32_1 = arith.constant 0 : i32
    return %c0_i32, %c0_i32_0 : i32, i32
  }
  func.func @transform_2(%arg0: i32) -> (i32, i32) {
    %c0_i32 = arith.constant 0 : i32
    %c0_i32_0 = arith.constant 0 : i32
    %c0_i32_1 = arith.constant 0 : i32
    return %c0_i32, %c0_i32_0 : i32, i32
  }
  func.func @transform_3(%arg0: i32) -> (i32, i32) {
    %c0_i32 = arith.constant 0 : i32
    %c0_i32_0 = arith.constant 0 : i32
    %c0_i32_1 = arith.constant 0 : i32
    return %c0_i32, %c0_i32_0 : i32, i32
  }
  func.func @transform_4(%arg0: i32) -> (i32, i32) {
    %c0_i32 = arith.constant 0 : i32
    %c0_i32_0 = arith.constant 0 : i32
    %c0_i32_1 = arith.constant 0 : i32
    return %c0_i32, %c0_i32_0 : i32, i32
  }
  func.func @transform_5(%arg0: i32) -> (i32, i32) {
    %c0_i32 = arith.constant 0 : i32
    %c0_i32_0 = arith.constant 0 : i32
    %c0_i32_1 = arith.constant 0 : i32
    return %c0_i32, %c0_i32_0 : i32, i32
  }
  func.func @transform_6(%arg0: i32) -> (i32, i32) {
    %c0_i32 = arith.constant 0 : i32
    %c0_i32_0 = arith.constant 0 : i32
    %c0_i32_1 = arith.constant 0 : i32
    return %c0_i32, %c0_i32_0 : i32, i32
  }
  func.func @transform_7(%arg0: i32) -> (i32, i32) {
    %c0_i32 = arith.constant 0 : i32
    %c0_i32_0 = arith.constant 0 : i32
    %c0_i32_1 = arith.constant 0 : i32
    return %c0_i32, %c0_i32_0 : i32, i32
  }
  func.func @transform_8(%arg0: i32) -> (i32, i32) {
    %c0_i32 = arith.constant 0 : i32
    %c0_i32_0 = arith.constant 0 : i32
    %c0_i32_1 = arith.constant 0 : i32
    return %c0_i32, %c0_i32_0 : i32, i32
  }
  func.func @transform_9(%arg0: i32) -> (i32, i32) {
    %c0_i32 = arith.constant 0 : i32
    %c0_i32_0 = arith.constant 0 : i32
    %c0_i32_1 = arith.constant 0 : i32
    return %c0_i32, %c0_i32_0 : i32, i32
  }
  func.func @transform_10(%arg0: i32) -> (i32, i32) {
    %c0_i32 = arith.constant 0 : i32
    %c0_i32_0 = arith.constant 0 : i32
    %c0_i32_1 = arith.constant 0 : i32
    return %c0_i32, %c0_i32_0 : i32, i32
  }
  func.func @transform_11(%arg0: i32) -> (i32, i32) {
    %c0_i32 = arith.constant 0 : i32
    %c0_i32_0 = arith.constant 0 : i32
    %c0_i32_1 = arith.constant 0 : i32
    return %c0_i32, %c0_i32_0 : i32, i32
  }
  func.func @transform_12(%arg0: i32) -> (i32, i32) {
    %c0_i32 = arith.constant 0 : i32
    %c0_i32_0 = arith.constant 0 : i32
    %c0_i32_1 = arith.constant 0 : i32
    return %c0_i32, %c0_i32_0 : i32, i32
  }
  func.func @transform_13(%arg0: i32) -> (i32, i32, i32) {
    %c0_i32 = arith.constant 0 : i32
    %c0_i32_0 = arith.constant 0 : i32
    %c0_i32_1 = arith.constant 0 : i32
    return %arg0, %c0_i32, %c0_i32_0 : i32, i32, i32
  }
}

</mosaic_0001>

<bundles_post_ra>
// kernel: tpu_custom_call.1
= control target key start
LH: loop header
LB: loop body
LE: loop exit
PB: predicated region body
PF: predicated region fallthrough
CT: control target
= control target key end

     0   :  { %s14909_s0 = inlined_call_operand.hbm [shape: f32[16,8,128], index: 0, kind: input, shape index: {}]   ;;  %s14910_s1 = inlined_call_operand.hbm [shape: f32[8,64], index: 1, kind: input, shape index: {}]   ;;  %s14911_s2 = inlined_call_operand.hbm [shape: bf16[128,256], index: 2, kind: input, shape index: {}]   ;;  %s14912_s3 = inlined_call_operand.hbm [shape: bf16[64,256], index: 3, kind: input, shape index: {}]   ;;  %s14913_s4 = inlined_call_operand.hbm [shape: f32[1,256], index: 4, kind: input, shape index: {}]   ;;  %s14914_s5 = inlined_call_operand.hbm [shape: bf16[256,1024], index: 5, kind: input, shape index: {}]   ;;  %s14915_s6 = inlined_call_operand.hbm [shape: f32[1,1024], index: 6, kind: input, shape index: {}]   ;;  %s14916_s7 = inlined_call_operand.hbm [shape: bf16[768,2048], index: 7, kind: input, shape index: {}]   ;;  %s14917_s8 = inlined_call_operand.hbm [shape: f32[1,1024], index: 8, kind: input, shape index: {}]   ;;  %s14918_s9 = inlined_call_operand.hbm [shape: bf16[256,256], index: 9, kind: input, shape index: {}]   ;;  %s14919_s10 = inlined_call_operand.hbm [shape: f32[1,256], index: 10, kind: input, shape index: {}]   ;;  %s14920_s11 = inlined_call_operand.hbm [shape: bf16[256,128], index: 11, kind: input, shape index: {}]   ;;  %s14921_s12 = inlined_call_operand.hbm [shape: f32[1,128], index: 12, kind: input, shape index: {}]   ;;  %s14922_s13 = inlined_call_operand.hbm [shape: f32[16,8,128], index: 13, kind: output, shape index: {}]  }
   0x1   :  { %16396 = sst [smem:[#allocation790_spill]] %s14909_s0 }
   0x2   :  { %16397 = sst [smem:[#allocation791_spill]] %s14910_s1 }
   0x3   :  { %16398 = sst [smem:[#allocation792_spill]] %s14912_s3 }
   0x4   :  { %16399 = sst [smem:[#allocation793_spill]] %s14914_s5 }
   0x5   :  { %16400 = sst [smem:[#allocation794_spill]] %s14916_s7 }
   0x6   :  { %16401 = sst [smem:[#allocation795_spill]] %s14918_s9 }
   0x7   :  { %16402 = sst [smem:[#allocation796_spill]] %s14922_s13 }
   0x8   :  { %18 = vsyncpa [#allocation9], 0 }
   0x9   :  { %20 = vsyncpa [#allocation9 + $0x1], 0 }
   0xa   :  { %21 = vsyncpa [#allocation12], 0 }
   0xb   :  { %22 = vsyncpa [#allocation15], 0 }
   0xc   :  { %23 = vsyncpa [#allocation18], 0 }
   0xd   :  { %24 = vsyncpa [#allocation21], 0 }
   0xe   :  { %25 = vsyncpa [#allocation24], 0 }
   0xf   :  { %26 = vsyncpa [#allocation27], 0 }
  0x10   :  { %27 = vsyncpa [#allocation10], 0 }
  0x11   :  { %29 = vsyncpa [#allocation10 + $0x1], 0  ;;  %s10883_s25 = smov 0   ;;  %s10885_s26 = smov 0  }
  0x12   :  { %s10887_s27 = smov 0   ;;  %s10889_s28 = smov 0  }
  0x13 LB: > { %s10788_s29 = smov [#allocation11]   ;;  %s10904_s14 = sadd.s32 4294967295, %s10750_s28   ;;  %s10750_s28 = sphi %s10889_s28, %s18049_s28   ;;  %s10746_s27 = sphi %s10887_s27, %s18048_s27   ;;  %s10742_s26 = sphi %s10885_s26, %s18047_s26   ;;  %s10738_s25 = sphi %s10883_s25, %s18046_s25  }
  0x14   : > { %s357_s30 = sshll.u32 %s10788_s29, 4  ;;  %p8775_p0 = scmp.ge.s32.totalorder %s10750_s28, 1  ;;  %s358_s30 = int_to_ptr.vmem [resolvable:$true] %s357_s30 }
  0x15   : > { %p14924_p1 = scmp.eq.s32.totalorder %s10904_s14, 0  ;;  %p344_p2 = scmp.lt.s32.totalorder %s10750_s28, 3 }
  0x16   : > { %s10789_s16 = smov [#allocation14]   ;;  %s10790_s19 = smov [#allocation17]  }
  0x17   : > { %p10910_p4 = pnand %p8775_p0, %p344_p2  ;;  %s380_s17 = sshll.u32 %s10789_s16, 4  ;;  %s10923_s17 = int_to_ptr.vmem [resolvable:$true] %s380_s17 }
  0x18   : > { %s404_s20 = sshll.u32 %s10790_s19, 4  ;;  %s16406_s1 = sld [smem:[#allocation791_spill]]  ;;  %s10925_s20 = int_to_ptr.vmem [resolvable:$true] %s404_s20 }
  0x19   : > { %s16403_s15 = scalar_select %p10910_p4, 1, 0 }
  0x1a   : > { %p9896_p6 = pneg %p10910_p4 }
  0x1b   : > { %16404 = sst [smem:[#allocation38_spill]] %s16403_s15 }
  0x1c   : > { %p10919_p7 = pnand %p9896_p6, %p14924_p1 }
  0x1e   : > { %s10258_s23 = scalar_lea.hbm %s16406_s1, 128  ;;  %p10935_p9 = pneg %p10919_p7 }
  0x1f   : > { %p10259_p8 = scmp.ne.s32.totalorder %s16406_s1, %s10258_s23  ;;  %p10265_p12 = scmp.lt.u32.totalorder %s10258_s23, %s16406_s1 }
  0x21   : > { %p10261_p10 = pnand %p10935_p9, %p10259_p8 }
  0x23   : > { %p10262_p11 = pneg %p10261_p10 }
  0x25   : > { %p10267_p13 = pnand %p10265_p12, %p10262_p11 }
  0x27   : > { %10270 = shalt.err (!%p10267_p13)
}
  0x28   : > { %s10271_s21 = scalar_lea.vmem %s358_s30, 128  ;;  %p10279_p5 = scmp.lt.s32.totalorder %s358_s30, %s358_s30 }
  0x29   : > { %p10272_p0 = scmp.ne.s32.totalorder %s358_s30, %s10271_s21  ;;  %p10280_p3 = scmp.lt.s32.totalorder %s10271_s21, %s10271_s21 }
  0x2b   : > { %p10274_p2 = pnand %p10272_p0, %p10935_p9  ;;  %p10281_p1 = por %p10280_p3, %p10279_p5 }
  0x2d   : > { %p10275_p6 = pneg %p10274_p2 }
  0x2f   : > { %p10282_p4 = pnand %p10281_p1, %p10275_p6 }
  0x31   : > { %10285 = shalt.err (!%p10282_p4)
}
  0x32   : > { %9899 = dma.hbm_to_vmem [thread:$0]  (!%p10919_p7), %s16406_s1, 128, %s358_s30, [#allocation12]  }
  0x33   : > { %s16408_s3 = sld [smem:[#allocation792_spill]] }
  0x39   : > { %s10286_s29 = scalar_lea.hbm %s16408_s3, 1024 }
  0x3a   : > { %p10287_p8 = scmp.ne.s32.totalorder %s16408_s3, %s10286_s29  ;;  %p10293_p1 = scmp.lt.u32.totalorder %s10286_s29, %s16408_s3 }
  0x3c   : > { %p10289_p10 = pnand %p10287_p8, %p10935_p9 }
  0x3e   : > { %p10290_p3 = pneg %p10289_p10 }
  0x40   : > { %p10295_p4 = pnand %p10293_p1, %p10290_p3 }
  0x42   : > { %10298 = shalt.err (!%p10295_p4)
}
  0x43   : > { %s10299_s30 = scalar_lea.vmem %s10923_s17, 1024  ;;  %p10307_p13 = scmp.lt.s32.totalorder %s10923_s17, %s10923_s17 }
  0x44   : > { %p10300_p5 = scmp.ne.s32.totalorder %s10923_s17, %s10299_s30  ;;  %p10308_p0 = scmp.lt.s32.totalorder %s10299_s30, %s10299_s30 }
  0x46   : > { %p10302_p11 = pnand %p10300_p5, %p10935_p9  ;;  %p10309_p2 = por %p10308_p0, %p10307_p13 }
  0x48   : > { %p10303_p12 = pneg %p10302_p11 }
  0x4a   : > { %p10310_p6 = pnand %p10309_p2, %p10303_p12 }
  0x4c   : > { %10313 = shalt.err (!%p10310_p6)
}
  0x4d   : > { %s14928_s15 = smov 128   ;;  %s14930_s0 = smov 8  }
  0x4e   : > { %9905 = dma.hbm_to_vmem [thread:$0]  (!%p10919_p7), %s16408_s3, 1024, %s10923_s17, [#allocation15], %s14928_s15, %s14928_s15, %s14930_s0  }
  0x4f   : > { %s16409_s5 = sld [smem:[#allocation793_spill]] }
  0x55   : > { %s10314_s29 = scalar_lea.hbm %s16409_s5, 16384 }
  0x56   : > { %p10315_p8 = scmp.ne.s32.totalorder %s16409_s5, %s10314_s29  ;;  %p10321_p1 = scmp.lt.u32.totalorder %s10314_s29, %s16409_s5 }
  0x58   : > { %p10317_p10 = pnand %p10315_p8, %p10935_p9 }
  0x5a   : > { %p10318_p3 = pneg %p10317_p10 }
  0x5c   : > { %p10323_p4 = pnand %p10321_p1, %p10318_p3 }
  0x5e   : > { %10326 = shalt.err (!%p10323_p4)
}
  0x5f   : > { %s10327_s17 = scalar_lea.vmem %s10925_s20, 16384  ;;  %p10335_p13 = scmp.lt.s32.totalorder %s10925_s20, %s10925_s20 }
  0x60   : > { %p10328_p5 = scmp.ne.s32.totalorder %s10925_s20, %s10327_s17  ;;  %p10336_p0 = scmp.lt.s32.totalorder %s10327_s17, %s10327_s17 }
  0x62   : > { %p10330_p11 = pnand %p10328_p5, %p10935_p9  ;;  %p10337_p2 = por %p10336_p0, %p10335_p13 }
  0x64   : > { %p10331_p12 = pneg %p10330_p11 }
  0x66   : > { %p10338_p6 = pnand %p10337_p2, %p10331_p12 }
  0x68   : > { %10341 = shalt.err (!%p10338_p6)
}
  0x69   : > { %s10793_s22 = smov 512   ;;  %s10794_s1 = smov 32  }
  0x6a   : > { %9911 = dma.hbm_to_vmem [thread:$0]  (!%p10919_p7), %s16409_s5, 16384, %s10925_s20, [#allocation18], %s10793_s22, %s10793_s22, %s10794_s1  }
  0x6b   : > { %s10795_s23 = smov [#allocation20]   ;;  %s16410_s7 = sld [smem:[#allocation794_spill]] }
  0x6c   : > { %s428_s29 = sshll.u32 %s10795_s23, 4  ;;  %s429_s29 = int_to_ptr.vmem [resolvable:$true] %s428_s29 }
  0x71   : > { %s10342_s30 = scalar_lea.hbm %s16410_s7, 98304 }
  0x72   : > { %p10343_p8 = scmp.ne.s32.totalorder %s16410_s7, %s10342_s30  ;;  %p10349_p1 = scmp.lt.u32.totalorder %s10342_s30, %s16410_s7 }
  0x74   : > { %p10345_p10 = pnand %p10343_p8, %p10935_p9 }
  0x76   : > { %p10346_p3 = pneg %p10345_p10 }
  0x78   : > { %p10351_p4 = pnand %p10349_p1, %p10346_p3 }
  0x7a   : > { %10354 = shalt.err (!%p10351_p4)
}
  0x7b   : > { %s10355_s20 = scalar_lea.vmem %s429_s29, 98304  ;;  %p10363_p13 = scmp.lt.s32.totalorder %s429_s29, %s429_s29 }
  0x7c   : > { %p10356_p5 = scmp.ne.s32.totalorder %s429_s29, %s10355_s20  ;;  %p10364_p0 = scmp.lt.s32.totalorder %s10355_s20, %s10355_s20 }
  0x7e   : > { %p10358_p11 = pnand %p10356_p5, %p10935_p9  ;;  %p10365_p2 = por %p10364_p0, %p10363_p13 }
  0x80   : > { %p10359_p12 = pneg %p10358_p11 }
  0x82   : > { %p10366_p6 = pnand %p10365_p2, %p10359_p12 }
  0x84   : > { %10369 = shalt.err (!%p10366_p6)
}
  0x85   : > { %s10796_s15 = smov 1024   ;;  %s10797_s22 = smov 64  }
  0x86   : > { %9917 = dma.hbm_to_vmem [thread:$0]  (!%p10919_p7), %s16410_s7, 98304, %s429_s29, [#allocation21], %s10796_s15, %s10796_s15, %s10797_s22  }
  0x87   : > { %s10798_s1 = smov [#allocation23]   ;;  %s10799_s13 = smov [#allocation26]  }
  0x88   : > { %s452_s24 = sshll.u32 %s10798_s1, 4  ;;  %s476_s23 = sshll.u32 %s10799_s13, 4  ;;  %s453_s24 = int_to_ptr.vmem [resolvable:$true] %s452_s24  ;;  %s11019_s23 = int_to_ptr.vmem [resolvable:$true] %s476_s23 }
  0x89   : > { %s16411_s9 = sld [smem:[#allocation795_spill]] }
  0x8f   : > { %s10370_s30 = scalar_lea.hbm %s16411_s9, 4096 }
  0x90   : > { %p10371_p8 = scmp.ne.s32.totalorder %s16411_s9, %s10370_s30  ;;  %p10377_p1 = scmp.lt.u32.totalorder %s10370_s30, %s16411_s9 }
  0x92   : > { %p10373_p10 = pnand %p10371_p8, %p10935_p9 }
  0x94   : > { %p10374_p3 = pneg %p10373_p10 }
  0x96   : > { %p10379_p4 = pnand %p10377_p1, %p10374_p3 }
  0x98   : > { %10382 = shalt.err (!%p10379_p4)
}
  0x99   : > { %s10383_s15 = scalar_lea.vmem %s453_s24, 4096  ;;  %p10391_p13 = scmp.lt.s32.totalorder %s453_s24, %s453_s24 }
  0x9a   : > { %p10384_p5 = scmp.ne.s32.totalorder %s453_s24, %s10383_s15  ;;  %p10392_p0 = scmp.lt.s32.totalorder %s10383_s15, %s10383_s15 }
  0x9c   : > { %p10386_p11 = pnand %p10384_p5, %p10935_p9  ;;  %p10393_p2 = por %p10392_p0, %p10391_p13 }
  0x9e   : > { %p10387_p12 = pneg %p10386_p11 }
  0xa0   : > { %p10394_p6 = pnand %p10393_p2, %p10387_p12 }
  0xa2   : > { %10397 = shalt.err (!%p10394_p6)
}
  0xa3   : > { %s16412_s0 = smov 8   ;;  %s16413_s1 = smov 128  }
  0xa4   : > { %9923 = dma.hbm_to_vmem [thread:$0]  (!%p10919_p7), %s16411_s9, 4096, %s453_s24, [#allocation24], %s16413_s1, %s16413_s1, %s16412_s0  }
  0xa5   : > { %s10398_s17 = scalar_lea.hbm %s14920_s11, 2048 }
  0xa6   : > { %p10399_p8 = scmp.ne.s32.totalorder %s14920_s11, %s10398_s17  ;;  %p10405_p1 = scmp.lt.u32.totalorder %s10398_s17, %s14920_s11 }
  0xa8   : > { %p10401_p10 = pnand %p10399_p8, %p10935_p9 }
  0xaa   : > { %p10402_p3 = pneg %p10401_p10 }
  0xac   : > { %p10407_p4 = pnand %p10405_p1, %p10402_p3 }
  0xae   : > { %10410 = shalt.err (!%p10407_p4)
}
  0xaf   : > { %s10411_s24 = scalar_lea.vmem %s11019_s23, 2048  ;;  %p10419_p13 = scmp.lt.s32.totalorder %s11019_s23, %s11019_s23 }
  0xb0   : > { %p10412_p5 = scmp.ne.s32.totalorder %s11019_s23, %s10411_s24  ;;  %p10420_p0 = scmp.lt.s32.totalorder %s10411_s24, %s10411_s24 }
  0xb2   : > { %p10414_p11 = pnand %p10412_p5, %p10935_p9  ;;  %p10421_p2 = por %p10420_p0, %p10419_p13 }
  0xb4   : > { %p10415_p12 = pneg %p10414_p11 }
  0xb6   : > { %p10422_p6 = pnand %p10421_p2, %p10415_p12 }
  0xb8   : > { %10425 = shalt.err (!%p10422_p6)
}
  0xb9   : > { %s10800_s13 = smov 4   ;;  %s10801_s30 = smov [#allocation13]  }
  0xba   : > { %9929 = dma.hbm_to_vmem [thread:$0]  (!%p10919_p7), %s14920_s11, 2048, %s11019_s23, [#allocation27], %s10797_s22, %s10797_s22, %s10800_s13  }
  0xbb   : > { %s367_s17 = sshll.u32 %s10801_s30, 4  ;;  %s10802_s20 = smov [#allocation16]   ;;  %s368_s17 = int_to_ptr.vmem [resolvable:$true] %s367_s17 }
  0xbc   : > { %s394_s3 = sshll.u32 %s10802_s20, 4  ;;  %s10426_s24 = scalar_lea.hbm %s14911_s2, 2048  ;;  %s395_s3 = int_to_ptr.vmem [resolvable:$true] %s394_s3 }
  0xbd   : > { %p10427_p8 = scmp.ne.s32.totalorder %s14911_s2, %s10426_s24  ;;  %p10433_p1 = scmp.lt.u32.totalorder %s10426_s24, %s14911_s2 }
  0xbf   : > { %p10429_p10 = pnand %p10427_p8, %p10935_p9 }
  0xc1   : > { %p10430_p3 = pneg %p10429_p10 }
  0xc3   : > { %p10435_p4 = pnand %p10433_p1, %p10430_p3 }
  0xc5   : > { %10438 = shalt.err (!%p10435_p4)
}
  0xc6   : > { %s10439_s22 = scalar_lea.vmem %s368_s17, 2048  ;;  %p10447_p13 = scmp.lt.s32.totalorder %s368_s17, %s368_s17 }
  0xc7   : > { %p10440_p5 = scmp.ne.s32.totalorder %s368_s17, %s10439_s22  ;;  %p10448_p0 = scmp.lt.s32.totalorder %s10439_s22, %s10439_s22 }
  0xc9   : > { %p10442_p11 = pnand %p10440_p5, %p10935_p9  ;;  %p10449_p2 = por %p10448_p0, %p10447_p13 }
  0xcb   : > { %p10443_p12 = pneg %p10442_p11 }
  0xcd   : > { %p10450_p6 = pnand %p10449_p2, %p10443_p12 }
  0xcf   : > { %10453 = shalt.err (!%p10450_p6)
}
  0xd0   : > { %9902 = dma.hbm_to_vmem [thread:$0]  (!%p10919_p7), %s14911_s2, 2048, %s368_s17, [#allocation12], %s16413_s1, %s16413_s1, %s16412_s0  }
  0xd1   : > { %s10454_s13 = scalar_lea.hbm %s14913_s4, 32 }
  0xd2   : > { %p10455_p8 = scmp.ne.s32.totalorder %s14913_s4, %s10454_s13  ;;  %p10461_p1 = scmp.lt.u32.totalorder %s10454_s13, %s14913_s4 }
  0xd4   : > { %p10457_p10 = pnand %p10455_p8, %p10935_p9 }
  0xd6   : > { %p10458_p3 = pneg %p10457_p10 }
  0xd8   : > { %p10463_p4 = pnand %p10461_p1, %p10458_p3 }
  0xda   : > { %10466 = shalt.err (!%p10463_p4)
}
  0xdb   : > { %s10467_s15 = scalar_lea.vmem %s395_s3, 32  ;;  %p10475_p13 = scmp.lt.s32.totalorder %s395_s3, %s395_s3 }
  0xdc   : > { %p10468_p5 = scmp.ne.s32.totalorder %s395_s3, %s10467_s15  ;;  %p10476_p0 = scmp.lt.s32.totalorder %s10467_s15, %s10467_s15 }
  0xde   : > { %p10470_p11 = pnand %p10468_p5, %p10935_p9  ;;  %p10477_p2 = por %p10476_p0, %p10475_p13 }
  0xe0   : > { %p10471_p12 = pneg %p10470_p11 }
  0xe2   : > { %p10478_p6 = pnand %p10477_p2, %p10471_p12 }
  0xe4   : > { %10481 = shalt.err (!%p10478_p6)
}
  0xe5   : > { %9908 = dma.hbm_to_vmem [thread:$0]  (!%p10919_p7), %s14913_s4, 32, %s395_s3, [#allocation15]  }
  0xe6   : > { %s10803_s19 = smov [#allocation19]   ;;  %s10804_s5 = smov [#allocation22]  }
  0xe7   : > { %s418_s22 = sshll.u32 %s10803_s19, 4  ;;  %s442_s7 = sshll.u32 %s10804_s5, 4  ;;  %s419_s22 = int_to_ptr.vmem [resolvable:$true] %s418_s22  ;;  %s443_s7 = int_to_ptr.vmem [resolvable:$true] %s442_s7 }
  0xe8   : > { %s10482_s13 = scalar_lea.hbm %s14915_s6, 128 }
  0xe9   : > { %p10483_p8 = scmp.ne.s32.totalorder %s14915_s6, %s10482_s13  ;;  %p10489_p1 = scmp.lt.u32.totalorder %s10482_s13, %s14915_s6 }
  0xeb   : > { %p10485_p10 = pnand %p10483_p8, %p10935_p9 }
  0xed   : > { %p10486_p3 = pneg %p10485_p10 }
  0xef   : > { %p10491_p4 = pnand %p10489_p1, %p10486_p3 }
  0xf1   : > { %10494 = shalt.err (!%p10491_p4)
}
  0xf2   : > { %s10495_s3 = scalar_lea.vmem %s419_s22, 128  ;;  %p10503_p13 = scmp.lt.s32.totalorder %s419_s22, %s419_s22 }
  0xf3   : > { %p10496_p5 = scmp.ne.s32.totalorder %s419_s22, %s10495_s3  ;;  %p10504_p0 = scmp.lt.s32.totalorder %s10495_s3, %s10495_s3 }
  0xf5   : > { %p10498_p11 = pnand %p10496_p5, %p10935_p9  ;;  %p10505_p2 = por %p10504_p0, %p10503_p13 }
  0xf7   : > { %p10499_p12 = pneg %p10498_p11 }
  0xf9   : > { %p10506_p6 = pnand %p10505_p2, %p10499_p12 }
  0xfb   : > { %10509 = shalt.err (!%p10506_p6)
}
  0xfc   : > { %9914 = dma.hbm_to_vmem [thread:$0]  (!%p10919_p7), %s14915_s6, 128, %s419_s22, [#allocation18]  }
  0xfd   : > { %s10510_s5 = scalar_lea.hbm %s14917_s8, 128 }
  0xfe   : > { %p10511_p8 = scmp.ne.s32.totalorder %s14917_s8, %s10510_s5  ;;  %p10517_p1 = scmp.lt.u32.totalorder %s10510_s5, %s14917_s8 }
 0x100   : > { %p10513_p10 = pnand %p10511_p8, %p10935_p9 }
 0x102   : > { %p10514_p3 = pneg %p10513_p10 }
 0x104   : > { %p10519_p4 = pnand %p10517_p1, %p10514_p3 }
 0x106   : > { %10522 = shalt.err (!%p10519_p4)
}
 0x107   : > { %s10523_s30 = scalar_lea.vmem %s443_s7, 128  ;;  %p10531_p13 = scmp.lt.s32.totalorder %s443_s7, %s443_s7 }
 0x108   : > { %p10524_p5 = scmp.ne.s32.totalorder %s443_s7, %s10523_s30  ;;  %p10532_p0 = scmp.lt.s32.totalorder %s10523_s30, %s10523_s30 }
 0x10a   : > { %p10526_p11 = pnand %p10524_p5, %p10935_p9  ;;  %p10533_p2 = por %p10532_p0, %p10531_p13 }
 0x10c   : > { %p10527_p12 = pneg %p10526_p11 }
 0x10e   : > { %p10534_p6 = pnand %p10533_p2, %p10527_p12 }
 0x110   : > { %10537 = shalt.err (!%p10534_p6)
}
 0x111   : > { %9920 = dma.hbm_to_vmem [thread:$0]  (!%p10919_p7), %s14917_s8, 128, %s443_s7, [#allocation21]  }
 0x112   : > { %s10805_s29 = smov [#allocation25]   ;;  %s10806_s15 = smov [#allocation28]  }
 0x113   : > { %s466_s3 = sshll.u32 %s10805_s29, 4  ;;  %s490_s17 = sshll.u32 %s10806_s15, 4  ;;  %s467_s3 = int_to_ptr.vmem [resolvable:$true] %s466_s3  ;;  %s491_s17 = int_to_ptr.vmem [resolvable:$true] %s490_s17 }
 0x114   : > { %s10538_s5 = scalar_lea.hbm %s14919_s10, 32 }
 0x115   : > { %p10539_p8 = scmp.ne.s32.totalorder %s14919_s10, %s10538_s5  ;;  %p10545_p1 = scmp.lt.u32.totalorder %s10538_s5, %s14919_s10 }
 0x117   : > { %p10541_p10 = pnand %p10539_p8, %p10935_p9 }
 0x119   : > { %p10542_p3 = pneg %p10541_p10 }
 0x11b   : > { %p10547_p4 = pnand %p10545_p1, %p10542_p3 }
 0x11d   : > { %10550 = shalt.err (!%p10547_p4)
}
 0x11e   : > { %s10551_s7 = scalar_lea.vmem %s467_s3, 32  ;;  %p10559_p13 = scmp.lt.s32.totalorder %s467_s3, %s467_s3 }
 0x11f   : > { %p10552_p5 = scmp.ne.s32.totalorder %s467_s3, %s10551_s7  ;;  %p10560_p0 = scmp.lt.s32.totalorder %s10551_s7, %s10551_s7 }
 0x121   : > { %p10554_p11 = pnand %p10552_p5, %p10935_p9  ;;  %p10561_p2 = por %p10560_p0, %p10559_p13 }
 0x123   : > { %p10555_p12 = pneg %p10554_p11 }
 0x125   : > { %p10562_p6 = pnand %p10561_p2, %p10555_p12 }
 0x127   : > { %10565 = shalt.err (!%p10562_p6)
}
 0x128   : > { %9926 = dma.hbm_to_vmem [thread:$0]  (!%p10919_p7), %s14919_s10, 32, %s467_s3, [#allocation24]  }
 0x129   : > { %s10566_s15 = scalar_lea.hbm %s14921_s12, 16 }
 0x12a   : > { %p10567_p8 = scmp.ne.s32.totalorder %s14921_s12, %s10566_s15  ;;  %p10573_p1 = scmp.lt.u32.totalorder %s10566_s15, %s14921_s12 }
 0x12c   : > { %p10569_p10 = pnand %p10567_p8, %p10935_p9 }
 0x12e   : > { %p10570_p3 = pneg %p10569_p10 }
 0x130   : > { %p10575_p4 = pnand %p10573_p1, %p10570_p3 }
 0x132   : > { %10578 = shalt.err (!%p10575_p4)
}
 0x133   : > { %s10579_s23 = scalar_lea.vmem %s491_s17, 16  ;;  %s10586_s3 = scalar_lea.vmem %s491_s17, 32 }
 0x134   : > { %p10580_p5 = scmp.ne.s32.totalorder %s491_s17, %s10579_s23  ;;  %p10587_p13 = scmp.lt.s32.totalorder %s491_s17, %s491_s17 }
 0x135   : > { %p10588_p0 = scmp.lt.s32.totalorder %s10586_s3, %s10579_s23 }
 0x136   : > { %p10582_p11 = pnand %p10580_p5, %p10935_p9 }
 0x137   : > { %p10589_p2 = por %p10588_p0, %p10587_p13 }
 0x138   : > { %p10583_p12 = pneg %p10582_p11 }
 0x13a   : > { %p10590_p6 = pnand %p10589_p2, %p10583_p12 }
 0x13c   : > { %10593 = shalt.err (!%p10590_p6)
}
 0x13d   : > { %9932 = dma.hbm_to_vmem [thread:$0]  (!%p10919_p7), %s14921_s12, 16, %s491_s17, [#allocation27]  }
 0x13e   : > { %s8774_s16 = sadd.s32 4294967294, %s10750_s28   ;;  %s11180_s18 = sadd.s32 1, %s10750_s28  }
 0x13f   : > { %s42_s7 = sadd.s32 1, %s10746_s27  ;;  %s39_s30 = ssub.s32 %s10750_s28, %s11180_s18 }
 0x140   : > { %p49_p9 = scmp.ne.s32.totalorder %s10746_s27, %s10742_s26  ;;  %p40_p8 = scmp.eq.s32.totalorder %s39_s30, 0 }
 0x141   : > { %p50_p10 = scmp.eq.s32.totalorder %s10750_s28, 0  ;;  %p55_p3 = scmp.ne.s32.totalorder %s10742_s26, %s10738_s25 }
 0x142   : > { %p331_p1 = scmp.eq.s32.totalorder %s10904_s14, 1  ;;  %p16414_p5 = scmp.eq.s32.totalorder %s10904_s14, 0 }
 0x143   : > { %s11192_s22 = scalar_select %p40_p8, %s10746_s27, %s42_s7  }
 0x144   : > { %p51_p4 = por %p50_p10, %p49_p9  ;;  %p11196_p11 = por %p16414_p5, %p55_p3 }
 0x145   : > { %p11200_p7 = por %p331_p1, %p49_p9  ;;  %p337_p12 = scmp.eq.s32.totalorder %s8774_s16, 1 }
 0x146   : > { %p9953_p13 = scmp.lt.s32.totalorder %s10750_s28, 2  ;;  %s501_s29 = sand.u32 1, %s10746_s27  }
 0x147   : > { %s16416_s17 = scalar_select %p11200_p7, 1, 0 }
 0x148   : > { %p11206_p0 = por %p337_p12, %p55_p3  ;;  %s8789_s24 = sshll.u32 %s501_s29, 6 }
 0x149   : > { %s9800_s19 = sshll.u32 %s10750_s28, 10  ;;  %s16418_s23 = sld [smem:[#allocation790_spill]] }
 0x14a   : > { %s16417_s15 = scalar_select %p11206_p0, 1, 0 }
 0x14b   : > { %s505_s13 = scalar_lea.vmem [#allocation8], %s8789_s24  ;;  %p11216_p2 = pnand %p9953_p13, %p51_p4 }
 0x14c   : > { %s512_s21 = sshll.u32 %s505_s13, 4  ;;  %s11222_s7 = scalar_lea.sflag [#allocation9], %s501_s29  ;;  %s11220_s21 = int_to_ptr.vmem [resolvable:$true] %s512_s21 }
 0x14d   : > { %p10596_p9 = pneg %p11216_p2 }
 0x14f   : > { %s11214_s3 = scalar_lea.hbm %s16418_s23, %s9800_s19  ;;  %s10599_s5 = scalar_lea.hbm %s16418_s23, 2048 }
 0x150   : > { %s10594_s30 = scalar_lea.hbm %s11214_s3, 1024  ;;  %p10600_p3 = scmp.lt.u32.totalorder %s11214_s3, %s16418_s23 }
 0x151   : > { %p10595_p6 = scmp.ne.s32.totalorder %s11214_s3, %s10594_s30  ;;  %p10601_p1 = scmp.lt.u32.totalorder %s10599_s5, %s10594_s30 }
 0x152   : > { %p10603_p5 = scmp.lt.u32.totalorder %s10594_s30, %s11214_s3 }
 0x153   : > { %p10597_p8 = pnand %p10596_p9, %p10595_p6  ;;  %p10602_p4 = por %p10601_p1, %p10600_p3 }
 0x155   : > { %p10598_p10 = pneg %p10597_p8  ;;  %p10604_p12 = por %p10603_p5, %p10602_p4 }
 0x157   : > { %p10605_p13 = pnand %p10604_p12, %p10598_p10 }
 0x159   : > { %10608 = shalt.err (!%p10605_p13)
}
 0x15a   : > { %s10609_s29 = scalar_lea.vmem %s11220_s21, 1024  ;;  %s10807_s24 = smov [#allocation8]  }
 0x15b   : > { %p10610_p6 = scmp.ne.s32.totalorder %s11220_s21, %s10609_s29  ;;  %s10614_s19 = sshll.u32 %s10807_s24, 4  ;;  %s10615_s19 = int_to_ptr.vmem [resolvable:$false] %s10614_s19 }
 0x15c   : > { %s10616_s9 = scalar_lea.vmem %s10615_s19, 2048  ;;  %p10617_p7 = scmp.lt.s32.totalorder %s11220_s21, %s10615_s19 }
 0x15d   : > { %p10612_p8 = pnand %p10610_p6, %p10596_p9  ;;  %p10618_p3 = scmp.lt.s32.totalorder %s10616_s9, %s10609_s29 }
 0x15f   : > { %p10613_p0 = pneg %p10612_p8  ;;  %p10619_p1 = por %p10618_p3, %p10617_p7 }
 0x161   : > { %p10620_p4 = pnand %p10619_p1, %p10613_p0 }
 0x163   : > { %10623 = shalt.err (!%p10620_p4)
}
 0x164   : > { %9936 = dma.hbm_to_vmem [thread:$0]  (!%p11216_p2), %s11214_s3, 1024, %s11220_s21, %s11222_s7, %s16413_s1, %s16413_s1, %s16412_s0  }
 0x165   : > { %s16420_s30 = sld [smem:[#allocation38_spill]] }
 0x16b   : > { %p16421_p9 = scmp.ne.s32.totalorder %s16420_s30, 0 }
 0x16d   : > { %524 = sbr.rel (%p16421_p9) target bundleno = 2747 (0xabb), region = 72 }
 0x174   : > { %s11256_s5 = sand.u32 1, %s10742_s26  }
 0x175   : > { %s8793_s13 = sshll.u32 %s11256_s5, 6  ;;  %s527_s29 = scalar_lea.sflag [#allocation9], %s11256_s5 }
 0x176   : > { %s11260_s24 = scalar_lea.vmem [#allocation8], %s8793_s13 }
 0x177   : > { %10705 = dma.done.wait (%p11196_p11), %s527_s29, 1024  }
 0x178   : > { %10707 = vsyncadd (%p11196_p11), %s527_s29, 4294966272  ;;  %p16422_p7 = scmp.eq.s32.totalorder %s10904_s14, 0 }
 0x17a   : > { %10709 = dma.done.wait (%p16422_p7), [#allocation12], 2176   ;;  %p16423_p0 = pmov %p16422_p7 }
 0x17c   : > { %10711 = vsyncadd (%p16423_p0), [#allocation12], 4294965120  ;;  %p16424_p2 = pmov %p16423_p0 }
 0x17d   : > { %p16425_p10 = pmov %p16423_p0 }
 0x17e   : > { %10713 = dma.done.wait (%p16424_p2), [#allocation15], 1056  }
 0x17f   : > { %10715 = vsyncadd (%p16425_p10), [#allocation15], 4294966240  ;;  %p16426_p5 = pmov %p16423_p0 }
 0x180   : > { %p16427_p12 = pmov %p16423_p0 }
 0x181   : > { %10717 = dma.done.wait (%p16426_p5), [#allocation18], 16512  }
 0x182   : > { %10719 = vsyncadd (%p16427_p12), [#allocation18], 4294950784  ;;  %p16428_p11 = pmov %p16423_p0 }
 0x183   : > { %p16429_p13 = pmov %p16423_p0 }
 0x184   : > { %10721 = dma.done.wait (%p16428_p11), [#allocation21], 98432  }
 0x185   : > { %10723 = vsyncadd (%p16429_p13), [#allocation21], 4294868864  ;;  %p16430_p6 = pmov %p16423_p0 }
 0x186   : > { %p16431_p8 = pmov %p16423_p0 }
 0x187   : > { %10725 = dma.done.wait (%p16430_p6), [#allocation24], 4128  }
 0x188   : > { %10727 = vsyncadd (%p16431_p8), [#allocation24], 4294963168  ;;  %p16432_p3 = pmov %p16423_p0 }
 0x189   : > { %p16433_p1 = pmov %p16423_p0 }
 0x18a   : > { %10729 = dma.done.wait (%p16432_p3), [#allocation27], 2064  }
 0x18b   : > { %10731 = vsyncadd (%p16433_p1), [#allocation27], 4294965232  ;;  %s11290_s0 = scalar_lea.vmem [#allocation29], %s8793_s13  ;;  %p16434_p4 = scmp.ne.s32.totalorder %s10904_s14, 0 }
 0x18c   : > { %v10808_v0 = vmov (!%p16434_p4), 0.0  }
 0x18d   : > { %627 = sbr.rel (%p16434_p4) target bundleno = 404 (0x194), region = 128  ;;  %628 = vst [vmem:[#allocation4] sm:$0xff] (!%p16434_p4), %v10808_v0  ;;  %629 = vst [vmem:[#allocation4 + $0x8] sm:$0xff] (!%p16434_p4), %v10808_v0 }
 0x18e   : > { %630 = vst [vmem:[#allocation5] sm:$0xff] (!%p16434_p4), %v10808_v0  ;;  %631 = vst [vmem:[#allocation5 + $0x8] sm:$0xff] (!%p16434_p4), %v10808_v0 }
 0x18f   : > { %632 = vst [vmem:[#allocation6] sm:$0xff] (!%p16434_p4), %v10808_v0  ;;  %633 = vst [vmem:[#allocation6 + $0x8] sm:$0xff] (!%p16434_p4), %v10808_v0 }
 0x190   : > { %634 = vst [vmem:[#allocation7] sm:$0xff] (!%p16434_p4), %v10808_v0  ;;  %635 = vst [vmem:[#allocation7 + $0x8] sm:$0xff] (!%p16434_p4), %v10808_v0 }
 0x194 PF: > { %v10094_v1 = vld [vmem:[#allocation13 + $0x4] ss:$8 sps:$4 sm:$0xff]   ;;  %v10096_v2 = vld [vmem:[#allocation13] ss:$8 sps:$4 sm:$0xff]   ;;  %v10809_v3 = vmov 0   ;;  %v648_v21 = vld [vmem:[#allocation11] sm:$0xff] }
 0x195   : > { %915 = vmatprep.mubr.bf16.mxu1 %v10809_v3  ;;  %786 = vmatprep.mubr.bf16.mxu0 %v10809_v3  ;;  %v10097_v4 = vld [vmem:[#allocation13 + $0x14] ss:$8 sps:$4 sm:$0xff]   ;;  %v10099_v5 = vld [vmem:[#allocation13 + $0x10] ss:$8 sps:$4 sm:$0xff]   ;;  %v10100_v6 = vld [vmem:[#allocation13 + $0x24] ss:$8 sps:$4 sm:$0xff]   ;;  %v649_v26 = vpack.c.bf16 %v648_v21, %v648_v21 }
 0x196   : > { %754 = vmatprep.subr.bf16.mxu0 %v10094_v1  ;;  %v10106_v7 = vld [vmem:[#allocation14 + $0x4] ss:$8 sps:$4 sm:$0xff]   ;;  %v10108_v8 = vld [vmem:[#allocation14] ss:$8 sps:$4 sm:$0xff]   ;;  %v10103_v10 = vld [vmem:[#allocation13 + $0x34] ss:$8 sps:$4 sm:$0xff]  }
 0x197   : > { %755 = vmatpush1.bf16.msra.mxu0 %v10096_v2  ;;  %v10102_v9 = vld [vmem:[#allocation13 + $0x20] ss:$8 sps:$4 sm:$0xff]   ;;  %883 = vmatprep.subr.bf16.mxu1 %v10106_v7  ;;  %v10112_v11 = vld [vmem:[#allocation14 + $0x14] ss:$8 sps:$4 sm:$0xff]   ;;  %v10114_v12 = vld [vmem:[#allocation14 + $0x10] ss:$8 sps:$4 sm:$0xff]  }
 0x198   : > { %756 = vmatprep.subr.bf16.mxu0 %v10097_v4  ;;  %884 = vmatpush1.bf16.msra.mxu1 %v10108_v8  ;;  %v10105_v13 = vld [vmem:[#allocation13 + $0x30] ss:$8 sps:$4 sm:$0xff]   ;;  %v10118_v14 = vld [vmem:[#allocation14 + $0x24] ss:$8 sps:$4 sm:$0xff]   ;;  %v10120_v16 = vld [vmem:[#allocation14 + $0x20] ss:$8 sps:$4 sm:$0xff]  }
 0x199   : > { %885 = vmatprep.subr.bf16.mxu1 %v10112_v11  ;;  %v10109_v15 = vld [vmem:[#allocation13 + $0x44] ss:$8 sps:$4 sm:$0xff]   ;;  %v10124_v17 = vld [vmem:[#allocation14 + $0x34] ss:$8 sps:$4 sm:$0xff]   ;;  %v10111_v18 = vld [vmem:[#allocation13 + $0x40] ss:$8 sps:$4 sm:$0xff]  }
 0x19a   : > { %v10115_v19 = vld [vmem:[#allocation13 + $0x54] ss:$8 sps:$4 sm:$0xff]   ;;  %v10126_v20 = vld [vmem:[#allocation14 + $0x30] ss:$8 sps:$4 sm:$0xff]   ;;  %v948_v23 = vld [vmem:[#allocation17] sm:$0xff]  ;;  %vm879_vm0 = vcmask 523264  }
 0x19b   : > { %757 = vmatpush1.bf16.msra.mxu0 %v10099_v5  ;;  %v10117_v22 = vld [vmem:[#allocation13 + $0x50] ss:$8 sps:$4 sm:$0xff]   ;;  %v952_v24 = vld [vmem:[#allocation17 + $0x20] sm:$0xff]  ;;  %v10127_v35 = vld [vmem:[#allocation13 + $0x74] ss:$8 sps:$4 sm:$0xff]   ;;  %s13049_s1 = smov 0  }
 0x19c   : > { %758 = vmatprep.subr.bf16.mxu0 %v10100_v6  ;;  %886 = vmatpush1.bf16.msra.mxu1 %v10114_v12  ;;  %v10121_v25 = vld [vmem:[#allocation13 + $0x64] ss:$8 sps:$4 sm:$0xff]   ;;  %v8834_v27 = vcombine.high %v948_v23, %v952_v24  ;;  %v8833_v30 = vcombine.low %v948_v23, %v952_v24  ;;  %v10123_v32 = vld [vmem:[#allocation13 + $0x60] ss:$8 sps:$4 sm:$0xff]   ;;  %v10129_v39 = vld [vmem:[#allocation13 + $0x70] ss:$8 sps:$4 sm:$0xff]  }
 0x19d   : > { %887 = vmatprep.subr.bf16.mxu1 %v10118_v14  ;;  %v956_v28 = vld [vmem:[#allocation17 + $0x40] sm:$0xff]  ;;  %v949_v36 = vld [vmem:[#allocation17 + $0x8] sm:$0xff]  ;;  %v636_v40 = vld [vmem:[%s11260_s24] sm:$0xff] }
 0x19e   : > { %v960_v29 = vld [vmem:[#allocation17 + $0x60] sm:$0xff]  ;;  %v953_v37 = vld [vmem:[#allocation17 + $0x28] sm:$0xff]  ;;  %v640_v14 = vld [vmem:[%s11260_s24 + $0x20] sm:$0xff] }
 0x19f   : > { %759 = vmatpush1.bf16.msra.mxu0 %v10102_v9  ;;  %v8842_v31 = vcombine.high %v956_v28, %v960_v29  ;;  %v964_v33 = vld [vmem:[#allocation17 + $0x80] sm:$0xff]  ;;  %v8841_v38 = vcombine.low %v956_v28, %v960_v29  ;;  %v8836_v45 = vcombine.high %v949_v36, %v953_v37  ;;  %v957_v46 = vld [vmem:[#allocation17 + $0x48] sm:$0xff]  ;;  %v8835_v51 = vcombine.low %v949_v36, %v953_v37 }
 0x1a0   : > { %760 = vmatprep.subr.bf16.mxu0 %v10103_v10  ;;  %888 = vmatpush1.bf16.msra.mxu1 %v10120_v16  ;;  %v968_v34 = vld [vmem:[#allocation17 + $0xa0] sm:$0xff]  ;;  %v961_v47 = vld [vmem:[#allocation17 + $0x68] sm:$0xff] }
 0x1a1   : > { %889 = vmatprep.subr.bf16.mxu1 %v10124_v17  ;;  %v8850_v41 = vcombine.high %v964_v33, %v968_v34  ;;  %v637_v42 = vld [vmem:[%s11260_s24 + $0x8] sm:$0xff]  ;;  %v8849_v48 = vcombine.low %v964_v33, %v968_v34  ;;  %v8844_v54 = vcombine.high %v957_v46, %v961_v47  ;;  %v965_v55 = vld [vmem:[#allocation17 + $0x88] sm:$0xff]  ;;  %v8843_v61 = vcombine.low %v957_v46, %v961_v47 }
 0x1a2   : > { %v972_v43 = vld [vmem:[#allocation17 + $0xc0] sm:$0xff]  ;;  %v644_v49 = vpack.c.bf16 %v637_v42, %v636_v40  ;;  %v969_v56 = vld [vmem:[#allocation17 + $0xa8] sm:$0xff] }
 0x1a3   : > { %761 = vmatpush1.bf16.msra.mxu0 %v10105_v13  ;;  %v976_v44 = vld [vmem:[#allocation17 + $0xe0] sm:$0xff]  ;;  %v639_v60 = vld [vmem:[%s11260_s24 + $0x18] sm:$0xff]  ;;  %v8852_v0 = vcombine.high %v965_v55, %v969_v56  ;;  %v8851_v7 = vcombine.low %v965_v55, %v969_v56 }
 0x1a4   : > { %762 = vmatprep.subr.bf16.mxu0 %v10109_v15  ;;  %890 = vmatpush1.bf16.msra.mxu1 %v10126_v20  ;;  %v8858_v50 = vcombine.high %v972_v43, %v976_v44  ;;  %v980_v52 = vld [vmem:[#allocation17 + $0x100] sm:$0xff]  ;;  %v8857_v57 = vcombine.low %v972_v43, %v976_v44  ;;  %v973_v1 = vld [vmem:[#allocation17 + $0xc8] sm:$0xff] }
 0x1a5   : > { %1716 = vmatprep.subr.bf16.mxu1 %v8834_v27  ;;  %v984_v53 = vld [vmem:[#allocation17 + $0x120] sm:$0xff]  ;;  %v977_v2 = vld [vmem:[#allocation17 + $0xe8] sm:$0xff] }
 0x1a6   : > { %v638_v58 = vld [vmem:[%s11260_s24 + $0x10] sm:$0xff]  ;;  %v8866_v59 = vcombine.high %v980_v52, %v984_v53  ;;  %v8865_v4 = vcombine.low %v980_v52, %v984_v53  ;;  %v8860_v10 = vcombine.high %v973_v1, %v977_v2  ;;  %v641_v16 = vld [vmem:[%s11260_s24 + $0x28] sm:$0xff]  ;;  %v8859_v17 = vcombine.low %v973_v1, %v977_v2 }
 0x1a7   : > { %763 = vmatpush1.bf16.msra.mxu0 %v10111_v18  ;;  %8832 = vmatmul.mubr.msk.bf16.vlgmr.msra.gmra.mrb[0].mxu1 %vm879_vm0, %v649_v26  ;;  %v988_v62 = vld [vmem:[#allocation17 + $0x140] sm:$0xff]  ;;  %v645_v5 = vpack.c.bf16 %v639_v60, %v638_v58  ;;  %v981_v11 = vld [vmem:[#allocation17 + $0x108] sm:$0xff]  ;;  %v646_v24 = vpack.c.bf16 %v641_v16, %v640_v14 }
 0x1a8   : > { %764 = vmatprep.subr.bf16.mxu0 %v10115_v19  ;;  %1717 = vmatpush1.bf16.msra.mxu1 %v8833_v30  ;;  %v992_v63 = vld [vmem:[#allocation17 + $0x160] sm:$0xff]  ;;  %v985_v12 = vld [vmem:[#allocation17 + $0x128] sm:$0xff] }
 0x1a9   : > { %1718 = vmatprep.subr.bf16.mxu1 %v8842_v31  ;;  %v8874_v6 = vcombine.high %v988_v62, %v992_v63  ;;  %v996_v8 = vld [vmem:[#allocation17 + $0x180] sm:$0xff]  ;;  %v8873_v13 = vcombine.low %v988_v62, %v992_v63  ;;  %v8868_v20 = vcombine.high %v981_v11, %v985_v12  ;;  %v989_v21 = vld [vmem:[#allocation17 + $0x148] sm:$0xff]  ;;  %v8867_v26 = vcombine.low %v981_v11, %v985_v12 }
 0x1aa   : > { %v1000_v9 = vld [vmem:[#allocation17 + $0x1a0] sm:$0xff]  ;;  %v997_v30 = vld [vmem:[#allocation17 + $0x188] sm:$0xff] }
 0x1ab   : > { %765 = vmatpush1.bf16.msra.mxu0 %v10117_v22  ;;  %v8882_v15 = vcombine.high %v996_v8, %v1000_v9  ;;  %v1004_v18 = vld [vmem:[#allocation17 + $0x1c0] sm:$0xff]  ;;  %v993_v22 = vld [vmem:[#allocation17 + $0x168] sm:$0xff]  ;;  %v8881_v23 = vcombine.low %v996_v8, %v1000_v9 }
 0x1ac   : > { %766 = vmatprep.subr.bf16.mxu0 %v10121_v25  ;;  %1719 = vmatpush1.bf16.msra.mxu1 %v8841_v38  ;;  %v1008_v19 = vld [vmem:[#allocation17 + $0x1e0] sm:$0xff]  ;;  %v8876_v29 = vcombine.high %v989_v21, %v993_v22  ;;  %v1001_v31 = vld [vmem:[#allocation17 + $0x1a8] sm:$0xff]  ;;  %v8875_v36 = vcombine.low %v989_v21, %v993_v22 }
 0x1ad   : > { %1720 = vmatprep.subr.bf16.mxu1 %v8850_v41  ;;  %v8890_v25 = vcombine.high %v1004_v18, %v1008_v19  ;;  %v1012_v27 = vld [vmem:[#allocation17 + $0x200] sm:$0xff]  ;;  %v1005_v40 = vld [vmem:[#allocation17 + $0x1c8] sm:$0xff] }
 0x1ae   : > { %v1016_v28 = vld [vmem:[#allocation17 + $0x220] sm:$0xff]  ;;  %v1009_v41 = vld [vmem:[#allocation17 + $0x1e8] sm:$0xff] }
 0x1af   : > { %767 = vmatpush1.bf16.msra.mxu0 %v10123_v32  ;;  %v8889_v32 = vcombine.low %v1004_v18, %v1008_v19  ;;  %v642_v33 = vld [vmem:[%s11260_s24 + $0x30] sm:$0xff]  ;;  %v8898_v34 = vcombine.high %v1012_v27, %v1016_v28  ;;  %v8897_v42 = vcombine.low %v1012_v27, %v1016_v28  ;;  %v8891_v52 = vcombine.low %v1005_v40, %v1009_v41 }
 0x1b0   : > { %768 = vmatprep.subr.bf16.mxu0 %v10127_v35  ;;  %1721 = vmatpush1.bf16.msra.mxu1 %v8849_v48  ;;  %v643_v35 = vld [vmem:[%s11260_s24 + $0x38] sm:$0xff]  ;;  %v1020_v37 = vld [vmem:[#allocation17 + $0x240] sm:$0xff] }
 0x1b1   : > { %1722 = vmatprep.subr.bf16.mxu1 %v8858_v50  ;;  %v1024_v38 = vld [vmem:[#allocation17 + $0x260] sm:$0xff]  ;;  %v647_v43 = vpack.c.bf16 %v643_v35, %v642_v33  ;;  %v1013_v48 = vld [vmem:[#allocation17 + $0x208] sm:$0xff] }
 0x1b2   : > { %v8906_v44 = vcombine.high %v1020_v37, %v1024_v38  ;;  %v1028_v46 = vld [vmem:[#allocation17 + $0x280] sm:$0xff]  ;;  %v8905_v50 = vcombine.low %v1020_v37, %v1024_v38  ;;  %v1021_v56 = vld [vmem:[#allocation17 + $0x248] sm:$0xff] }
 0x1b3   : > { %769 = vmatpush1.bf16.msra.mxu0 %v10129_v39  ;;  %v8884_v39 = vcombine.high %v997_v30, %v1001_v31  ;;  %v1032_v47 = vld [vmem:[#allocation17 + $0x2a0] sm:$0xff]  ;;  %v1033_v1 = vld [vmem:[#allocation17 + $0x2a8] sm:$0xff] }
 0x1b4   : > { %1789 = vmatprep.subr.bf16.mxu0 %v8836_v45  ;;  %1723 = vmatpush1.bf16.msra.mxu1 %v8857_v57  ;;  %v8883_v45 = vcombine.low %v997_v30, %v1001_v31  ;;  %v1036_v53 = vld [vmem:[#allocation17 + $0x2c0] sm:$0xff]  ;;  %v1025_v57 = vld [vmem:[#allocation17 + $0x268] sm:$0xff]  ;;  %v8913_v58 = vcombine.low %v1028_v46, %v1032_v47 }
 0x1b5   : > { %1724 = vmatprep.subr.bf16.mxu1 %v8866_v59  ;;  %v1048_v62 = vld [vmem:[#allocation17 + $0x320] sm:$0xff]  ;;  %v8908_v63 = vcombine.high %v1021_v56, %v1025_v57  ;;  %v1037_v9 = vld [vmem:[#allocation17 + $0x2c8] sm:$0xff] }
 0x1b6   : > { %787 = vmatmul.mubr.bf16.vlgmr.msra.gmra.mrb[0].mxu0 %v644_v49  ;;  %v1017_v49 = vld [vmem:[#allocation17 + $0x228] sm:$0xff]  ;;  %v1068_v33 = vld [vmem:[#allocation17 + $0x3c0] sm:$0xff] }
 0x1b7   : > { %796 = vmatprep.mubr.bf16.mxu0 %v10809_v3  ;;  %1790 = vmatpush1.bf16.msra.mxu0 %v8835_v51  ;;  %v8914_v51 = vcombine.high %v1028_v46, %v1032_v47  ;;  %v8900_v55 = vcombine.high %v1013_v48, %v1017_v49  ;;  %v8899_v60 = vcombine.low %v1013_v48, %v1017_v49  ;;  %v1049_v16 = vld [vmem:[#allocation17 + $0x328] sm:$0xff]  ;;  %v829_v48 = vlaneseq }
 0x1b8   : > { %1791 = vmatprep.subr.bf16.mxu0 %v8844_v54  ;;  %1725 = vmatpush1.bf16.msra.mxu1 %v8865_v4  ;;  %v1040_v54 = vld [vmem:[#allocation17 + $0x2e0] sm:$0xff]  ;;  %v1057_v21 = vld [vmem:[#allocation17 + $0x368] sm:$0xff] }
 0x1b9   : > { %1726 = vmatprep.subr.bf16.mxu1 %v8874_v6  ;;  %v8922_v59 = vcombine.high %v1036_v53, %v1040_v54  ;;  %v8921_v2 = vcombine.low %v1036_v53, %v1040_v54  ;;  %v1052_v6 = vld [vmem:[#allocation17 + $0x340] sm:$0xff]  ;;  %v1061_v27 = vld [vmem:[#allocation17 + $0x388] sm:$0xff]  ;;  %v11307_v49 = vshrl.u32 %v829_v48, 7 }
 0x1ba   : > { %v1069_v35 = vld [vmem:[#allocation17 + $0x3c8] sm:$0xff] }
 0x1bb   : > { %1792 = vmatpush1.bf16.msra.mxu0 %v8843_v61  ;;  %v1044_v61 = vld [vmem:[#allocation17 + $0x300] sm:$0xff]  ;;  %v1073_v37 = vld [vmem:[#allocation17 + $0x3e8] sm:$0xff]  ;;  %16435 = vst [vmem:[#allocation39_spill] sm:$0xff] %v11307_v49  ;;  %v11313_v53 = vsub.s32 1, %v11307_v49 }
 0x1bc   : > { %1793 = vmatprep.subr.bf16.mxu0 %v8852_v0  ;;  %1727 = vmatpush1.bf16.msra.mxu1 %v8873_v13  ;;  %v1029_v0 = vld [vmem:[#allocation17 + $0x288] sm:$0xff]  ;;  %v8930_v4 = vcombine.high %v1044_v61, %v1048_v62  ;;  %v8929_v11 = vcombine.low %v1044_v61, %v1048_v62 }
 0x1bd   : > { %1728 = vmatprep.subr.bf16.mxu1 %v8882_v15  ;;  %v8916_v8 = vcombine.high %v1029_v0, %v1033_v1  ;;  %v8915_v13 = vcombine.low %v1029_v0, %v1033_v1  ;;  %v1045_v15 = vld [vmem:[#allocation17 + $0x308] sm:$0xff]  ;;  %16437 = vst [vmem:[#allocation41_spill] sm:$0xff] %v11313_v53 }
 0x1be   : > { %797 = vmatmul.mubr.bf16.gmra.mrb[4].mxu0 %v645_v5  ;;  %v8907_v5 = vcombine.low %v1021_v56, %v1025_v57  ;;  %v8932_v19 = vcombine.high %v1045_v15, %v1049_v16  ;;  %v8931_v22 = vcombine.low %v1045_v15, %v1049_v16  ;;  %v970_v16 = vld [vmem:[#allocation17 + $0xb0] sm:$0xff] }
 0x1bf   : > { %806 = vmatprep.mubr.bf16.mxu0 %v10809_v3  ;;  %1794 = vmatpush1.bf16.msra.mxu0 %v8851_v7  ;;  %v1056_v7 = vld [vmem:[#allocation17 + $0x360] sm:$0xff] }
 0x1c0   : > { %1795 = vmatprep.subr.bf16.mxu0 %v8860_v10  ;;  %1729 = vmatpush1.bf16.msra.mxu1 %v8881_v23  ;;  %v1041_v10 = vld [vmem:[#allocation17 + $0x2e8] sm:$0xff]  ;;  %v8938_v12 = vcombine.high %v1052_v6, %v1056_v7 }
 0x1c1   : > { %1730 = vmatprep.subr.bf16.mxu1 %v8890_v25  ;;  %v8924_v14 = vcombine.high %v1037_v9, %v1041_v10  ;;  %v8923_v18 = vcombine.low %v1037_v9, %v1041_v10  ;;  %v1060_v25 = vld [vmem:[#allocation17 + $0x380] sm:$0xff]  ;;  %v963_v9 = vld [vmem:[#allocation17 + $0x78] sm:$0xff] }
 0x1c3   : > { %1796 = vmatpush1.bf16.msra.mxu0 %v8859_v17  ;;  %v8937_v17 = vcombine.low %v1052_v6, %v1056_v7  ;;  %v962_v7 = vld [vmem:[#allocation17 + $0x70] sm:$0xff] }
 0x1c4   : > { %1797 = vmatprep.subr.bf16.mxu0 %v8868_v20  ;;  %1731 = vmatpush1.bf16.msra.mxu1 %v8889_v32  ;;  %v1053_v20 = vld [vmem:[#allocation17 + $0x348] sm:$0xff] }
 0x1c5   : > { %1732 = vmatprep.subr.bf16.mxu1 %v8898_v34  ;;  %v8940_v23 = vcombine.high %v1053_v20, %v1057_v21  ;;  %v1072_v34 = vld [vmem:[#allocation17 + $0x3e0] sm:$0xff] }
 0x1c6   : > { %807 = vmatmul.mubr.bf16.gmra.mrb[8].mxu0 %v646_v24  ;;  %v8939_v24 = vcombine.low %v1053_v20, %v1057_v21  ;;  %v8953_v38 = vcombine.low %v1068_v33, %v1072_v34 }
 0x1c7   : > { %816 = vmatprep.mubr.bf16.mxu0 %v10809_v3  ;;  %1798 = vmatpush1.bf16.msra.mxu0 %v8867_v26  ;;  %v8892_v3 = vcombine.high %v1005_v40, %v1009_v41  ;;  %v1064_v26 = vld [vmem:[#allocation17 + $0x3a0] sm:$0xff]  ;;  %v8956_v40 = vcombine.high %v1069_v35, %v1073_v37  ;;  %v950_v41 = vld [vmem:[#allocation17 + $0x10] sm:$0xff] }
 0x1c8   : > { %1799 = vmatprep.subr.bf16.mxu0 %v8876_v29  ;;  %1733 = vmatpush1.bf16.msra.mxu1 %v8897_v42  ;;  %v8946_v28 = vcombine.high %v1060_v25, %v1064_v26  ;;  %v1065_v29 = vld [vmem:[#allocation17 + $0x3a8] sm:$0xff]  ;;  %v8945_v30 = vcombine.low %v1060_v25, %v1064_v26  ;;  %v954_v42 = vld [vmem:[#allocation17 + $0x30] sm:$0xff] }
 0x1c9   : > { %1734 = vmatprep.subr.bf16.mxu1 %v8906_v44  ;;  %v8947_v31 = vcombine.low %v1061_v27, %v1065_v29  ;;  %v8948_v32 = vcombine.high %v1061_v27, %v1065_v29  ;;  %v8838_v44 = vcombine.high %v950_v41, %v954_v42  ;;  %v8837_v46 = vcombine.low %v950_v41, %v954_v42  ;;  %v974_v29 = vld [vmem:[#allocation17 + $0xd0] sm:$0xff] }
 0x1ca   : > { %v986_v42 = vld [vmem:[#allocation17 + $0x130] sm:$0xff] }
 0x1cb   : > { %1800 = vmatpush1.bf16.msra.mxu0 %v8875_v36  ;;  %v8954_v36 = vcombine.high %v1068_v33, %v1072_v34  ;;  %v979_v33 = vld [vmem:[#allocation17 + $0xf8] sm:$0xff] }
 0x1cc   : > { %1801 = vmatprep.subr.bf16.mxu0 %v8884_v39  ;;  %1735 = vmatpush1.bf16.msra.mxu1 %v8905_v50  ;;  %v8955_v39 = vcombine.low %v1069_v35, %v1073_v37  ;;  %v11310_v50 = vsub.s32 0, %v11307_v49 }
 0x1cd   : > { %1736 = vmatprep.subr.bf16.mxu1 %v8914_v51  ;;  %v827_v51 = vld [vmem:[#allocation16] sm:$0x3] }
 0x1ce   : > { %817 = vmatmul.mubr.bf16.gmra.mrb[12].mxu0 %v647_v43  ;;  %v951_v43 = vld [vmem:[#allocation17 + $0x18] sm:$0xff]  ;;  %16436 = vst [vmem:[#allocation40_spill] sm:$0xff] %v11310_v50  ;;  %v832_v56 = vrot.slane %v827_v51, %v11310_v50 }
 0x1cf   : > { %1802 = vmatpush1.bf16.msra.mxu0 %v8883_v45  ;;  %v955_v45 = vld [vmem:[#allocation17 + $0x38] sm:$0xff] }
 0x1d0   : > { %1803 = vmatprep.subr.bf16.mxu0 %v8892_v3  ;;  %1737 = vmatpush1.bf16.msra.mxu1 %v8913_v58  ;;  %v8839_v47 = vcombine.low %v951_v43, %v955_v45  ;;  %v8840_v3 = vcombine.high %v951_v43, %v955_v45  ;;  %v836_v58 = vrot.slane %v827_v51, %v11313_v53  ;;  %v983_v43 = vld [vmem:[#allocation17 + $0x118] sm:$0xff] }
 0x1d1   : > { %1738 = vmatprep.subr.bf16.mxu1 %v8922_v59 }
 0x1d3   : > { %1804 = vmatpush1.bf16.msra.mxu0 %v8891_v52 }
 0x1d4   : > { %1805 = vmatprep.subr.bf16.mxu0 %v8900_v55  ;;  %1739 = vmatpush1.bf16.msra.mxu1 %v8921_v2 }
 0x1d5   : > { %1740 = vmatprep.subr.bf16.mxu1 %v8930_v4 }
 0x1d7   : > { %1806 = vmatpush1.bf16.msra.mxu0 %v8899_v60 }
 0x1d8   : > { %1807 = vmatprep.subr.bf16.mxu0 %v8908_v63  ;;  %1741 = vmatpush1.bf16.msra.mxu1 %v8929_v11 }
 0x1d9   : > { %1742 = vmatprep.subr.bf16.mxu1 %v8938_v12 }
 0x1db   : > { %1808 = vmatpush1.bf16.msra.mxu0 %v8907_v5  ;;  %v958_v5 = vld [vmem:[#allocation17 + $0x50] sm:$0xff] }
 0x1dc   : > { %1809 = vmatprep.subr.bf16.mxu0 %v8916_v8  ;;  %1743 = vmatpush1.bf16.msra.mxu1 %v8937_v17  ;;  %v959_v8 = vld [vmem:[#allocation17 + $0x58] sm:$0xff]  ;;  %v8846_v12 = vcombine.high %v958_v5, %v962_v7 }
 0x1dd   : > { %1744 = vmatprep.subr.bf16.mxu1 %v8946_v28  ;;  %v967_v17 = vld [vmem:[#allocation17 + $0x98] sm:$0xff] }
 0x1df   : > { %1810 = vmatpush1.bf16.msra.mxu0 %v8915_v13  ;;  %v8848_v13 = vcombine.high %v959_v8, %v963_v9 }
 0x1e0   : > { %1811 = vmatprep.subr.bf16.mxu0 %v8924_v14  ;;  %1745 = vmatpush1.bf16.msra.mxu1 %v8945_v30  ;;  %v966_v14 = vld [vmem:[#allocation17 + $0x90] sm:$0xff] }
 0x1e1   : > { %1746 = vmatprep.subr.bf16.mxu1 %v8954_v36  ;;  %v8854_v27 = vcombine.high %v966_v14, %v970_v16  ;;  %v8853_v36 = vcombine.low %v966_v14, %v970_v16 }
 0x1e3   : > { %1812 = vmatpush1.bf16.msra.mxu0 %v8923_v18  ;;  %v971_v18 = vld [vmem:[#allocation17 + $0xb8] sm:$0xff] }
 0x1e4   : > { %1813 = vmatprep.subr.bf16.mxu0 %v8932_v19  ;;  %1747 = vmatpush1.bf16.msra.mxu1 %v8953_v38  ;;  %v8856_v28 = vcombine.high %v967_v17, %v971_v18  ;;  %v8855_v37 = vcombine.low %v967_v17, %v971_v18 }
 0x1e5   : > { %1862 = vmatprep.subr.bf16.mxu1 %v8838_v44  ;;  %v987_v44 = vld [vmem:[#allocation17 + $0x138] sm:$0xff] }
 0x1e7   : > { %1814 = vmatpush1.bf16.msra.mxu0 %v8931_v22 }
 0x1e8   : > { %1815 = vmatprep.subr.bf16.mxu0 %v8940_v23  ;;  %v8845_v23 = vcombine.low %v958_v5, %v962_v7  ;;  %v998_v7 = vld [vmem:[#allocation17 + $0x190] sm:$0xff] }
 0x1eb   : > { %1816 = vmatpush1.bf16.msra.mxu0 %v8939_v24  ;;  %v8847_v24 = vcombine.low %v959_v8, %v963_v9  ;;  %v1002_v9 = vld [vmem:[#allocation17 + $0x1b0] sm:$0xff] }
 0x1ec   : > { %1817 = vmatprep.subr.bf16.mxu0 %v8948_v32  ;;  %v975_v32 = vld [vmem:[#allocation17 + $0xd8] sm:$0xff] }
 0x1ed   : > { %v8863_v51 = vcombine.low %v975_v32, %v979_v33 }
 0x1ef   : > { %1818 = vmatpush1.bf16.msra.mxu0 %v8947_v31  ;;  %v978_v31 = vld [vmem:[#allocation17 + $0xf0] sm:$0xff] }
 0x1f0   : > { %1819 = vmatprep.subr.bf16.mxu0 %v8956_v40  ;;  %v8862_v38 = vcombine.high %v974_v29, %v978_v31  ;;  %v982_v40 = vld [vmem:[#allocation17 + $0x110] sm:$0xff]  ;;  %v8861_v48 = vcombine.low %v974_v29, %v978_v31  ;;  %v1011_v29 = vld [vmem:[#allocation17 + $0x1f8] sm:$0xff]  ;;  %v8885_v31 = vcombine.low %v998_v7, %v1002_v9 }
 0x1f3   : > { %1820 = vmatpush1.bf16.msra.mxu0 %v8955_v39  ;;  %v8864_v39 = vcombine.high %v975_v32, %v979_v33 }
 0x1f4   : > { %1935 = vmatprep.subr.bf16.mxu0 %v8840_v3 }
 0x27a   : > { %v917_v52 = vpop.f32.mrb[0].mxu1 }
 0x27b   : > { %v919_v54 = vpop.f32.mrb[1].mxu1  ;;  %v11317_v59 = vadd.f32 %v917_v52, %v832_v56  ;;  %v8872_v56 = vcombine.high %v983_v43, %v987_v44 }
 0x27c   : > { %v921_v55 = vpop.f32.mrb[2].mxu1  ;;  %v11319_v60 = vadd.f32 %v919_v54, %v836_v58 }
 0x27d   : > { %v922_v57 = vpop.f32.mrb[3].mxu1  ;;  %v8870_v55 = vcombine.high %v982_v40, %v986_v42 }
 0x27e   : > { %v990_v57 = vld [vmem:[#allocation17 + $0x150] sm:$0xff] }
 0x289   : > { %v788_v61 = vpop.f32.mrb[0].mxu0 }
 0x28a   : > { %v924_v62 = vadd.f32 %v11317_v59, %v788_v61  ;;  %v790_v63 = vpop.f32.mrb[1].mxu0  ;;  %v994_v61 = vld [vmem:[#allocation17 + $0x170] sm:$0xff] }
 0x28b   : > { %v925_v0 = vadd.f32 %v11319_v60, %v790_v63  ;;  %v792_v1 = vpop.f32.mrb[2].mxu0  ;;  %v995_v63 = vld [vmem:[#allocation17 + $0x178] sm:$0xff]  ;;  %v8878_v5 = vcombine.high %v990_v57, %v994_v61  ;;  %v8877_v18 = vcombine.low %v990_v57, %v994_v61 }
 0x28c   : > { %v926_v2 = vadd.f32 %v11317_v59, %v792_v1  ;;  %v794_v4 = vpop.f32.mrb[3].mxu0 }
 0x28d   : > { %v927_v6 = vadd.f32 %v11319_v60, %v794_v4  ;;  %v8871_v4 = vcombine.low %v983_v43, %v987_v44  ;;  %v1022_v43 = vld [vmem:[#allocation17 + $0x250] sm:$0xff] }
 0x28e   : > { %v11325_v10 = vpack.c.bf16 %v926_v2, %v924_v62  ;;  %v991_v62 = vld [vmem:[#allocation17 + $0x158] sm:$0xff]  ;;  %v8869_v2 = vcombine.low %v982_v40, %v986_v42  ;;  %v1026_v44 = vld [vmem:[#allocation17 + $0x270] sm:$0xff] }
 0x28f   : > { %v11327_v11 = vpack.c.bf16 %v927_v6, %v925_v0  ;;  %v8880_v6 = vcombine.high %v991_v62, %v995_v63 }
 0x291   : > { %v798_v15 = vpop.f32.mrb[4].mxu0  ;;  %1748 = vmatprep.mubr.bf16.mxu1 %v11327_v11  ;;  %1821 = vmatprep.mubr.bf16.mxu0 %v11327_v11 }
 0x292   : > { %v928_v19 = vadd.f32 %v11317_v59, %v798_v15  ;;  %v800_v20 = vpop.f32.mrb[5].mxu0  ;;  %1749 = vmatmul.mubr.bf16.vlgmr.msra.gmra.mrb[4].mxu1 %v11325_v10  ;;  %1822 = vmatmul.mubr.bf16.vlgmr.msra.gmra.mrb[16].mxu0 %v11325_v10 }
 0x293   : > { %v929_v21 = vadd.f32 %v11319_v60, %v800_v20  ;;  %1863 = vmatpush1.bf16.msra.mxu1 %v8837_v46  ;;  %1936 = vmatpush1.bf16.msra.mxu0 %v8839_v47  ;;  %v802_v22 = vpop.f32.mrb[6].mxu0 }
 0x294   : > { %v930_v25 = vadd.f32 %v11317_v59, %v802_v22  ;;  %v804_v26 = vpop.f32.mrb[7].mxu0  ;;  %1864 = vmatprep.subr.bf16.mxu1 %v8846_v12  ;;  %1937 = vmatprep.subr.bf16.mxu0 %v8848_v13  ;;  %v999_v12 = vld [vmem:[#allocation17 + $0x198] sm:$0xff]  ;;  %v8886_v22 = vcombine.high %v998_v7, %v1002_v9  ;;  %v1046_v9 = vld [vmem:[#allocation17 + $0x310] sm:$0xff] }
 0x295   : > { %v931_v30 = vadd.f32 %v11319_v60, %v804_v26  ;;  %v1003_v13 = vld [vmem:[#allocation17 + $0x1b8] sm:$0xff] }
 0x296   : > { %v11337_v34 = vpack.c.bf16 %v930_v25, %v928_v19  ;;  %v8879_v19 = vcombine.low %v991_v62, %v995_v63  ;;  %v1006_v25 = vld [vmem:[#allocation17 + $0x1d0] sm:$0xff]  ;;  %v8887_v32 = vcombine.low %v999_v12, %v1003_v13 }
 0x297   : > { %v11339_v35 = vpack.c.bf16 %v931_v30, %v929_v21  ;;  %1865 = vmatpush1.bf16.msra.mxu1 %v8845_v23  ;;  %1938 = vmatpush1.bf16.msra.mxu0 %v8847_v24  ;;  %v8888_v23 = vcombine.high %v999_v12, %v1003_v13  ;;  %v1038_v62 = vld [vmem:[#allocation17 + $0x2d0] sm:$0xff]  ;;  %v1047_v13 = vld [vmem:[#allocation17 + $0x318] sm:$0xff] }
 0x298   : > { %1866 = vmatprep.subr.bf16.mxu1 %v8854_v27  ;;  %1939 = vmatprep.subr.bf16.mxu0 %v8856_v28  ;;  %v1010_v27 = vld [vmem:[#allocation17 + $0x1f0] sm:$0xff]  ;;  %v1007_v28 = vld [vmem:[#allocation17 + $0x1d8] sm:$0xff] }
 0x299   : > { %v808_v41 = vpop.f32.mrb[8].mxu0  ;;  %1758 = vmatprep.mubr.bf16.mxu1 %v11339_v35  ;;  %1831 = vmatprep.mubr.bf16.mxu0 %v11339_v35  ;;  %v8896_v33 = vcombine.high %v1007_v28, %v1011_v29  ;;  %v8895_v40 = vcombine.low %v1007_v28, %v1011_v29  ;;  %v1042_v63 = vld [vmem:[#allocation17 + $0x2f0] sm:$0xff] }
 0x29a   : > { %v932_v45 = vadd.f32 %v11317_v59, %v808_v41  ;;  %v810_v46 = vpop.f32.mrb[9].mxu0  ;;  %1759 = vmatmul.mubr.bf16.gmra.mrb[8].mxu1 %v11337_v34  ;;  %1832 = vmatmul.mubr.bf16.gmra.mrb[20].mxu0 %v11337_v34  ;;  %v8926_v7 = vcombine.high %v1038_v62, %v1042_v63  ;;  %v1050_v12 = vld [vmem:[#allocation17 + $0x330] sm:$0xff] }
 0x29b   : > { %v933_v47 = vadd.f32 %v11319_v60, %v810_v46  ;;  %1867 = vmatpush1.bf16.msra.mxu1 %v8853_v36  ;;  %1940 = vmatpush1.bf16.msra.mxu0 %v8855_v37  ;;  %v812_v3 = vpop.f32.mrb[10].mxu0  ;;  %v1018_v36 = vld [vmem:[#allocation17 + $0x230] sm:$0xff]  ;;  %v1015_v37 = vld [vmem:[#allocation17 + $0x218] sm:$0xff] }
 0x29c   : > { %v934_v52 = vadd.f32 %v11317_v59, %v812_v3  ;;  %v814_v54 = vpop.f32.mrb[11].mxu0  ;;  %1868 = vmatprep.subr.bf16.mxu1 %v8862_v38  ;;  %1941 = vmatprep.subr.bf16.mxu0 %v8864_v39  ;;  %v1019_v38 = vld [vmem:[#allocation17 + $0x238] sm:$0xff]  ;;  %v8893_v39 = vcombine.low %v1006_v25, %v1010_v27  ;;  %v1062_v28 = vld [vmem:[#allocation17 + $0x390] sm:$0xff] }
 0x29d   : > { %v935_v58 = vadd.f32 %v11319_v60, %v814_v54  ;;  %v8904_v42 = vcombine.high %v1015_v37, %v1019_v38  ;;  %v1027_v46 = vld [vmem:[#allocation17 + $0x278] sm:$0xff]  ;;  %v8903_v3 = vcombine.low %v1015_v37, %v1019_v38  ;;  %v1034_v54 = vld [vmem:[#allocation17 + $0x2b0] sm:$0xff] }
 0x29e   : > { %v11349_v0 = vpack.c.bf16 %v934_v52, %v932_v45  ;;  %v1023_v45 = vld [vmem:[#allocation17 + $0x258] sm:$0xff]  ;;  %v1030_v52 = vld [vmem:[#allocation17 + $0x290] sm:$0xff] }
 0x29f   : > { %v11351_v1 = vpack.c.bf16 %v935_v58, %v933_v47  ;;  %1869 = vmatpush1.bf16.msra.mxu1 %v8861_v48  ;;  %1942 = vmatpush1.bf16.msra.mxu0 %v8863_v51  ;;  %v8910_v48 = vcombine.high %v1022_v43, %v1026_v44  ;;  %v8912_v51 = vcombine.high %v1023_v45, %v1027_v46  ;;  %v1066_v29 = vld [vmem:[#allocation17 + $0x3b0] sm:$0xff] }
 0x2a0   : > { %1870 = vmatprep.subr.bf16.mxu1 %v8870_v55  ;;  %1943 = vmatprep.subr.bf16.mxu0 %v8872_v56  ;;  %v1031_v55 = vld [vmem:[#allocation17 + $0x298] sm:$0xff]  ;;  %v8909_v56 = vcombine.low %v1022_v43, %v1026_v44  ;;  %v8911_v57 = vcombine.low %v1023_v45, %v1027_v46  ;;  %v8918_v58 = vcombine.high %v1030_v52, %v1034_v54  ;;  %v1070_v37 = vld [vmem:[#allocation17 + $0x3d0] sm:$0xff] }
 0x2a1   : > { %v818_v8 = vpop.f32.mrb[12].mxu0  ;;  %1768 = vmatprep.mubr.bf16.mxu1 %v11351_v1  ;;  %1841 = vmatprep.mubr.bf16.mxu0 %v11351_v1  ;;  %v1074_v38 = vld [vmem:[#allocation17 + $0x3f0] sm:$0xff] }
 0x2a2   : > { %v936_v14 = vadd.f32 %v11317_v59, %v818_v8  ;;  %v820_v15 = vpop.f32.mrb[13].mxu0  ;;  %1769 = vmatmul.mubr.bf16.gmra.mrb[12].mxu1 %v11349_v0  ;;  %1842 = vmatmul.mubr.bf16.gmra.mrb[24].mxu0 %v11349_v0  ;;  %v8958_v43 = vcombine.high %v1070_v37, %v1074_v38  ;;  %v8957_v45 = vcombine.low %v1070_v37, %v1074_v38  ;;  %v11487_v37 = vld [vmem:[#allocation20 + $0x198] sm:$0xff]  ;;  %v11489_v38 = vld [vmem:[#allocation20 + $0x1a0] sm:$0xff] }
 0x2a3   : > { %v937_v16 = vadd.f32 %v11319_v60, %v820_v15  ;;  %1871 = vmatpush1.bf16.msra.mxu1 %v8869_v2  ;;  %1944 = vmatpush1.bf16.msra.mxu0 %v8871_v4  ;;  %v822_v17 = vpop.f32.mrb[14].mxu0  ;;  %v1039_v2 = vld [vmem:[#allocation17 + $0x2d8] sm:$0xff]  ;;  %v8925_v15 = vcombine.low %v1038_v62, %v1042_v63  ;;  %v11423_v62 = vld [vmem:[#allocation20 + $0x98] sm:$0xff]  ;;  %v11425_v63 = vld [vmem:[#allocation20 + $0xa0] sm:$0xff]  ;;  %16487 = vst [vmem:[#allocation91_spill] sm:$0xff] %v11487_v37 }
 0x2a4   : > { %v938_v20 = vadd.f32 %v11317_v59, %v822_v17  ;;  %v824_v21 = vpop.f32.mrb[15].mxu0  ;;  %1872 = vmatprep.subr.bf16.mxu1 %v8878_v5  ;;  %1945 = vmatprep.subr.bf16.mxu0 %v8880_v6  ;;  %v1014_v59 = vld [vmem:[#allocation17 + $0x210] sm:$0xff]  ;;  %v1043_v4 = vld [vmem:[#allocation17 + $0x2f8] sm:$0xff]  ;;  %v8917_v5 = vcombine.low %v1030_v52, %v1034_v54  ;;  %v8934_v17 = vcombine.high %v1046_v9, %v1050_v12  ;;  %v11407_v52 = vld [vmem:[#allocation20 + $0x58] sm:$0xff] }
 0x2a5   : > { %v939_v24 = vadd.f32 %v11319_v60, %v824_v21  ;;  %v8894_v60 = vcombine.high %v1006_v25, %v1010_v27  ;;  %v8902_v41 = vcombine.high %v1014_v59, %v1018_v36  ;;  %v8901_v47 = vcombine.low %v1014_v59, %v1018_v36  ;;  %v1055_v21 = vld [vmem:[#allocation17 + $0x358] sm:$0xff]  ;;  %16449 = vst [vmem:[#allocation53_spill] sm:$0xff] %v11407_v52  ;;  %v11409_v54 = vld [vmem:[#allocation20 + $0x60] sm:$0xff]  ;;  %v11635_v52 = vld [vmem:[#allocation20 + $0x378] sm:$0xff] }
 0x2a6   : > { %v11361_v26 = vpack.c.bf16 %v938_v20, %v936_v14  ;;  %v8928_v8 = vcombine.high %v1039_v2, %v1043_v4  ;;  %v1051_v14 = vld [vmem:[#allocation17 + $0x338] sm:$0xff]  ;;  %v1058_v20 = vld [vmem:[#allocation17 + $0x370] sm:$0xff]  ;;  %16450 = vst [vmem:[#allocation54_spill] sm:$0xff] %v11409_v54  ;;  %16456 = vst [vmem:[#allocation60_spill] sm:$0xff] %v11423_v62 }
 0x2a7   : > { %v11363_v30 = vpack.c.bf16 %v939_v24, %v937_v16  ;;  %1873 = vmatpush1.bf16.msra.mxu1 %v8877_v18  ;;  %1946 = vmatpush1.bf16.msra.mxu0 %v8879_v19  ;;  %v8927_v16 = vcombine.low %v1039_v2, %v1043_v4  ;;  %v8936_v18 = vcombine.high %v1047_v13, %v1051_v14  ;;  %v1054_v19 = vld [vmem:[#allocation17 + $0x350] sm:$0xff]  ;;  %v11429_v4 = vld [vmem:[#allocation20 + $0xb0] sm:$0xff] }
 0x2a8   : > { %1874 = vmatprep.subr.bf16.mxu1 %v8886_v22  ;;  %1947 = vmatprep.subr.bf16.mxu0 %v8888_v23  ;;  %v1059_v22 = vld [vmem:[#allocation17 + $0x378] sm:$0xff]  ;;  %v8933_v23 = vcombine.low %v1046_v9, %v1050_v12  ;;  %v8935_v24 = vcombine.low %v1047_v13, %v1051_v14  ;;  %v8942_v25 = vcombine.high %v1054_v19, %v1058_v20  ;;  %v11427_v2 = vld [vmem:[#allocation20 + $0xa8] sm:$0xff]  ;;  %v11439_v9 = vld [vmem:[#allocation20 + $0xd8] sm:$0xff] }
 0x2a9   : > { %1778 = vmatprep.mubr.bf16.mxu1 %v11363_v30  ;;  %1851 = vmatprep.mubr.bf16.mxu0 %v11363_v30  ;;  %v8944_v27 = vcombine.high %v1055_v21, %v1059_v22  ;;  %v8941_v59 = vcombine.low %v1054_v19, %v1058_v20  ;;  %16457 = vst [vmem:[#allocation61_spill] sm:$0xff] %v11425_v63  ;;  %16458 = vst [vmem:[#allocation62_spill] sm:$0xff] %v11427_v2  ;;  %v11441_v12 = vld [vmem:[#allocation20 + $0xe0] sm:$0xff]  ;;  %v11443_v13 = vld [vmem:[#allocation20 + $0xe8] sm:$0xff] }
 0x2aa   : > { %1779 = vmatmul.mubr.bf16.gmra.mrb[16].mxu1 %v11361_v26  ;;  %1852 = vmatmul.mubr.bf16.gmra.mrb[28].mxu0 %v11361_v26  ;;  %16459 = vst [vmem:[#allocation63_spill] sm:$0xff] %v11429_v4  ;;  %16464 = vst [vmem:[#allocation68_spill] sm:$0xff] %v11439_v9  ;;  %v11445_v14 = vld [vmem:[#allocation20 + $0xf0] sm:$0xff]  ;;  %v11455_v19 = vld [vmem:[#allocation20 + $0x118] sm:$0xff] }
 0x2ab   : > { %1875 = vmatpush1.bf16.msra.mxu1 %v8885_v31  ;;  %1948 = vmatpush1.bf16.msra.mxu0 %v8887_v32  ;;  %v1063_v31 = vld [vmem:[#allocation17 + $0x398] sm:$0xff]  ;;  %16465 = vst [vmem:[#allocation69_spill] sm:$0xff] %v11441_v12  ;;  %16466 = vst [vmem:[#allocation70_spill] sm:$0xff] %v11443_v13  ;;  %v11457_v20 = vld [vmem:[#allocation20 + $0x120] sm:$0xff] }
 0x2ac   : > { %1894 = vmatprep.mubr.bf16.mxu1 %v11327_v11  ;;  %1967 = vmatprep.mubr.bf16.mxu0 %v11327_v11  ;;  %v1035_v11 = vld [vmem:[#allocation17 + $0x2b8] sm:$0xff]  ;;  %16467 = vst [vmem:[#allocation71_spill] sm:$0xff] %v11445_v14  ;;  %16472 = vst [vmem:[#allocation76_spill] sm:$0xff] %v11455_v19  ;;  %v11527_v4 = vld [vmem:[#allocation20 + $0x238] sm:$0xff] }
 0x2ad   : > { %1876 = vmatprep.subr.bf16.mxu1 %v8894_v60  ;;  %1949 = vmatprep.subr.bf16.mxu0 %v8896_v33  ;;  %v8920_v61 = vcombine.high %v1031_v55, %v1035_v11  ;;  %v8919_v6 = vcombine.low %v1031_v55, %v1035_v11  ;;  %v1067_v32 = vld [vmem:[#allocation17 + $0x3b8] sm:$0xff]  ;;  %v8943_v60 = vcombine.low %v1055_v21, %v1059_v22  ;;  %v11411_v55 = vld [vmem:[#allocation20 + $0x68] sm:$0xff]  ;;  %v11529_v14 = vld [vmem:[#allocation20 + $0x240] sm:$0xff] }
 0x2ae   : > { %v8950_v33 = vcombine.high %v1062_v28, %v1066_v29  ;;  %v8952_v36 = vcombine.high %v1063_v31, %v1067_v32  ;;  %16451 = vst [vmem:[#allocation55_spill] sm:$0xff] %v11411_v55  ;;  %v11413_v11 = vld [vmem:[#allocation20 + $0x70] sm:$0xff]  ;;  %16473 = vst [vmem:[#allocation77_spill] sm:$0xff] %v11457_v20  ;;  %v11459_v21 = vld [vmem:[#allocation20 + $0x128] sm:$0xff] }
 0x2af   : > { %1877 = vmatpush1.bf16.msra.mxu1 %v8893_v39  ;;  %1950 = vmatpush1.bf16.msra.mxu0 %v8895_v40  ;;  %v1071_v39 = vld [vmem:[#allocation17 + $0x3d8] sm:$0xff]  ;;  %16452 = vst [vmem:[#allocation56_spill] sm:$0xff] %v11413_v11  ;;  %16474 = vst [vmem:[#allocation78_spill] sm:$0xff] %v11459_v21  ;;  %v11537_v11 = vld [vmem:[#allocation20 + $0x260] sm:$0xff] }
 0x2b0   : > { %1878 = vmatprep.subr.bf16.mxu1 %v8902_v41  ;;  %1951 = vmatprep.subr.bf16.mxu0 %v8904_v42  ;;  %v1075_v40 = vld [vmem:[#allocation17 + $0x3f8] sm:$0xff]  ;;  %v8949_v41 = vcombine.low %v1062_v28, %v1066_v29  ;;  %v8951_v42 = vcombine.low %v1063_v31, %v1067_v32  ;;  %v11471_v28 = vld [vmem:[#allocation20 + $0x158] sm:$0xff]  ;;  %v11473_v29 = vld [vmem:[#allocation20 + $0x160] sm:$0xff]  ;;  %16488 = vst [vmem:[#allocation92_spill] sm:$0xff] %v11489_v38 }
 0x2b1   : > { %v8960_v44 = vcombine.high %v1071_v39, %v1075_v40  ;;  %v8959_v46 = vcombine.low %v1071_v39, %v1075_v40  ;;  %v11461_v22 = vld [vmem:[#allocation20 + $0x130] sm:$0xff]  ;;  %16480 = vst [vmem:[#allocation84_spill] sm:$0xff] %v11471_v28  ;;  %16481 = vst [vmem:[#allocation85_spill] sm:$0xff] %v11473_v29  ;;  %v11475_v31 = vld [vmem:[#allocation20 + $0x168] sm:$0xff] }
 0x2b2   : > { %16475 = vst [vmem:[#allocation79_spill] sm:$0xff] %v11461_v22  ;;  %16482 = vst [vmem:[#allocation86_spill] sm:$0xff] %v11475_v31  ;;  %v11477_v32 = vld [vmem:[#allocation20 + $0x170] sm:$0xff]  ;;  %v11491_v39 = vld [vmem:[#allocation20 + $0x1a8] sm:$0xff] }
 0x2b3   : > { %1879 = vmatpush1.bf16.msra.mxu1 %v8901_v47  ;;  %1952 = vmatpush1.bf16.msra.mxu0 %v8903_v3  ;;  %v11391_v47 = vld [vmem:[#allocation20 + $0x18] sm:$0xff]  ;;  %v11395_v3 = vld [vmem:[#allocation20 + $0x28] sm:$0xff]  ;;  %16483 = vst [vmem:[#allocation87_spill] sm:$0xff] %v11477_v32  ;;  %16489 = vst [vmem:[#allocation93_spill] sm:$0xff] %v11491_v39 }
 0x2b4   : > { %1880 = vmatprep.subr.bf16.mxu1 %v8910_v48  ;;  %1953 = vmatprep.subr.bf16.mxu0 %v8912_v51  ;;  %16441 = vst [vmem:[#allocation45_spill] sm:$0xff] %v11391_v47  ;;  %16443 = vst [vmem:[#allocation47_spill] sm:$0xff] %v11395_v3  ;;  %v11399_v48 = vld [vmem:[#allocation20 + $0x38] sm:$0xff]  ;;  %v11403_v51 = vld [vmem:[#allocation20 + $0x48] sm:$0xff] }
 0x2b5   : > { %16445 = vst [vmem:[#allocation49_spill] sm:$0xff] %v11399_v48  ;;  %16447 = vst [vmem:[#allocation51_spill] sm:$0xff] %v11403_v51  ;;  %v11493_v40 = vld [vmem:[#allocation20 + $0x1b0] sm:$0xff]  ;;  %v11515_v48 = vld [vmem:[#allocation20 + $0x208] sm:$0xff] }
 0x2b6   : > { %16490 = vst [vmem:[#allocation94_spill] sm:$0xff] %v11493_v40  ;;  %16500 = vst [vmem:[#allocation104_spill] sm:$0xff] %v11515_v48  ;;  %v11521_v40 = vld [vmem:[#allocation20 + $0x220] sm:$0xff]  ;;  %v11523_v22 = vld [vmem:[#allocation20 + $0x228] sm:$0xff] }
 0x2b7   : > { %1881 = vmatpush1.bf16.msra.mxu1 %v8909_v56  ;;  %1954 = vmatpush1.bf16.msra.mxu0 %v8911_v57  ;;  %v11415_v56 = vld [vmem:[#allocation20 + $0x78] sm:$0xff]  ;;  %v11417_v57 = vld [vmem:[#allocation20 + $0x80] sm:$0xff]  ;;  %16503 = vst [vmem:[#allocation107_spill] sm:$0xff] %v11521_v40  ;;  %16504 = vst [vmem:[#allocation108_spill] sm:$0xff] %v11523_v22 }
 0x2b8   : > { %1882 = vmatprep.subr.bf16.mxu1 %v8918_v58  ;;  %1955 = vmatprep.subr.bf16.mxu0 %v8920_v61  ;;  %16453 = vst [vmem:[#allocation57_spill] sm:$0xff] %v11415_v56  ;;  %v11419_v58 = vld [vmem:[#allocation20 + $0x88] sm:$0xff]  ;;  %v11421_v61 = vld [vmem:[#allocation20 + $0x90] sm:$0xff]  ;;  %v11519_v56 = vld [vmem:[#allocation20 + $0x218] sm:$0xff] }
 0x2b9   : > { %16454 = vst [vmem:[#allocation58_spill] sm:$0xff] %v11419_v58  ;;  %16455 = vst [vmem:[#allocation59_spill] sm:$0xff] %v11421_v61  ;;  %v11525_v32 = vld [vmem:[#allocation20 + $0x230] sm:$0xff]  ;;  %v11539_v39 = vld [vmem:[#allocation20 + $0x268] sm:$0xff] }
 0x2ba   : > { %16502 = vst [vmem:[#allocation106_spill] sm:$0xff] %v11519_v56  ;;  %16505 = vst [vmem:[#allocation109_spill] sm:$0xff] %v11525_v32  ;;  %v11543_v21 = vld [vmem:[#allocation20 + $0x270] sm:$0xff]  ;;  %v11545_v22 = vld [vmem:[#allocation20 + $0x278] sm:$0xff] }
 0x2bb   : > { %1883 = vmatpush1.bf16.msra.mxu1 %v8917_v5  ;;  %1956 = vmatpush1.bf16.msra.mxu0 %v8919_v6  ;;  %v11431_v5 = vld [vmem:[#allocation20 + $0xb8] sm:$0xff]  ;;  %v11433_v6 = vld [vmem:[#allocation20 + $0xc0] sm:$0xff]  ;;  %16506 = vst [vmem:[#allocation110_spill] sm:$0xff] %v11527_v4  ;;  %16507 = vst [vmem:[#allocation111_spill] sm:$0xff] %v11529_v14 }
 0x2bc   : > { %1884 = vmatprep.subr.bf16.mxu1 %v8926_v7  ;;  %1957 = vmatprep.subr.bf16.mxu0 %v8928_v8  ;;  %16460 = vst [vmem:[#allocation64_spill] sm:$0xff] %v11431_v5  ;;  %16461 = vst [vmem:[#allocation65_spill] sm:$0xff] %v11433_v6  ;;  %v11435_v7 = vld [vmem:[#allocation20 + $0xc8] sm:$0xff]  ;;  %v11437_v8 = vld [vmem:[#allocation20 + $0xd0] sm:$0xff] }
 0x2bd   : > { %16462 = vst [vmem:[#allocation66_spill] sm:$0xff] %v11435_v7  ;;  %16463 = vst [vmem:[#allocation67_spill] sm:$0xff] %v11437_v8  ;;  %v11511_v5 = vld [vmem:[#allocation20 + $0x1f8] sm:$0xff]  ;;  %v11547_v32 = vld [vmem:[#allocation20 + $0x280] sm:$0xff] }
 0x2be   : > { %16498 = vst [vmem:[#allocation102_spill] sm:$0xff] %v11511_v5  ;;  %v11533_v5 = vld [vmem:[#allocation20 + $0x250] sm:$0xff]  ;;  %16511 = vst [vmem:[#allocation115_spill] sm:$0xff] %v11537_v11  ;;  %v11550_v31 = vld [vmem:[#allocation20 + $0x288] sm:$0xff] }
 0x2bf   : > { %1885 = vmatpush1.bf16.msra.mxu1 %v8925_v15  ;;  %1958 = vmatpush1.bf16.msra.mxu0 %v8927_v16  ;;  %v11447_v15 = vld [vmem:[#allocation20 + $0xf8] sm:$0xff]  ;;  %v11449_v16 = vld [vmem:[#allocation20 + $0x100] sm:$0xff]  ;;  %16509 = vst [vmem:[#allocation113_spill] sm:$0xff] %v11533_v5  ;;  %16512 = vst [vmem:[#allocation116_spill] sm:$0xff] %v11539_v39 }
 0x2c0   : > { %1886 = vmatprep.subr.bf16.mxu1 %v8934_v17  ;;  %1959 = vmatprep.subr.bf16.mxu0 %v8936_v18  ;;  %16468 = vst [vmem:[#allocation72_spill] sm:$0xff] %v11447_v15  ;;  %16469 = vst [vmem:[#allocation73_spill] sm:$0xff] %v11449_v16  ;;  %v11451_v17 = vld [vmem:[#allocation20 + $0x108] sm:$0xff]  ;;  %v11453_v18 = vld [vmem:[#allocation20 + $0x110] sm:$0xff] }
 0x2c1   : > { %16470 = vst [vmem:[#allocation74_spill] sm:$0xff] %v11451_v17  ;;  %16471 = vst [vmem:[#allocation75_spill] sm:$0xff] %v11453_v18  ;;  %v11513_v15 = vld [vmem:[#allocation20 + $0x200] sm:$0xff]  ;;  %v11552_v2 = vld [vmem:[#allocation20 + $0x290] sm:$0xff] }
 0x2c2   : > { %16499 = vst [vmem:[#allocation103_spill] sm:$0xff] %v11513_v15  ;;  %16513 = vst [vmem:[#allocation117_spill] sm:$0xff] %v11543_v21  ;;  %v11554_v13 = vld [vmem:[#allocation20 + $0x298] sm:$0xff]  ;;  %v11557_v55 = vld [vmem:[#allocation20 + $0x2a0] sm:$0xff] }
 0x2c3   : > { %1887 = vmatpush1.bf16.msra.mxu1 %v8933_v23  ;;  %1960 = vmatpush1.bf16.msra.mxu0 %v8935_v24  ;;  %v11463_v23 = vld [vmem:[#allocation20 + $0x138] sm:$0xff]  ;;  %v11465_v24 = vld [vmem:[#allocation20 + $0x140] sm:$0xff]  ;;  %16514 = vst [vmem:[#allocation118_spill] sm:$0xff] %v11545_v22  ;;  %16515 = vst [vmem:[#allocation119_spill] sm:$0xff] %v11547_v32 }
 0x2c4   : > { %1888 = vmatprep.subr.bf16.mxu1 %v8942_v25  ;;  %1961 = vmatprep.subr.bf16.mxu0 %v8944_v27  ;;  %16476 = vst [vmem:[#allocation80_spill] sm:$0xff] %v11463_v23  ;;  %16477 = vst [vmem:[#allocation81_spill] sm:$0xff] %v11465_v24  ;;  %v11467_v25 = vld [vmem:[#allocation20 + $0x148] sm:$0xff]  ;;  %v11469_v27 = vld [vmem:[#allocation20 + $0x150] sm:$0xff] }
 0x2c5   : > { %16478 = vst [vmem:[#allocation82_spill] sm:$0xff] %v11467_v25  ;;  %16479 = vst [vmem:[#allocation83_spill] sm:$0xff] %v11469_v27  ;;  %v11507_v23 = vld [vmem:[#allocation20 + $0x1e8] sm:$0xff]  ;;  %v11561_v40 = vld [vmem:[#allocation20 + $0x2b0] sm:$0xff] }
 0x2c6   : > { %16496 = vst [vmem:[#allocation100_spill] sm:$0xff] %v11507_v23  ;;  %v11541_v23 = vld [vmem:[#allocation19] sm:$0xff]  ;;  %16516 = vst [vmem:[#allocation120_spill] sm:$0xff] %v11550_v31  ;;  %v11559_v39 = vld [vmem:[#allocation20 + $0x2a8] sm:$0xff] }
 0x2c7   : > { %1889 = vmatpush1.bf16.msra.mxu1 %v8941_v59  ;;  %1962 = vmatpush1.bf16.msra.mxu0 %v8943_v60  ;;  %v11479_v59 = vld [vmem:[#allocation20 + $0x178] sm:$0xff]  ;;  %v11481_v60 = vld [vmem:[#allocation20 + $0x180] sm:$0xff]  ;;  %16517 = vst [vmem:[#allocation121_spill] sm:$0xff] %v11552_v2  ;;  %16518 = vst [vmem:[#allocation122_spill] sm:$0xff] %v11554_v13  ;;  %v11577_v3 = vrot.slane %v11541_v23, %v11310_v50  ;;  %v11592_v29 = vrot.slane %v11541_v23, %v11313_v53 }
 0x2c8   : > { %1890 = vmatprep.subr.bf16.mxu1 %v8950_v33  ;;  %1963 = vmatprep.subr.bf16.mxu0 %v8952_v36  ;;  %16484 = vst [vmem:[#allocation88_spill] sm:$0xff] %v11479_v59  ;;  %v11483_v33 = vld [vmem:[#allocation20 + $0x188] sm:$0xff]  ;;  %v11485_v36 = vld [vmem:[#allocation20 + $0x190] sm:$0xff]  ;;  %16519 = vst [vmem:[#allocation123_spill] sm:$0xff] %v11557_v55 }
 0x2c9   : > { %16485 = vst [vmem:[#allocation89_spill] sm:$0xff] %v11483_v33  ;;  %16486 = vst [vmem:[#allocation90_spill] sm:$0xff] %v11485_v36  ;;  %v11509_v59 = vld [vmem:[#allocation20 + $0x1f0] sm:$0xff]  ;;  %v11563_v21 = vld [vmem:[#allocation20 + $0x2b8] sm:$0xff] }
 0x2ca   : > { %16497 = vst [vmem:[#allocation101_spill] sm:$0xff] %v11509_v59  ;;  %v11531_v59 = vld [vmem:[#allocation20 + $0x248] sm:$0xff]  ;;  %16520 = vst [vmem:[#allocation124_spill] sm:$0xff] %v11559_v39  ;;  %v11565_v22 = vld [vmem:[#allocation20 + $0x2c0] sm:$0xff]  ;;  %v16528_v39 = vsub.s32 2, %v11307_v49 }
 0x2cb   : > { %1891 = vmatpush1.bf16.msra.mxu1 %v8949_v41  ;;  %1964 = vmatpush1.bf16.msra.mxu0 %v8951_v42  ;;  %v11495_v41 = vld [vmem:[#allocation20 + $0x1b8] sm:$0xff]  ;;  %v11497_v42 = vld [vmem:[#allocation20 + $0x1c0] sm:$0xff]  ;;  %16508 = vst [vmem:[#allocation112_spill] sm:$0xff] %v11531_v59  ;;  %16521 = vst [vmem:[#allocation125_spill] sm:$0xff] %v11561_v40 }
 0x2cc   : > { %1892 = vmatprep.subr.bf16.mxu1 %v8958_v43  ;;  %1965 = vmatprep.subr.bf16.mxu0 %v8960_v44  ;;  %16491 = vst [vmem:[#allocation95_spill] sm:$0xff] %v11495_v41  ;;  %v11499_v43 = vld [vmem:[#allocation20 + $0x1c8] sm:$0xff]  ;;  %v11501_v44 = vld [vmem:[#allocation20 + $0x1d0] sm:$0xff]  ;;  %16522 = vst [vmem:[#allocation126_spill] sm:$0xff] %v11563_v21  ;;  %v11582_v40 = vrot.slane %v11541_v23, %v16528_v39 }
 0x2cd   : > { %16492 = vst [vmem:[#allocation96_spill] sm:$0xff] %v11499_v43  ;;  %16493 = vst [vmem:[#allocation97_spill] sm:$0xff] %v11501_v44  ;;  %v11517_v41 = vld [vmem:[#allocation20 + $0x210] sm:$0xff]  ;;  %v11567_v11 = vld [vmem:[#allocation20 + $0x2c8] sm:$0xff] }
 0x2ce   : > { %16501 = vst [vmem:[#allocation105_spill] sm:$0xff] %v11517_v41  ;;  %16523 = vst [vmem:[#allocation127_spill] sm:$0xff] %v11565_v22  ;;  %v11569_v4 = vld [vmem:[#allocation20 + $0x2d0] sm:$0xff]  ;;  %v11571_v38 = vld [vmem:[#allocation20 + $0x2d8] sm:$0xff] }
 0x2cf   : > { %1893 = vmatpush1.bf16.msra.mxu1 %v8957_v45  ;;  %1966 = vmatpush1.bf16.msra.mxu0 %v8959_v46  ;;  %v11503_v45 = vld [vmem:[#allocation20 + $0x1d8] sm:$0xff]  ;;  %v11505_v46 = vld [vmem:[#allocation20 + $0x1e0] sm:$0xff]  ;;  %16524 = vst [vmem:[#allocation128_spill] sm:$0xff] %v11567_v11  ;;  %16525 = vst [vmem:[#allocation129_spill] sm:$0xff] %v11569_v4 }
 0x2d0   : > { %16494 = vst [vmem:[#allocation98_spill] sm:$0xff] %v11503_v45  ;;  %16495 = vst [vmem:[#allocation99_spill] sm:$0xff] %v11505_v46  ;;  %v11573_v46 = vld [vmem:[#allocation20 + $0x2e0] sm:$0xff]  ;;  %v11584_v21 = vld [vmem:[#allocation20 + $0x2e8] sm:$0xff] }
 0x2d1   : > { %16526 = vst [vmem:[#allocation130_spill] sm:$0xff] %v11571_v38  ;;  %16527 = vst [vmem:[#allocation131_spill] sm:$0xff] %v11573_v46  ;;  %v11586_v55 = vld [vmem:[#allocation20 + $0x2f0] sm:$0xff]  ;;  %v11588_v20 = vld [vmem:[#allocation20 + $0x2f8] sm:$0xff]  ;;  %v16532_v46 = vsub.s32 3, %v11307_v49 }
 0x2d2   : > { %1895 = vmatmul.mubr.bf16.vlgmr.msra.gmra.mrb[20].mxu1 %v11325_v10  ;;  %1968 = vmatmul.mubr.bf16.vlgmr.msra.gmra.mrb[32].mxu0 %v11325_v10  ;;  %v11385_v10 = vld [vmem:[#allocation20] sm:$0xff]  ;;  %16529 = vst [vmem:[#allocation132_spill] sm:$0xff] %v11584_v21  ;;  %16530 = vst [vmem:[#allocation133_spill] sm:$0xff] %v11586_v55  ;;  %v11601_v12 = vld [vmem:[#allocation20 + $0x308] sm:$0xff] }
 0x2d3   : > { %1904 = vmatprep.mubr.bf16.mxu1 %v11339_v35  ;;  %1977 = vmatprep.mubr.bf16.mxu0 %v11339_v35  ;;  %16438 = vst [vmem:[#allocation42_spill] sm:$0xff] %v11385_v10  ;;  %v11387_v35 = vld [vmem:[#allocation20 + $0x8] sm:$0xff]  ;;  %16531 = vst [vmem:[#allocation134_spill] sm:$0xff] %v11588_v20  ;;  %v11597_v50 = vrot.slane %v11541_v23, %v16532_v46  ;;  %v11599_v63 = vld [vmem:[#allocation20 + $0x300] sm:$0xff] }
 0x2d4   : > { %16439 = vst [vmem:[#allocation43_spill] sm:$0xff] %v11387_v35  ;;  %16533 = vst [vmem:[#allocation135_spill] sm:$0xff] %v11601_v12  ;;  %v11603_v39 = vld [vmem:[#allocation20 + $0x310] sm:$0xff]  ;;  %v11605_v21 = vld [vmem:[#allocation20 + $0x318] sm:$0xff] }
 0x2d5   : > { %16534 = vst [vmem:[#allocation136_spill] sm:$0xff] %v11603_v39  ;;  %16535 = vst [vmem:[#allocation137_spill] sm:$0xff] %v11605_v21  ;;  %v11607_v55 = vld [vmem:[#allocation20 + $0x320] sm:$0xff]  ;;  %v11609_v20 = vld [vmem:[#allocation20 + $0x328] sm:$0xff] }
 0x2d6   : > { %16536 = vst [vmem:[#allocation138_spill] sm:$0xff] %v11607_v55  ;;  %16537 = vst [vmem:[#allocation139_spill] sm:$0xff] %v11609_v20  ;;  %v11611_v54 = vld [vmem:[#allocation20 + $0x330] sm:$0xff]  ;;  %v11613_v13 = vld [vmem:[#allocation20 + $0x338] sm:$0xff] }
 0x2d7   : > { %16538 = vst [vmem:[#allocation140_spill] sm:$0xff] %v11611_v54  ;;  %16539 = vst [vmem:[#allocation141_spill] sm:$0xff] %v11613_v13  ;;  %v11615_v46 = vld [vmem:[#allocation20 + $0x340] sm:$0xff]  ;;  %v11619_v45 = vld [vmem:[#allocation20 + $0x348] sm:$0xff] }
 0x2d8   : > { %16540 = vst [vmem:[#allocation142_spill] sm:$0xff] %v11619_v45  ;;  %v11621_v21 = vld [vmem:[#allocation20 + $0x350] sm:$0xff]  ;;  %v11623_v55 = vld [vmem:[#allocation20 + $0x358] sm:$0xff]  ;;  %v11627_v28 = vld [vmem:[#allocation20 + $0x360] sm:$0xff] }
 0x2d9   : > { %16541 = vst [vmem:[#allocation143_spill] sm:$0xff] %v11621_v21  ;;  %16542 = vst [vmem:[#allocation144_spill] sm:$0xff] %v11623_v55  ;;  %v11629_v62 = vld [vmem:[#allocation20 + $0x368] sm:$0xff]  ;;  %v11683_v2 = vld [vmem:[#allocation20 + $0x420] sm:$0xff] }
 0x2da   : > { %1905 = vmatmul.mubr.bf16.gmra.mrb[24].mxu1 %v11337_v34  ;;  %1978 = vmatmul.mubr.bf16.gmra.mrb[36].mxu0 %v11337_v34  ;;  %v11389_v34 = vld [vmem:[#allocation20 + $0x10] sm:$0xff]  ;;  %16543 = vst [vmem:[#allocation145_spill] sm:$0xff] %v11627_v28  ;;  %16544 = vst [vmem:[#allocation146_spill] sm:$0xff] %v11629_v62  ;;  %v11653_v28 = vld [vmem:[#allocation20 + $0x3b8] sm:$0xff] }
 0x2db   : > { %1914 = vmatprep.mubr.bf16.mxu1 %v11351_v1  ;;  %1987 = vmatprep.mubr.bf16.mxu0 %v11351_v1  ;;  %16440 = vst [vmem:[#allocation44_spill] sm:$0xff] %v11389_v34  ;;  %v11393_v1 = vld [vmem:[#allocation20 + $0x20] sm:$0xff]  ;;  %16546 = vst [vmem:[#allocation148_spill] sm:$0xff] %v11635_v52  ;;  %v11651_v52 = vld [vmem:[#allocation20 + $0x3b0] sm:$0xff] }
 0x2dc   : > { %16442 = vst [vmem:[#allocation46_spill] sm:$0xff] %v11393_v1  ;;  %16553 = vst [vmem:[#allocation155_spill] sm:$0xff] %v11651_v52  ;;  %v11669_v52 = vld [vmem:[#allocation20 + $0x3f8] sm:$0xff]  ;;  %v11675_v39 = vld [vmem:[#allocation20 + $0x408] sm:$0xff] }
 0x2dd   : > { %16554 = vst [vmem:[#allocation156_spill] sm:$0xff] %v11653_v28  ;;  %16561 = vst [vmem:[#allocation163_spill] sm:$0xff] %v11669_v52  ;;  %v11685_v4 = vld [vmem:[#allocation20 + $0x428] sm:$0xff]  ;;  %v11691_v5 = vld [vmem:[#allocation20 + $0x438] sm:$0xff] }
 0x2de   : > { %16562 = vst [vmem:[#allocation164_spill] sm:$0xff] %v11675_v39  ;;  %16565 = vst [vmem:[#allocation167_spill] sm:$0xff] %v11683_v2  ;;  %v11709_v2 = vld [vmem:[#allocation20 + $0x478] sm:$0xff]  ;;  %v11731_v36 = vld [vmem:[#allocation20 + $0x4c8] sm:$0xff] }
 0x2df   : > { %16566 = vst [vmem:[#allocation168_spill] sm:$0xff] %v11685_v4  ;;  %16568 = vst [vmem:[#allocation170_spill] sm:$0xff] %v11691_v5  ;;  %v11707_v5 = vld [vmem:[#allocation20 + $0x470] sm:$0xff]  ;;  %v11739_v18 = vld [vmem:[#allocation20 + $0x4e0] sm:$0xff] }
 0x2e0   : > { %16574 = vst [vmem:[#allocation176_spill] sm:$0xff] %v11707_v5  ;;  %16575 = vst [vmem:[#allocation177_spill] sm:$0xff] %v11709_v2  ;;  %v11725_v5 = vld [vmem:[#allocation20 + $0x4b8] sm:$0xff]  ;;  %v11741_v27 = vld [vmem:[#allocation20 + $0x4e8] sm:$0xff] }
 0x2e1   : > { %16583 = vst [vmem:[#allocation185_spill] sm:$0xff] %v11725_v5  ;;  %16585 = vst [vmem:[#allocation187_spill] sm:$0xff] %v11731_v36  ;;  %v11747_v8 = vld [vmem:[#allocation20 + $0x4f8] sm:$0xff]  ;;  %v11787_v34 = vld [vmem:[#allocation20 + $0x588] sm:$0xff] }
 0x2e2   : > { %1915 = vmatmul.mubr.bf16.gmra.mrb[28].mxu1 %v11349_v0  ;;  %1988 = vmatmul.mubr.bf16.gmra.mrb[40].mxu0 %v11349_v0  ;;  %v11397_v0 = vld [vmem:[#allocation20 + $0x30] sm:$0xff]  ;;  %16588 = vst [vmem:[#allocation190_spill] sm:$0xff] %v11739_v18  ;;  %16589 = vst [vmem:[#allocation191_spill] sm:$0xff] %v11741_v27  ;;  %v11765_v18 = vld [vmem:[#allocation20 + $0x538] sm:$0xff] }
 0x2e3   : > { %1924 = vmatprep.mubr.bf16.mxu1 %v11363_v30  ;;  %1997 = vmatprep.mubr.bf16.mxu0 %v11363_v30  ;;  %16444 = vst [vmem:[#allocation48_spill] sm:$0xff] %v11397_v0  ;;  %v11401_v30 = vld [vmem:[#allocation20 + $0x40] sm:$0xff]  ;;  %v11535_v0 = vld [vmem:[#allocation20 + $0x258] sm:$0xff]  ;;  %16591 = vst [vmem:[#allocation193_spill] sm:$0xff] %v11747_v8 }
 0x2e4   : > { %16446 = vst [vmem:[#allocation50_spill] sm:$0xff] %v11401_v30  ;;  %16510 = vst [vmem:[#allocation114_spill] sm:$0xff] %v11535_v0  ;;  %v11763_v8 = vld [vmem:[#allocation20 + $0x530] sm:$0xff]  ;;  %v11973_v36 = vld [vmem:[#allocation20 + $0x858] sm:$0xff] }
 0x2e5   : > { %16598 = vst [vmem:[#allocation200_spill] sm:$0xff] %v11763_v8  ;;  %16599 = vst [vmem:[#allocation201_spill] sm:$0xff] %v11765_v18  ;;  %v11781_v8 = vld [vmem:[#allocation20 + $0x578] sm:$0xff]  ;;  %v11987_v39 = vld [vmem:[#allocation20 + $0x888] sm:$0xff] }
 0x2e6   : > { %16607 = vst [vmem:[#allocation209_spill] sm:$0xff] %v11781_v8  ;;  %16609 = vst [vmem:[#allocation211_spill] sm:$0xff] %v11787_v34  ;;  %v12051_v45 = vld [vmem:[#allocation20 + $0x930] sm:$0xff]  ;;  %v12059_v11 = vld [vmem:[#allocation20 + $0x948] sm:$0xff] }
 0x2e7   : > { %16696 = vst [vmem:[#allocation298_spill] sm:$0xff] %v11973_v36  ;;  %16702 = vst [vmem:[#allocation304_spill] sm:$0xff] %v11987_v39  ;;  %v11995_v36 = vld [vmem:[#allocation20 + $0x8a0] sm:$0xff]  ;;  %v12007_v39 = vld [vmem:[#allocation20 + $0x8d0] sm:$0xff] }
 0x2e8   : > { %16705 = vst [vmem:[#allocation307_spill] sm:$0xff] %v11995_v36  ;;  %16710 = vst [vmem:[#allocation312_spill] sm:$0xff] %v12007_v39  ;;  %v12025_v36 = vld [vmem:[#allocation20 + $0x8f0] sm:$0xff]  ;;  %v16719_v39 = vsub.s32 7, %v11307_v49  ;;  %v12067_v59 = vld [vmem:[#allocation20 + $0x960] sm:$0xff] }
 0x2e9   : > { %16716 = vst [vmem:[#allocation316_spill] sm:$0xff] %v12025_v36  ;;  %v12047_v36 = vld [vmem:[#allocation20 + $0x920] sm:$0xff]  ;;  %16725 = vst [vmem:[#allocation323_spill] sm:$0xff] %v12051_v45  ;;  %v12069_v33 = vld [vmem:[#allocation20 + $0x968] sm:$0xff] }
 0x2ea   : > { %1925 = vmatmul.mubr.bf16.gmra.mrb[32].mxu1 %v11361_v26  ;;  %1998 = vmatmul.mubr.bf16.gmra.mrb[44].mxu0 %v11361_v26  ;;  %v11405_v26 = vld [vmem:[#allocation20 + $0x50] sm:$0xff]  ;;  %16723 = vst [vmem:[#allocation321_spill] sm:$0xff] %v12047_v36  ;;  %16728 = vst [vmem:[#allocation326_spill] sm:$0xff] %v12059_v11  ;;  %v12063_v36 = vld [vmem:[#allocation20 + $0x958] sm:$0xff] }
 0x2eb   : > { %16448 = vst [vmem:[#allocation52_spill] sm:$0xff] %v11405_v26  ;;  %16730 = vst [vmem:[#allocation328_spill] sm:$0xff] %v12063_v36  ;;  %v12075_v43 = vld [vmem:[#allocation20 + $0x978] sm:$0xff]  ;;  %v12123_v17 = vld [vmem:[#allocation20 + $0xa20] sm:$0xff] }
 0x2ec   : > { %16731 = vst [vmem:[#allocation329_spill] sm:$0xff] %v12067_v59  ;;  %16732 = vst [vmem:[#allocation330_spill] sm:$0xff] %v12069_v33  ;;  %v12093_v59 = vld [vmem:[#allocation20 + $0x9b8] sm:$0xff]  ;;  %v12125_v25 = vld [vmem:[#allocation20 + $0xa28] sm:$0xff] }
 0x2ed   : > { %16734 = vst [vmem:[#allocation332_spill] sm:$0xff] %v12075_v43  ;;  %v12091_v43 = vld [vmem:[#allocation20 + $0x9b0] sm:$0xff]  ;;  %16742 = vst [vmem:[#allocation340_spill] sm:$0xff] %v12093_v59  ;;  %v12131_v58 = vld [vmem:[#allocation20 + $0xa38] sm:$0xff] }
 0x2ee   : > { %16741 = vst [vmem:[#allocation339_spill] sm:$0xff] %v12091_v43  ;;  %v12109_v43 = vld [vmem:[#allocation20 + $0x9f8] sm:$0xff]  ;;  %16753 = vst [vmem:[#allocation351_spill] sm:$0xff] %v12123_v17  ;;  %v12179_v7 = vld [vmem:[#allocation20 + $0xae0] sm:$0xff] }
 0x2ef   : > { %16749 = vst [vmem:[#allocation347_spill] sm:$0xff] %v12109_v43  ;;  %16754 = vst [vmem:[#allocation352_spill] sm:$0xff] %v12125_v25  ;;  %v12149_v17 = vld [vmem:[#allocation20 + $0xa78] sm:$0xff]  ;;  %v12181_v35 = vld [vmem:[#allocation20 + $0xae8] sm:$0xff] }
 0x2f0   : > { %16756 = vst [vmem:[#allocation354_spill] sm:$0xff] %v12131_v58  ;;  %v12147_v58 = vld [vmem:[#allocation20 + $0xa70] sm:$0xff]  ;;  %16763 = vst [vmem:[#allocation361_spill] sm:$0xff] %v12149_v17  ;;  %v12187_v51 = vld [vmem:[#allocation20 + $0xaf8] sm:$0xff] }
 0x2f1   : > { %16762 = vst [vmem:[#allocation360_spill] sm:$0xff] %v12147_v58  ;;  %v12165_v58 = vld [vmem:[#allocation20 + $0xab8] sm:$0xff]  ;;  %16775 = vst [vmem:[#allocation373_spill] sm:$0xff] %v12179_v7 }
 0x2f2   : > { %16770 = vst [vmem:[#allocation368_spill] sm:$0xff] %v12165_v58  ;;  %16776 = vst [vmem:[#allocation374_spill] sm:$0xff] %v12181_v35  ;;  %v12205_v7 = vld [vmem:[#allocation20 + $0xb38] sm:$0xff] }
 0x2f3   : > { %16778 = vst [vmem:[#allocation376_spill] sm:$0xff] %v12187_v51  ;;  %v12203_v51 = vld [vmem:[#allocation20 + $0xb30] sm:$0xff]  ;;  %16786 = vst [vmem:[#allocation384_spill] sm:$0xff] %v12205_v7 }
 0x2f4   : > { %16785 = vst [vmem:[#allocation383_spill] sm:$0xff] %v12203_v51  ;;  %v12221_v51 = vld [vmem:[#allocation20 + $0xb78] sm:$0xff] }
 0x2f5   : > { %16794 = vst [vmem:[#allocation392_spill] sm:$0xff] %v12221_v51 }
 0x365   : > { %v1750_v1 = vpop.f32.mrb[4].mxu1  ;;  %v1823_v53 = vpop.f32.mrb[16].mxu0 }
 0x366   : > { %v2050_v38 = vadd.f32 %v11577_v3, %v1750_v1  ;;  %v2052_v56 = vadd.f32 %v11582_v40, %v1823_v53  ;;  %v1752_v0 = vpop.f32.mrb[5].mxu1  ;;  %v1825_v37 = vpop.f32.mrb[17].mxu0  ;;  %v11631_v1 = vld [vmem:[#allocation20 + $0x370] sm:$0xff] }
 0x367   : > { %v2051_v20 = vadd.f32 %v11592_v29, %v1752_v0  ;;  %v2053_v54 = vadd.f32 %v11597_v50, %v1825_v37  ;;  %v1754_v19 = vpop.f32.mrb[6].mxu1  ;;  %v1827_v13 = vpop.f32.mrb[18].mxu0  ;;  %16545 = vst [vmem:[#allocation147_spill] sm:$0xff] %v11631_v1  ;;  %v11637_v0 = vld [vmem:[#allocation20 + $0x380] sm:$0xff]  ;;  %v11639_v37 = vld [vmem:[#allocation20 + $0x388] sm:$0xff] }
 0x368   : > { %2114 = vst [vmem:[#allocation2] sm:$0xff] %v2050_v38  ;;  %2116 = vst [vmem:[#allocation2 + $0x10] sm:$0xff] %v2052_v56  ;;  %v2058_v53 = vadd.f32 %v11577_v3, %v1754_v19  ;;  %v2060_v9 = vadd.f32 %v11582_v40, %v1827_v13  ;;  %v1756_v47 = vpop.f32.mrb[7].mxu1  ;;  %v1829_v55 = vpop.f32.mrb[19].mxu0  ;;  %v11643_v38 = vld [vmem:[#allocation20 + $0x390] sm:$0xff]  ;;  %v11645_v56 = vld [vmem:[#allocation20 + $0x398] sm:$0xff] }
 0x369   : > { %16547 = vst [vmem:[#allocation149_spill] sm:$0xff] %v11637_v0  ;;  %16548 = vst [vmem:[#allocation150_spill] sm:$0xff] %v11639_v37  ;;  %v2059_v62 = vadd.f32 %v11592_v29, %v1756_v47  ;;  %v2061_v1 = vadd.f32 %v11597_v50, %v1829_v55  ;;  %v11647_v19 = vld [vmem:[#allocation20 + $0x3a0] sm:$0xff]  ;;  %v11649_v13 = vld [vmem:[#allocation20 + $0x3a8] sm:$0xff] }
 0x36a   : > { %2115 = vst [vmem:[#allocation2 + $0x8] sm:$0xff] %v2051_v20  ;;  %2117 = vst [vmem:[#allocation2 + $0x18] sm:$0xff] %v2053_v54  ;;  %v11655_v54 = vld [vmem:[#allocation20 + $0x3c0] sm:$0xff]  ;;  %v11657_v47 = vld [vmem:[#allocation20 + $0x3c8] sm:$0xff] }
 0x36b   : > { %16549 = vst [vmem:[#allocation151_spill] sm:$0xff] %v11643_v38  ;;  %16550 = vst [vmem:[#allocation152_spill] sm:$0xff] %v11645_v56  ;;  %v11659_v55 = vld [vmem:[#allocation20 + $0x3d0] sm:$0xff]  ;;  %v11661_v20 = vld [vmem:[#allocation20 + $0x3d8] sm:$0xff] }
 0x36c   : > { %16551 = vst [vmem:[#allocation153_spill] sm:$0xff] %v11647_v19  ;;  %2122 = vst [vmem:[#allocation2 + $0x40] sm:$0xff] %v2058_v53  ;;  %v11663_v56 = vld [vmem:[#allocation20 + $0x3e0] sm:$0xff]  ;;  %v11665_v53 = vld [vmem:[#allocation20 + $0x3e8] sm:$0xff] }
 0x36d   : > { %2124 = vst [vmem:[#allocation2 + $0x50] sm:$0xff] %v2060_v9  ;;  %16552 = vst [vmem:[#allocation154_spill] sm:$0xff] %v11649_v13  ;;  %v1760_v9 = vpop.f32.mrb[8].mxu1  ;;  %v1833_v13 = vpop.f32.mrb[20].mxu0  ;;  %v11667_v19 = vld [vmem:[#allocation20 + $0x3f0] sm:$0xff]  ;;  %v12039_v37 = vld [vmem:[#allocation20 + $0x900] sm:$0xff] }
 0x36e   : > { %2123 = vst [vmem:[#allocation2 + $0x48] sm:$0xff] %v2059_v62  ;;  %2125 = vst [vmem:[#allocation2 + $0x58] sm:$0xff] %v2061_v1  ;;  %v11671_v62 = vld [vmem:[#allocation20 + $0x400] sm:$0xff]  ;;  %v2066_v1 = vadd.f32 %v11577_v3, %v1760_v9  ;;  %v2068_v28 = vadd.f32 %v11582_v40, %v1833_v13  ;;  %v1762_v38 = vpop.f32.mrb[9].mxu1  ;;  %v11687_v9 = vld [vmem:[#allocation20 + $0x430] sm:$0xff] }
 0x36f   : > { %16555 = vst [vmem:[#allocation157_spill] sm:$0xff] %v11657_v47  ;;  %16556 = vst [vmem:[#allocation158_spill] sm:$0xff] %v11659_v55  ;;  %v1835_v55 = vpop.f32.mrb[21].mxu0  ;;  %v1764_v21 = vpop.f32.mrb[10].mxu1  ;;  %v12043_v47 = vld [vmem:[#allocation20 + $0x910] sm:$0xff] }
 0x370   : > { %16557 = vst [vmem:[#allocation159_spill] sm:$0xff] %v11661_v20  ;;  %16558 = vst [vmem:[#allocation160_spill] sm:$0xff] %v11663_v56  ;;  %v11677_v20 = vld [vmem:[#allocation20 + $0x410] sm:$0xff]  ;;  %v11679_v56 = vld [vmem:[#allocation20 + $0x418] sm:$0xff]  ;;  %v1837_v52 = vpop.f32.mrb[22].mxu0  ;;  %v2074_v13 = vadd.f32 %v11577_v3, %v1764_v21  ;;  %v1766_v41 = vpop.f32.mrb[11].mxu1 }
 0x371   : > { %16559 = vst [vmem:[#allocation161_spill] sm:$0xff] %v11665_v53  ;;  %16560 = vst [vmem:[#allocation162_spill] sm:$0xff] %v11667_v19  ;;  %v2067_v53 = vadd.f32 %v11592_v29, %v1762_v38  ;;  %v2069_v19 = vadd.f32 %v11597_v50, %v1835_v55  ;;  %v11693_v38 = vld [vmem:[#allocation20 + $0x440] sm:$0xff]  ;;  %v11695_v55 = vld [vmem:[#allocation20 + $0x448] sm:$0xff]  ;;  %v2075_v4 = vadd.f32 %v11592_v29, %v1766_v41 }
 0x372   : > { %16563 = vst [vmem:[#allocation165_spill] sm:$0xff] %v11677_v20  ;;  %16564 = vst [vmem:[#allocation166_spill] sm:$0xff] %v11679_v56  ;;  %v2076_v20 = vadd.f32 %v11582_v40, %v1837_v52  ;;  %v1839_v56 = vpop.f32.mrb[23].mxu0  ;;  %v11703_v21 = vld [vmem:[#allocation20 + $0x460] sm:$0xff]  ;;  %v11705_v52 = vld [vmem:[#allocation20 + $0x468] sm:$0xff] }
 0x373   : > { %16567 = vst [vmem:[#allocation169_spill] sm:$0xff] %v11687_v9  ;;  %2130 = vst [vmem:[#allocation2 + $0x80] sm:$0xff] %v2066_v1  ;;  %v2077_v9 = vadd.f32 %v11597_v50, %v1839_v56  ;;  %v11699_v1 = vld [vmem:[#allocation20 + $0x450] sm:$0xff]  ;;  %v11713_v41 = vld [vmem:[#allocation20 + $0x488] sm:$0xff] }
 0x374   : > { %2132 = vst [vmem:[#allocation2 + $0x90] sm:$0xff] %v2068_v28  ;;  %16569 = vst [vmem:[#allocation171_spill] sm:$0xff] %v11695_v55  ;;  %v11701_v28 = vld [vmem:[#allocation20 + $0x458] sm:$0xff]  ;;  %v11715_v56 = vld [vmem:[#allocation20 + $0x490] sm:$0xff] }
 0x375   : > { %2131 = vst [vmem:[#allocation2 + $0x88] sm:$0xff] %v2067_v53  ;;  %2133 = vst [vmem:[#allocation2 + $0x98] sm:$0xff] %v2069_v19  ;;  %v11711_v19 = vld [vmem:[#allocation20 + $0x480] sm:$0xff]  ;;  %v11717_v53 = vld [vmem:[#allocation20 + $0x498] sm:$0xff] }
 0x376   : > { %16570 = vst [vmem:[#allocation172_spill] sm:$0xff] %v11699_v1  ;;  %16571 = vst [vmem:[#allocation173_spill] sm:$0xff] %v11701_v28  ;;  %v11719_v28 = vld [vmem:[#allocation20 + $0x4a0] sm:$0xff]  ;;  %v12001_v55 = vld [vmem:[#allocation20 + $0x8b8] sm:$0xff] }
 0x377   : > { %16572 = vst [vmem:[#allocation174_spill] sm:$0xff] %v11703_v21  ;;  %2138 = vst [vmem:[#allocation2 + $0xc0] sm:$0xff] %v2074_v13  ;;  %v11721_v13 = vld [vmem:[#allocation20 + $0x4a8] sm:$0xff]  ;;  %v11723_v21 = vld [vmem:[#allocation20 + $0x4b0] sm:$0xff] }
 0x378   : > { %2140 = vst [vmem:[#allocation2 + $0xd0] sm:$0xff] %v2076_v20  ;;  %16573 = vst [vmem:[#allocation175_spill] sm:$0xff] %v11705_v52  ;;  %v1770_v20 = vpop.f32.mrb[12].mxu1  ;;  %v1843_v52 = vpop.f32.mrb[24].mxu0 }
 0x379   : > { %2139 = vst [vmem:[#allocation2 + $0xc8] sm:$0xff] %v2075_v4  ;;  %2141 = vst [vmem:[#allocation2 + $0xd8] sm:$0xff] %v2077_v9  ;;  %v11727_v4 = vld [vmem:[#allocation20 + $0x4c0] sm:$0xff]  ;;  %v2082_v9 = vadd.f32 %v11577_v3, %v1770_v20  ;;  %v2084_v2 = vadd.f32 %v11582_v40, %v1843_v52  ;;  %v1772_v1 = vpop.f32.mrb[13].mxu1  ;;  %v11743_v20 = vld [vmem:[#allocation20 + $0x4f0] sm:$0xff] }
 0x37a   : > { %16576 = vst [vmem:[#allocation178_spill] sm:$0xff] %v11711_v19  ;;  %16577 = vst [vmem:[#allocation179_spill] sm:$0xff] %v11713_v41  ;;  %v1774_v44 = vpop.f32.mrb[14].mxu1  ;;  %v11803_v41 = vld [vmem:[#allocation20 + $0x5b8] sm:$0xff] }
 0x37b   : > { %16578 = vst [vmem:[#allocation180_spill] sm:$0xff] %v11715_v56  ;;  %16579 = vst [vmem:[#allocation181_spill] sm:$0xff] %v11717_v53  ;;  %v1845_v56 = vpop.f32.mrb[25].mxu0  ;;  %v11733_v53 = vld [vmem:[#allocation20 + $0x4d0] sm:$0xff]  ;;  %v2090_v52 = vadd.f32 %v11577_v3, %v1774_v44  ;;  %v1776_v61 = vpop.f32.mrb[15].mxu1  ;;  %v11759_v44 = vld [vmem:[#allocation20 + $0x520] sm:$0xff] }
 0x37c   : > { %16580 = vst [vmem:[#allocation182_spill] sm:$0xff] %v11719_v28  ;;  %16581 = vst [vmem:[#allocation183_spill] sm:$0xff] %v11721_v13  ;;  %v11735_v28 = vld [vmem:[#allocation20 + $0x4d8] sm:$0xff]  ;;  %v2083_v13 = vadd.f32 %v11592_v29, %v1772_v1  ;;  %v1847_v5 = vpop.f32.mrb[26].mxu0  ;;  %v11749_v1 = vld [vmem:[#allocation20 + $0x500] sm:$0xff]  ;;  %v2091_v27 = vadd.f32 %v11592_v29, %v1776_v61 }
 0x37d   : > { %16582 = vst [vmem:[#allocation184_spill] sm:$0xff] %v11723_v21  ;;  %16584 = vst [vmem:[#allocation186_spill] sm:$0xff] %v11727_v4  ;;  %v2085_v21 = vadd.f32 %v11597_v50, %v1845_v56  ;;  %v11751_v56 = vld [vmem:[#allocation20 + $0x508] sm:$0xff] }
 0x37e   : > { %16586 = vst [vmem:[#allocation188_spill] sm:$0xff] %v11733_v53  ;;  %16587 = vst [vmem:[#allocation189_spill] sm:$0xff] %v11735_v28  ;;  %v2092_v53 = vadd.f32 %v11582_v40, %v1847_v5  ;;  %v1849_v28 = vpop.f32.mrb[27].mxu0  ;;  %v11761_v5 = vld [vmem:[#allocation20 + $0x528] sm:$0xff] }
 0x37f   : > { %16590 = vst [vmem:[#allocation192_spill] sm:$0xff] %v11743_v20  ;;  %2146 = vst [vmem:[#allocation2 + $0x100] sm:$0xff] %v2082_v9  ;;  %v2093_v20 = vadd.f32 %v11597_v50, %v1849_v28  ;;  %v11755_v9 = vld [vmem:[#allocation20 + $0x510] sm:$0xff]  ;;  %v11769_v61 = vld [vmem:[#allocation20 + $0x548] sm:$0xff] }
 0x380   : > { %2148 = vst [vmem:[#allocation2 + $0x110] sm:$0xff] %v2084_v2  ;;  %16592 = vst [vmem:[#allocation194_spill] sm:$0xff] %v11749_v1  ;;  %v11757_v2 = vld [vmem:[#allocation20 + $0x518] sm:$0xff]  ;;  %v11771_v28 = vld [vmem:[#allocation20 + $0x550] sm:$0xff] }
 0x381   : > { %16593 = vst [vmem:[#allocation195_spill] sm:$0xff] %v11751_v56  ;;  %2147 = vst [vmem:[#allocation2 + $0x108] sm:$0xff] %v2083_v13  ;;  %v11773_v13 = vld [vmem:[#allocation20 + $0x558] sm:$0xff]  ;;  %v11795_v56 = vld [vmem:[#allocation20 + $0x5a0] sm:$0xff] }
 0x382   : > { %2149 = vst [vmem:[#allocation2 + $0x118] sm:$0xff] %v2085_v21  ;;  %16594 = vst [vmem:[#allocation196_spill] sm:$0xff] %v11755_v9  ;;  %v11767_v21 = vld [vmem:[#allocation20 + $0x540] sm:$0xff] }
 0x383   : > { %16595 = vst [vmem:[#allocation197_spill] sm:$0xff] %v11757_v2  ;;  %16596 = vst [vmem:[#allocation198_spill] sm:$0xff] %v11759_v44  ;;  %v11775_v2 = vld [vmem:[#allocation20 + $0x560] sm:$0xff]  ;;  %v11779_v44 = vld [vmem:[#allocation20 + $0x570] sm:$0xff] }
 0x384   : > { %2154 = vst [vmem:[#allocation2 + $0x140] sm:$0xff] %v2090_v52  ;;  %2156 = vst [vmem:[#allocation2 + $0x150] sm:$0xff] %v2092_v53  ;;  %v11777_v52 = vld [vmem:[#allocation20 + $0x568] sm:$0xff]  ;;  %v1780_v53 = vpop.f32.mrb[16].mxu1 }
 0x385   : > { %16597 = vst [vmem:[#allocation199_spill] sm:$0xff] %v11761_v5  ;;  %2155 = vst [vmem:[#allocation2 + $0x148] sm:$0xff] %v2091_v27  ;;  %v1853_v5 = vpop.f32.mrb[28].mxu0  ;;  %v11783_v27 = vld [vmem:[#allocation20 + $0x580] sm:$0xff]  ;;  %v1782_v9 = vpop.f32.mrb[17].mxu1 }
 0x386   : > { %2157 = vst [vmem:[#allocation2 + $0x158] sm:$0xff] %v2093_v20  ;;  %16600 = vst [vmem:[#allocation202_spill] sm:$0xff] %v11767_v21  ;;  %v2098_v20 = vadd.f32 %v11577_v3, %v1780_v53  ;;  %v2100_v18 = vadd.f32 %v11582_v40, %v1853_v5  ;;  %v1784_v26 = vpop.f32.mrb[18].mxu1  ;;  %v11799_v53 = vld [vmem:[#allocation20 + $0x5b0] sm:$0xff] }
 0x387   : > { %16601 = vst [vmem:[#allocation203_spill] sm:$0xff] %v11769_v61  ;;  %16602 = vst [vmem:[#allocation204_spill] sm:$0xff] %v11771_v28  ;;  %v1855_v28 = vpop.f32.mrb[29].mxu0  ;;  %v11797_v61 = vld [vmem:[#allocation20 + $0x5a8] sm:$0xff]  ;;  %v2106_v5 = vadd.f32 %v11577_v3, %v1784_v26  ;;  %v1786_v34 = vpop.f32.mrb[19].mxu1  ;;  %v11815_v3 = vld [vmem:[#allocation20 + $0x5e0] sm:$0xff] }
 0x388   : > { %16603 = vst [vmem:[#allocation205_spill] sm:$0xff] %v11773_v13  ;;  %16604 = vst [vmem:[#allocation206_spill] sm:$0xff] %v11775_v2  ;;  %v11789_v13 = vld [vmem:[#allocation20 + $0x590] sm:$0xff]  ;;  %v11791_v2 = vld [vmem:[#allocation20 + $0x598] sm:$0xff]  ;;  %v1857_v8 = vpop.f32.mrb[30].mxu0 }
 0x389   : > { %16605 = vst [vmem:[#allocation207_spill] sm:$0xff] %v11777_v52  ;;  %16606 = vst [vmem:[#allocation208_spill] sm:$0xff] %v11779_v44  ;;  %v2099_v52 = vadd.f32 %v11592_v29, %v1782_v9  ;;  %v2101_v44 = vadd.f32 %v11597_v50, %v1855_v28  ;;  %v11805_v9 = vld [vmem:[#allocation20 + $0x5c0] sm:$0xff]  ;;  %v11807_v28 = vld [vmem:[#allocation20 + $0x5c8] sm:$0xff] }
 0x38a   : > { %16608 = vst [vmem:[#allocation210_spill] sm:$0xff] %v11783_v27  ;;  %16610 = vst [vmem:[#allocation212_spill] sm:$0xff] %v11789_v13  ;;  %v2108_v13 = vadd.f32 %v11582_v40, %v1857_v8  ;;  %v11817_v26 = vld [vmem:[#allocation20 + $0x5e8] sm:$0xff]  ;;  %v11819_v8 = vld [vmem:[#allocation20 + $0x5f0] sm:$0xff] }
 0x38b   : > { %16611 = vst [vmem:[#allocation213_spill] sm:$0xff] %v11791_v2  ;;  %16612 = vst [vmem:[#allocation214_spill] sm:$0xff] %v11795_v56  ;;  %v1859_v2 = vpop.f32.mrb[31].mxu0  ;;  %v11821_v40 = vld [vmem:[#allocation20 + $0x5f8] sm:$0xff]  ;;  %v11851_v56 = vld [vmem:[#allocation20 + $0x670] sm:$0xff] }
 0x38c   : > { %16613 = vst [vmem:[#allocation215_spill] sm:$0xff] %v11797_v61  ;;  %16614 = vst [vmem:[#allocation216_spill] sm:$0xff] %v11799_v53  ;;  %v2107_v61 = vadd.f32 %v11592_v29, %v1786_v34  ;;  %v2109_v53 = vadd.f32 %v11597_v50, %v1859_v2  ;;  %v11825_v34 = vld [vmem:[#allocation20 + $0x608] sm:$0xff]  ;;  %v11827_v50 = vld [vmem:[#allocation20 + $0x610] sm:$0xff] }
 0x38d   : > { %2162 = vst [vmem:[#allocation2 + $0x180] sm:$0xff] %v2098_v20  ;;  %2164 = vst [vmem:[#allocation2 + $0x190] sm:$0xff] %v2100_v18  ;;  %v11811_v20 = vld [vmem:[#allocation20 + $0x5d0] sm:$0xff]  ;;  %v11813_v18 = vld [vmem:[#allocation20 + $0x5d8] sm:$0xff] }
 0x38e   : > { %16615 = vst [vmem:[#allocation217_spill] sm:$0xff] %v11803_v41  ;;  %16616 = vst [vmem:[#allocation218_spill] sm:$0xff] %v11805_v9  ;;  %v11829_v29 = vld [vmem:[#allocation20 + $0x618] sm:$0xff]  ;;  %v11831_v2 = vld [vmem:[#allocation20 + $0x620] sm:$0xff] }
 0x38f   : > { %16617 = vst [vmem:[#allocation219_spill] sm:$0xff] %v11807_v28  ;;  %2163 = vst [vmem:[#allocation2 + $0x188] sm:$0xff] %v2099_v52  ;;  %v11833_v52 = vld [vmem:[#allocation20 + $0x628] sm:$0xff]  ;;  %v11839_v41 = vld [vmem:[#allocation20 + $0x640] sm:$0xff] }
 0x390   : > { %2165 = vst [vmem:[#allocation2 + $0x198] sm:$0xff] %v2101_v44  ;;  %16618 = vst [vmem:[#allocation220_spill] sm:$0xff] %v11811_v20  ;;  %v11823_v44 = vld [vmem:[#allocation20 + $0x600] sm:$0xff]  ;;  %v11893_v20 = vld [vmem:[#allocation20 + $0x718] sm:$0xff] }
 0x391   : > { %16619 = vst [vmem:[#allocation221_spill] sm:$0xff] %v11813_v18  ;;  %16620 = vst [vmem:[#allocation222_spill] sm:$0xff] %v11815_v3  ;;  %v11861_v3 = vld [vmem:[#allocation20 + $0x698] sm:$0xff]  ;;  %v11865_v18 = vld [vmem:[#allocation20 + $0x6a8] sm:$0xff] }
 0x392   : > { %2170 = vst [vmem:[#allocation2 + $0x1c0] sm:$0xff] %v2106_v5  ;;  %2172 = vst [vmem:[#allocation2 + $0x1d0] sm:$0xff] %v2108_v13  ;;  %v11835_v13 = vld [vmem:[#allocation20 + $0x630] sm:$0xff]  ;;  %v11837_v5 = vld [vmem:[#allocation20 + $0x638] sm:$0xff] }
 0x393   : > { %16621 = vst [vmem:[#allocation223_spill] sm:$0xff] %v11817_v26  ;;  %16622 = vst [vmem:[#allocation224_spill] sm:$0xff] %v11819_v8  ;;  %v11847_v8 = vld [vmem:[#allocation20 + $0x660] sm:$0xff]  ;;  %v11849_v26 = vld [vmem:[#allocation20 + $0x668] sm:$0xff] }
 0x394   : > { %16623 = vst [vmem:[#allocation225_spill] sm:$0xff] %v11821_v40  ;;  %2171 = vst [vmem:[#allocation2 + $0x1c8] sm:$0xff] %v2107_v61  ;;  %v11841_v61 = vld [vmem:[#allocation20 + $0x648] sm:$0xff]  ;;  %v11845_v40 = vld [vmem:[#allocation20 + $0x658] sm:$0xff] }
 0x395   : > { %2173 = vst [vmem:[#allocation2 + $0x1d8] sm:$0xff] %v2109_v53  ;;  %16624 = vst [vmem:[#allocation226_spill] sm:$0xff] %v11825_v34  ;;  %v11843_v53 = vld [vmem:[#allocation20 + $0x650] sm:$0xff]  ;;  %v11925_v34 = vld [vmem:[#allocation20 + $0x798] sm:$0xff] }
 0x396   : > { %16625 = vst [vmem:[#allocation227_spill] sm:$0xff] %v11827_v50  ;;  %16626 = vst [vmem:[#allocation228_spill] sm:$0xff] %v11829_v29  ;;  %v11863_v29 = vld [vmem:[#allocation20 + $0x6a0] sm:$0xff]  ;;  %v11877_v50 = vld [vmem:[#allocation20 + $0x6d8] sm:$0xff] }
 0x397   : > { %16627 = vst [vmem:[#allocation229_spill] sm:$0xff] %v11831_v2  ;;  %16628 = vst [vmem:[#allocation230_spill] sm:$0xff] %v11833_v52  ;;  %v11853_v2 = vld [vmem:[#allocation20 + $0x678] sm:$0xff]  ;;  %v11855_v52 = vld [vmem:[#allocation20 + $0x680] sm:$0xff] }
 0x398   : > { %16629 = vst [vmem:[#allocation231_spill] sm:$0xff] %v11835_v13  ;;  %16630 = vst [vmem:[#allocation232_spill] sm:$0xff] %v11837_v5  ;;  %v11857_v13 = vld [vmem:[#allocation20 + $0x688] sm:$0xff]  ;;  %v11859_v5 = vld [vmem:[#allocation20 + $0x690] sm:$0xff] }
 0x399   : > { %16631 = vst [vmem:[#allocation233_spill] sm:$0xff] %v11841_v61  ;;  %16632 = vst [vmem:[#allocation234_spill] sm:$0xff] %v11843_v53  ;;  %v11879_v53 = vld [vmem:[#allocation20 + $0x6e0] sm:$0xff]  ;;  %v11941_v61 = vld [vmem:[#allocation20 + $0x7d8] sm:$0xff] }
 0x39a   : > { %16633 = vst [vmem:[#allocation235_spill] sm:$0xff] %v11845_v40  ;;  %16634 = vst [vmem:[#allocation236_spill] sm:$0xff] %v11847_v8  ;;  %v11867_v40 = vld [vmem:[#allocation20 + $0x6b0] sm:$0xff]  ;;  %v11869_v8 = vld [vmem:[#allocation20 + $0x6b8] sm:$0xff] }
 0x39b   : > { %16635 = vst [vmem:[#allocation237_spill] sm:$0xff] %v11849_v26  ;;  %16636 = vst [vmem:[#allocation238_spill] sm:$0xff] %v11851_v56  ;;  %v11871_v26 = vld [vmem:[#allocation20 + $0x6c0] sm:$0xff]  ;;  %v11873_v56 = vld [vmem:[#allocation20 + $0x6c8] sm:$0xff] }
 0x39c   : > { %16637 = vst [vmem:[#allocation239_spill] sm:$0xff] %v11853_v2  ;;  %16638 = vst [vmem:[#allocation240_spill] sm:$0xff] %v11855_v52  ;;  %v11875_v2 = vld [vmem:[#allocation20 + $0x6d0] sm:$0xff]  ;;  %v11957_v28 = vld [vmem:[#allocation20 + $0x818] sm:$0xff] }
 0x39d   : > { %16639 = vst [vmem:[#allocation241_spill] sm:$0xff] %v11857_v13  ;;  %16640 = vst [vmem:[#allocation242_spill] sm:$0xff] %v11859_v5  ;;  %v11881_v5 = vld [vmem:[#allocation20 + $0x6e8] sm:$0xff]  ;;  %v11895_v13 = vld [vmem:[#allocation20 + $0x720] sm:$0xff] }
 0x39e   : > { %16641 = vst [vmem:[#allocation243_spill] sm:$0xff] %v11861_v3  ;;  %16642 = vst [vmem:[#allocation244_spill] sm:$0xff] %v11863_v29  ;;  %v11883_v3 = vld [vmem:[#allocation20 + $0x6f0] sm:$0xff]  ;;  %v11885_v29 = vld [vmem:[#allocation20 + $0x6f8] sm:$0xff] }
 0x39f   : > { %16643 = vst [vmem:[#allocation245_spill] sm:$0xff] %v11865_v18  ;;  %16644 = vst [vmem:[#allocation246_spill] sm:$0xff] %v11867_v40  ;;  %v11887_v18 = vld [vmem:[#allocation20 + $0x700] sm:$0xff]  ;;  %v11889_v40 = vld [vmem:[#allocation20 + $0x708] sm:$0xff] }
 0x3a0   : > { %16645 = vst [vmem:[#allocation247_spill] sm:$0xff] %v11869_v8  ;;  %16646 = vst [vmem:[#allocation248_spill] sm:$0xff] %v11871_v26  ;;  %v11891_v8 = vld [vmem:[#allocation20 + $0x710] sm:$0xff]  ;;  %v12429_v52 = vld [vmem:[#allocation20 + $0xe98] sm:$0xff] }
 0x3a1   : > { %16647 = vst [vmem:[#allocation249_spill] sm:$0xff] %v11873_v56  ;;  %16648 = vst [vmem:[#allocation250_spill] sm:$0xff] %v11875_v2  ;;  %v11897_v2 = vld [vmem:[#allocation20 + $0x728] sm:$0xff]  ;;  %v11909_v56 = vld [vmem:[#allocation20 + $0x758] sm:$0xff] }
 0x3a2   : > { %16649 = vst [vmem:[#allocation251_spill] sm:$0xff] %v11877_v50  ;;  %16650 = vst [vmem:[#allocation252_spill] sm:$0xff] %v11879_v53  ;;  %v11899_v50 = vld [vmem:[#allocation20 + $0x730] sm:$0xff]  ;;  %v11901_v53 = vld [vmem:[#allocation20 + $0x738] sm:$0xff] }
 0x3a3   : > { %16651 = vst [vmem:[#allocation253_spill] sm:$0xff] %v11881_v5  ;;  %16652 = vst [vmem:[#allocation254_spill] sm:$0xff] %v11883_v3  ;;  %v11903_v5 = vld [vmem:[#allocation20 + $0x740] sm:$0xff]  ;;  %v11905_v3 = vld [vmem:[#allocation20 + $0x748] sm:$0xff] }
 0x3a4   : > { %16653 = vst [vmem:[#allocation255_spill] sm:$0xff] %v11885_v29  ;;  %16654 = vst [vmem:[#allocation256_spill] sm:$0xff] %v11887_v18  ;;  %v11907_v29 = vld [vmem:[#allocation20 + $0x750] sm:$0xff]  ;;  %v12243_v18 = vld [vmem:[#allocation20 + $0xbb8] sm:$0xff] }
 0x3a5   : > { %16655 = vst [vmem:[#allocation257_spill] sm:$0xff] %v11889_v40  ;;  %16656 = vst [vmem:[#allocation258_spill] sm:$0xff] %v11891_v8  ;;  %v11911_v40 = vld [vmem:[#allocation20 + $0x760] sm:$0xff]  ;;  %v11913_v8 = vld [vmem:[#allocation20 + $0x768] sm:$0xff]  ;;  %v1896_v12 = vpop.f32.mrb[20].mxu1 }
 0x3a6   : > { %16657 = vst [vmem:[#allocation259_spill] sm:$0xff] %v11893_v20  ;;  %16658 = vst [vmem:[#allocation260_spill] sm:$0xff] %v11895_v13  ;;  %v11915_v20 = vld [vmem:[#allocation20 + $0x770] sm:$0xff]  ;;  %v11917_v13 = vld [vmem:[#allocation20 + $0x778] sm:$0xff]  ;;  %v1898_v31 = vpop.f32.mrb[21].mxu1 }
 0x3a7   : > { %16659 = vst [vmem:[#allocation261_spill] sm:$0xff] %v11897_v2  ;;  %16660 = vst [vmem:[#allocation262_spill] sm:$0xff] %v11899_v50  ;;  %v11919_v2 = vld [vmem:[#allocation20 + $0x780] sm:$0xff]  ;;  %v11921_v50 = vld [vmem:[#allocation20 + $0x788] sm:$0xff]  ;;  %v1900_v48 = vpop.f32.mrb[22].mxu1 }
 0x3a8   : > { %16661 = vst [vmem:[#allocation263_spill] sm:$0xff] %v11901_v53  ;;  %16662 = vst [vmem:[#allocation264_spill] sm:$0xff] %v11903_v5  ;;  %v11923_v53 = vld [vmem:[#allocation20 + $0x790] sm:$0xff]  ;;  %v1902_v11 = vpop.f32.mrb[23].mxu1  ;;  %v12413_v5 = vld [vmem:[#allocation20 + $0xe58] sm:$0xff] }
 0x3a9   : > { %16663 = vst [vmem:[#allocation265_spill] sm:$0xff] %v11905_v3  ;;  %16664 = vst [vmem:[#allocation266_spill] sm:$0xff] %v11907_v29  ;;  %v11927_v3 = vld [vmem:[#allocation20 + $0x7a0] sm:$0xff]  ;;  %v11929_v29 = vld [vmem:[#allocation20 + $0x7a8] sm:$0xff] }
 0x3aa   : > { %16665 = vst [vmem:[#allocation267_spill] sm:$0xff] %v11909_v56  ;;  %16666 = vst [vmem:[#allocation268_spill] sm:$0xff] %v11911_v40  ;;  %v11931_v56 = vld [vmem:[#allocation20 + $0x7b0] sm:$0xff]  ;;  %v11933_v40 = vld [vmem:[#allocation20 + $0x7b8] sm:$0xff] }
 0x3ab   : > { %16667 = vst [vmem:[#allocation269_spill] sm:$0xff] %v11913_v8  ;;  %16668 = vst [vmem:[#allocation270_spill] sm:$0xff] %v11915_v20  ;;  %v11935_v8 = vld [vmem:[#allocation20 + $0x7c0] sm:$0xff]  ;;  %v11937_v20 = vld [vmem:[#allocation20 + $0x7c8] sm:$0xff] }
 0x3ac   : > { %16669 = vst [vmem:[#allocation271_spill] sm:$0xff] %v11917_v13  ;;  %16670 = vst [vmem:[#allocation272_spill] sm:$0xff] %v11919_v2  ;;  %v11939_v13 = vld [vmem:[#allocation20 + $0x7d0] sm:$0xff]  ;;  %v12235_v2 = vld [vmem:[#allocation20 + $0xba0] sm:$0xff] }
 0x3ad   : > { %16671 = vst [vmem:[#allocation273_spill] sm:$0xff] %v11921_v50  ;;  %16672 = vst [vmem:[#allocation274_spill] sm:$0xff] %v11923_v53  ;;  %v11943_v50 = vld [vmem:[#allocation20 + $0x7e0] sm:$0xff]  ;;  %v11945_v53 = vld [vmem:[#allocation20 + $0x7e8] sm:$0xff] }
 0x3ae   : > { %16673 = vst [vmem:[#allocation275_spill] sm:$0xff] %v11925_v34  ;;  %16674 = vst [vmem:[#allocation276_spill] sm:$0xff] %v11927_v3  ;;  %v11947_v34 = vld [vmem:[#allocation20 + $0x7f0] sm:$0xff]  ;;  %v11949_v3 = vld [vmem:[#allocation20 + $0x7f8] sm:$0xff] }
 0x3af   : > { %16675 = vst [vmem:[#allocation277_spill] sm:$0xff] %v11929_v29  ;;  %16676 = vst [vmem:[#allocation278_spill] sm:$0xff] %v11931_v56  ;;  %v11951_v29 = vld [vmem:[#allocation20 + $0x800] sm:$0xff]  ;;  %v11953_v56 = vld [vmem:[#allocation20 + $0x808] sm:$0xff] }
 0x3b0   : > { %16677 = vst [vmem:[#allocation279_spill] sm:$0xff] %v11933_v40  ;;  %16678 = vst [vmem:[#allocation280_spill] sm:$0xff] %v11935_v8  ;;  %v11955_v40 = vld [vmem:[#allocation20 + $0x810] sm:$0xff]  ;;  %v12237_v8 = vld [vmem:[#allocation20 + $0xba8] sm:$0xff] }
 0x3b1   : > { %16679 = vst [vmem:[#allocation281_spill] sm:$0xff] %v11937_v20  ;;  %16680 = vst [vmem:[#allocation282_spill] sm:$0xff] %v11939_v13  ;;  %v11959_v20 = vld [vmem:[#allocation20 + $0x820] sm:$0xff]  ;;  %v11961_v13 = vld [vmem:[#allocation20 + $0x828] sm:$0xff] }
 0x3b2   : > { %16681 = vst [vmem:[#allocation283_spill] sm:$0xff] %v11941_v61  ;;  %16682 = vst [vmem:[#allocation284_spill] sm:$0xff] %v11943_v50  ;;  %v11963_v61 = vld [vmem:[#allocation20 + $0x830] sm:$0xff]  ;;  %v11965_v50 = vld [vmem:[#allocation20 + $0x838] sm:$0xff] }
 0x3b3   : > { %16683 = vst [vmem:[#allocation285_spill] sm:$0xff] %v11945_v53  ;;  %16684 = vst [vmem:[#allocation286_spill] sm:$0xff] %v11947_v34  ;;  %v11967_v53 = vld [vmem:[#allocation20 + $0x840] sm:$0xff]  ;;  %v11969_v34 = vld [vmem:[#allocation20 + $0x848] sm:$0xff] }
 0x3b4   : > { %16685 = vst [vmem:[#allocation287_spill] sm:$0xff] %v11949_v3  ;;  %16686 = vst [vmem:[#allocation288_spill] sm:$0xff] %v11951_v29  ;;  %v11971_v3 = vld [vmem:[#allocation20 + $0x850] sm:$0xff]  ;;  %v2949_v26 = vld [vmem:[#allocation5] sm:$0xff]  }
 0x3b5   : > { %16687 = vst [vmem:[#allocation289_spill] sm:$0xff] %v11953_v56  ;;  %16688 = vst [vmem:[#allocation290_spill] sm:$0xff] %v11955_v40  ;;  %v11975_v56 = vld [vmem:[#allocation20 + $0x860] sm:$0xff]  ;;  %v11977_v40 = vld [vmem:[#allocation20 + $0x868] sm:$0xff] }
 0x3b6   : > { %16689 = vst [vmem:[#allocation291_spill] sm:$0xff] %v11957_v28  ;;  %16690 = vst [vmem:[#allocation292_spill] sm:$0xff] %v11959_v20  ;;  %v11979_v28 = vld [vmem:[#allocation20 + $0x870] sm:$0xff]  ;;  %v11981_v20 = vld [vmem:[#allocation20 + $0x878] sm:$0xff] }
 0x3b7   : > { %16691 = vst [vmem:[#allocation293_spill] sm:$0xff] %v11961_v13  ;;  %16692 = vst [vmem:[#allocation294_spill] sm:$0xff] %v11963_v61  ;;  %v11983_v13 = vld [vmem:[#allocation20 + $0x880] sm:$0xff]  ;;  %v12005_v61 = vld [vmem:[#allocation20 + $0x8c8] sm:$0xff] }
 0x3b8   : > { %16693 = vst [vmem:[#allocation295_spill] sm:$0xff] %v11965_v50  ;;  %16694 = vst [vmem:[#allocation296_spill] sm:$0xff] %v11969_v34  ;;  %v11989_v34 = vld [vmem:[#allocation20 + $0x890] sm:$0xff]  ;;  %v12003_v50 = vld [vmem:[#allocation20 + $0x8c0] sm:$0xff] }
 0x3b9   : > { %16695 = vst [vmem:[#allocation297_spill] sm:$0xff] %v11971_v3  ;;  %16697 = vst [vmem:[#allocation299_spill] sm:$0xff] %v11975_v56  ;;  %v11991_v3 = vld [vmem:[#allocation20 + $0x898] sm:$0xff] }
 0x3ba   : > { %16698 = vst [vmem:[#allocation300_spill] sm:$0xff] %v11977_v40  ;;  %16699 = vst [vmem:[#allocation301_spill] sm:$0xff] %v11979_v28  ;;  %v11997_v28 = vld [vmem:[#allocation20 + $0x8a8] sm:$0xff]  ;;  %v16713_v40 = vsub.s32 4, %v11307_v49 }
 0x3bb   : > { %16700 = vst [vmem:[#allocation302_spill] sm:$0xff] %v11981_v20  ;;  %16701 = vst [vmem:[#allocation303_spill] sm:$0xff] %v11983_v13  ;;  %v11999_v20 = vld [vmem:[#allocation20 + $0x8b0] sm:$0xff] }
 0x3bc   : > { %16703 = vst [vmem:[#allocation305_spill] sm:$0xff] %v11989_v34  ;;  %16704 = vst [vmem:[#allocation306_spill] sm:$0xff] %v11991_v3  ;;  %v12009_v34 = vld [vmem:[#allocation20 + $0x8d8] sm:$0xff]  ;;  %v12011_v3 = vld [vmem:[#allocation20 + $0x8e0] sm:$0xff]  ;;  %v12016_v56 = vrot.slane %v11541_v23, %v16713_v40  ;;  %v12037_v40 = vrot.slane %v11541_v23, %v16719_v39 }
 0x3bd   : > { %16706 = vst [vmem:[#allocation308_spill] sm:$0xff] %v11997_v28  ;;  %16707 = vst [vmem:[#allocation309_spill] sm:$0xff] %v11999_v20  ;;  %v16714_v28 = vsub.s32 6, %v11307_v49 }
 0x3be   : > { %16708 = vst [vmem:[#allocation310_spill] sm:$0xff] %v12001_v55  ;;  %16709 = vst [vmem:[#allocation311_spill] sm:$0xff] %v12005_v61  ;;  %v12023_v55 = vld [vmem:[#allocation20 + $0x8e8] sm:$0xff]  ;;  %v12027_v61 = vld [vmem:[#allocation20 + $0x8f8] sm:$0xff]  ;;  %v2054_v39 = vadd.f32 %v12016_v56, %v1896_v12 }
 0x3bf   : > { %16711 = vst [vmem:[#allocation313_spill] sm:$0xff] %v12009_v34  ;;  %16712 = vst [vmem:[#allocation314_spill] sm:$0xff] %v12011_v3  ;;  %v12021_v20 = vrot.slane %v11541_v23, %v16714_v28  ;;  %v16718_v34 = vsub.s32 5, %v11307_v49  ;;  %v12041_v28 = vld [vmem:[#allocation20 + $0x908] sm:$0xff]  ;;  %v12053_v49 = vld [vmem:[#allocation20 + $0x938] sm:$0xff] }
 0x3c0   : > { %16715 = vst [vmem:[#allocation315_spill] sm:$0xff] %v12023_v55  ;;  %16717 = vst [vmem:[#allocation317_spill] sm:$0xff] %v12027_v61  ;;  %v12045_v55 = vld [vmem:[#allocation20 + $0x918] sm:$0xff]  ;;  %v12049_v61 = vld [vmem:[#allocation20 + $0x928] sm:$0xff] }
 0x3c1   : > { %v12032_v3 = vrot.slane %v11541_v23, %v16718_v34  ;;  %16720 = vst [vmem:[#allocation318_spill] sm:$0xff] %v12041_v28  ;;  %16721 = vst [vmem:[#allocation319_spill] sm:$0xff] %v12043_v47  ;;  %v1969_v34 = vpop.f32.mrb[32].mxu0  ;;  %v12055_v23 = vld [vmem:[#allocation20 + $0x940] sm:$0xff]  ;;  %v12071_v12 = vld [vmem:[#allocation20 + $0x970] sm:$0xff] }
 0x3c2   : > { %16722 = vst [vmem:[#allocation320_spill] sm:$0xff] %v12045_v55  ;;  %16724 = vst [vmem:[#allocation322_spill] sm:$0xff] %v12049_v61  ;;  %v2056_v28 = vadd.f32 %v12021_v20, %v1969_v34  ;;  %v1971_v47 = vpop.f32.mrb[33].mxu0  ;;  %v12061_v55 = vld [vmem:[#allocation20 + $0x950] sm:$0xff]  ;;  %v2062_v34 = vadd.f32 %v12016_v56, %v1900_v48  ;;  %v12087_v48 = vld [vmem:[#allocation20 + $0x9a0] sm:$0xff] }
 0x3c3   : > { %16726 = vst [vmem:[#allocation324_spill] sm:$0xff] %v12053_v49  ;;  %16727 = vst [vmem:[#allocation325_spill] sm:$0xff] %v12055_v23  ;;  %v2055_v61 = vadd.f32 %v12032_v3, %v1898_v31  ;;  %v2057_v45 = vadd.f32 %v12037_v40, %v1971_v47  ;;  %v1973_v49 = vpop.f32.mrb[34].mxu0  ;;  %v12077_v31 = vld [vmem:[#allocation20 + $0x980] sm:$0xff]  ;;  %v12079_v47 = vld [vmem:[#allocation20 + $0x988] sm:$0xff]  ;;  %v2063_v33 = vadd.f32 %v12032_v3, %v1902_v11 }
 0x3c4   : > { %16729 = vst [vmem:[#allocation327_spill] sm:$0xff] %v12061_v55  ;;  %16733 = vst [vmem:[#allocation331_spill] sm:$0xff] %v12071_v12  ;;  %v2064_v55 = vadd.f32 %v12021_v20, %v1973_v49  ;;  %v1975_v36 = vpop.f32.mrb[35].mxu0  ;;  %v12089_v49 = vld [vmem:[#allocation20 + $0x9a8] sm:$0xff] }
 0x3c5   : > { %2118 = vst [vmem:[#allocation2 + $0x20] sm:$0xff] %v2054_v39  ;;  %2120 = vst [vmem:[#allocation2 + $0x30] sm:$0xff] %v2056_v28  ;;  %v2065_v12 = vadd.f32 %v12037_v40, %v1975_v36  ;;  %v12083_v39 = vld [vmem:[#allocation20 + $0x990] sm:$0xff]  ;;  %v12085_v28 = vld [vmem:[#allocation20 + $0x998] sm:$0xff] }
 0x3c6   : > { %16735 = vst [vmem:[#allocation333_spill] sm:$0xff] %v12077_v31  ;;  %16736 = vst [vmem:[#allocation334_spill] sm:$0xff] %v12079_v47  ;;  %v12097_v11 = vld [vmem:[#allocation20 + $0x9c8] sm:$0xff]  ;;  %v12099_v36 = vld [vmem:[#allocation20 + $0x9d0] sm:$0xff] }
 0x3c7   : > { %2119 = vst [vmem:[#allocation2 + $0x28] sm:$0xff] %v2055_v61  ;;  %2121 = vst [vmem:[#allocation2 + $0x38] sm:$0xff] %v2057_v45  ;;  %v12095_v45 = vld [vmem:[#allocation20 + $0x9c0] sm:$0xff]  ;;  %v12101_v61 = vld [vmem:[#allocation20 + $0x9d8] sm:$0xff] }
 0x3c8   : > { %16737 = vst [vmem:[#allocation335_spill] sm:$0xff] %v12083_v39  ;;  %16738 = vst [vmem:[#allocation336_spill] sm:$0xff] %v12085_v28  ;;  %v12103_v28 = vld [vmem:[#allocation20 + $0x9e0] sm:$0xff]  ;;  %v12115_v47 = vld [vmem:[#allocation20 + $0xa08] sm:$0xff] }
 0x3c9   : > { %16739 = vst [vmem:[#allocation337_spill] sm:$0xff] %v12087_v48  ;;  %2126 = vst [vmem:[#allocation2 + $0x60] sm:$0xff] %v2062_v34  ;;  %v12105_v34 = vld [vmem:[#allocation20 + $0x9e8] sm:$0xff]  ;;  %v12107_v48 = vld [vmem:[#allocation20 + $0x9f0] sm:$0xff] }
 0x3ca   : > { %2128 = vst [vmem:[#allocation2 + $0x70] sm:$0xff] %v2064_v55  ;;  %16740 = vst [vmem:[#allocation338_spill] sm:$0xff] %v12089_v49  ;;  %v1906_v55 = vpop.f32.mrb[24].mxu1  ;;  %v1979_v49 = vpop.f32.mrb[36].mxu0 }
 0x3cb   : > { %2127 = vst [vmem:[#allocation2 + $0x68] sm:$0xff] %v2063_v33  ;;  %2129 = vst [vmem:[#allocation2 + $0x78] sm:$0xff] %v2065_v12  ;;  %v12111_v33 = vld [vmem:[#allocation20 + $0xa00] sm:$0xff]  ;;  %v2070_v12 = vadd.f32 %v12016_v56, %v1906_v55  ;;  %v2072_v59 = vadd.f32 %v12021_v20, %v1979_v49  ;;  %v1908_v39 = vpop.f32.mrb[25].mxu1  ;;  %v12127_v55 = vld [vmem:[#allocation20 + $0xa30] sm:$0xff] }
 0x3cc   : > { %16743 = vst [vmem:[#allocation341_spill] sm:$0xff] %v12097_v11  ;;  %16744 = vst [vmem:[#allocation342_spill] sm:$0xff] %v12099_v36  ;;  %v1981_v36 = vpop.f32.mrb[37].mxu0  ;;  %v1910_v11 = vpop.f32.mrb[26].mxu1 }
 0x3cd   : > { %16745 = vst [vmem:[#allocation343_spill] sm:$0xff] %v12101_v61  ;;  %16746 = vst [vmem:[#allocation344_spill] sm:$0xff] %v12103_v28  ;;  %v12117_v61 = vld [vmem:[#allocation20 + $0xa10] sm:$0xff]  ;;  %v12119_v28 = vld [vmem:[#allocation20 + $0xa18] sm:$0xff]  ;;  %v1983_v43 = vpop.f32.mrb[38].mxu0  ;;  %v2078_v49 = vadd.f32 %v12016_v56, %v1910_v11 }
 0x3ce   : > { %16747 = vst [vmem:[#allocation345_spill] sm:$0xff] %v12105_v34  ;;  %16748 = vst [vmem:[#allocation346_spill] sm:$0xff] %v12107_v48  ;;  %v2071_v34 = vadd.f32 %v12032_v3, %v1908_v39  ;;  %v2073_v48 = vadd.f32 %v12037_v40, %v1981_v36  ;;  %v12133_v39 = vld [vmem:[#allocation20 + $0xa40] sm:$0xff]  ;;  %v12135_v36 = vld [vmem:[#allocation20 + $0xa48] sm:$0xff] }
 0x3cf   : > { %16750 = vst [vmem:[#allocation348_spill] sm:$0xff] %v12115_v47  ;;  %16751 = vst [vmem:[#allocation349_spill] sm:$0xff] %v12117_v61  ;;  %v2080_v61 = vadd.f32 %v12021_v20, %v1983_v43  ;;  %v1912_v47 = vpop.f32.mrb[27].mxu1  ;;  %v12143_v11 = vld [vmem:[#allocation20 + $0xa60] sm:$0xff]  ;;  %v12145_v43 = vld [vmem:[#allocation20 + $0xa68] sm:$0xff] }
 0x3d0   : > { %16752 = vst [vmem:[#allocation350_spill] sm:$0xff] %v12119_v28  ;;  %16755 = vst [vmem:[#allocation353_spill] sm:$0xff] %v12127_v55  ;;  %v1985_v28 = vpop.f32.mrb[39].mxu0  ;;  %v2079_v25 = vadd.f32 %v12032_v3, %v1912_v47  ;;  %v12153_v47 = vld [vmem:[#allocation20 + $0xa88] sm:$0xff] }
 0x3d1   : > { %2134 = vst [vmem:[#allocation2 + $0xa0] sm:$0xff] %v2070_v12  ;;  %2136 = vst [vmem:[#allocation2 + $0xb0] sm:$0xff] %v2072_v59  ;;  %v2081_v55 = vadd.f32 %v12037_v40, %v1985_v28  ;;  %v12139_v12 = vld [vmem:[#allocation20 + $0xa50] sm:$0xff]  ;;  %v12141_v59 = vld [vmem:[#allocation20 + $0xa58] sm:$0xff] }
 0x3d2   : > { %16757 = vst [vmem:[#allocation355_spill] sm:$0xff] %v12135_v36  ;;  %2135 = vst [vmem:[#allocation2 + $0xa8] sm:$0xff] %v2071_v34  ;;  %v12155_v28 = vld [vmem:[#allocation20 + $0xa90] sm:$0xff]  ;;  %v12157_v34 = vld [vmem:[#allocation20 + $0xa98] sm:$0xff] }
 0x3d3   : > { %2137 = vst [vmem:[#allocation2 + $0xb8] sm:$0xff] %v2073_v48  ;;  %16758 = vst [vmem:[#allocation356_spill] sm:$0xff] %v12139_v12  ;;  %v12151_v48 = vld [vmem:[#allocation20 + $0xa80] sm:$0xff] }
 0x3d4   : > { %16759 = vst [vmem:[#allocation357_spill] sm:$0xff] %v12141_v59  ;;  %16760 = vst [vmem:[#allocation358_spill] sm:$0xff] %v12143_v11  ;;  %v12159_v59 = vld [vmem:[#allocation20 + $0xaa0] sm:$0xff]  ;;  %v12163_v11 = vld [vmem:[#allocation20 + $0xab0] sm:$0xff] }
 0x3d5   : > { %2142 = vst [vmem:[#allocation2 + $0xe0] sm:$0xff] %v2078_v49  ;;  %2144 = vst [vmem:[#allocation2 + $0xf0] sm:$0xff] %v2080_v61  ;;  %v12161_v49 = vld [vmem:[#allocation20 + $0xaa8] sm:$0xff]  ;;  %v1916_v61 = vpop.f32.mrb[28].mxu1 }
 0x3d6   : > { %16761 = vst [vmem:[#allocation359_spill] sm:$0xff] %v12145_v43  ;;  %2143 = vst [vmem:[#allocation2 + $0xe8] sm:$0xff] %v2079_v25  ;;  %v1989_v43 = vpop.f32.mrb[40].mxu0  ;;  %v12167_v25 = vld [vmem:[#allocation20 + $0xac0] sm:$0xff]  ;;  %v1918_v12 = vpop.f32.mrb[29].mxu1 }
 0x3d7   : > { %2145 = vst [vmem:[#allocation2 + $0xf8] sm:$0xff] %v2081_v55  ;;  %16764 = vst [vmem:[#allocation362_spill] sm:$0xff] %v12153_v47  ;;  %v2086_v55 = vadd.f32 %v12016_v56, %v1916_v61  ;;  %v2088_v17 = vadd.f32 %v12021_v20, %v1989_v43  ;;  %v12171_v47 = vld [vmem:[#allocation20 + $0xac8] sm:$0xff]  ;;  %v1920_v36 = vpop.f32.mrb[30].mxu1  ;;  %v12183_v61 = vld [vmem:[#allocation20 + $0xaf0] sm:$0xff] }
 0x3d8   : > { %16765 = vst [vmem:[#allocation363_spill] sm:$0xff] %v12155_v28  ;;  %16766 = vst [vmem:[#allocation364_spill] sm:$0xff] %v12157_v34  ;;  %v1991_v28 = vpop.f32.mrb[41].mxu0  ;;  %v12173_v34 = vld [vmem:[#allocation20 + $0xad0] sm:$0xff]  ;;  %v2094_v43 = vadd.f32 %v12016_v56, %v1920_v36  ;;  %v12199_v36 = vld [vmem:[#allocation20 + $0xb20] sm:$0xff] }
 0x3d9   : > { %16767 = vst [vmem:[#allocation365_spill] sm:$0xff] %v12159_v59  ;;  %16768 = vst [vmem:[#allocation366_spill] sm:$0xff] %v12161_v49  ;;  %v12175_v59 = vld [vmem:[#allocation20 + $0xad8] sm:$0xff]  ;;  %v2087_v49 = vadd.f32 %v12032_v3, %v1918_v12  ;;  %v1993_v58 = vpop.f32.mrb[42].mxu0  ;;  %v12189_v12 = vld [vmem:[#allocation20 + $0xb00] sm:$0xff] }
 0x3da   : > { %16769 = vst [vmem:[#allocation367_spill] sm:$0xff] %v12163_v11  ;;  %16771 = vst [vmem:[#allocation369_spill] sm:$0xff] %v12167_v25  ;;  %v2089_v11 = vadd.f32 %v12037_v40, %v1991_v28  ;;  %v12191_v28 = vld [vmem:[#allocation20 + $0xb08] sm:$0xff] }
 0x3db   : > { %16772 = vst [vmem:[#allocation370_spill] sm:$0xff] %v12171_v47  ;;  %16773 = vst [vmem:[#allocation371_spill] sm:$0xff] %v12173_v34  ;;  %v2096_v34 = vadd.f32 %v12021_v20, %v1993_v58  ;;  %v1922_v47 = vpop.f32.mrb[31].mxu1  ;;  %v12201_v58 = vld [vmem:[#allocation20 + $0xb28] sm:$0xff] }
 0x3dc   : > { %16774 = vst [vmem:[#allocation372_spill] sm:$0xff] %v12175_v59  ;;  %16777 = vst [vmem:[#allocation375_spill] sm:$0xff] %v12183_v61  ;;  %v1995_v59 = vpop.f32.mrb[43].mxu0  ;;  %v2095_v35 = vadd.f32 %v12032_v3, %v1922_v47  ;;  %v12209_v47 = vld [vmem:[#allocation20 + $0xb48] sm:$0xff] }
 0x3dd   : > { %2150 = vst [vmem:[#allocation2 + $0x120] sm:$0xff] %v2086_v55  ;;  %2152 = vst [vmem:[#allocation2 + $0x130] sm:$0xff] %v2088_v17  ;;  %v2097_v61 = vadd.f32 %v12037_v40, %v1995_v59  ;;  %v12195_v55 = vld [vmem:[#allocation20 + $0xb10] sm:$0xff]  ;;  %v12197_v17 = vld [vmem:[#allocation20 + $0xb18] sm:$0xff] }
 0x3de   : > { %16779 = vst [vmem:[#allocation377_spill] sm:$0xff] %v12189_v12  ;;  %16780 = vst [vmem:[#allocation378_spill] sm:$0xff] %v12191_v28  ;;  %v12211_v59 = vld [vmem:[#allocation20 + $0xb50] sm:$0xff]  ;;  %v12227_v28 = vld [vmem:[#allocation20 + $0xb88] sm:$0xff] }
 0x3df   : > { %2151 = vst [vmem:[#allocation2 + $0x128] sm:$0xff] %v2087_v49  ;;  %2153 = vst [vmem:[#allocation2 + $0x138] sm:$0xff] %v2089_v11  ;;  %v12207_v11 = vld [vmem:[#allocation20 + $0xb40] sm:$0xff]  ;;  %v12213_v49 = vld [vmem:[#allocation20 + $0xb58] sm:$0xff] }
 0x3e0   : > { %16781 = vst [vmem:[#allocation379_spill] sm:$0xff] %v12195_v55  ;;  %16782 = vst [vmem:[#allocation380_spill] sm:$0xff] %v12197_v17  ;;  %v12215_v17 = vld [vmem:[#allocation20 + $0xb60] sm:$0xff] }
 0x3e1   : > { %16783 = vst [vmem:[#allocation381_spill] sm:$0xff] %v12199_v36  ;;  %2158 = vst [vmem:[#allocation2 + $0x160] sm:$0xff] %v2094_v43  ;;  %v12217_v43 = vld [vmem:[#allocation20 + $0xb68] sm:$0xff]  ;;  %v12219_v36 = vld [vmem:[#allocation20 + $0xb70] sm:$0xff] }
 0x3e2   : > { %2160 = vst [vmem:[#allocation2 + $0x170] sm:$0xff] %v2096_v34  ;;  %16784 = vst [vmem:[#allocation382_spill] sm:$0xff] %v12201_v58  ;;  %v1926_v34 = vpop.f32.mrb[32].mxu1  ;;  %v1999_v58 = vpop.f32.mrb[44].mxu0 }
 0x3e3   : > { %2159 = vst [vmem:[#allocation2 + $0x168] sm:$0xff] %v2095_v35  ;;  %2161 = vst [vmem:[#allocation2 + $0x178] sm:$0xff] %v2097_v61  ;;  %v12223_v35 = vld [vmem:[#allocation20 + $0xb80] sm:$0xff]  ;;  %v2102_v61 = vadd.f32 %v12016_v56, %v1926_v34  ;;  %v2104_v7 = vadd.f32 %v12021_v20, %v1999_v58  ;;  %v1928_v55 = vpop.f32.mrb[33].mxu1  ;;  %v12239_v34 = vld [vmem:[#allocation20 + $0xbb0] sm:$0xff] }
 0x3e4   : > { %16787 = vst [vmem:[#allocation385_spill] sm:$0xff] %v12207_v11  ;;  %16788 = vst [vmem:[#allocation386_spill] sm:$0xff] %v12209_v47  ;;  %v1930_v47 = vpop.f32.mrb[34].mxu1 }
 0x3e5   : > { %16789 = vst [vmem:[#allocation387_spill] sm:$0xff] %v12211_v59  ;;  %16790 = vst [vmem:[#allocation388_spill] sm:$0xff] %v12213_v49  ;;  %v2001_v59 = vpop.f32.mrb[45].mxu0  ;;  %v12229_v49 = vld [vmem:[#allocation20 + $0xb90] sm:$0xff]  ;;  %v2110_v58 = vadd.f32 %v12016_v56, %v1930_v47  ;;  %v12255_v56 = vld [vmem:[#allocation20 + $0xbe0] sm:$0xff] }
 0x3e6   : > { %16791 = vst [vmem:[#allocation389_spill] sm:$0xff] %v12215_v17  ;;  %16792 = vst [vmem:[#allocation390_spill] sm:$0xff] %v12217_v43  ;;  %v12231_v17 = vld [vmem:[#allocation20 + $0xb98] sm:$0xff]  ;;  %v2103_v43 = vadd.f32 %v12032_v3, %v1928_v55  ;;  %v2003_v51 = vpop.f32.mrb[46].mxu0  ;;  %v12245_v55 = vld [vmem:[#allocation20 + $0xbc0] sm:$0xff] }
 0x3e7   : > { %16793 = vst [vmem:[#allocation391_spill] sm:$0xff] %v12219_v36  ;;  %16795 = vst [vmem:[#allocation393_spill] sm:$0xff] %v12227_v28  ;;  %v2105_v36 = vadd.f32 %v12037_v40, %v2001_v59  ;;  %v1932_v28 = vpop.f32.mrb[35].mxu1  ;;  %v12247_v59 = vld [vmem:[#allocation20 + $0xbc8] sm:$0xff]  ;;  %v12261_v47 = vld [vmem:[#allocation20 + $0xbf8] sm:$0xff] }
 0x3e8   : > { %16796 = vst [vmem:[#allocation394_spill] sm:$0xff] %v12229_v49  ;;  %16797 = vst [vmem:[#allocation395_spill] sm:$0xff] %v12231_v17  ;;  %v2112_v49 = vadd.f32 %v12021_v20, %v2003_v51  ;;  %v2005_v17 = vpop.f32.mrb[47].mxu0  ;;  %v12257_v51 = vld [vmem:[#allocation20 + $0xbe8] sm:$0xff]  ;;  %v12259_v20 = vld [vmem:[#allocation20 + $0xbf0] sm:$0xff] }
 0x3e9   : > { %16798 = vst [vmem:[#allocation396_spill] sm:$0xff] %v12235_v2  ;;  %16799 = vst [vmem:[#allocation397_spill] sm:$0xff] %v12237_v8  ;;  %v2111_v8 = vadd.f32 %v12032_v3, %v1932_v28  ;;  %v12265_v3 = vld [vmem:[#allocation20 + $0xc08] sm:$0xff]  ;;  %v12269_v28 = vld [vmem:[#allocation20 + $0xc18] sm:$0xff] }
 0x3ea   : > { %16800 = vst [vmem:[#allocation398_spill] sm:$0xff] %v12239_v34  ;;  %2166 = vst [vmem:[#allocation2 + $0x1a0] sm:$0xff] %v2102_v61  ;;  %v2113_v34 = vadd.f32 %v12037_v40, %v2005_v17  ;;  %v12251_v61 = vld [vmem:[#allocation20 + $0xbd0] sm:$0xff]  ;;  %v12271_v17 = vld [vmem:[#allocation20 + $0xc20] sm:$0xff] }
 0x3eb   : > { %2168 = vst [vmem:[#allocation2 + $0x1b0] sm:$0xff] %v2104_v7  ;;  %16801 = vst [vmem:[#allocation399_spill] sm:$0xff] %v12243_v18  ;;  %v12253_v7 = vld [vmem:[#allocation20 + $0xbd8] sm:$0xff]  ;;  %v12267_v40 = vld [vmem:[#allocation20 + $0xc10] sm:$0xff] }
 0x3ec   : > { %16802 = vst [vmem:[#allocation400_spill] sm:$0xff] %v12247_v59  ;;  %2167 = vst [vmem:[#allocation2 + $0x1a8] sm:$0xff] %v2103_v43  ;;  %v12273_v43 = vld [vmem:[#allocation20 + $0xc28] sm:$0xff]  ;;  %v12279_v18 = vld [vmem:[#allocation20 + $0xc40] sm:$0xff] }
 0x3ed   : > { %2169 = vst [vmem:[#allocation2 + $0x1b8] sm:$0xff] %v2105_v36  ;;  %16803 = vst [vmem:[#allocation401_spill] sm:$0xff] %v12251_v61  ;;  %v12263_v36 = vld [vmem:[#allocation20 + $0xc00] sm:$0xff]  ;;  %v12291_v2 = vld [vmem:[#allocation20 + $0xc70] sm:$0xff] }
 0x3ee   : > { %16804 = vst [vmem:[#allocation402_spill] sm:$0xff] %v12253_v7  ;;  %16805 = vst [vmem:[#allocation403_spill] sm:$0xff] %v12255_v56  ;;  %v12301_v56 = vld [vmem:[#allocation20 + $0xc98] sm:$0xff]  ;;  %v12305_v7 = vld [vmem:[#allocation20 + $0xca8] sm:$0xff] }
 0x3ef   : > { %2174 = vst [vmem:[#allocation2 + $0x1e0] sm:$0xff] %v2110_v58  ;;  %2176 = vst [vmem:[#allocation2 + $0x1f0] sm:$0xff] %v2112_v49  ;;  %v12275_v49 = vld [vmem:[#allocation20 + $0xc30] sm:$0xff]  ;;  %v12277_v58 = vld [vmem:[#allocation20 + $0xc38] sm:$0xff] }
 0x3f0   : > { %16806 = vst [vmem:[#allocation404_spill] sm:$0xff] %v12257_v51  ;;  %16807 = vst [vmem:[#allocation405_spill] sm:$0xff] %v12259_v20  ;;  %v12287_v20 = vld [vmem:[#allocation20 + $0xc60] sm:$0xff]  ;;  %v12289_v51 = vld [vmem:[#allocation20 + $0xc68] sm:$0xff] }
 0x3f1   : > { %16808 = vst [vmem:[#allocation406_spill] sm:$0xff] %v12261_v47  ;;  %2175 = vst [vmem:[#allocation2 + $0x1e8] sm:$0xff] %v2111_v8  ;;  %v12281_v8 = vld [vmem:[#allocation20 + $0xc48] sm:$0xff]  ;;  %v12285_v47 = vld [vmem:[#allocation20 + $0xc58] sm:$0xff] }
 0x3f2   : > { %2177 = vst [vmem:[#allocation2 + $0x1f8] sm:$0xff] %v2113_v34  ;;  %16809 = vst [vmem:[#allocation407_spill] sm:$0xff] %v12265_v3  ;;  %v12283_v34 = vld [vmem:[#allocation20 + $0xc50] sm:$0xff]  ;;  %v12333_v61 = vld [vmem:[#allocation20 + $0xd18] sm:$0xff] }
 0x3f3   : > { %16810 = vst [vmem:[#allocation408_spill] sm:$0xff] %v12267_v40  ;;  %16811 = vst [vmem:[#allocation409_spill] sm:$0xff] %v12269_v28  ;;  %v12303_v28 = vld [vmem:[#allocation20 + $0xca0] sm:$0xff]  ;;  %v12317_v40 = vld [vmem:[#allocation20 + $0xcd8] sm:$0xff] }
 0x3f4   : > { %16812 = vst [vmem:[#allocation410_spill] sm:$0xff] %v12271_v17  ;;  %16813 = vst [vmem:[#allocation411_spill] sm:$0xff] %v12273_v43  ;;  %v12293_v17 = vld [vmem:[#allocation20 + $0xc78] sm:$0xff]  ;;  %v12295_v43 = vld [vmem:[#allocation20 + $0xc80] sm:$0xff] }
 0x3f5   : > { %16814 = vst [vmem:[#allocation412_spill] sm:$0xff] %v12275_v49  ;;  %16815 = vst [vmem:[#allocation413_spill] sm:$0xff] %v12277_v58  ;;  %v12297_v49 = vld [vmem:[#allocation20 + $0xc88] sm:$0xff]  ;;  %v12299_v58 = vld [vmem:[#allocation20 + $0xc90] sm:$0xff] }
 0x3f6   : > { %16816 = vst [vmem:[#allocation414_spill] sm:$0xff] %v12279_v18  ;;  %16817 = vst [vmem:[#allocation415_spill] sm:$0xff] %v12281_v8  ;;  %v12365_v3 = vld [vmem:[#allocation20 + $0xd98] sm:$0xff] }
 0x3f7   : > { %16818 = vst [vmem:[#allocation416_spill] sm:$0xff] %v12283_v34  ;;  %16819 = vst [vmem:[#allocation417_spill] sm:$0xff] %v12285_v47  ;;  %v12307_v47 = vld [vmem:[#allocation20 + $0xcb0] sm:$0xff]  ;;  %v12319_v34 = vld [vmem:[#allocation20 + $0xce0] sm:$0xff] }
 0x3f8   : > { %16820 = vst [vmem:[#allocation418_spill] sm:$0xff] %v12287_v20  ;;  %16821 = vst [vmem:[#allocation419_spill] sm:$0xff] %v12289_v51  ;;  %v12309_v20 = vld [vmem:[#allocation20 + $0xcb8] sm:$0xff]  ;;  %v12311_v51 = vld [vmem:[#allocation20 + $0xcc0] sm:$0xff] }
 0x3f9   : > { %16822 = vst [vmem:[#allocation420_spill] sm:$0xff] %v12291_v2  ;;  %16823 = vst [vmem:[#allocation421_spill] sm:$0xff] %v12293_v17  ;;  %v12313_v2 = vld [vmem:[#allocation20 + $0xcc8] sm:$0xff]  ;;  %v12315_v17 = vld [vmem:[#allocation20 + $0xcd0] sm:$0xff] }
 0x3fa   : > { %16824 = vst [vmem:[#allocation422_spill] sm:$0xff] %v12297_v49  ;;  %16825 = vst [vmem:[#allocation423_spill] sm:$0xff] %v12299_v58  ;;  %v12321_v58 = vld [vmem:[#allocation20 + $0xce8] sm:$0xff]  ;;  %v12335_v49 = vld [vmem:[#allocation20 + $0xd20] sm:$0xff] }
 0x3fb   : > { %16826 = vst [vmem:[#allocation424_spill] sm:$0xff] %v12301_v56  ;;  %16827 = vst [vmem:[#allocation425_spill] sm:$0xff] %v12303_v28  ;;  %v12323_v56 = vld [vmem:[#allocation20 + $0xcf0] sm:$0xff]  ;;  %v12325_v28 = vld [vmem:[#allocation20 + $0xcf8] sm:$0xff] }
 0x3fc   : > { %16828 = vst [vmem:[#allocation426_spill] sm:$0xff] %v12305_v7  ;;  %16829 = vst [vmem:[#allocation427_spill] sm:$0xff] %v12307_v47  ;;  %v12327_v7 = vld [vmem:[#allocation20 + $0xd00] sm:$0xff]  ;;  %v12329_v47 = vld [vmem:[#allocation20 + $0xd08] sm:$0xff] }
 0x3fd   : > { %16830 = vst [vmem:[#allocation428_spill] sm:$0xff] %v12309_v20  ;;  %16831 = vst [vmem:[#allocation429_spill] sm:$0xff] %v12313_v2  ;;  %v12331_v20 = vld [vmem:[#allocation20 + $0xd10] sm:$0xff]  ;;  %v12349_v2 = vld [vmem:[#allocation20 + $0xd58] sm:$0xff] }
 0x3fe   : > { %16832 = vst [vmem:[#allocation430_spill] sm:$0xff] %v12315_v17  ;;  %16833 = vst [vmem:[#allocation431_spill] sm:$0xff] %v12317_v40  ;;  %v12337_v17 = vld [vmem:[#allocation20 + $0xd28] sm:$0xff]  ;;  %v12339_v40 = vld [vmem:[#allocation20 + $0xd30] sm:$0xff] }
 0x3ff   : > { %16834 = vst [vmem:[#allocation432_spill] sm:$0xff] %v12319_v34  ;;  %16835 = vst [vmem:[#allocation433_spill] sm:$0xff] %v12321_v58  ;;  %v12341_v34 = vld [vmem:[#allocation20 + $0xd38] sm:$0xff]  ;;  %v12343_v58 = vld [vmem:[#allocation20 + $0xd40] sm:$0xff] }
 0x400   : > { %16836 = vst [vmem:[#allocation434_spill] sm:$0xff] %v12323_v56  ;;  %16837 = vst [vmem:[#allocation435_spill] sm:$0xff] %v12325_v28  ;;  %v12345_v56 = vld [vmem:[#allocation20 + $0xd48] sm:$0xff]  ;;  %v12347_v28 = vld [vmem:[#allocation20 + $0xd50] sm:$0xff] }
 0x401   : > { %16838 = vst [vmem:[#allocation436_spill] sm:$0xff] %v12327_v7  ;;  %16839 = vst [vmem:[#allocation437_spill] sm:$0xff] %v12329_v47  ;;  %v12351_v47 = vld [vmem:[#allocation20 + $0xd60] sm:$0xff]  ;;  %v12381_v8 = vld [vmem:[#allocation20 + $0xdd8] sm:$0xff] }
 0x402   : > { %16840 = vst [vmem:[#allocation438_spill] sm:$0xff] %v12331_v20  ;;  %16841 = vst [vmem:[#allocation439_spill] sm:$0xff] %v12333_v61  ;;  %v12353_v20 = vld [vmem:[#allocation20 + $0xd68] sm:$0xff]  ;;  %v12355_v61 = vld [vmem:[#allocation20 + $0xd70] sm:$0xff] }
 0x403   : > { %16842 = vst [vmem:[#allocation440_spill] sm:$0xff] %v12335_v49  ;;  %16843 = vst [vmem:[#allocation441_spill] sm:$0xff] %v12337_v17  ;;  %v12357_v49 = vld [vmem:[#allocation20 + $0xd78] sm:$0xff]  ;;  %v12359_v17 = vld [vmem:[#allocation20 + $0xd80] sm:$0xff] }
 0x404   : > { %16844 = vst [vmem:[#allocation442_spill] sm:$0xff] %v12339_v40  ;;  %16845 = vst [vmem:[#allocation443_spill] sm:$0xff] %v12341_v34  ;;  %v12361_v40 = vld [vmem:[#allocation20 + $0xd88] sm:$0xff]  ;;  %v12363_v34 = vld [vmem:[#allocation20 + $0xd90] sm:$0xff] }
 0x405   : > { %16846 = vst [vmem:[#allocation444_spill] sm:$0xff] %v12345_v56  ;;  %16847 = vst [vmem:[#allocation445_spill] sm:$0xff] %v12347_v28  ;;  %v12367_v56 = vld [vmem:[#allocation20 + $0xda0] sm:$0xff]  ;;  %v12369_v28 = vld [vmem:[#allocation20 + $0xda8] sm:$0xff] }
 0x406   : > { %16848 = vst [vmem:[#allocation446_spill] sm:$0xff] %v12349_v2  ;;  %16849 = vst [vmem:[#allocation447_spill] sm:$0xff] %v12351_v47  ;;  %v12371_v2 = vld [vmem:[#allocation20 + $0xdb0] sm:$0xff]  ;;  %v12373_v47 = vld [vmem:[#allocation20 + $0xdb8] sm:$0xff] }
 0x407   : > { %16850 = vst [vmem:[#allocation448_spill] sm:$0xff] %v12353_v20  ;;  %16851 = vst [vmem:[#allocation449_spill] sm:$0xff] %v12355_v61  ;;  %v12375_v20 = vld [vmem:[#allocation20 + $0xdc0] sm:$0xff]  ;;  %v12377_v61 = vld [vmem:[#allocation20 + $0xdc8] sm:$0xff] }
 0x408   : > { %16852 = vst [vmem:[#allocation450_spill] sm:$0xff] %v12357_v49  ;;  %16853 = vst [vmem:[#allocation451_spill] sm:$0xff] %v12359_v17  ;;  %v12379_v49 = vld [vmem:[#allocation20 + $0xdd0] sm:$0xff]  ;;  %v12397_v59 = vld [vmem:[#allocation20 + $0xe18] sm:$0xff] }
 0x409   : > { %16854 = vst [vmem:[#allocation452_spill] sm:$0xff] %v12361_v40  ;;  %16855 = vst [vmem:[#allocation453_spill] sm:$0xff] %v12363_v34  ;;  %v12383_v40 = vld [vmem:[#allocation20 + $0xde0] sm:$0xff]  ;;  %v12385_v34 = vld [vmem:[#allocation20 + $0xde8] sm:$0xff] }
 0x40a   : > { %16856 = vst [vmem:[#allocation454_spill] sm:$0xff] %v12365_v3  ;;  %16857 = vst [vmem:[#allocation455_spill] sm:$0xff] %v12367_v56  ;;  %v12387_v3 = vld [vmem:[#allocation20 + $0xdf0] sm:$0xff]  ;;  %v12389_v56 = vld [vmem:[#allocation20 + $0xdf8] sm:$0xff] }
 0x40b   : > { %16858 = vst [vmem:[#allocation456_spill] sm:$0xff] %v12369_v28  ;;  %16859 = vst [vmem:[#allocation457_spill] sm:$0xff] %v12371_v2  ;;  %v12391_v28 = vld [vmem:[#allocation20 + $0xe00] sm:$0xff]  ;;  %v12393_v2 = vld [vmem:[#allocation20 + $0xe08] sm:$0xff] }
 0x40c   : > { %16860 = vst [vmem:[#allocation458_spill] sm:$0xff] %v12373_v47  ;;  %16861 = vst [vmem:[#allocation459_spill] sm:$0xff] %v12375_v20  ;;  %v12395_v47 = vld [vmem:[#allocation20 + $0xe10] sm:$0xff] }
 0x40d   : > { %16862 = vst [vmem:[#allocation460_spill] sm:$0xff] %v12377_v61  ;;  %16863 = vst [vmem:[#allocation461_spill] sm:$0xff] %v12379_v49  ;;  %v12399_v61 = vld [vmem:[#allocation20 + $0xe20] sm:$0xff]  ;;  %v12401_v49 = vld [vmem:[#allocation20 + $0xe28] sm:$0xff] }
 0x40e   : > { %16864 = vst [vmem:[#allocation462_spill] sm:$0xff] %v12381_v8  ;;  %16865 = vst [vmem:[#allocation463_spill] sm:$0xff] %v12383_v40  ;;  %v12403_v8 = vld [vmem:[#allocation20 + $0xe30] sm:$0xff]  ;;  %v12405_v40 = vld [vmem:[#allocation20 + $0xe38] sm:$0xff] }
 0x40f   : > { %16866 = vst [vmem:[#allocation464_spill] sm:$0xff] %v12385_v34  ;;  %16867 = vst [vmem:[#allocation465_spill] sm:$0xff] %v12387_v3  ;;  %v12407_v34 = vld [vmem:[#allocation20 + $0xe40] sm:$0xff]  ;;  %v12409_v3 = vld [vmem:[#allocation20 + $0xe48] sm:$0xff] }
 0x410   : > { %16868 = vst [vmem:[#allocation466_spill] sm:$0xff] %v12389_v56  ;;  %16869 = vst [vmem:[#allocation467_spill] sm:$0xff] %v12391_v28  ;;  %v12411_v56 = vld [vmem:[#allocation20 + $0xe50] sm:$0xff] }
 0x411   : > { %16870 = vst [vmem:[#allocation468_spill] sm:$0xff] %v12393_v2  ;;  %16871 = vst [vmem:[#allocation469_spill] sm:$0xff] %v12395_v47  ;;  %v12415_v2 = vld [vmem:[#allocation20 + $0xe60] sm:$0xff]  ;;  %v12417_v47 = vld [vmem:[#allocation20 + $0xe68] sm:$0xff] }
 0x412   : > { %16872 = vst [vmem:[#allocation470_spill] sm:$0xff] %v12397_v59  ;;  %16873 = vst [vmem:[#allocation471_spill] sm:$0xff] %v12399_v61  ;;  %v12419_v59 = vld [vmem:[#allocation20 + $0xe70] sm:$0xff]  ;;  %v12421_v61 = vld [vmem:[#allocation20 + $0xe78] sm:$0xff] }
 0x413   : > { %16874 = vst [vmem:[#allocation472_spill] sm:$0xff] %v12401_v49  ;;  %16875 = vst [vmem:[#allocation473_spill] sm:$0xff] %v12403_v8  ;;  %v12423_v49 = vld [vmem:[#allocation20 + $0xe80] sm:$0xff]  ;;  %v12425_v8 = vld [vmem:[#allocation20 + $0xe88] sm:$0xff] }
 0x414   : > { %16876 = vst [vmem:[#allocation474_spill] sm:$0xff] %v12405_v40  ;;  %16877 = vst [vmem:[#allocation475_spill] sm:$0xff] %v12407_v34  ;;  %v12427_v40 = vld [vmem:[#allocation20 + $0xe90] sm:$0xff]  ;;  %v2953_v34 = vld [vmem:[#allocation7] sm:$0xff]  }
 0x415   : > { %16878 = vst [vmem:[#allocation476_spill] sm:$0xff] %v12409_v3  ;;  %16879 = vst [vmem:[#allocation477_spill] sm:$0xff] %v12411_v56  ;;  %v12431_v3 = vld [vmem:[#allocation20 + $0xea0] sm:$0xff]  ;;  %v12433_v56 = vld [vmem:[#allocation20 + $0xea8] sm:$0xff] }
 0x416   : > { %16880 = vst [vmem:[#allocation478_spill] sm:$0xff] %v12413_v5  ;;  %16881 = vst [vmem:[#allocation479_spill] sm:$0xff] %v12415_v2  ;;  %v12435_v5 = vld [vmem:[#allocation20 + $0xeb0] sm:$0xff]  ;;  %v12437_v2 = vld [vmem:[#allocation20 + $0xeb8] sm:$0xff] }
 0x417   : > { %16882 = vst [vmem:[#allocation480_spill] sm:$0xff] %v12417_v47  ;;  %16883 = vst [vmem:[#allocation481_spill] sm:$0xff] %v12419_v59  ;;  %v12439_v47 = vld [vmem:[#allocation20 + $0xec0] sm:$0xff]  ;;  %v12441_v59 = vld [vmem:[#allocation20 + $0xec8] sm:$0xff] }
 0x418   : > { %16884 = vst [vmem:[#allocation482_spill] sm:$0xff] %v12421_v61  ;;  %16885 = vst [vmem:[#allocation483_spill] sm:$0xff] %v12423_v49  ;;  %v12443_v61 = vld [vmem:[#allocation20 + $0xed0] sm:$0xff]  ;;  %v12445_v49 = vld [vmem:[#allocation20 + $0xed8] sm:$0xff] }
 0x419   : > { %16886 = vst [vmem:[#allocation484_spill] sm:$0xff] %v12425_v8  ;;  %16887 = vst [vmem:[#allocation485_spill] sm:$0xff] %v12427_v40  ;;  %v12447_v8 = vld [vmem:[#allocation20 + $0xee0] sm:$0xff]  ;;  %v12449_v40 = vld [vmem:[#allocation20 + $0xee8] sm:$0xff] }
 0x41a   : > { %16888 = vst [vmem:[#allocation486_spill] sm:$0xff] %v12429_v52  ;;  %16889 = vst [vmem:[#allocation487_spill] sm:$0xff] %v12431_v3  ;;  %v12451_v52 = vld [vmem:[#allocation20 + $0xef0] sm:$0xff]  ;;  %v12453_v3 = vld [vmem:[#allocation20 + $0xef8] sm:$0xff] }
 0x41b   : > { %16890 = vst [vmem:[#allocation488_spill] sm:$0xff] %v12433_v56  ;;  %16891 = vst [vmem:[#allocation489_spill] sm:$0xff] %v12435_v5  ;;  %v12455_v56 = vld [vmem:[#allocation20 + $0xf00] sm:$0xff]  ;;  %v12457_v5 = vld [vmem:[#allocation20 + $0xf08] sm:$0xff] }
 0x41c   : > { %16892 = vst [vmem:[#allocation490_spill] sm:$0xff] %v12437_v2  ;;  %16893 = vst [vmem:[#allocation491_spill] sm:$0xff] %v12439_v47  ;;  %v12459_v2 = vld [vmem:[#allocation20 + $0xf10] sm:$0xff]  ;;  %v12461_v47 = vld [vmem:[#allocation20 + $0xf18] sm:$0xff] }
 0x41d   : > { %16894 = vst [vmem:[#allocation492_spill] sm:$0xff] %v12441_v59  ;;  %16895 = vst [vmem:[#allocation493_spill] sm:$0xff] %v12443_v61  ;;  %v12463_v59 = vld [vmem:[#allocation20 + $0xf20] sm:$0xff]  ;;  %v12465_v61 = vld [vmem:[#allocation20 + $0xf28] sm:$0xff] }
 0x41e   : > { %16896 = vst [vmem:[#allocation494_spill] sm:$0xff] %v12445_v49  ;;  %16897 = vst [vmem:[#allocation495_spill] sm:$0xff] %v12447_v8  ;;  %v12467_v49 = vld [vmem:[#allocation20 + $0xf30] sm:$0xff]  ;;  %v12469_v8 = vld [vmem:[#allocation20 + $0xf38] sm:$0xff] }
 0x41f   : > { %16898 = vst [vmem:[#allocation496_spill] sm:$0xff] %v12449_v40  ;;  %16899 = vst [vmem:[#allocation497_spill] sm:$0xff] %v12451_v52  ;;  %v12471_v40 = vld [vmem:[#allocation20 + $0xf40] sm:$0xff]  ;;  %v12473_v52 = vld [vmem:[#allocation20 + $0xf48] sm:$0xff] }
 0x420   : > { %16900 = vst [vmem:[#allocation498_spill] sm:$0xff] %v12453_v3  ;;  %16901 = vst [vmem:[#allocation499_spill] sm:$0xff] %v12455_v56  ;;  %v12475_v3 = vld [vmem:[#allocation20 + $0xf50] sm:$0xff]  ;;  %v12477_v56 = vld [vmem:[#allocation20 + $0xf58] sm:$0xff] }
 0x421   : > { %16902 = vst [vmem:[#allocation500_spill] sm:$0xff] %v12457_v5  ;;  %16903 = vst [vmem:[#allocation501_spill] sm:$0xff] %v12459_v2  ;;  %v12479_v5 = vld [vmem:[#allocation20 + $0xf60] sm:$0xff]  ;;  %v12481_v2 = vld [vmem:[#allocation20 + $0xf68] sm:$0xff] }
 0x422   : > { %16904 = vst [vmem:[#allocation502_spill] sm:$0xff] %v12461_v47  ;;  %16905 = vst [vmem:[#allocation503_spill] sm:$0xff] %v12463_v59  ;;  %v12483_v47 = vld [vmem:[#allocation20 + $0xf70] sm:$0xff]  ;;  %v12485_v59 = vld [vmem:[#allocation20 + $0xf78] sm:$0xff] }
 0x423   : > { %16906 = vst [vmem:[#allocation504_spill] sm:$0xff] %v12465_v61  ;;  %16907 = vst [vmem:[#allocation505_spill] sm:$0xff] %v12467_v49  ;;  %v12487_v61 = vld [vmem:[#allocation20 + $0xf80] sm:$0xff]  ;;  %v12489_v49 = vld [vmem:[#allocation20 + $0xf88] sm:$0xff] }
 0x424   : > { %16908 = vst [vmem:[#allocation506_spill] sm:$0xff] %v12469_v8  ;;  %16909 = vst [vmem:[#allocation507_spill] sm:$0xff] %v12471_v40  ;;  %v12491_v8 = vld [vmem:[#allocation20 + $0xf90] sm:$0xff]  ;;  %v12493_v40 = vld [vmem:[#allocation20 + $0xf98] sm:$0xff] }
 0x425   : > { %16910 = vst [vmem:[#allocation508_spill] sm:$0xff] %v12473_v52  ;;  %16911 = vst [vmem:[#allocation509_spill] sm:$0xff] %v12475_v3  ;;  %v12495_v52 = vld [vmem:[#allocation20 + $0xfa0] sm:$0xff]  ;;  %v12497_v3 = vld [vmem:[#allocation20 + $0xfa8] sm:$0xff] }
 0x426   : > { %16912 = vst [vmem:[#allocation510_spill] sm:$0xff] %v12477_v56  ;;  %16913 = vst [vmem:[#allocation511_spill] sm:$0xff] %v12479_v5  ;;  %v12499_v56 = vld [vmem:[#allocation20 + $0xfb0] sm:$0xff]  ;;  %v12501_v5 = vld [vmem:[#allocation20 + $0xfb8] sm:$0xff] }
 0x427   : > { %16914 = vst [vmem:[#allocation512_spill] sm:$0xff] %v12481_v2  ;;  %16915 = vst [vmem:[#allocation513_spill] sm:$0xff] %v12483_v47  ;;  %v12503_v2 = vld [vmem:[#allocation20 + $0xfc0] sm:$0xff]  ;;  %v12505_v47 = vld [vmem:[#allocation20 + $0xfc8] sm:$0xff] }
 0x428   : > { %16916 = vst [vmem:[#allocation514_spill] sm:$0xff] %v12485_v59  ;;  %16917 = vst [vmem:[#allocation515_spill] sm:$0xff] %v12487_v61  ;;  %v12507_v59 = vld [vmem:[#allocation20 + $0xfd0] sm:$0xff]  ;;  %v12509_v61 = vld [vmem:[#allocation20 + $0xfd8] sm:$0xff] }
 0x429   : > { %16918 = vst [vmem:[#allocation516_spill] sm:$0xff] %v12489_v49  ;;  %16919 = vst [vmem:[#allocation517_spill] sm:$0xff] %v12491_v8  ;;  %v12511_v49 = vld [vmem:[#allocation20 + $0xfe0] sm:$0xff]  ;;  %v12513_v8 = vld [vmem:[#allocation20 + $0xfe8] sm:$0xff] }
 0x42a   : > { %16920 = vst [vmem:[#allocation518_spill] sm:$0xff] %v12493_v40  ;;  %16921 = vst [vmem:[#allocation519_spill] sm:$0xff] %v12495_v52  ;;  %v12515_v40 = vld [vmem:[#allocation20 + $0xff0] sm:$0xff]  ;;  %v12517_v52 = vld [vmem:[#allocation20 + $0xff8] sm:$0xff] }
 0x42b   : > { %16922 = vst [vmem:[#allocation520_spill] sm:$0xff] %v12497_v3  ;;  %16923 = vst [vmem:[#allocation521_spill] sm:$0xff] %v12499_v56  ;;  %v12519_v3 = vld [vmem:[#allocation20 + $0x1000] sm:$0xff]  ;;  %v12521_v56 = vld [vmem:[#allocation20 + $0x1008] sm:$0xff] }
 0x42c   : > { %16924 = vst [vmem:[#allocation522_spill] sm:$0xff] %v12501_v5  ;;  %16925 = vst [vmem:[#allocation523_spill] sm:$0xff] %v12503_v2  ;;  %v12523_v5 = vld [vmem:[#allocation20 + $0x1010] sm:$0xff]  ;;  %v12525_v2 = vld [vmem:[#allocation20 + $0x1018] sm:$0xff] }
 0x42d   : > { %16926 = vst [vmem:[#allocation524_spill] sm:$0xff] %v12505_v47  ;;  %16927 = vst [vmem:[#allocation525_spill] sm:$0xff] %v12507_v59  ;;  %v12527_v47 = vld [vmem:[#allocation20 + $0x1020] sm:$0xff]  ;;  %v12529_v59 = vld [vmem:[#allocation20 + $0x1028] sm:$0xff] }
 0x42e   : > { %16928 = vst [vmem:[#allocation526_spill] sm:$0xff] %v12509_v61  ;;  %16929 = vst [vmem:[#allocation527_spill] sm:$0xff] %v12511_v49  ;;  %v12531_v61 = vld [vmem:[#allocation20 + $0x1030] sm:$0xff]  ;;  %v12533_v49 = vld [vmem:[#allocation20 + $0x1038] sm:$0xff] }
 0x42f   : > { %16930 = vst [vmem:[#allocation528_spill] sm:$0xff] %v12513_v8  ;;  %16931 = vst [vmem:[#allocation529_spill] sm:$0xff] %v12515_v40  ;;  %v12535_v8 = vld [vmem:[#allocation20 + $0x1040] sm:$0xff]  ;;  %v12537_v40 = vld [vmem:[#allocation20 + $0x1048] sm:$0xff] }
 0x430   : > { %16932 = vst [vmem:[#allocation530_spill] sm:$0xff] %v12517_v52  ;;  %16933 = vst [vmem:[#allocation531_spill] sm:$0xff] %v12519_v3  ;;  %v12539_v52 = vld [vmem:[#allocation20 + $0x1050] sm:$0xff]  ;;  %v12541_v3 = vld [vmem:[#allocation20 + $0x1058] sm:$0xff] }
 0x431   : > { %16934 = vst [vmem:[#allocation532_spill] sm:$0xff] %v12521_v56  ;;  %16935 = vst [vmem:[#allocation533_spill] sm:$0xff] %v12523_v5  ;;  %v12543_v56 = vld [vmem:[#allocation20 + $0x1060] sm:$0xff]  ;;  %v12545_v5 = vld [vmem:[#allocation20 + $0x1068] sm:$0xff] }
 0x432   : > { %16936 = vst [vmem:[#allocation534_spill] sm:$0xff] %v12525_v2  ;;  %16937 = vst [vmem:[#allocation535_spill] sm:$0xff] %v12527_v47  ;;  %v12547_v2 = vld [vmem:[#allocation20 + $0x1070] sm:$0xff]  ;;  %v12549_v47 = vld [vmem:[#allocation20 + $0x1078] sm:$0xff] }
 0x433   : > { %16938 = vst [vmem:[#allocation536_spill] sm:$0xff] %v12529_v59  ;;  %16939 = vst [vmem:[#allocation537_spill] sm:$0xff] %v12531_v61  ;;  %v12551_v59 = vld [vmem:[#allocation20 + $0x1080] sm:$0xff]  ;;  %v12553_v61 = vld [vmem:[#allocation20 + $0x1088] sm:$0xff] }
 0x434   : > { %16940 = vst [vmem:[#allocation538_spill] sm:$0xff] %v12533_v49  ;;  %16941 = vst [vmem:[#allocation539_spill] sm:$0xff] %v12535_v8  ;;  %v12555_v49 = vld [vmem:[#allocation20 + $0x1090] sm:$0xff]  ;;  %v12557_v8 = vld [vmem:[#allocation20 + $0x1098] sm:$0xff] }
 0x435   : > { %16942 = vst [vmem:[#allocation540_spill] sm:$0xff] %v12537_v40  ;;  %16943 = vst [vmem:[#allocation541_spill] sm:$0xff] %v12539_v52  ;;  %v12559_v40 = vld [vmem:[#allocation20 + $0x10a0] sm:$0xff]  ;;  %v12561_v52 = vld [vmem:[#allocation20 + $0x10a8] sm:$0xff] }
 0x436   : > { %16944 = vst [vmem:[#allocation542_spill] sm:$0xff] %v12541_v3  ;;  %16945 = vst [vmem:[#allocation543_spill] sm:$0xff] %v12543_v56  ;;  %v12563_v3 = vld [vmem:[#allocation20 + $0x10b0] sm:$0xff]  ;;  %v12565_v56 = vld [vmem:[#allocation20 + $0x10b8] sm:$0xff] }
 0x437   : > { %16946 = vst [vmem:[#allocation544_spill] sm:$0xff] %v12545_v5  ;;  %16947 = vst [vmem:[#allocation545_spill] sm:$0xff] %v12547_v2  ;;  %v12567_v5 = vld [vmem:[#allocation20 + $0x10c0] sm:$0xff]  ;;  %v12569_v2 = vld [vmem:[#allocation20 + $0x10c8] sm:$0xff] }
 0x438   : > { %16948 = vst [vmem:[#allocation546_spill] sm:$0xff] %v12549_v47  ;;  %16949 = vst [vmem:[#allocation547_spill] sm:$0xff] %v12551_v59  ;;  %v12571_v47 = vld [vmem:[#allocation20 + $0x10d0] sm:$0xff]  ;;  %v12573_v59 = vld [vmem:[#allocation20 + $0x10d8] sm:$0xff] }
 0x439   : > { %16950 = vst [vmem:[#allocation548_spill] sm:$0xff] %v12553_v61  ;;  %16951 = vst [vmem:[#allocation549_spill] sm:$0xff] %v12555_v49  ;;  %v12575_v61 = vld [vmem:[#allocation20 + $0x10e0] sm:$0xff]  ;;  %v12577_v49 = vld [vmem:[#allocation20 + $0x10e8] sm:$0xff] }
 0x43a   : > { %16952 = vst [vmem:[#allocation550_spill] sm:$0xff] %v12557_v8  ;;  %16953 = vst [vmem:[#allocation551_spill] sm:$0xff] %v12559_v40  ;;  %v12579_v8 = vld [vmem:[#allocation20 + $0x10f0] sm:$0xff]  ;;  %v12581_v40 = vld [vmem:[#allocation20 + $0x10f8] sm:$0xff] }
 0x43b   : > { %16954 = vst [vmem:[#allocation552_spill] sm:$0xff] %v12561_v52  ;;  %16955 = vst [vmem:[#allocation553_spill] sm:$0xff] %v12563_v3  ;;  %v12583_v52 = vld [vmem:[#allocation20 + $0x1100] sm:$0xff]  ;;  %v12585_v3 = vld [vmem:[#allocation20 + $0x1108] sm:$0xff] }
 0x43c   : > { %16956 = vst [vmem:[#allocation554_spill] sm:$0xff] %v12565_v56  ;;  %16957 = vst [vmem:[#allocation555_spill] sm:$0xff] %v12567_v5  ;;  %v12587_v56 = vld [vmem:[#allocation20 + $0x1110] sm:$0xff]  ;;  %v12589_v5 = vld [vmem:[#allocation20 + $0x1118] sm:$0xff] }
 0x43d   : > { %16958 = vst [vmem:[#allocation556_spill] sm:$0xff] %v12569_v2  ;;  %16959 = vst [vmem:[#allocation557_spill] sm:$0xff] %v12571_v47  ;;  %v12591_v2 = vld [vmem:[#allocation20 + $0x1120] sm:$0xff]  ;;  %v12593_v47 = vld [vmem:[#allocation20 + $0x1128] sm:$0xff] }
 0x43e   : > { %16960 = vst [vmem:[#allocation558_spill] sm:$0xff] %v12573_v59  ;;  %16961 = vst [vmem:[#allocation559_spill] sm:$0xff] %v12575_v61  ;;  %v12595_v59 = vld [vmem:[#allocation20 + $0x1130] sm:$0xff]  ;;  %v12597_v61 = vld [vmem:[#allocation20 + $0x1138] sm:$0xff] }
 0x43f   : > { %16962 = vst [vmem:[#allocation560_spill] sm:$0xff] %v12577_v49  ;;  %16963 = vst [vmem:[#allocation561_spill] sm:$0xff] %v12579_v8  ;;  %v12599_v49 = vld [vmem:[#allocation20 + $0x1140] sm:$0xff]  ;;  %v12601_v8 = vld [vmem:[#allocation20 + $0x1148] sm:$0xff] }
 0x440   : > { %16964 = vst [vmem:[#allocation562_spill] sm:$0xff] %v12581_v40  ;;  %16965 = vst [vmem:[#allocation563_spill] sm:$0xff] %v12583_v52  ;;  %v12603_v40 = vld [vmem:[#allocation20 + $0x1150] sm:$0xff]  ;;  %v12605_v52 = vld [vmem:[#allocation20 + $0x1158] sm:$0xff] }
 0x441   : > { %16966 = vst [vmem:[#allocation564_spill] sm:$0xff] %v12585_v3  ;;  %16967 = vst [vmem:[#allocation565_spill] sm:$0xff] %v12587_v56  ;;  %v12607_v3 = vld [vmem:[#allocation20 + $0x1160] sm:$0xff]  ;;  %v12609_v56 = vld [vmem:[#allocation20 + $0x1168] sm:$0xff] }
 0x442   : > { %16968 = vst [vmem:[#allocation566_spill] sm:$0xff] %v12589_v5  ;;  %16969 = vst [vmem:[#allocation567_spill] sm:$0xff] %v12591_v2  ;;  %v12611_v5 = vld [vmem:[#allocation20 + $0x1170] sm:$0xff]  ;;  %v12613_v2 = vld [vmem:[#allocation20 + $0x1178] sm:$0xff] }
 0x443   : > { %16970 = vst [vmem:[#allocation568_spill] sm:$0xff] %v12593_v47  ;;  %16971 = vst [vmem:[#allocation569_spill] sm:$0xff] %v12595_v59  ;;  %v12615_v47 = vld [vmem:[#allocation20 + $0x1180] sm:$0xff]  ;;  %v12617_v59 = vld [vmem:[#allocation20 + $0x1188] sm:$0xff] }
 0x444   : > { %16972 = vst [vmem:[#allocation570_spill] sm:$0xff] %v12597_v61  ;;  %16973 = vst [vmem:[#allocation571_spill] sm:$0xff] %v12599_v49  ;;  %v12619_v61 = vld [vmem:[#allocation20 + $0x1190] sm:$0xff]  ;;  %v12621_v49 = vld [vmem:[#allocation20 + $0x1198] sm:$0xff] }
 0x445   : > { %16974 = vst [vmem:[#allocation572_spill] sm:$0xff] %v12601_v8  ;;  %16975 = vst [vmem:[#allocation573_spill] sm:$0xff] %v12603_v40  ;;  %v12623_v8 = vld [vmem:[#allocation20 + $0x11a0] sm:$0xff]  ;;  %v12625_v40 = vld [vmem:[#allocation20 + $0x11a8] sm:$0xff] }
 0x446   : > { %16976 = vst [vmem:[#allocation574_spill] sm:$0xff] %v12605_v52  ;;  %16977 = vst [vmem:[#allocation575_spill] sm:$0xff] %v12607_v3  ;;  %v12627_v52 = vld [vmem:[#allocation20 + $0x11b0] sm:$0xff]  ;;  %v12629_v3 = vld [vmem:[#allocation20 + $0x11b8] sm:$0xff] }
 0x447   : > { %16978 = vst [vmem:[#allocation576_spill] sm:$0xff] %v12609_v56  ;;  %16979 = vst [vmem:[#allocation577_spill] sm:$0xff] %v12611_v5  ;;  %v12631_v56 = vld [vmem:[#allocation20 + $0x11c0] sm:$0xff]  ;;  %v12633_v5 = vld [vmem:[#allocation20 + $0x11c8] sm:$0xff] }
 0x448   : > { %16980 = vst [vmem:[#allocation578_spill] sm:$0xff] %v12613_v2  ;;  %16981 = vst [vmem:[#allocation579_spill] sm:$0xff] %v12615_v47  ;;  %v12635_v2 = vld [vmem:[#allocation20 + $0x11d0] sm:$0xff]  ;;  %v12637_v47 = vld [vmem:[#allocation20 + $0x11d8] sm:$0xff] }
 0x449   : > { %16982 = vst [vmem:[#allocation580_spill] sm:$0xff] %v12617_v59  ;;  %16983 = vst [vmem:[#allocation581_spill] sm:$0xff] %v12619_v61  ;;  %v12639_v59 = vld [vmem:[#allocation20 + $0x11e0] sm:$0xff]  ;;  %v12641_v61 = vld [vmem:[#allocation20 + $0x11e8] sm:$0xff] }
 0x44a   : > { %16984 = vst [vmem:[#allocation582_spill] sm:$0xff] %v12621_v49  ;;  %16985 = vst [vmem:[#allocation583_spill] sm:$0xff] %v12623_v8  ;;  %v12643_v49 = vld [vmem:[#allocation20 + $0x11f0] sm:$0xff]  ;;  %v12645_v8 = vld [vmem:[#allocation20 + $0x11f8] sm:$0xff] }
 0x44b   : > { %16986 = vst [vmem:[#allocation584_spill] sm:$0xff] %v12625_v40  ;;  %16987 = vst [vmem:[#allocation585_spill] sm:$0xff] %v12627_v52  ;;  %v12647_v40 = vld [vmem:[#allocation20 + $0x1200] sm:$0xff]  ;;  %v12649_v52 = vld [vmem:[#allocation20 + $0x1208] sm:$0xff] }
 0x44c   : > { %16988 = vst [vmem:[#allocation586_spill] sm:$0xff] %v12629_v3  ;;  %16989 = vst [vmem:[#allocation587_spill] sm:$0xff] %v12631_v56  ;;  %v12651_v3 = vld [vmem:[#allocation20 + $0x1210] sm:$0xff]  ;;  %v12653_v56 = vld [vmem:[#allocation20 + $0x1218] sm:$0xff] }
 0x44d   : > { %16990 = vst [vmem:[#allocation588_spill] sm:$0xff] %v12633_v5  ;;  %16991 = vst [vmem:[#allocation589_spill] sm:$0xff] %v12635_v2  ;;  %v12655_v5 = vld [vmem:[#allocation20 + $0x1220] sm:$0xff]  ;;  %v12657_v2 = vld [vmem:[#allocation20 + $0x1228] sm:$0xff] }
 0x44e   : > { %16992 = vst [vmem:[#allocation590_spill] sm:$0xff] %v12637_v47  ;;  %16993 = vst [vmem:[#allocation591_spill] sm:$0xff] %v12639_v59  ;;  %v12659_v47 = vld [vmem:[#allocation20 + $0x1230] sm:$0xff]  ;;  %v12661_v59 = vld [vmem:[#allocation20 + $0x1238] sm:$0xff] }
 0x44f   : > { %16994 = vst [vmem:[#allocation592_spill] sm:$0xff] %v12641_v61  ;;  %16995 = vst [vmem:[#allocation593_spill] sm:$0xff] %v12643_v49  ;;  %v12663_v61 = vld [vmem:[#allocation20 + $0x1240] sm:$0xff]  ;;  %v12665_v49 = vld [vmem:[#allocation20 + $0x1248] sm:$0xff] }
 0x450   : > { %16996 = vst [vmem:[#allocation594_spill] sm:$0xff] %v12645_v8  ;;  %16997 = vst [vmem:[#allocation595_spill] sm:$0xff] %v12647_v40  ;;  %v12667_v8 = vld [vmem:[#allocation20 + $0x1250] sm:$0xff]  ;;  %v12669_v40 = vld [vmem:[#allocation20 + $0x1258] sm:$0xff] }
 0x451   : > { %16998 = vst [vmem:[#allocation596_spill] sm:$0xff] %v12649_v52  ;;  %16999 = vst [vmem:[#allocation597_spill] sm:$0xff] %v12651_v3  ;;  %v12671_v52 = vld [vmem:[#allocation20 + $0x1260] sm:$0xff]  ;;  %v12673_v3 = vld [vmem:[#allocation20 + $0x1268] sm:$0xff] }
 0x452   : > { %17000 = vst [vmem:[#allocation598_spill] sm:$0xff] %v12653_v56  ;;  %17001 = vst [vmem:[#allocation599_spill] sm:$0xff] %v12655_v5  ;;  %v12675_v56 = vld [vmem:[#allocation20 + $0x1270] sm:$0xff]  ;;  %v12677_v5 = vld [vmem:[#allocation20 + $0x1278] sm:$0xff] }
 0x453   : > { %17002 = vst [vmem:[#allocation600_spill] sm:$0xff] %v12657_v2  ;;  %17003 = vst [vmem:[#allocation601_spill] sm:$0xff] %v12659_v47  ;;  %v12679_v2 = vld [vmem:[#allocation20 + $0x1280] sm:$0xff]  ;;  %v12681_v47 = vld [vmem:[#allocation20 + $0x1288] sm:$0xff] }
 0x454   : > { %17004 = vst [vmem:[#allocation602_spill] sm:$0xff] %v12661_v59  ;;  %17005 = vst [vmem:[#allocation603_spill] sm:$0xff] %v12663_v61  ;;  %v12683_v59 = vld [vmem:[#allocation20 + $0x1290] sm:$0xff]  ;;  %v12685_v61 = vld [vmem:[#allocation20 + $0x1298] sm:$0xff] }
 0x455   : > { %17006 = vst [vmem:[#allocation604_spill] sm:$0xff] %v12665_v49  ;;  %17007 = vst [vmem:[#allocation605_spill] sm:$0xff] %v12667_v8  ;;  %v12687_v49 = vld [vmem:[#allocation20 + $0x12a0] sm:$0xff]  ;;  %v12689_v8 = vld [vmem:[#allocation20 + $0x12a8] sm:$0xff] }
 0x456   : > { %17008 = vst [vmem:[#allocation606_spill] sm:$0xff] %v12669_v40  ;;  %17009 = vst [vmem:[#allocation607_spill] sm:$0xff] %v12671_v52  ;;  %v12691_v40 = vld [vmem:[#allocation20 + $0x12b0] sm:$0xff]  ;;  %v12693_v52 = vld [vmem:[#allocation20 + $0x12b8] sm:$0xff] }
 0x457   : > { %17010 = vst [vmem:[#allocation608_spill] sm:$0xff] %v12673_v3  ;;  %17011 = vst [vmem:[#allocation609_spill] sm:$0xff] %v12675_v56  ;;  %v12695_v3 = vld [vmem:[#allocation20 + $0x12c0] sm:$0xff]  ;;  %v12697_v56 = vld [vmem:[#allocation20 + $0x12c8] sm:$0xff] }
 0x458   : > { %17012 = vst [vmem:[#allocation610_spill] sm:$0xff] %v12677_v5  ;;  %17013 = vst [vmem:[#allocation611_spill] sm:$0xff] %v12679_v2  ;;  %v12699_v5 = vld [vmem:[#allocation20 + $0x12d0] sm:$0xff]  ;;  %v12701_v2 = vld [vmem:[#allocation20 + $0x12d8] sm:$0xff] }
 0x459   : > { %17014 = vst [vmem:[#allocation612_spill] sm:$0xff] %v12681_v47  ;;  %17015 = vst [vmem:[#allocation613_spill] sm:$0xff] %v12683_v59  ;;  %v12703_v47 = vld [vmem:[#allocation20 + $0x12e0] sm:$0xff]  ;;  %v12705_v59 = vld [vmem:[#allocation20 + $0x12e8] sm:$0xff] }
 0x45a   : > { %17016 = vst [vmem:[#allocation614_spill] sm:$0xff] %v12685_v61  ;;  %17017 = vst [vmem:[#allocation615_spill] sm:$0xff] %v12687_v49  ;;  %v12707_v61 = vld [vmem:[#allocation20 + $0x12f0] sm:$0xff]  ;;  %v12709_v49 = vld [vmem:[#allocation20 + $0x12f8] sm:$0xff] }
 0x45b   : > { %17018 = vst [vmem:[#allocation616_spill] sm:$0xff] %v12689_v8  ;;  %17019 = vst [vmem:[#allocation617_spill] sm:$0xff] %v12691_v40  ;;  %v12711_v8 = vld [vmem:[#allocation20 + $0x1300] sm:$0xff]  ;;  %v12713_v40 = vld [vmem:[#allocation20 + $0x1308] sm:$0xff] }
 0x45c   : > { %17020 = vst [vmem:[#allocation618_spill] sm:$0xff] %v12693_v52  ;;  %17021 = vst [vmem:[#allocation619_spill] sm:$0xff] %v12695_v3  ;;  %v12715_v52 = vld [vmem:[#allocation20 + $0x1310] sm:$0xff]  ;;  %v12717_v3 = vld [vmem:[#allocation20 + $0x1318] sm:$0xff] }
 0x45d   : > { %17022 = vst [vmem:[#allocation620_spill] sm:$0xff] %v12697_v56  ;;  %17023 = vst [vmem:[#allocation621_spill] sm:$0xff] %v12699_v5  ;;  %v12719_v56 = vld [vmem:[#allocation20 + $0x1320] sm:$0xff]  ;;  %v12721_v5 = vld [vmem:[#allocation20 + $0x1328] sm:$0xff] }
 0x45e   : > { %17024 = vst [vmem:[#allocation622_spill] sm:$0xff] %v12701_v2  ;;  %17025 = vst [vmem:[#allocation623_spill] sm:$0xff] %v12703_v47  ;;  %v12723_v2 = vld [vmem:[#allocation20 + $0x1330] sm:$0xff]  ;;  %v12725_v47 = vld [vmem:[#allocation20 + $0x1338] sm:$0xff] }
 0x45f   : > { %17026 = vst [vmem:[#allocation624_spill] sm:$0xff] %v12705_v59  ;;  %17027 = vst [vmem:[#allocation625_spill] sm:$0xff] %v12707_v61  ;;  %v12727_v59 = vld [vmem:[#allocation20 + $0x1340] sm:$0xff]  ;;  %v12729_v61 = vld [vmem:[#allocation20 + $0x1348] sm:$0xff] }
 0x460   : > { %17028 = vst [vmem:[#allocation626_spill] sm:$0xff] %v12709_v49  ;;  %17029 = vst [vmem:[#allocation627_spill] sm:$0xff] %v12711_v8  ;;  %v12731_v49 = vld [vmem:[#allocation20 + $0x1350] sm:$0xff]  ;;  %v12733_v8 = vld [vmem:[#allocation20 + $0x1358] sm:$0xff] }
 0x461   : > { %17030 = vst [vmem:[#allocation628_spill] sm:$0xff] %v12713_v40  ;;  %17031 = vst [vmem:[#allocation629_spill] sm:$0xff] %v12715_v52  ;;  %v12735_v40 = vld [vmem:[#allocation20 + $0x1360] sm:$0xff]  ;;  %v12737_v52 = vld [vmem:[#allocation20 + $0x1368] sm:$0xff] }
 0x462   : > { %17032 = vst [vmem:[#allocation630_spill] sm:$0xff] %v12717_v3  ;;  %17033 = vst [vmem:[#allocation631_spill] sm:$0xff] %v12719_v56  ;;  %v12739_v3 = vld [vmem:[#allocation20 + $0x1370] sm:$0xff]  ;;  %v12741_v56 = vld [vmem:[#allocation20 + $0x1378] sm:$0xff] }
 0x463   : > { %17034 = vst [vmem:[#allocation632_spill] sm:$0xff] %v12721_v5  ;;  %17035 = vst [vmem:[#allocation633_spill] sm:$0xff] %v12723_v2  ;;  %v12743_v5 = vld [vmem:[#allocation20 + $0x1380] sm:$0xff]  ;;  %v12745_v2 = vld [vmem:[#allocation20 + $0x1388] sm:$0xff] }
 0x464   : > { %17036 = vst [vmem:[#allocation634_spill] sm:$0xff] %v12725_v47  ;;  %17037 = vst [vmem:[#allocation635_spill] sm:$0xff] %v12727_v59  ;;  %v12747_v47 = vld [vmem:[#allocation20 + $0x1390] sm:$0xff]  ;;  %v12749_v59 = vld [vmem:[#allocation20 + $0x1398] sm:$0xff] }
 0x465   : > { %17038 = vst [vmem:[#allocation636_spill] sm:$0xff] %v12729_v61  ;;  %17039 = vst [vmem:[#allocation637_spill] sm:$0xff] %v12731_v49  ;;  %v12751_v61 = vld [vmem:[#allocation20 + $0x13a0] sm:$0xff]  ;;  %v12753_v49 = vld [vmem:[#allocation20 + $0x13a8] sm:$0xff] }
 0x466   : > { %17040 = vst [vmem:[#allocation638_spill] sm:$0xff] %v12733_v8  ;;  %17041 = vst [vmem:[#allocation639_spill] sm:$0xff] %v12735_v40  ;;  %v12755_v8 = vld [vmem:[#allocation20 + $0x13b0] sm:$0xff]  ;;  %v12757_v40 = vld [vmem:[#allocation20 + $0x13b8] sm:$0xff] }
 0x467   : > { %17042 = vst [vmem:[#allocation640_spill] sm:$0xff] %v12737_v52  ;;  %17043 = vst [vmem:[#allocation641_spill] sm:$0xff] %v12739_v3  ;;  %v12759_v52 = vld [vmem:[#allocation20 + $0x13c0] sm:$0xff]  ;;  %v12761_v3 = vld [vmem:[#allocation20 + $0x13c8] sm:$0xff] }
 0x468   : > { %17044 = vst [vmem:[#allocation642_spill] sm:$0xff] %v12741_v56  ;;  %17045 = vst [vmem:[#allocation643_spill] sm:$0xff] %v12743_v5  ;;  %v12763_v56 = vld [vmem:[#allocation20 + $0x13d0] sm:$0xff]  ;;  %v12765_v5 = vld [vmem:[#allocation20 + $0x13d8] sm:$0xff] }
 0x469   : > { %17046 = vst [vmem:[#allocation644_spill] sm:$0xff] %v12745_v2  ;;  %17047 = vst [vmem:[#allocation645_spill] sm:$0xff] %v12747_v47  ;;  %v12767_v2 = vld [vmem:[#allocation20 + $0x13e0] sm:$0xff]  ;;  %v12769_v47 = vld [vmem:[#allocation20 + $0x13e8] sm:$0xff] }
 0x46a   : > { %17048 = vst [vmem:[#allocation646_spill] sm:$0xff] %v12749_v59  ;;  %17049 = vst [vmem:[#allocation647_spill] sm:$0xff] %v12751_v61  ;;  %v12771_v59 = vld [vmem:[#allocation20 + $0x13f0] sm:$0xff]  ;;  %v12773_v61 = vld [vmem:[#allocation20 + $0x13f8] sm:$0xff] }
 0x46b   : > { %17050 = vst [vmem:[#allocation648_spill] sm:$0xff] %v12753_v49  ;;  %17051 = vst [vmem:[#allocation649_spill] sm:$0xff] %v12755_v8  ;;  %v12775_v49 = vld [vmem:[#allocation20 + $0x1400] sm:$0xff]  ;;  %v12777_v8 = vld [vmem:[#allocation20 + $0x1408] sm:$0xff] }
 0x46c   : > { %17052 = vst [vmem:[#allocation650_spill] sm:$0xff] %v12757_v40  ;;  %17053 = vst [vmem:[#allocation651_spill] sm:$0xff] %v12759_v52  ;;  %v12779_v40 = vld [vmem:[#allocation20 + $0x1410] sm:$0xff]  ;;  %v12781_v52 = vld [vmem:[#allocation20 + $0x1418] sm:$0xff] }
 0x46d   : > { %17054 = vst [vmem:[#allocation652_spill] sm:$0xff] %v12761_v3  ;;  %17055 = vst [vmem:[#allocation653_spill] sm:$0xff] %v12763_v56  ;;  %v12783_v3 = vld [vmem:[#allocation20 + $0x1420] sm:$0xff]  ;;  %v12785_v56 = vld [vmem:[#allocation20 + $0x1428] sm:$0xff] }
 0x46e   : > { %17056 = vst [vmem:[#allocation654_spill] sm:$0xff] %v12765_v5  ;;  %17057 = vst [vmem:[#allocation655_spill] sm:$0xff] %v12767_v2  ;;  %v12787_v5 = vld [vmem:[#allocation20 + $0x1430] sm:$0xff]  ;;  %v12789_v2 = vld [vmem:[#allocation20 + $0x1438] sm:$0xff] }
 0x46f   : > { %17058 = vst [vmem:[#allocation656_spill] sm:$0xff] %v12769_v47  ;;  %17059 = vst [vmem:[#allocation657_spill] sm:$0xff] %v12771_v59  ;;  %v12791_v47 = vld [vmem:[#allocation20 + $0x1440] sm:$0xff]  ;;  %v12793_v59 = vld [vmem:[#allocation20 + $0x1448] sm:$0xff] }
 0x470   : > { %17060 = vst [vmem:[#allocation658_spill] sm:$0xff] %v12773_v61  ;;  %17061 = vst [vmem:[#allocation659_spill] sm:$0xff] %v12775_v49  ;;  %v12795_v61 = vld [vmem:[#allocation20 + $0x1450] sm:$0xff]  ;;  %v12797_v49 = vld [vmem:[#allocation20 + $0x1458] sm:$0xff] }
 0x471   : > { %17062 = vst [vmem:[#allocation660_spill] sm:$0xff] %v12777_v8  ;;  %17063 = vst [vmem:[#allocation661_spill] sm:$0xff] %v12779_v40  ;;  %v12799_v8 = vld [vmem:[#allocation20 + $0x1460] sm:$0xff]  ;;  %v12801_v40 = vld [vmem:[#allocation20 + $0x1468] sm:$0xff] }
 0x472   : > { %17064 = vst [vmem:[#allocation662_spill] sm:$0xff] %v12781_v52  ;;  %17065 = vst [vmem:[#allocation663_spill] sm:$0xff] %v12783_v3  ;;  %v12803_v52 = vld [vmem:[#allocation20 + $0x1470] sm:$0xff]  ;;  %v12805_v3 = vld [vmem:[#allocation20 + $0x1478] sm:$0xff] }
 0x473   : > { %17066 = vst [vmem:[#allocation664_spill] sm:$0xff] %v12785_v56  ;;  %17067 = vst [vmem:[#allocation665_spill] sm:$0xff] %v12787_v5  ;;  %v12807_v56 = vld [vmem:[#allocation20 + $0x1480] sm:$0xff]  ;;  %v12809_v5 = vld [vmem:[#allocation20 + $0x1488] sm:$0xff] }
 0x474   : > { %17068 = vst [vmem:[#allocation666_spill] sm:$0xff] %v12789_v2  ;;  %17069 = vst [vmem:[#allocation667_spill] sm:$0xff] %v12791_v47  ;;  %v12811_v2 = vld [vmem:[#allocation20 + $0x1490] sm:$0xff]  ;;  %v12813_v47 = vld [vmem:[#allocation20 + $0x1498] sm:$0xff] }
 0x475   : > { %17070 = vst [vmem:[#allocation668_spill] sm:$0xff] %v12793_v59  ;;  %17071 = vst [vmem:[#allocation669_spill] sm:$0xff] %v12795_v61  ;;  %v12815_v59 = vld [vmem:[#allocation20 + $0x14a0] sm:$0xff]  ;;  %v12817_v61 = vld [vmem:[#allocation20 + $0x14a8] sm:$0xff] }
 0x476   : > { %17072 = vst [vmem:[#allocation670_spill] sm:$0xff] %v12797_v49  ;;  %17073 = vst [vmem:[#allocation671_spill] sm:$0xff] %v12799_v8  ;;  %v12819_v49 = vld [vmem:[#allocation20 + $0x14b0] sm:$0xff]  ;;  %v12821_v8 = vld [vmem:[#allocation20 + $0x14b8] sm:$0xff] }
 0x477   : > { %17074 = vst [vmem:[#allocation672_spill] sm:$0xff] %v12801_v40  ;;  %17075 = vst [vmem:[#allocation673_spill] sm:$0xff] %v12803_v52  ;;  %v12823_v40 = vld [vmem:[#allocation20 + $0x14c0] sm:$0xff]  ;;  %v12825_v52 = vld [vmem:[#allocation20 + $0x14c8] sm:$0xff] }
 0x478   : > { %17076 = vst [vmem:[#allocation674_spill] sm:$0xff] %v12805_v3  ;;  %17077 = vst [vmem:[#allocation675_spill] sm:$0xff] %v12807_v56  ;;  %v12827_v3 = vld [vmem:[#allocation20 + $0x14d0] sm:$0xff]  ;;  %v12829_v56 = vld [vmem:[#allocation20 + $0x14d8] sm:$0xff] }
 0x479   : > { %17078 = vst [vmem:[#allocation676_spill] sm:$0xff] %v12809_v5  ;;  %17079 = vst [vmem:[#allocation677_spill] sm:$0xff] %v12811_v2  ;;  %v12831_v5 = vld [vmem:[#allocation20 + $0x14e0] sm:$0xff]  ;;  %v12833_v2 = vld [vmem:[#allocation20 + $0x14e8] sm:$0xff] }
 0x47a   : > { %17080 = vst [vmem:[#allocation678_spill] sm:$0xff] %v12813_v47  ;;  %17081 = vst [vmem:[#allocation679_spill] sm:$0xff] %v12815_v59  ;;  %v12835_v47 = vld [vmem:[#allocation20 + $0x14f0] sm:$0xff]  ;;  %v12837_v59 = vld [vmem:[#allocation20 + $0x14f8] sm:$0xff] }
 0x47b   : > { %17082 = vst [vmem:[#allocation680_spill] sm:$0xff] %v12817_v61  ;;  %17083 = vst [vmem:[#allocation681_spill] sm:$0xff] %v12819_v49  ;;  %v12839_v61 = vld [vmem:[#allocation20 + $0x1500] sm:$0xff]  ;;  %v12841_v49 = vld [vmem:[#allocation20 + $0x1508] sm:$0xff] }
 0x47c   : > { %17084 = vst [vmem:[#allocation682_spill] sm:$0xff] %v12821_v8  ;;  %17085 = vst [vmem:[#allocation683_spill] sm:$0xff] %v12823_v40  ;;  %v12843_v8 = vld [vmem:[#allocation20 + $0x1510] sm:$0xff]  ;;  %v12845_v40 = vld [vmem:[#allocation20 + $0x1518] sm:$0xff] }
 0x47d   : > { %17086 = vst [vmem:[#allocation684_spill] sm:$0xff] %v12825_v52  ;;  %17087 = vst [vmem:[#allocation685_spill] sm:$0xff] %v12827_v3  ;;  %v12847_v52 = vld [vmem:[#allocation20 + $0x1520] sm:$0xff]  ;;  %v12849_v3 = vld [vmem:[#allocation20 + $0x1528] sm:$0xff] }
 0x47e   : > { %17088 = vst [vmem:[#allocation686_spill] sm:$0xff] %v12829_v56  ;;  %17089 = vst [vmem:[#allocation687_spill] sm:$0xff] %v12831_v5  ;;  %v12851_v56 = vld [vmem:[#allocation20 + $0x1530] sm:$0xff]  ;;  %v12853_v5 = vld [vmem:[#allocation20 + $0x1538] sm:$0xff] }
 0x47f   : > { %17090 = vst [vmem:[#allocation688_spill] sm:$0xff] %v12833_v2  ;;  %17091 = vst [vmem:[#allocation689_spill] sm:$0xff] %v12835_v47  ;;  %v12855_v2 = vld [vmem:[#allocation20 + $0x1540] sm:$0xff]  ;;  %v12857_v47 = vld [vmem:[#allocation20 + $0x1548] sm:$0xff] }
 0x480   : > { %17092 = vst [vmem:[#allocation690_spill] sm:$0xff] %v12837_v59  ;;  %17093 = vst [vmem:[#allocation691_spill] sm:$0xff] %v12839_v61  ;;  %v12859_v59 = vld [vmem:[#allocation20 + $0x1550] sm:$0xff]  ;;  %v12861_v61 = vld [vmem:[#allocation20 + $0x1558] sm:$0xff] }
 0x481   : > { %17094 = vst [vmem:[#allocation692_spill] sm:$0xff] %v12841_v49  ;;  %17095 = vst [vmem:[#allocation693_spill] sm:$0xff] %v12843_v8  ;;  %v12863_v49 = vld [vmem:[#allocation20 + $0x1560] sm:$0xff]  ;;  %v12865_v8 = vld [vmem:[#allocation20 + $0x1568] sm:$0xff] }
 0x482   : > { %17096 = vst [vmem:[#allocation694_spill] sm:$0xff] %v12845_v40  ;;  %17097 = vst [vmem:[#allocation695_spill] sm:$0xff] %v12847_v52  ;;  %v12867_v40 = vld [vmem:[#allocation20 + $0x1570] sm:$0xff]  ;;  %v12869_v52 = vld [vmem:[#allocation20 + $0x1578] sm:$0xff] }
 0x483   : > { %17098 = vst [vmem:[#allocation696_spill] sm:$0xff] %v12849_v3  ;;  %17099 = vst [vmem:[#allocation697_spill] sm:$0xff] %v12851_v56  ;;  %v12871_v3 = vld [vmem:[#allocation20 + $0x1580] sm:$0xff]  ;;  %v12873_v56 = vld [vmem:[#allocation20 + $0x1588] sm:$0xff] }
 0x484   : > { %17100 = vst [vmem:[#allocation698_spill] sm:$0xff] %v12853_v5  ;;  %17101 = vst [vmem:[#allocation699_spill] sm:$0xff] %v12855_v2  ;;  %v12875_v5 = vld [vmem:[#allocation20 + $0x1590] sm:$0xff]  ;;  %v12877_v2 = vld [vmem:[#allocation20 + $0x1598] sm:$0xff] }
 0x485   : > { %17102 = vst [vmem:[#allocation700_spill] sm:$0xff] %v12857_v47  ;;  %17103 = vst [vmem:[#allocation701_spill] sm:$0xff] %v12859_v59  ;;  %v12879_v47 = vld [vmem:[#allocation20 + $0x15a0] sm:$0xff]  ;;  %v12881_v59 = vld [vmem:[#allocation20 + $0x15a8] sm:$0xff] }
 0x486   : > { %17104 = vst [vmem:[#allocation702_spill] sm:$0xff] %v12861_v61  ;;  %17105 = vst [vmem:[#allocation703_spill] sm:$0xff] %v12863_v49  ;;  %v12883_v61 = vld [vmem:[#allocation20 + $0x15b0] sm:$0xff]  ;;  %v12885_v49 = vld [vmem:[#allocation20 + $0x15b8] sm:$0xff] }
 0x487   : > { %17106 = vst [vmem:[#allocation704_spill] sm:$0xff] %v12865_v8  ;;  %17107 = vst [vmem:[#allocation705_spill] sm:$0xff] %v12867_v40  ;;  %v12887_v8 = vld [vmem:[#allocation20 + $0x15c0] sm:$0xff]  ;;  %v12889_v40 = vld [vmem:[#allocation20 + $0x15c8] sm:$0xff] }
 0x488   : > { %17108 = vst [vmem:[#allocation706_spill] sm:$0xff] %v12869_v52  ;;  %17109 = vst [vmem:[#allocation707_spill] sm:$0xff] %v12871_v3  ;;  %v12891_v52 = vld [vmem:[#allocation20 + $0x15d0] sm:$0xff]  ;;  %v12893_v3 = vld [vmem:[#allocation20 + $0x15d8] sm:$0xff] }
 0x489   : > { %17110 = vst [vmem:[#allocation708_spill] sm:$0xff] %v12873_v56  ;;  %17111 = vst [vmem:[#allocation709_spill] sm:$0xff] %v12875_v5  ;;  %v12895_v56 = vld [vmem:[#allocation20 + $0x15e0] sm:$0xff]  ;;  %v12897_v5 = vld [vmem:[#allocation20 + $0x15e8] sm:$0xff] }
 0x48a   : > { %17112 = vst [vmem:[#allocation710_spill] sm:$0xff] %v12877_v2  ;;  %17113 = vst [vmem:[#allocation711_spill] sm:$0xff] %v12879_v47  ;;  %v12899_v2 = vld [vmem:[#allocation20 + $0x15f0] sm:$0xff]  ;;  %v12901_v47 = vld [vmem:[#allocation20 + $0x15f8] sm:$0xff] }
 0x48b   : > { %17114 = vst [vmem:[#allocation712_spill] sm:$0xff] %v12881_v59  ;;  %17115 = vst [vmem:[#allocation713_spill] sm:$0xff] %v12883_v61  ;;  %v12903_v59 = vld [vmem:[#allocation20 + $0x1600] sm:$0xff]  ;;  %v12905_v61 = vld [vmem:[#allocation20 + $0x1608] sm:$0xff] }
 0x48c   : > { %17116 = vst [vmem:[#allocation714_spill] sm:$0xff] %v12885_v49  ;;  %17117 = vst [vmem:[#allocation715_spill] sm:$0xff] %v12887_v8  ;;  %v12907_v49 = vld [vmem:[#allocation20 + $0x1610] sm:$0xff]  ;;  %v12909_v8 = vld [vmem:[#allocation20 + $0x1618] sm:$0xff] }
 0x48d   : > { %17118 = vst [vmem:[#allocation716_spill] sm:$0xff] %v12889_v40  ;;  %17119 = vst [vmem:[#allocation717_spill] sm:$0xff] %v12891_v52  ;;  %v12911_v40 = vld [vmem:[#allocation20 + $0x1620] sm:$0xff]  ;;  %v12913_v52 = vld [vmem:[#allocation20 + $0x1628] sm:$0xff] }
 0x48e   : > { %17120 = vst [vmem:[#allocation718_spill] sm:$0xff] %v12893_v3  ;;  %17121 = vst [vmem:[#allocation719_spill] sm:$0xff] %v12895_v56  ;;  %v12915_v3 = vld [vmem:[#allocation20 + $0x1630] sm:$0xff]  ;;  %v12917_v56 = vld [vmem:[#allocation20 + $0x1638] sm:$0xff] }
 0x48f   : > { %17122 = vst [vmem:[#allocation720_spill] sm:$0xff] %v12897_v5  ;;  %17123 = vst [vmem:[#allocation721_spill] sm:$0xff] %v12899_v2  ;;  %v12919_v5 = vld [vmem:[#allocation20 + $0x1640] sm:$0xff]  ;;  %v12921_v2 = vld [vmem:[#allocation20 + $0x1648] sm:$0xff] }
 0x490   : > { %17124 = vst [vmem:[#allocation722_spill] sm:$0xff] %v12901_v47  ;;  %17125 = vst [vmem:[#allocation723_spill] sm:$0xff] %v12903_v59  ;;  %v12923_v47 = vld [vmem:[#allocation20 + $0x1650] sm:$0xff]  ;;  %v12925_v59 = vld [vmem:[#allocation20 + $0x1658] sm:$0xff] }
 0x491   : > { %17126 = vst [vmem:[#allocation724_spill] sm:$0xff] %v12905_v61  ;;  %17127 = vst [vmem:[#allocation725_spill] sm:$0xff] %v12907_v49  ;;  %v12927_v61 = vld [vmem:[#allocation20 + $0x1660] sm:$0xff]  ;;  %v12929_v49 = vld [vmem:[#allocation20 + $0x1668] sm:$0xff] }
 0x492   : > { %17128 = vst [vmem:[#allocation726_spill] sm:$0xff] %v12909_v8  ;;  %17129 = vst [vmem:[#allocation727_spill] sm:$0xff] %v12911_v40  ;;  %v12931_v8 = vld [vmem:[#allocation20 + $0x1670] sm:$0xff]  ;;  %v12933_v40 = vld [vmem:[#allocation20 + $0x1678] sm:$0xff] }
 0x493   : > { %17130 = vst [vmem:[#allocation728_spill] sm:$0xff] %v12913_v52  ;;  %17131 = vst [vmem:[#allocation729_spill] sm:$0xff] %v12915_v3  ;;  %v12935_v52 = vld [vmem:[#allocation20 + $0x1680] sm:$0xff]  ;;  %v12937_v3 = vld [vmem:[#allocation20 + $0x1688] sm:$0xff] }
 0x494   : > { %17132 = vst [vmem:[#allocation730_spill] sm:$0xff] %v12917_v56  ;;  %17133 = vst [vmem:[#allocation731_spill] sm:$0xff] %v12919_v5  ;;  %v12939_v56 = vld [vmem:[#allocation20 + $0x1690] sm:$0xff]  ;;  %v12941_v5 = vld [vmem:[#allocation20 + $0x1698] sm:$0xff] }
 0x495   : > { %17134 = vst [vmem:[#allocation732_spill] sm:$0xff] %v12921_v2  ;;  %17135 = vst [vmem:[#allocation733_spill] sm:$0xff] %v12923_v47  ;;  %v12943_v2 = vld [vmem:[#allocation20 + $0x16a0] sm:$0xff]  ;;  %v12945_v47 = vld [vmem:[#allocation20 + $0x16a8] sm:$0xff] }
 0x496   : > { %17136 = vst [vmem:[#allocation734_spill] sm:$0xff] %v12925_v59  ;;  %17137 = vst [vmem:[#allocation735_spill] sm:$0xff] %v12927_v61  ;;  %v12947_v59 = vld [vmem:[#allocation20 + $0x16b0] sm:$0xff]  ;;  %v12949_v61 = vld [vmem:[#allocation20 + $0x16b8] sm:$0xff] }
 0x497   : > { %17138 = vst [vmem:[#allocation736_spill] sm:$0xff] %v12929_v49  ;;  %17139 = vst [vmem:[#allocation737_spill] sm:$0xff] %v12931_v8  ;;  %v12951_v49 = vld [vmem:[#allocation20 + $0x16c0] sm:$0xff]  ;;  %v12953_v8 = vld [vmem:[#allocation20 + $0x16c8] sm:$0xff] }
 0x498   : > { %17140 = vst [vmem:[#allocation738_spill] sm:$0xff] %v12933_v40  ;;  %17141 = vst [vmem:[#allocation739_spill] sm:$0xff] %v12935_v52  ;;  %v12955_v40 = vld [vmem:[#allocation20 + $0x16d0] sm:$0xff]  ;;  %v12957_v52 = vld [vmem:[#allocation20 + $0x16d8] sm:$0xff] }
 0x499   : > { %17142 = vst [vmem:[#allocation740_spill] sm:$0xff] %v12937_v3  ;;  %17143 = vst [vmem:[#allocation741_spill] sm:$0xff] %v12939_v56  ;;  %v12959_v3 = vld [vmem:[#allocation20 + $0x16e0] sm:$0xff]  ;;  %v12961_v56 = vld [vmem:[#allocation20 + $0x16e8] sm:$0xff] }
 0x49a   : > { %17144 = vst [vmem:[#allocation742_spill] sm:$0xff] %v12941_v5  ;;  %17145 = vst [vmem:[#allocation743_spill] sm:$0xff] %v12943_v2  ;;  %v12963_v5 = vld [vmem:[#allocation20 + $0x16f0] sm:$0xff]  ;;  %v12965_v2 = vld [vmem:[#allocation20 + $0x16f8] sm:$0xff] }
 0x49b   : > { %17146 = vst [vmem:[#allocation744_spill] sm:$0xff] %v12945_v47  ;;  %17147 = vst [vmem:[#allocation745_spill] sm:$0xff] %v12947_v59  ;;  %v12967_v47 = vld [vmem:[#allocation20 + $0x1700] sm:$0xff]  ;;  %v12969_v59 = vld [vmem:[#allocation20 + $0x1708] sm:$0xff] }
 0x49c   : > { %17148 = vst [vmem:[#allocation746_spill] sm:$0xff] %v12949_v61  ;;  %17149 = vst [vmem:[#allocation747_spill] sm:$0xff] %v12951_v49  ;;  %v12971_v61 = vld [vmem:[#allocation20 + $0x1710] sm:$0xff]  ;;  %v12973_v49 = vld [vmem:[#allocation20 + $0x1718] sm:$0xff] }
 0x49d   : > { %17150 = vst [vmem:[#allocation748_spill] sm:$0xff] %v12953_v8  ;;  %17151 = vst [vmem:[#allocation749_spill] sm:$0xff] %v12955_v40  ;;  %v12975_v8 = vld [vmem:[#allocation20 + $0x1720] sm:$0xff]  ;;  %v12977_v40 = vld [vmem:[#allocation20 + $0x1728] sm:$0xff] }
 0x49e   : > { %17152 = vst [vmem:[#allocation750_spill] sm:$0xff] %v12957_v52  ;;  %17153 = vst [vmem:[#allocation751_spill] sm:$0xff] %v12959_v3  ;;  %v12979_v52 = vld [vmem:[#allocation20 + $0x1730] sm:$0xff]  ;;  %v12981_v3 = vld [vmem:[#allocation20 + $0x1738] sm:$0xff] }
 0x49f   : > { %17154 = vst [vmem:[#allocation752_spill] sm:$0xff] %v12961_v56  ;;  %17155 = vst [vmem:[#allocation753_spill] sm:$0xff] %v12963_v5  ;;  %v12983_v56 = vld [vmem:[#allocation20 + $0x1740] sm:$0xff]  ;;  %v12985_v5 = vld [vmem:[#allocation20 + $0x1748] sm:$0xff] }
 0x4a0   : > { %17156 = vst [vmem:[#allocation754_spill] sm:$0xff] %v12965_v2  ;;  %17157 = vst [vmem:[#allocation755_spill] sm:$0xff] %v12967_v47  ;;  %v12987_v2 = vld [vmem:[#allocation20 + $0x1750] sm:$0xff]  ;;  %v12989_v47 = vld [vmem:[#allocation20 + $0x1758] sm:$0xff] }
 0x4a1   : > { %17158 = vst [vmem:[#allocation756_spill] sm:$0xff] %v12969_v59  ;;  %17159 = vst [vmem:[#allocation757_spill] sm:$0xff] %v12971_v61  ;;  %v12991_v59 = vld [vmem:[#allocation20 + $0x1760] sm:$0xff]  ;;  %v12993_v61 = vld [vmem:[#allocation20 + $0x1768] sm:$0xff] }
 0x4a2   : > { %17160 = vst [vmem:[#allocation758_spill] sm:$0xff] %v12973_v49  ;;  %17161 = vst [vmem:[#allocation759_spill] sm:$0xff] %v12975_v8  ;;  %v12995_v49 = vld [vmem:[#allocation20 + $0x1770] sm:$0xff]  ;;  %v12997_v8 = vld [vmem:[#allocation20 + $0x1778] sm:$0xff] }
 0x4a3   : > { %17162 = vst [vmem:[#allocation760_spill] sm:$0xff] %v12977_v40  ;;  %17163 = vst [vmem:[#allocation761_spill] sm:$0xff] %v12979_v52  ;;  %v12999_v40 = vld [vmem:[#allocation20 + $0x1780] sm:$0xff]  ;;  %v13001_v52 = vld [vmem:[#allocation20 + $0x1788] sm:$0xff] }
 0x4a4   : > { %17164 = vst [vmem:[#allocation762_spill] sm:$0xff] %v12981_v3  ;;  %17165 = vst [vmem:[#allocation763_spill] sm:$0xff] %v12983_v56  ;;  %v13003_v3 = vld [vmem:[#allocation20 + $0x1790] sm:$0xff]  ;;  %v13005_v56 = vld [vmem:[#allocation20 + $0x1798] sm:$0xff] }
 0x4a5   : > { %17166 = vst [vmem:[#allocation764_spill] sm:$0xff] %v12985_v5  ;;  %17167 = vst [vmem:[#allocation765_spill] sm:$0xff] %v12987_v2  ;;  %v13007_v5 = vld [vmem:[#allocation20 + $0x17a0] sm:$0xff]  ;;  %v13009_v2 = vld [vmem:[#allocation20 + $0x17a8] sm:$0xff] }
 0x4a6   : > { %17168 = vst [vmem:[#allocation766_spill] sm:$0xff] %v12989_v47  ;;  %17169 = vst [vmem:[#allocation767_spill] sm:$0xff] %v12991_v59  ;;  %v13011_v47 = vld [vmem:[#allocation20 + $0x17b0] sm:$0xff]  ;;  %v13013_v59 = vld [vmem:[#allocation20 + $0x17b8] sm:$0xff] }
 0x4a7   : > { %17170 = vst [vmem:[#allocation768_spill] sm:$0xff] %v12993_v61  ;;  %17171 = vst [vmem:[#allocation769_spill] sm:$0xff] %v12995_v49  ;;  %v13015_v61 = vld [vmem:[#allocation20 + $0x17c0] sm:$0xff]  ;;  %v13017_v49 = vld [vmem:[#allocation20 + $0x17c8] sm:$0xff] }
 0x4a8   : > { %17172 = vst [vmem:[#allocation770_spill] sm:$0xff] %v12997_v8  ;;  %17173 = vst [vmem:[#allocation771_spill] sm:$0xff] %v12999_v40  ;;  %v13019_v8 = vld [vmem:[#allocation20 + $0x17d0] sm:$0xff]  ;;  %v13021_v40 = vld [vmem:[#allocation20 + $0x17d8] sm:$0xff] }
 0x4a9   : > { %17174 = vst [vmem:[#allocation772_spill] sm:$0xff] %v13001_v52  ;;  %17175 = vst [vmem:[#allocation773_spill] sm:$0xff] %v13003_v3  ;;  %v13023_v52 = vld [vmem:[#allocation20 + $0x17e0] sm:$0xff]  ;;  %v13025_v3 = vld [vmem:[#allocation20 + $0x17e8] sm:$0xff] }
 0x4aa   : > { %17176 = vst [vmem:[#allocation774_spill] sm:$0xff] %v13005_v56  ;;  %17177 = vst [vmem:[#allocation775_spill] sm:$0xff] %v13007_v5  ;;  %v13027_v56 = vld [vmem:[#allocation20 + $0x17f0] sm:$0xff]  ;;  %v13029_v5 = vld [vmem:[#allocation20 + $0x17f8] sm:$0xff] }
 0x4ab   : > { %17178 = vst [vmem:[#allocation776_spill] sm:$0xff] %v13009_v2  ;;  %17179 = vst [vmem:[#allocation777_spill] sm:$0xff] %v13011_v47  ;;  %v13031_v2 = vld [vmem:[#allocation22] sm:$0xff]  ;;  %v2947_v47 = vld [vmem:[#allocation4] sm:$0xff]  }
 0x4ac   : > { %17180 = vst [vmem:[#allocation778_spill] sm:$0xff] %v13013_v59  ;;  %17181 = vst [vmem:[#allocation779_spill] sm:$0xff] %v13015_v61  ;;  %v2948_v59 = vld [vmem:[#allocation4 + $0x8] sm:$0xff]   ;;  %v2950_v61 = vld [vmem:[#allocation5 + $0x8] sm:$0xff]  }
 0x4ad   : > { %17182 = vst [vmem:[#allocation780_spill] sm:$0xff] %v13017_v49  ;;  %17183 = vst [vmem:[#allocation781_spill] sm:$0xff] %v13019_v8  ;;  %v2951_v28 = vld [vmem:[#allocation6] sm:$0xff]   ;;  %v2952_v49 = vld [vmem:[#allocation6 + $0x8] sm:$0xff]  }
 0x4ae   : > { %17184 = vst [vmem:[#allocation782_spill] sm:$0xff] %v13025_v3  ;;  %17185 = vst [vmem:[#allocation783_spill] sm:$0xff] %v13027_v56  ;;  %v2954_v8 = vld [vmem:[#allocation7 + $0x8] sm:$0xff]  }
 0x4af   : > { %17186 = vst [vmem:[#allocation784_spill] sm:$0xff] %v13029_v5  ;;  %17187 = vst [vmem:[#allocation785_spill] sm:$0xff] %v13031_v2 }
 0x4b0 LB: >> { %v17188_v32 = vld [vmem:[#allocation119_spill] sm:$0xff]  ;;  %v17189_v31 = vld [vmem:[#allocation333_spill] sm:$0xff]  ;;  %v17190_v30 = vld [vmem:[#allocation50_spill] sm:$0xff]  ;;  %17215 = vst [vmem:[#allocation786_spill] sm:$0xff] %v10754_v8  ;;  %p7801_p9 = scmp.lt.s32.totalorder %s10786_s1, 7  ;;  %p7967_p7 = scmp.lt.s32.totalorder %s10786_s1, 8  ;;  %s10786_s1 = sphi %s13049_s1, %s2960_s1   ;;  %v10782_v47 = vphi %v2947_v47, %v18039_v47   ;;  %v10778_v59 = vphi %v2948_v59, %v18038_v59   ;;  %v10774_v26 = vphi %v2949_v26, %v18037_v26   ;;  %v10770_v61 = vphi %v2950_v61, %v18036_v61   ;;  %v10766_v28 = vphi %v2951_v28, %v18035_v28   ;;  %v10762_v49 = vphi %v2952_v49, %v18034_v49   ;;  %v10758_v34 = vphi %v2953_v34, %v18033_v34   ;;  %v10754_v8 = vphi %v2954_v8, %v18032_v8  }
 0x4b1   : >> { %v17191_v27 = vld [vmem:[#allocation210_spill] sm:$0xff]  ;;  %v17192_v25 = vld [vmem:[#allocation369_spill] sm:$0xff]  ;;  %v17195_v22 = vld [vmem:[#allocation127_spill] sm:$0xff]  ;;  %17216 = vst [vmem:[#allocation787_spill] sm:$0xff] %v10758_v34  ;;  %p7968_p0 = scmp.ge.s32.totalorder %s10786_s1, 1  ;;  %s9743_s19 = sadd.s32 4294967295, %s10786_s1 }
 0x4b2   : >> { %v17193_v24 = vld [vmem:[#allocation81_spill] sm:$0xff]  ;;  %v17196_v21 = vld [vmem:[#allocation202_spill] sm:$0xff]  ;;  %v17197_v20 = vld [vmem:[#allocation459_spill] sm:$0xff]  ;;  %17217 = vst [vmem:[#allocation788_spill] sm:$0xff] %v10770_v61  ;;  %s7802_s20 = scalar_select %p7801_p9, %s10786_s1, 7 }
 0x4b3   : >> { %v17194_v23 = vld [vmem:[#allocation325_spill] sm:$0xff]  ;;  %v17198_v19 = vld [vmem:[#allocation178_spill] sm:$0xff]  ;;  %v17200_v17 = vld [vmem:[#allocation451_spill] sm:$0xff]  ;;  %17218 = vst [vmem:[#allocation789_spill] sm:$0xff] %v10774_v26  ;;  %s7969_s16 = scalar_select %p7967_p7, 1, 0 }
 0x4b4   : >> { %v17199_v18 = vld [vmem:[#allocation414_spill] sm:$0xff]  ;;  %v17201_v16 = vld [vmem:[#allocation73_spill] sm:$0xff]  ;;  %v17202_v15 = vld [vmem:[#allocation103_spill] sm:$0xff]  ;;  %s9801_s3 = sshll.u32 %s7802_s20, 6  ;;  %p7984_p2 = scmp.gt.s32.totalorder %s9743_s19, 0 }
 0x4b5   : >> { %v17203_v14 = vld [vmem:[#allocation111_spill] sm:$0xff]  ;;  %v17205_v12 = vld [vmem:[#allocation377_spill] sm:$0xff]  ;;  %v17207_v9 = vld [vmem:[#allocation218_spill] sm:$0xff]  ;;  %s14170_s21 = scalar_lea.vmem [#allocation2], %s9801_s3  ;;  %s2960_s1 = sadd.s32 1, %s10786_s1  }
 0x4b6   : >> { %v17204_v13 = vld [vmem:[#allocation303_spill] sm:$0xff]  ;;  %v17206_v11 = vld [vmem:[#allocation385_spill] sm:$0xff]  ;;  %v17208_v7 = vld [vmem:[#allocation436_spill] sm:$0xff]  ;;  %s7976_s7 = scalar_select %p7968_p0, 1, 0 }
 0x4b7   : >> { %v17209_v6 = vld [vmem:[#allocation65_spill] sm:$0xff]  ;;  %v17210_v4 = vld [vmem:[#allocation186_spill] sm:$0xff]  ;;  %v17213_v29 = vld [vmem:[#allocation288_spill] sm:$0xff]  ;;  %v9234_v3 = vcombine.high %v17204_v13, %v12003_v50  ;;  %v9233_v26 = vcombine.low %v17204_v13, %v12003_v50  ;;  %s18051_s19 = smov (!%p7984_p2, %s9743_s19), 0  ;;  %p2957_p10 = scmp.ge.s32.totalorder %s2960_s1, 9  }
 0x4b8   : >> { %v17211_v1 = vld [vmem:[#allocation194_spill] sm:$0xff]  ;;  %v17212_v0 = vld [vmem:[#allocation149_spill] sm:$0xff]  ;;  %v9218_v34 = vcombine.high %v17213_v29, %v11967_v53  ;;  %v9217_v5 = vcombine.low %v17213_v29, %v11967_v53  ;;  %v8978_v56 = vcombine.high %v11417_v57, %v17209_v6  ;;  %v8977_v61 = vcombine.low %v11417_v57, %v17209_v6  ;;  %v17223_v6 = vld [vmem:[#allocation240_spill] sm:$0xff]  ;;  %s9802_s9 = sshll.u32 %s18051_s19, 4  ;;  %s9803_s13 = sshll.u32 (%p2957_p10), %s10904_s14, 10 }
 0x4b9   : >> { %v17214_v10 = vld [vmem:[#allocation42_spill] sm:$0xff]  ;;  %v9250_v29 = vcombine.high %v12039_v37, %v17194_v23  ;;  %s7988_s30 = scalar_lea.vmem [#allocation3], %s9802_s9  ;;  %v10217_v53 = vld [vmem:[#allocation23 + $0x70] ss:$8 sps:$4 sm:$0xff] (%p2957_p10)   ;;  %s8548_s29 = sshll.u32 (%p2957_p10), %s11290_s0, 4  ;;  %s14863_s29 = int_to_ptr.vmem [resolvable:$true] %s8548_s29 }
 0x4ba   : >> { %v8962_v8 = vcombine.high %v17214_v10, %v17190_v30  ;;  %v8961_v2 = vcombine.low %v17214_v10, %v17190_v30  ;;  %6858 = vmatprep.subr.bf16.mxu1 %v9218_v34  ;;  %v8994_v10 = vcombine.high %v17201_v16, %v17193_v24  ;;  %v9281_v34 = vcombine.low %v12111_v33, %v12133_v39  ;;  %v10202_v57 = vld [vmem:[#allocation23 + $0x20] ss:$8 sps:$4 sm:$0xff] (%p2957_p10)   ;;  %s18042_s20 = sld [smem:[#allocation796_spill]] (%p2957_p10)  ;;  %p18043_p12 = scmp.ne.s32.totalorder (%p2957_p10), %s16416_s17, 0 }
 0x4bb   : >> { %6859 = vmatpush1.bf16.msra.mxu1 %v9217_v5  ;;  %v9249_v5 = vcombine.low %v12039_v37, %v17194_v23  ;;  %v17538_v23 = vld [vmem:[#allocation654_spill] sm:$0xff]  ;;  %s10810_s14 = smov (%p2957_p10), [#allocation29]  }
 0x4bc   : >> { %6817 = vmatprep.subr.bf16.mxu0 %v8962_v8  ;;  %6860 = vmatprep.subr.bf16.mxu1 %v9234_v3  ;;  %v9266_v3 = vcombine.high %v17189_v31, %v12095_v45  ;;  %v9025_v8 = vcombine.low %v17202_v15, %v17203_v14  ;;  %v10209_v37 = vld [vmem:[#allocation23 + $0x54] ss:$8 sps:$4 sm:$0xff] (%p2957_p10)   ;;  %v10214_v50 = vld [vmem:[#allocation23 + $0x60] ss:$8 sps:$4 sm:$0xff] (%p2957_p10)  }
 0x4bd   : >> { %6818 = vmatpush1.bf16.msra.mxu0 %v8961_v2  ;;  %v8993_v2 = vcombine.low %v17201_v16, %v17193_v24 }
 0x4be   : >> { %6819 = vmatprep.subr.bf16.mxu0 %v8978_v56  ;;  %v9010_v56 = vcombine.high %v11481_v60, %v11497_v42 }
 0x4bf   : >> { %6861 = vmatpush1.bf16.msra.mxu1 %v9233_v26  ;;  %v9265_v26 = vcombine.low %v17189_v31, %v12095_v45  ;;  %v10218_v45 = vld [vmem:[#allocation23 + $0x84] ss:$8 sps:$4 sm:$0xff] (%p2957_p10)  }
 0x4c0   : >> { %6862 = vmatprep.subr.bf16.mxu1 %v9250_v29  ;;  %v9282_v29 = vcombine.high %v12111_v33, %v12133_v39  ;;  %v10242_v33 = vld [vmem:[#allocation26 + $0x40] sm:$0xff] (%p2957_p10)   ;;  %s14861_s3 = scalar_lea.hbm (%p2957_p10), %s18042_s20, %s9803_s13 }
 0x4c1   : >> { %6820 = vmatpush1.bf16.msra.mxu0 %v8977_v61  ;;  %v9009_v61 = vcombine.low %v11481_v60, %v11497_v42  ;;  %v10205_v60 = vld [vmem:[#allocation23 + $0x30] ss:$8 sps:$4 sm:$0xff] (%p2957_p10)   ;;  %v10206_v42 = vld [vmem:[#allocation23 + $0x44] ss:$8 sps:$4 sm:$0xff] (%p2957_p10)  }
 0x4c2   : >> { %6821 = vmatprep.subr.bf16.mxu0 %v8994_v10  ;;  %v9026_v10 = vcombine.high %v17202_v15, %v17203_v14  ;;  %v17254_v14 = vld [vmem:[#allocation89_spill] sm:$0xff]  ;;  %v10243_v39 = vld [vmem:[#allocation26] sm:$0xff] (%p2957_p10)  }
 0x4c3   : >> { %6863 = vmatpush1.bf16.msra.mxu1 %v9249_v5  ;;  %v9298_v5 = vcombine.high %v12151_v48, %v17192_v25 }
 0x4c4   : >> { %6864 = vmatprep.subr.bf16.mxu1 %v9266_v3  ;;  %v9041_v3 = vcombine.low %v17188_v32, %v17195_v22 }
 0x4c5   : >> { %6822 = vmatpush1.bf16.msra.mxu0 %v8993_v2  ;;  %v9042_v2 = vcombine.high %v17188_v32, %v17195_v22 }
 0x4c6   : >> { %6823 = vmatprep.subr.bf16.mxu0 %v9010_v56  ;;  %v13124_v56 = vpack.c.bf16 %v10778_v59, %v10778_v59 }
 0x4c7   : >> { %6865 = vmatpush1.bf16.msra.mxu1 %v9265_v26  ;;  %v9058_v26 = vcombine.high %v11599_v63, %v11615_v46 }
 0x4c8   : >> { %6866 = vmatprep.subr.bf16.mxu1 %v9282_v29  ;;  %6849 = vmatprep.mubr.bf16.mxu0 %v13124_v56  ;;  %v9057_v29 = vcombine.low %v11599_v63, %v11615_v46  ;;  %v10203_v63 = vld [vmem:[#allocation23 + $0x34] ss:$8 sps:$4 sm:$0xff] (%p2957_p10)   ;;  %v10208_v46 = vld [vmem:[#allocation23 + $0x40] ss:$8 sps:$4 sm:$0xff] (%p2957_p10)  }
 0x4c9   : >> { %6824 = vmatpush1.bf16.msra.mxu0 %v9009_v61  ;;  %v9297_v61 = vcombine.low %v12151_v48, %v17192_v25  ;;  %6890 = vmatprep.mubr.bf16.mxu1 %v13124_v56  ;;  %v10220_v48 = vld [vmem:[#allocation23 + $0x80] ss:$8 sps:$4 sm:$0xff] (%p2957_p10)  }
 0x4ca   : >> { %6825 = vmatprep.subr.bf16.mxu0 %v9026_v10  ;;  %v9314_v10 = vcombine.high %v17205_v12, %v17206_v11 }
 0x4cb   : >> { %6867 = vmatpush1.bf16.msra.mxu1 %v9281_v34  ;;  %v9074_v34 = vcombine.high %v17212_v0, %v11655_v54 }
 0x4cc   : >> { %6868 = vmatprep.subr.bf16.mxu1 %v9298_v5  ;;  %v9073_v5 = vcombine.low %v17212_v0, %v11655_v54  ;;  %v10211_v54 = vld [vmem:[#allocation23 + $0x50] ss:$8 sps:$4 sm:$0xff] (%p2957_p10)  }
 0x4cd   : >> { %6826 = vmatpush1.bf16.msra.mxu0 %v9025_v8  ;;  %v9313_v8 = vcombine.low %v17205_v12, %v17206_v11 }
 0x4ce   : >> { %6827 = vmatprep.subr.bf16.mxu0 %v9042_v2  ;;  %v9330_v2 = vcombine.high %v12223_v35, %v12245_v55 }
 0x4cf   : >> { %6869 = vmatpush1.bf16.msra.mxu1 %v9297_v61  ;;  %v9090_v61 = vcombine.high %v11671_v62, %v11693_v38 }
 0x4d0   : >> { %6870 = vmatprep.subr.bf16.mxu1 %v9314_v10  ;;  %v9089_v10 = vcombine.low %v11671_v62, %v11693_v38  ;;  %v10212_v62 = vld [vmem:[#allocation23 + $0x64] ss:$8 sps:$4 sm:$0xff] (%p2957_p10)  }
 0x4d1   : >> { %6828 = vmatpush1.bf16.msra.mxu0 %v9041_v3  ;;  %v9329_v3 = vcombine.low %v12223_v35, %v12245_v55  ;;  %v10244_v35 = vld [vmem:[#allocation26 + $0x48] sm:$0xff] (%p2957_p10)  }
 0x4d2   : >> { %6829 = vmatprep.subr.bf16.mxu0 %v9058_v26  ;;  %v9346_v26 = vcombine.high %v12263_v36, %v17199_v18  ;;  %v10245_v55 = vld [vmem:[#allocation26 + $0x8] sm:$0xff] (%p2957_p10)  }
 0x4d3   : >> { %6871 = vmatpush1.bf16.msra.mxu1 %v9313_v8  ;;  %v9106_v8 = vcombine.high %v17198_v19, %v17210_v4 }
 0x4d4   : >> { %6872 = vmatprep.subr.bf16.mxu1 %v9330_v2  ;;  %v9105_v2 = vcombine.low %v17198_v19, %v17210_v4  ;;  %v17222_v4 = vld [vmem:[#allocation248_spill] sm:$0xff] }
 0x4d5   : >> { %6830 = vmatpush1.bf16.msra.mxu0 %v9057_v29  ;;  %v9345_v29 = vcombine.low %v12263_v36, %v17199_v18  ;;  %v10221_v36 = vld [vmem:[#allocation23 + $0x94] ss:$8 sps:$4 sm:$0xff] (%p2957_p10)  }
 0x4d6   : >> { %6831 = vmatprep.subr.bf16.mxu0 %v9074_v34  ;;  %v9362_v34 = vcombine.high %v12295_v43, %v12311_v51 }
 0x4d7   : >> { %6873 = vmatpush1.bf16.msra.mxu1 %v9329_v3  ;;  %v9122_v3 = vcombine.high %v17211_v1, %v17196_v21 }
 0x4d8   : >> { %6874 = vmatprep.subr.bf16.mxu1 %v9346_v26  ;;  %v9121_v26 = vcombine.low %v17211_v1, %v17196_v21  ;;  %v17467_v21 = vld [vmem:[#allocation159_spill] sm:$0xff] }
 0x4d9   : >> { %6832 = vmatpush1.bf16.msra.mxu0 %v9073_v5  ;;  %v9361_v5 = vcombine.low %v12295_v43, %v12311_v51  ;;  %v10246_v51 = vld [vmem:[#allocation26 + $0x50] sm:$0xff] (%p2957_p10)   ;;  %v10248_v43 = vld [vmem:[#allocation26 + $0x58] sm:$0xff] (%p2957_p10)  }
 0x4da   : >> { %6833 = vmatprep.subr.bf16.mxu0 %v9090_v61  ;;  %v9378_v61 = vcombine.high %v17208_v7, %v12343_v58 }
 0x4db   : >> { %6875 = vmatpush1.bf16.msra.mxu1 %v9345_v29  ;;  %v9138_v29 = vcombine.high %v17191_v27, %v17207_v9 }
 0x4dc   : >> { %6876 = vmatprep.subr.bf16.mxu1 %v9362_v34  ;;  %v9137_v34 = vcombine.low %v17191_v27, %v17207_v9  ;;  %v17226_v9 = vld [vmem:[#allocation483_spill] sm:$0xff] }
 0x4dd   : >> { %6834 = vmatpush1.bf16.msra.mxu0 %v9089_v10  ;;  %v9377_v10 = vcombine.low %v17208_v7, %v12343_v58  ;;  %v7809_v27 = vld [vmem:[%s14170_s21 + $0x18] sm:$0xff] }
 0x4de   : >> { %6835 = vmatprep.subr.bf16.mxu0 %v9106_v8  ;;  %v9394_v8 = vcombine.high %v17200_v17, %v17197_v20  ;;  %v10226_v58 = vld [vmem:[#allocation23 + $0xa0] ss:$8 sps:$4 sm:$0xff] (%p2957_p10)  }
 0x4df   : >> { %6877 = vmatpush1.bf16.msra.mxu1 %v9361_v5  ;;  %v9154_v5 = vcombine.high %v11823_v44, %v11839_v41 }
 0x4e0   : >> { %6878 = vmatprep.subr.bf16.mxu1 %v9378_v61  ;;  %v17220_v61 = vld [vmem:[#allocation467_spill] sm:$0xff] }
 0x4e1   : >> { %6836 = vmatpush1.bf16.msra.mxu0 %v9105_v2  ;;  %v9393_v2 = vcombine.low %v17200_v17, %v17197_v20  ;;  %v17221_v0 = vmov %v17220_v61 }
 0x4e2   : >> { %6837 = vmatprep.subr.bf16.mxu0 %v9122_v3  ;;  %v17219_v3 = vld [vmem:[#allocation475_spill] sm:$0xff] }
 0x4e3   : >> { %6879 = vmatpush1.bf16.msra.mxu1 %v9377_v10  ;;  %v9410_v1 = vcombine.high %v17220_v61, %v17219_v3  ;;  %v9409_v10 = vcombine.low %v17221_v0, %v17219_v3  ;;  %v17227_v61 = vld [vmem:[#allocation264_spill] sm:$0xff]  ;;  %v17231_v3 = vld [vmem:[#allocation499_spill] sm:$0xff] }
 0x4e4   : >> { %6880 = vmatprep.subr.bf16.mxu1 %v9394_v8  ;;  %v17224_v8 = vld [vmem:[#allocation491_spill] sm:$0xff]  ;;  %v17228_v12 = vmov %v17227_v61  ;;  %v17229_v0 = vld [vmem:[#allocation256_spill] sm:$0xff] }
 0x4e5   : >> { %6838 = vmatpush1.bf16.msra.mxu0 %v9121_v26  ;;  %v9153_v26 = vcombine.low %v11823_v44, %v11839_v41  ;;  %v17225_v7 = vmov %v17224_v8  ;;  %v9426_v11 = vcombine.high %v17226_v9, %v17224_v8  ;;  %v17232_v8 = vld [vmem:[#allocation280_spill] sm:$0xff] }
 0x4e6   : >> { %6839 = vmatprep.subr.bf16.mxu0 %v9138_v29  ;;  %v9170_v29 = vcombine.high %v17223_v6, %v17222_v4 }
 0x4e7   : >> { %6881 = vmatpush1.bf16.msra.mxu1 %v9393_v2  ;;  %v9425_v2 = vcombine.low %v17226_v9, %v17225_v7  ;;  %v17236_v7 = vld [vmem:[#allocation515_spill] sm:$0xff] }
 0x4e8   : >> { %6882 = vmatprep.subr.bf16.mxu1 %v9410_v1  ;;  %v17230_v1 = vld [vmem:[#allocation507_spill] sm:$0xff] }
 0x4e9   : >> { %6840 = vmatpush1.bf16.msra.mxu0 %v9137_v34  ;;  %v9169_v34 = vcombine.low %v17223_v6, %v17222_v4  ;;  %v9442_v13 = vcombine.high %v17231_v3, %v17230_v1  ;;  %v17233_v4 = vmov %v17232_v8  ;;  %v17234_v6 = vld [vmem:[#allocation272_spill] sm:$0xff] }
 0x4ea   : >> { %6841 = vmatprep.subr.bf16.mxu0 %v9154_v5  ;;  %v9186_v5 = vcombine.high %v17229_v0, %v17227_v61  ;;  %v17237_v61 = vld [vmem:[#allocation539_spill] sm:$0xff] }
 0x4eb   : >> { %6883 = vmatpush1.bf16.msra.mxu1 %v9409_v10  ;;  %v9441_v10 = vcombine.low %v17231_v3, %v17230_v1  ;;  %v17239_v1 = vld [vmem:[#allocation531_spill] sm:$0xff] }
 0x4ec   : >> { %6884 = vmatprep.subr.bf16.mxu1 %v9426_v11  ;;  %v17235_v11 = vld [vmem:[#allocation523_spill] sm:$0xff] }
 0x4ed   : >> { %6842 = vmatpush1.bf16.msra.mxu0 %v9153_v26  ;;  %v9185_v26 = vcombine.low %v17229_v0, %v17228_v12  ;;  %v9458_v9 = vcombine.high %v17236_v7, %v17235_v11  ;;  %v17238_v0 = vmov %v17237_v61  ;;  %v17241_v3 = vld [vmem:[#allocation43_spill] sm:$0xff] }
 0x4ee   : >> { %6843 = vmatprep.subr.bf16.mxu0 %v9170_v29  ;;  %v9202_v29 = vcombine.high %v17234_v6, %v17232_v8  ;;  %v13218_v8 = vpack.c.bf16 %v10782_v47, %v10782_v47 }
 0x4ef   : >> { %6885 = vmatpush1.bf16.msra.mxu1 %v9425_v2  ;;  %v9457_v2 = vcombine.low %v17236_v7, %v17235_v11  ;;  %v13230_v11 = vpack.c.bf16 %v10762_v49, %v10762_v49 }
 0x4f0   : >> { %6886 = vmatprep.subr.bf16.mxu1 %v9442_v13  ;;  %v17240_v13 = vld [vmem:[#allocation51_spill] sm:$0xff] }
 0x4f1   : >> { %6844 = vmatpush1.bf16.msra.mxu0 %v9169_v34  ;;  %v9201_v34 = vcombine.low %v17234_v6, %v17233_v4  ;;  %v8964_v12 = vcombine.high %v17241_v3, %v17240_v13  ;;  %v17244_v4 = vld [vmem:[#allocation66_spill] sm:$0xff] }
 0x4f2   : >> { %6845 = vmatprep.subr.bf16.mxu0 %v9186_v5  ;;  %v9474_v5 = vcombine.high %v17239_v1, %v17237_v61  ;;  %v17245_v6 = vld [vmem:[#allocation58_spill] sm:$0xff] }
 0x4f3   : >> { %6887 = vmatpush1.bf16.msra.mxu1 %v9441_v10  ;;  %v8963_v10 = vcombine.low %v17241_v3, %v17240_v13  ;;  %v8980_v7 = vcombine.high %v17245_v6, %v17244_v4  ;;  %v17249_v3 = vld [vmem:[#allocation74_spill] sm:$0xff] }
 0x4f4   : >> { %6888 = vmatprep.subr.bf16.mxu1 %v9458_v9  ;;  %v17242_v9 = vld [vmem:[#allocation555_spill] sm:$0xff] }
 0x4f5   : >> { %6846 = vmatpush1.bf16.msra.mxu0 %v9185_v26  ;;  %v9473_v26 = vcombine.low %v17239_v1, %v17238_v0  ;;  %v17248_v1 = vld [vmem:[#allocation82_spill] sm:$0xff] }
 0x4f6   : >> { %6847 = vmatprep.subr.bf16.mxu0 %v9202_v29  ;;  %v17243_v29 = vld [vmem:[#allocation547_spill] sm:$0xff]  ;;  %v8996_v13 = vcombine.high %v17249_v3, %v17248_v1 }
 0x4f7   : >> { %6889 = vmatpush1.bf16.msra.mxu1 %v9457_v2  ;;  %v9490_v61 = vcombine.high %v17243_v29, %v17242_v9  ;;  %v17246_v2 = vld [vmem:[#allocation571_spill] sm:$0xff] }
 0x4f8   : >> { %6940 = vmatprep.subr.bf16.mxu1 %v8964_v12  ;;  %v8979_v12 = vcombine.low %v17245_v6, %v17244_v4 }
 0x4f9   : >> { %6848 = vmatpush1.bf16.msra.mxu0 %v9201_v34  ;;  %v9489_v34 = vcombine.low %v17243_v29, %v17242_v9  ;;  %v17253_v9 = vld [vmem:[#allocation96_spill] sm:$0xff] }
 0x4fa   : >> { %6899 = vmatprep.subr.bf16.mxu0 %v9474_v5  ;;  %6891 = vmatmul.mubr.bf16.vlgmr.msra.gmra.mrb[0].mxu1 %v13218_v8  ;;  %v17247_v5 = vld [vmem:[#allocation563_spill] sm:$0xff]  ;;  %v9012_v15 = vcombine.high %v17254_v14, %v17253_v9  ;;  %v17726_v29 = vld [vmem:[#allocation552_spill] sm:$0xff] }
 0x4fb   : >> { %6941 = vmatpush1.bf16.msra.mxu1 %v8963_v10  ;;  %v9506_v0 = vcombine.high %v17247_v5, %v17246_v2  ;;  %6972 = vmatprep.mubr.bf16.mxu1 %v13124_v56  ;;  %v8995_v10 = vcombine.low %v17249_v3, %v17248_v1  ;;  %v17256_v1 = vld [vmem:[#allocation595_spill] sm:$0xff]  ;;  %v17258_v3 = vld [vmem:[#allocation104_spill] sm:$0xff] }
 0x4fc   : >> { %6850 = vmatmul.mubr.bf16.vlgmr.msra.gmra.mrb[0].mxu0 %v13218_v8  ;;  %6942 = vmatprep.subr.bf16.mxu1 %v8980_v7  ;;  %v17250_v7 = vld [vmem:[#allocation587_spill] sm:$0xff] }
 0x4fd   : >> { %6900 = vmatpush1.bf16.msra.mxu0 %v9473_v26  ;;  %6931 = vmatprep.mubr.bf16.mxu0 %v13230_v11  ;;  %v9505_v26 = vcombine.low %v17247_v5, %v17246_v2  ;;  %v17255_v2 = vld [vmem:[#allocation603_spill] sm:$0xff] }
 0x4fe   : >> { %6901 = vmatprep.subr.bf16.mxu0 %v9490_v61  ;;  %v17251_v61 = vld [vmem:[#allocation579_spill] sm:$0xff] }
 0x4ff   : >> { %6943 = vmatpush1.bf16.msra.mxu1 %v8979_v12  ;;  %v17252_v4 = vmov %v17251_v61  ;;  %v9522_v6 = vcombine.high %v17251_v61, %v17250_v7  ;;  %v9011_v12 = vcombine.low %v17254_v14, %v17253_v9  ;;  %v17259_v61 = vld [vmem:[#allocation619_spill] sm:$0xff]  ;;  %v17263_v9 = vld [vmem:[#allocation120_spill] sm:$0xff] }
 0x500   : >> { %6944 = vmatprep.subr.bf16.mxu1 %v8996_v13  ;;  %v17257_v13 = vld [vmem:[#allocation112_spill] sm:$0xff] }
 0x501   : >> { %6902 = vmatpush1.bf16.msra.mxu0 %v9489_v34  ;;  %v9521_v34 = vcombine.low %v17252_v4, %v17250_v7  ;;  %v9028_v5 = vcombine.high %v17258_v3, %v17257_v13  ;;  %v17260_v4 = vmov %v17259_v61  ;;  %v17261_v7 = vld [vmem:[#allocation611_spill] sm:$0xff] }
 0x502   : >> { %6903 = vmatprep.subr.bf16.mxu0 %v9506_v0  ;;  %v9538_v0 = vcombine.high %v17256_v1, %v17255_v2 }
 0x503   : >> { %6945 = vmatpush1.bf16.msra.mxu1 %v8995_v10  ;;  %v9027_v10 = vcombine.low %v17258_v3, %v17257_v13  ;;  %v17267_v3 = vld [vmem:[#allocation135_spill] sm:$0xff] }
 0x504   : >> { %6946 = vmatprep.subr.bf16.mxu1 %v9012_v15  ;;  %v17262_v15 = vld [vmem:[#allocation128_spill] sm:$0xff] }
 0x505   : >> { %6904 = vmatpush1.bf16.msra.mxu0 %v9505_v26  ;;  %v9537_v26 = vcombine.low %v17256_v1, %v17255_v2  ;;  %v9044_v14 = vcombine.high %v17263_v9, %v17262_v15  ;;  %v17264_v1 = vld [vmem:[#allocation635_spill] sm:$0xff] }
 0x506   : >> { %6905 = vmatprep.subr.bf16.mxu0 %v9522_v6  ;;  %v9554_v6 = vcombine.high %v17261_v7, %v17259_v61  ;;  %v17265_v2 = vld [vmem:[#allocation627_spill] sm:$0xff] }
 0x507   : >> { %6947 = vmatpush1.bf16.msra.mxu1 %v9011_v12  ;;  %v9043_v12 = vcombine.low %v17263_v9, %v17262_v15  ;;  %v17268_v61 = vld [vmem:[#allocation651_spill] sm:$0xff]  ;;  %v17272_v9 = vld [vmem:[#allocation150_spill] sm:$0xff] }
 0x508   : >> { %6948 = vmatprep.subr.bf16.mxu1 %v9028_v5  ;;  %v17266_v5 = vld [vmem:[#allocation142_spill] sm:$0xff] }
 0x509   : >> { %6906 = vmatpush1.bf16.msra.mxu0 %v9521_v34  ;;  %v9553_v34 = vcombine.low %v17261_v7, %v17260_v4  ;;  %v9060_v13 = vcombine.high %v17267_v3, %v17266_v5  ;;  %v17269_v4 = vmov %v17268_v61  ;;  %v17270_v7 = vld [vmem:[#allocation643_spill] sm:$0xff] }
 0x50a   : >> { %6907 = vmatprep.subr.bf16.mxu0 %v9538_v0  ;;  %v9570_v0 = vcombine.high %v17265_v2, %v17264_v1 }
 0x50b   : >> { %6949 = vmatpush1.bf16.msra.mxu1 %v9027_v10  ;;  %v9059_v10 = vcombine.low %v17267_v3, %v17266_v5  ;;  %v17276_v3 = vld [vmem:[#allocation164_spill] sm:$0xff] }
 0x50c   : >> { %6950 = vmatprep.subr.bf16.mxu1 %v9044_v14  ;;  %v17271_v14 = vld [vmem:[#allocation157_spill] sm:$0xff] }
 0x50d   : >> { %6908 = vmatpush1.bf16.msra.mxu0 %v9537_v26  ;;  %v9569_v26 = vcombine.low %v17265_v2, %v17264_v1  ;;  %v9076_v15 = vcombine.high %v17272_v9, %v17271_v14  ;;  %v17273_v1 = vld [vmem:[#allocation667_spill] sm:$0xff] }
 0x50e   : >> { %6909 = vmatprep.subr.bf16.mxu0 %v9554_v6  ;;  %v9586_v6 = vcombine.high %v17270_v7, %v17268_v61  ;;  %v17274_v2 = vld [vmem:[#allocation659_spill] sm:$0xff] }
 0x50f   : >> { %6951 = vmatpush1.bf16.msra.mxu1 %v9043_v12  ;;  %v9075_v12 = vcombine.low %v17272_v9, %v17271_v14  ;;  %v17277_v61 = vld [vmem:[#allocation683_spill] sm:$0xff] }
 0x510   : >> { %6952 = vmatprep.subr.bf16.mxu1 %v9060_v13  ;;  %v17275_v13 = vld [vmem:[#allocation171_spill] sm:$0xff] }
 0x511   : >> { %6910 = vmatpush1.bf16.msra.mxu0 %v9553_v34  ;;  %v9585_v34 = vcombine.low %v17270_v7, %v17269_v4  ;;  %v9092_v5 = vcombine.high %v17276_v3, %v17275_v13  ;;  %v17278_v4 = vmov %v17277_v61  ;;  %v17279_v7 = vld [vmem:[#allocation675_spill] sm:$0xff] }
 0x512   : >> { %6911 = vmatprep.subr.bf16.mxu0 %v9570_v0  ;;  %v9602_v0 = vcombine.high %v17274_v2, %v17273_v1  ;;  %v17281_v9 = vld [vmem:[#allocation179_spill] sm:$0xff] }
 0x513   : >> { %6953 = vmatpush1.bf16.msra.mxu1 %v9059_v10  ;;  %v9091_v10 = vcombine.low %v17276_v3, %v17275_v13  ;;  %v17285_v3 = vld [vmem:[#allocation195_spill] sm:$0xff] }
 0x514   : >> { %6954 = vmatprep.subr.bf16.mxu1 %v9076_v15  ;;  %v17280_v15 = vld [vmem:[#allocation187_spill] sm:$0xff] }
 0x515   : >> { %6912 = vmatpush1.bf16.msra.mxu0 %v9569_v26  ;;  %v9601_v26 = vcombine.low %v17274_v2, %v17273_v1  ;;  %v9108_v14 = vcombine.high %v17281_v9, %v17280_v15  ;;  %v17282_v1 = vld [vmem:[#allocation699_spill] sm:$0xff] }
 0x516   : >> { %6913 = vmatprep.subr.bf16.mxu0 %v9586_v6  ;;  %v9618_v6 = vcombine.high %v17279_v7, %v17277_v61  ;;  %v17283_v2 = vld [vmem:[#allocation691_spill] sm:$0xff] }
 0x517   : >> { %6955 = vmatpush1.bf16.msra.mxu1 %v9075_v12  ;;  %v9107_v12 = vcombine.low %v17281_v9, %v17280_v15  ;;  %v17286_v61 = vld [vmem:[#allocation715_spill] sm:$0xff] }
 0x518   : >> { %6956 = vmatprep.subr.bf16.mxu1 %v9092_v5  ;;  %v17284_v5 = vld [vmem:[#allocation203_spill] sm:$0xff] }
 0x519   : >> { %6914 = vmatpush1.bf16.msra.mxu0 %v9585_v34  ;;  %v9617_v34 = vcombine.low %v17279_v7, %v17278_v4  ;;  %v9124_v13 = vcombine.high %v17285_v3, %v17284_v5  ;;  %v17287_v4 = vmov %v17286_v61  ;;  %v17288_v7 = vld [vmem:[#allocation707_spill] sm:$0xff] }
 0x51a   : >> { %6915 = vmatprep.subr.bf16.mxu0 %v9602_v0  ;;  %v9634_v0 = vcombine.high %v17283_v2, %v17282_v1  ;;  %v17290_v9 = vld [vmem:[#allocation211_spill] sm:$0xff] }
 0x51b   : >> { %6957 = vmatpush1.bf16.msra.mxu1 %v9091_v10  ;;  %v9123_v10 = vcombine.low %v17285_v3, %v17284_v5  ;;  %v17294_v3 = vld [vmem:[#allocation226_spill] sm:$0xff] }
 0x51c   : >> { %6958 = vmatprep.subr.bf16.mxu1 %v9108_v14  ;;  %v17289_v14 = vld [vmem:[#allocation219_spill] sm:$0xff] }
 0x51d   : >> { %6916 = vmatpush1.bf16.msra.mxu0 %v9601_v26  ;;  %v9633_v26 = vcombine.low %v17283_v2, %v17282_v1  ;;  %v9140_v15 = vcombine.high %v17290_v9, %v17289_v14  ;;  %v17291_v1 = vld [vmem:[#allocation731_spill] sm:$0xff] }
 0x51e   : >> { %6917 = vmatprep.subr.bf16.mxu0 %v9618_v6  ;;  %v9650_v6 = vcombine.high %v17288_v7, %v17286_v61  ;;  %v17292_v2 = vld [vmem:[#allocation723_spill] sm:$0xff] }
 0x51f   : >> { %6959 = vmatpush1.bf16.msra.mxu1 %v9107_v12  ;;  %v9139_v12 = vcombine.low %v17290_v9, %v17289_v14  ;;  %v17295_v61 = vld [vmem:[#allocation747_spill] sm:$0xff]  ;;  %v17299_v9 = vld [vmem:[#allocation241_spill] sm:$0xff] }
 0x520   : >> { %6960 = vmatprep.subr.bf16.mxu1 %v9124_v13  ;;  %v17293_v13 = vld [vmem:[#allocation233_spill] sm:$0xff] }
 0x521   : >> { %6918 = vmatpush1.bf16.msra.mxu0 %v9617_v34  ;;  %v9649_v34 = vcombine.low %v17288_v7, %v17287_v4  ;;  %v9156_v5 = vcombine.high %v17294_v3, %v17293_v13  ;;  %v17296_v4 = vmov %v17295_v61  ;;  %v17297_v7 = vld [vmem:[#allocation739_spill] sm:$0xff] }
 0x522   : >> { %6919 = vmatprep.subr.bf16.mxu0 %v9634_v0  ;;  %v9666_v0 = vcombine.high %v17292_v2, %v17291_v1 }
 0x523   : >> { %6961 = vmatpush1.bf16.msra.mxu1 %v9123_v10  ;;  %v9155_v10 = vcombine.low %v17294_v3, %v17293_v13  ;;  %v17303_v3 = vld [vmem:[#allocation257_spill] sm:$0xff] }
 0x524   : >> { %6962 = vmatprep.subr.bf16.mxu1 %v9140_v15  ;;  %v17298_v15 = vld [vmem:[#allocation249_spill] sm:$0xff] }
 0x525   : >> { %6920 = vmatpush1.bf16.msra.mxu0 %v9633_v26  ;;  %v9665_v26 = vcombine.low %v17292_v2, %v17291_v1  ;;  %v9172_v14 = vcombine.high %v17299_v9, %v17298_v15  ;;  %v17300_v1 = vld [vmem:[#allocation763_spill] sm:$0xff] }
 0x526   : >> { %6921 = vmatprep.subr.bf16.mxu0 %v9650_v6  ;;  %v9682_v6 = vcombine.high %v17297_v7, %v17295_v61  ;;  %v17301_v2 = vld [vmem:[#allocation755_spill] sm:$0xff] }
 0x527   : >> { %6963 = vmatpush1.bf16.msra.mxu1 %v9139_v12  ;;  %v9171_v12 = vcombine.low %v17299_v9, %v17298_v15  ;;  %v17304_v61 = vld [vmem:[#allocation779_spill] sm:$0xff]  ;;  %v17308_v9 = vld [vmem:[#allocation273_spill] sm:$0xff] }
 0x528   : >> { %6964 = vmatprep.subr.bf16.mxu1 %v9156_v5  ;;  %v17302_v5 = vld [vmem:[#allocation265_spill] sm:$0xff] }
 0x529   : >> { %6922 = vmatpush1.bf16.msra.mxu0 %v9649_v34  ;;  %v9681_v34 = vcombine.low %v17297_v7, %v17296_v4  ;;  %v9188_v13 = vcombine.high %v17303_v3, %v17302_v5  ;;  %v17305_v4 = vmov %v17304_v61  ;;  %v17306_v7 = vld [vmem:[#allocation771_spill] sm:$0xff] }
 0x52a   : >> { %6923 = vmatprep.subr.bf16.mxu0 %v9666_v0  ;;  %v9698_v0 = vcombine.high %v17301_v2, %v17300_v1 }
 0x52b   : >> { %6965 = vmatpush1.bf16.msra.mxu1 %v9155_v10  ;;  %v9187_v10 = vcombine.low %v17303_v3, %v17302_v5  ;;  %v17312_v3 = vld [vmem:[#allocation532_spill] sm:$0xff] }
 0x52c   : >> { %6966 = vmatprep.subr.bf16.mxu1 %v9172_v14  ;;  %v17307_v14 = vld [vmem:[#allocation281_spill] sm:$0xff] }
 0x52d   : >> { %6924 = vmatpush1.bf16.msra.mxu0 %v9665_v26  ;;  %v9697_v26 = vcombine.low %v17301_v2, %v17300_v1  ;;  %v9204_v15 = vcombine.high %v17308_v9, %v17307_v14  ;;  %v17309_v1 = vld [vmem:[#allocation296_spill] sm:$0xff]  ;;  %v17310_v2 = vld [vmem:[#allocation289_spill] sm:$0xff] }
 0x52e   : >> { %6925 = vmatprep.subr.bf16.mxu0 %v9682_v6  ;;  %v9714_v6 = vcombine.high %v17306_v7, %v17304_v61  ;;  %v13358_v61 = vpack.c.bf16 %v10766_v28, %v10766_v28 }
 0x52f   : >> { %6967 = vmatpush1.bf16.msra.mxu1 %v9171_v12  ;;  %v9203_v12 = vcombine.low %v17308_v9, %v17307_v14  ;;  %v17316_v9 = vld [vmem:[#allocation548_spill] sm:$0xff] }
 0x530   : >> { %6968 = vmatprep.subr.bf16.mxu1 %v9188_v13  ;;  %v17311_v13 = vld [vmem:[#allocation540_spill] sm:$0xff] }
 0x531   : >> { %6926 = vmatpush1.bf16.msra.mxu0 %v9681_v34  ;;  %v9713_v34 = vcombine.low %v17306_v7, %v17305_v4  ;;  %v9476_v5 = vcombine.high %v17312_v3, %v17311_v13  ;;  %v17315_v7 = vld [vmem:[#allocation556_spill] sm:$0xff] }
 0x532   : >> { %6927 = vmatprep.subr.bf16.mxu0 %v9698_v0  ;;  %v9220_v0 = vcombine.high %v17310_v2, %v17309_v1  ;;  %v9492_v14 = vcombine.high %v17316_v9, %v17315_v7 }
 0x533   : >> { %6969 = vmatpush1.bf16.msra.mxu1 %v9187_v10  ;;  %v9475_v10 = vcombine.low %v17312_v3, %v17311_v13  ;;  %v17320_v3 = vld [vmem:[#allocation564_spill] sm:$0xff] }
 0x534   : >> { %6970 = vmatprep.subr.bf16.mxu1 %v9204_v15  ;;  %v17313_v15 = vld [vmem:[#allocation311_spill] sm:$0xff] }
 0x535   : >> { %6928 = vmatpush1.bf16.msra.mxu0 %v9697_v26  ;;  %v9219_v26 = vcombine.low %v17310_v2, %v17309_v1  ;;  %v17319_v2 = vld [vmem:[#allocation572_spill] sm:$0xff] }
 0x536   : >> { %6929 = vmatprep.subr.bf16.mxu0 %v9714_v6  ;;  %v17314_v6 = vld [vmem:[#allocation304_spill] sm:$0xff]  ;;  %v9508_v13 = vcombine.high %v17320_v3, %v17319_v2 }
 0x537   : >> { %6971 = vmatpush1.bf16.msra.mxu1 %v9203_v12  ;;  %v9236_v4 = vcombine.high %v17314_v6, %v17313_v15  ;;  %v9491_v12 = vcombine.low %v17316_v9, %v17315_v7  ;;  %v17323_v7 = vld [vmem:[#allocation588_spill] sm:$0xff] }
 0x538   : >> { %7022 = vmatprep.subr.bf16.mxu1 %v9476_v5  ;;  %v17317_v5 = vld [vmem:[#allocation326_spill] sm:$0xff]  ;;  %v17324_v9 = vld [vmem:[#allocation580_spill] sm:$0xff] }
 0x539   : >> { %6930 = vmatpush1.bf16.msra.mxu0 %v9713_v34  ;;  %v9235_v34 = vcombine.low %v17314_v6, %v17313_v15  ;;  %v9524_v15 = vcombine.high %v17324_v9, %v17323_v7 }
 0x53a   : >> { %6981 = vmatprep.subr.bf16.mxu0 %v9220_v0  ;;  %6973 = vmatmul.mubr.bf16.vlgmr.msra.gmra.mrb[4].mxu1 %v13218_v8  ;;  %v17318_v0 = vld [vmem:[#allocation318_spill] sm:$0xff] }
 0x53b   : >> { %7023 = vmatpush1.bf16.msra.mxu1 %v9475_v10  ;;  %v9252_v1 = vcombine.high %v17318_v0, %v17317_v5  ;;  %7054 = vmatprep.mubr.bf16.mxu1 %v13230_v11  ;;  %v9507_v10 = vcombine.low %v17320_v3, %v17319_v2  ;;  %v17326_v2 = vld [vmem:[#allocation348_spill] sm:$0xff] }
 0x53c   : >> { %6932 = vmatmul.mubr.bf16.vlgmr.msra.gmra.mrb[4].mxu0 %v13358_v61  ;;  %7024 = vmatprep.subr.bf16.mxu1 %v9492_v14  ;;  %v17322_v14 = vld [vmem:[#allocation334_spill] sm:$0xff]  ;;  %v17328_v3 = vld [vmem:[#allocation596_spill] sm:$0xff] }
 0x53d   : >> { %6982 = vmatpush1.bf16.msra.mxu0 %v9219_v26  ;;  %7013 = vmatprep.mubr.bf16.mxu0 %v13124_v56  ;;  %v9251_v26 = vcombine.low %v17318_v0, %v17317_v5  ;;  %v17325_v0 = vld [vmem:[#allocation355_spill] sm:$0xff] }
 0x53e   : >> { %6983 = vmatprep.subr.bf16.mxu0 %v9236_v4  ;;  %v17321_v4 = vld [vmem:[#allocation341_spill] sm:$0xff] }
 0x53f   : >> { %7025 = vmatpush1.bf16.msra.mxu1 %v9491_v12  ;;  %v9268_v6 = vcombine.high %v17322_v14, %v17321_v4  ;;  %v9523_v12 = vcombine.low %v17324_v9, %v17323_v7  ;;  %v17330_v7 = vld [vmem:[#allocation362_spill] sm:$0xff]  ;;  %v17332_v9 = vld [vmem:[#allocation612_spill] sm:$0xff] }
 0x540   : >> { %7026 = vmatprep.subr.bf16.mxu1 %v9508_v13  ;;  %v17327_v13 = vld [vmem:[#allocation604_spill] sm:$0xff] }
 0x541   : >> { %6984 = vmatpush1.bf16.msra.mxu0 %v9235_v34  ;;  %v9267_v34 = vcombine.low %v17322_v14, %v17321_v4  ;;  %v9540_v5 = vcombine.high %v17328_v3, %v17327_v13  ;;  %v17329_v4 = vld [vmem:[#allocation370_spill] sm:$0xff] }
 0x542   : >> { %6985 = vmatprep.subr.bf16.mxu0 %v9252_v1  ;;  %v9284_v1 = vcombine.high %v17326_v2, %v17325_v0 }
 0x543   : >> { %7027 = vmatpush1.bf16.msra.mxu1 %v9507_v10  ;;  %v9539_v10 = vcombine.low %v17328_v3, %v17327_v13  ;;  %v17336_v3 = vld [vmem:[#allocation628_spill] sm:$0xff] }
 0x544   : >> { %7028 = vmatprep.subr.bf16.mxu1 %v9524_v15  ;;  %v17331_v15 = vld [vmem:[#allocation620_spill] sm:$0xff] }
 0x545   : >> { %6986 = vmatpush1.bf16.msra.mxu0 %v9251_v26  ;;  %v9283_v26 = vcombine.low %v17326_v2, %v17325_v0  ;;  %v9556_v14 = vcombine.high %v17332_v9, %v17331_v15  ;;  %v17333_v0 = vld [vmem:[#allocation386_spill] sm:$0xff] }
 0x546   : >> { %6987 = vmatprep.subr.bf16.mxu0 %v9268_v6  ;;  %v9300_v6 = vcombine.high %v17330_v7, %v17329_v4  ;;  %v17334_v2 = vld [vmem:[#allocation378_spill] sm:$0xff] }
 0x547   : >> { %7029 = vmatpush1.bf16.msra.mxu1 %v9523_v12  ;;  %v9555_v12 = vcombine.low %v17332_v9, %v17331_v15  ;;  %v17340_v9 = vld [vmem:[#allocation644_spill] sm:$0xff] }
 0x548   : >> { %7030 = vmatprep.subr.bf16.mxu1 %v9540_v5  ;;  %v17335_v5 = vld [vmem:[#allocation636_spill] sm:$0xff] }
 0x549   : >> { %6988 = vmatpush1.bf16.msra.mxu0 %v9267_v34  ;;  %v9299_v34 = vcombine.low %v17330_v7, %v17329_v4  ;;  %v9572_v13 = vcombine.high %v17336_v3, %v17335_v5  ;;  %v17337_v4 = vld [vmem:[#allocation400_spill] sm:$0xff]  ;;  %v17338_v7 = vld [vmem:[#allocation393_spill] sm:$0xff] }
 0x54a   : >> { %6989 = vmatprep.subr.bf16.mxu0 %v9284_v1  ;;  %v9316_v1 = vcombine.high %v17334_v2, %v17333_v0 }
 0x54b   : >> { %7031 = vmatpush1.bf16.msra.mxu1 %v9539_v10  ;;  %v9571_v10 = vcombine.low %v17336_v3, %v17335_v5  ;;  %v17344_v3 = vld [vmem:[#allocation660_spill] sm:$0xff] }
 0x54c   : >> { %7032 = vmatprep.subr.bf16.mxu1 %v9556_v14  ;;  %v17339_v14 = vld [vmem:[#allocation652_spill] sm:$0xff] }
 0x54d   : >> { %6990 = vmatpush1.bf16.msra.mxu0 %v9283_v26  ;;  %v9315_v26 = vcombine.low %v17334_v2, %v17333_v0  ;;  %v9588_v15 = vcombine.high %v17340_v9, %v17339_v14  ;;  %v17341_v0 = vld [vmem:[#allocation415_spill] sm:$0xff] }
 0x54e   : >> { %6991 = vmatprep.subr.bf16.mxu0 %v9300_v6  ;;  %v9332_v6 = vcombine.high %v17338_v7, %v17337_v4  ;;  %v17342_v2 = vld [vmem:[#allocation407_spill] sm:$0xff] }
 0x54f   : >> { %7033 = vmatpush1.bf16.msra.mxu1 %v9555_v12  ;;  %v9587_v12 = vcombine.low %v17340_v9, %v17339_v14  ;;  %v17348_v9 = vld [vmem:[#allocation676_spill] sm:$0xff] }
 0x550   : >> { %7034 = vmatprep.subr.bf16.mxu1 %v9572_v13  ;;  %v17343_v13 = vld [vmem:[#allocation668_spill] sm:$0xff] }
 0x551   : >> { %6992 = vmatpush1.bf16.msra.mxu0 %v9299_v34  ;;  %v9331_v34 = vcombine.low %v17338_v7, %v17337_v4  ;;  %v9604_v5 = vcombine.high %v17344_v3, %v17343_v13  ;;  %v17345_v4 = vld [vmem:[#allocation429_spill] sm:$0xff]  ;;  %v17346_v7 = vld [vmem:[#allocation422_spill] sm:$0xff] }
 0x552   : >> { %6993 = vmatprep.subr.bf16.mxu0 %v9316_v1  ;;  %v9348_v1 = vcombine.high %v17342_v2, %v17341_v0 }
 0x553   : >> { %7035 = vmatpush1.bf16.msra.mxu1 %v9571_v10  ;;  %v9603_v10 = vcombine.low %v17344_v3, %v17343_v13  ;;  %v17352_v3 = vld [vmem:[#allocation692_spill] sm:$0xff] }
 0x554   : >> { %7036 = vmatprep.subr.bf16.mxu1 %v9588_v15  ;;  %v17347_v15 = vld [vmem:[#allocation684_spill] sm:$0xff] }
 0x555   : >> { %6994 = vmatpush1.bf16.msra.mxu0 %v9315_v26  ;;  %v9347_v26 = vcombine.low %v17342_v2, %v17341_v0  ;;  %v9620_v14 = vcombine.high %v17348_v9, %v17347_v15  ;;  %v17349_v0 = vld [vmem:[#allocation444_spill] sm:$0xff]  ;;  %v17350_v2 = vld [vmem:[#allocation437_spill] sm:$0xff] }
 0x556   : >> { %6995 = vmatprep.subr.bf16.mxu0 %v9332_v6  ;;  %v9364_v6 = vcombine.high %v17346_v7, %v17345_v4 }
 0x557   : >> { %7037 = vmatpush1.bf16.msra.mxu1 %v9587_v12  ;;  %v9619_v12 = vcombine.low %v17348_v9, %v17347_v15  ;;  %v17356_v9 = vld [vmem:[#allocation708_spill] sm:$0xff] }
 0x558   : >> { %7038 = vmatprep.subr.bf16.mxu1 %v9604_v5  ;;  %v17351_v5 = vld [vmem:[#allocation700_spill] sm:$0xff] }
 0x559   : >> { %6996 = vmatpush1.bf16.msra.mxu0 %v9331_v34  ;;  %v9363_v34 = vcombine.low %v17346_v7, %v17345_v4  ;;  %v9636_v13 = vcombine.high %v17352_v3, %v17351_v5  ;;  %v17353_v4 = vld [vmem:[#allocation460_spill] sm:$0xff] }
 0x55a   : >> { %6997 = vmatprep.subr.bf16.mxu0 %v9348_v1  ;;  %v9380_v1 = vcombine.high %v17350_v2, %v17349_v0  ;;  %v17354_v7 = vld [vmem:[#allocation452_spill] sm:$0xff] }
 0x55b   : >> { %7039 = vmatpush1.bf16.msra.mxu1 %v9603_v10  ;;  %v9635_v10 = vcombine.low %v17352_v3, %v17351_v5  ;;  %v17360_v3 = vld [vmem:[#allocation724_spill] sm:$0xff] }
 0x55c   : >> { %7040 = vmatprep.subr.bf16.mxu1 %v9620_v14  ;;  %v17355_v14 = vld [vmem:[#allocation716_spill] sm:$0xff] }
 0x55d   : >> { %6998 = vmatpush1.bf16.msra.mxu0 %v9347_v26  ;;  %v9379_v26 = vcombine.low %v17350_v2, %v17349_v0  ;;  %v9652_v15 = vcombine.high %v17356_v9, %v17355_v14  ;;  %v17357_v0 = vld [vmem:[#allocation476_spill] sm:$0xff] }
 0x55e   : >> { %6999 = vmatprep.subr.bf16.mxu0 %v9364_v6  ;;  %v9396_v6 = vcombine.high %v17354_v7, %v17353_v4  ;;  %v17358_v2 = vld [vmem:[#allocation468_spill] sm:$0xff] }
 0x55f   : >> { %7041 = vmatpush1.bf16.msra.mxu1 %v9619_v12  ;;  %v9651_v12 = vcombine.low %v17356_v9, %v17355_v14  ;;  %v17364_v9 = vld [vmem:[#allocation740_spill] sm:$0xff] }
 0x560   : >> { %7042 = vmatprep.subr.bf16.mxu1 %v9636_v13  ;;  %v17359_v13 = vld [vmem:[#allocation732_spill] sm:$0xff] }
 0x561   : >> { %7000 = vmatpush1.bf16.msra.mxu0 %v9363_v34  ;;  %v9395_v34 = vcombine.low %v17354_v7, %v17353_v4  ;;  %v9668_v5 = vcombine.high %v17360_v3, %v17359_v13  ;;  %v17361_v4 = vld [vmem:[#allocation492_spill] sm:$0xff] }
 0x562   : >> { %7001 = vmatprep.subr.bf16.mxu0 %v9380_v1  ;;  %v9412_v1 = vcombine.high %v17358_v2, %v17357_v0  ;;  %v17362_v7 = vld [vmem:[#allocation484_spill] sm:$0xff] }
 0x563   : >> { %7043 = vmatpush1.bf16.msra.mxu1 %v9635_v10  ;;  %v9667_v10 = vcombine.low %v17360_v3, %v17359_v13  ;;  %v17368_v3 = vld [vmem:[#allocation756_spill] sm:$0xff] }
 0x564   : >> { %7044 = vmatprep.subr.bf16.mxu1 %v9652_v15  ;;  %v17363_v15 = vld [vmem:[#allocation748_spill] sm:$0xff] }
 0x565   : >> { %7002 = vmatpush1.bf16.msra.mxu0 %v9379_v26  ;;  %v9411_v26 = vcombine.low %v17358_v2, %v17357_v0  ;;  %v9684_v14 = vcombine.high %v17364_v9, %v17363_v15  ;;  %v17365_v0 = vld [vmem:[#allocation508_spill] sm:$0xff] }
 0x566   : >> { %7003 = vmatprep.subr.bf16.mxu0 %v9396_v6  ;;  %v9428_v6 = vcombine.high %v17362_v7, %v17361_v4  ;;  %v17366_v2 = vld [vmem:[#allocation500_spill] sm:$0xff] }
 0x567   : >> { %7045 = vmatpush1.bf16.msra.mxu1 %v9651_v12  ;;  %v9683_v12 = vcombine.low %v17364_v9, %v17363_v15  ;;  %v17372_v9 = vld [vmem:[#allocation772_spill] sm:$0xff] }
 0x568   : >> { %7046 = vmatprep.subr.bf16.mxu1 %v9668_v5  ;;  %v17367_v5 = vld [vmem:[#allocation764_spill] sm:$0xff] }
 0x569   : >> { %7004 = vmatpush1.bf16.msra.mxu0 %v9395_v34  ;;  %v9427_v34 = vcombine.low %v17362_v7, %v17361_v4  ;;  %v9700_v13 = vcombine.high %v17368_v3, %v17367_v5  ;;  %v17369_v4 = vld [vmem:[#allocation524_spill] sm:$0xff] }
 0x56a   : >> { %7005 = vmatprep.subr.bf16.mxu0 %v9412_v1  ;;  %v9444_v1 = vcombine.high %v17366_v2, %v17365_v0  ;;  %v17370_v7 = vld [vmem:[#allocation516_spill] sm:$0xff] }
 0x56b   : >> { %7047 = vmatpush1.bf16.msra.mxu1 %v9667_v10  ;;  %v9699_v10 = vcombine.low %v17368_v3, %v17367_v5  ;;  %v17376_v3 = vld [vmem:[#allocation290_spill] sm:$0xff] }
 0x56c   : >> { %7048 = vmatprep.subr.bf16.mxu1 %v9684_v14  ;;  %v17371_v14 = vld [vmem:[#allocation780_spill] sm:$0xff] }
 0x56d   : >> { %7006 = vmatpush1.bf16.msra.mxu0 %v9411_v26  ;;  %v9443_v26 = vcombine.low %v17366_v2, %v17365_v0  ;;  %v9716_v15 = vcombine.high %v17372_v9, %v17371_v14  ;;  %v17373_v0 = vld [vmem:[#allocation52_spill] sm:$0xff] }
 0x56e   : >> { %7007 = vmatprep.subr.bf16.mxu0 %v9428_v6  ;;  %v9460_v6 = vcombine.high %v17370_v7, %v17369_v4  ;;  %v17374_v2 = vld [vmem:[#allocation44_spill] sm:$0xff] }
 0x56f   : >> { %7049 = vmatpush1.bf16.msra.mxu1 %v9683_v12  ;;  %v9715_v12 = vcombine.low %v17372_v9, %v17371_v14  ;;  %v17380_v9 = vld [vmem:[#allocation305_spill] sm:$0xff] }
 0x570   : >> { %7050 = vmatprep.subr.bf16.mxu1 %v9700_v13  ;;  %v17375_v13 = vld [vmem:[#allocation297_spill] sm:$0xff] }
 0x571   : >> { %7008 = vmatpush1.bf16.msra.mxu0 %v9427_v34  ;;  %v9459_v34 = vcombine.low %v17370_v7, %v17369_v4  ;;  %v9222_v5 = vcombine.high %v17376_v3, %v17375_v13  ;;  %v17377_v4 = vld [vmem:[#allocation67_spill] sm:$0xff] }
 0x572   : >> { %7009 = vmatprep.subr.bf16.mxu0 %v9444_v1  ;;  %v8966_v1 = vcombine.high %v17374_v2, %v17373_v0  ;;  %v17378_v7 = vld [vmem:[#allocation59_spill] sm:$0xff] }
 0x573   : >> { %7051 = vmatpush1.bf16.msra.mxu1 %v9699_v10  ;;  %v9221_v10 = vcombine.low %v17376_v3, %v17375_v13  ;;  %v17384_v3 = vld [vmem:[#allocation319_spill] sm:$0xff] }
 0x574   : >> { %7052 = vmatprep.subr.bf16.mxu1 %v9716_v15  ;;  %v17379_v15 = vld [vmem:[#allocation312_spill] sm:$0xff] }
 0x575   : >> { %7010 = vmatpush1.bf16.msra.mxu0 %v9443_v26  ;;  %v8965_v26 = vcombine.low %v17374_v2, %v17373_v0  ;;  %v9238_v14 = vcombine.high %v17380_v9, %v17379_v15  ;;  %v17383_v2 = vld [vmem:[#allocation327_spill] sm:$0xff] }
 0x576   : >> { %7011 = vmatprep.subr.bf16.mxu0 %v9460_v6  ;;  %v8982_v6 = vcombine.high %v17378_v7, %v17377_v4  ;;  %v9254_v13 = vcombine.high %v17384_v3, %v17383_v2 }
 0x577   : >> { %7053 = vmatpush1.bf16.msra.mxu1 %v9715_v12  ;;  %v9237_v12 = vcombine.low %v17380_v9, %v17379_v15  ;;  %v17388_v9 = vld [vmem:[#allocation335_spill] sm:$0xff] }
 0x578   : >> { %7104 = vmatprep.subr.bf16.mxu1 %v9222_v5  ;;  %v17381_v5 = vld [vmem:[#allocation83_spill] sm:$0xff] }
 0x579   : >> { %7012 = vmatpush1.bf16.msra.mxu0 %v9459_v34  ;;  %v8981_v34 = vcombine.low %v17378_v7, %v17377_v4  ;;  %v17387_v7 = vld [vmem:[#allocation342_spill] sm:$0xff] }
 0x57a   : >> { %7063 = vmatprep.subr.bf16.mxu0 %v8966_v1  ;;  %7055 = vmatmul.mubr.bf16.vlgmr.msra.gmra.mrb[8].mxu1 %v13358_v61  ;;  %v17382_v1 = vld [vmem:[#allocation75_spill] sm:$0xff]  ;;  %v9270_v15 = vcombine.high %v17388_v9, %v17387_v7 }
 0x57b   : >> { %7105 = vmatpush1.bf16.msra.mxu1 %v9221_v10  ;;  %v8998_v0 = vcombine.high %v17382_v1, %v17381_v5  ;;  %7136 = vmatprep.mubr.bf16.mxu1 %v13124_v56  ;;  %v9253_v10 = vcombine.low %v17384_v3, %v17383_v2  ;;  %v17390_v2 = vld [vmem:[#allocation105_spill] sm:$0xff] }
 0x57c   : >> { %7014 = vmatmul.mubr.bf16.vlgmr.msra.gmra.mrb[8].mxu0 %v13218_v8  ;;  %7106 = vmatprep.subr.bf16.mxu1 %v9238_v14  ;;  %v17385_v14 = vld [vmem:[#allocation97_spill] sm:$0xff] }
 0x57d   : >> { %7064 = vmatpush1.bf16.msra.mxu0 %v8965_v26  ;;  %7095 = vmatprep.mubr.bf16.mxu0 %v13124_v56  ;;  %v8997_v26 = vcombine.low %v17382_v1, %v17381_v5  ;;  %v17389_v1 = vld [vmem:[#allocation113_spill] sm:$0xff] }
 0x57e   : >> { %7065 = vmatprep.subr.bf16.mxu0 %v8982_v6  ;;  %v17386_v6 = vld [vmem:[#allocation90_spill] sm:$0xff]  ;;  %v17392_v3 = vld [vmem:[#allocation349_spill] sm:$0xff] }
 0x57f   : >> { %7107 = vmatpush1.bf16.msra.mxu1 %v9237_v12  ;;  %v9014_v4 = vcombine.high %v17386_v6, %v17385_v14  ;;  %v9269_v12 = vcombine.low %v17388_v9, %v17387_v7  ;;  %v17394_v7 = vld [vmem:[#allocation121_spill] sm:$0xff]  ;;  %v17396_v9 = vld [vmem:[#allocation363_spill] sm:$0xff] }
 0x580   : >> { %7108 = vmatprep.subr.bf16.mxu1 %v9254_v13  ;;  %v17391_v13 = vld [vmem:[#allocation356_spill] sm:$0xff] }
 0x581   : >> { %7066 = vmatpush1.bf16.msra.mxu0 %v8981_v34  ;;  %v9013_v34 = vcombine.low %v17386_v6, %v17385_v14  ;;  %v9286_v5 = vcombine.high %v17392_v3, %v17391_v13  ;;  %v17393_v6 = vld [vmem:[#allocation129_spill] sm:$0xff] }
 0x582   : >> { %7067 = vmatprep.subr.bf16.mxu0 %v8998_v0  ;;  %v9030_v0 = vcombine.high %v17390_v2, %v17389_v1 }
 0x583   : >> { %7109 = vmatpush1.bf16.msra.mxu1 %v9253_v10  ;;  %v9285_v10 = vcombine.low %v17392_v3, %v17391_v13  ;;  %v17400_v3 = vld [vmem:[#allocation379_spill] sm:$0xff] }
 0x584   : >> { %7110 = vmatprep.subr.bf16.mxu1 %v9270_v15  ;;  %v17395_v15 = vld [vmem:[#allocation371_spill] sm:$0xff] }
 0x585   : >> { %7068 = vmatpush1.bf16.msra.mxu0 %v8997_v26  ;;  %v9029_v26 = vcombine.low %v17390_v2, %v17389_v1  ;;  %v9302_v14 = vcombine.high %v17396_v9, %v17395_v15  ;;  %v17397_v1 = vld [vmem:[#allocation143_spill] sm:$0xff]  ;;  %v17398_v2 = vld [vmem:[#allocation136_spill] sm:$0xff] }
 0x586   : >> { %7069 = vmatprep.subr.bf16.mxu0 %v9014_v4  ;;  %v9046_v4 = vcombine.high %v17394_v7, %v17393_v6 }
 0x587   : >> { %7111 = vmatpush1.bf16.msra.mxu1 %v9269_v12  ;;  %v9301_v12 = vcombine.low %v17396_v9, %v17395_v15  ;;  %v17404_v9 = vld [vmem:[#allocation394_spill] sm:$0xff] }
 0x588   : >> { %7112 = vmatprep.subr.bf16.mxu1 %v9286_v5  ;;  %v17399_v5 = vld [vmem:[#allocation387_spill] sm:$0xff] }
 0x589   : >> { %7070 = vmatpush1.bf16.msra.mxu0 %v9013_v34  ;;  %v9045_v34 = vcombine.low %v17394_v7, %v17393_v6  ;;  %v9318_v13 = vcombine.high %v17400_v3, %v17399_v5  ;;  %v17401_v6 = vld [vmem:[#allocation158_spill] sm:$0xff]  ;;  %v17402_v7 = vld [vmem:[#allocation151_spill] sm:$0xff] }
 0x58a   : >> { %7071 = vmatprep.subr.bf16.mxu0 %v9030_v0  ;;  %v9062_v0 = vcombine.high %v17398_v2, %v17397_v1 }
 0x58b   : >> { %7113 = vmatpush1.bf16.msra.mxu1 %v9285_v10  ;;  %v9317_v10 = vcombine.low %v17400_v3, %v17399_v5  ;;  %v17408_v3 = vld [vmem:[#allocation408_spill] sm:$0xff] }
 0x58c   : >> { %7114 = vmatprep.subr.bf16.mxu1 %v9302_v14  ;;  %v17403_v14 = vld [vmem:[#allocation401_spill] sm:$0xff] }
 0x58d   : >> { %7072 = vmatpush1.bf16.msra.mxu0 %v9029_v26  ;;  %v9061_v26 = vcombine.low %v17398_v2, %v17397_v1  ;;  %v9334_v15 = vcombine.high %v17404_v9, %v17403_v14  ;;  %v17405_v1 = vld [vmem:[#allocation172_spill] sm:$0xff]  ;;  %v17406_v2 = vld [vmem:[#allocation165_spill] sm:$0xff] }
 0x58e   : >> { %7073 = vmatprep.subr.bf16.mxu0 %v9046_v4  ;;  %v9078_v4 = vcombine.high %v17402_v7, %v17401_v6 }
 0x58f   : >> { %7115 = vmatpush1.bf16.msra.mxu1 %v9301_v12  ;;  %v9333_v12 = vcombine.low %v17404_v9, %v17403_v14  ;;  %v17412_v9 = vld [vmem:[#allocation423_spill] sm:$0xff] }
 0x590   : >> { %7116 = vmatprep.subr.bf16.mxu1 %v9318_v13  ;;  %v17407_v13 = vld [vmem:[#allocation416_spill] sm:$0xff] }
 0x591   : >> { %7074 = vmatpush1.bf16.msra.mxu0 %v9045_v34  ;;  %v9077_v34 = vcombine.low %v17402_v7, %v17401_v6  ;;  %v9350_v5 = vcombine.high %v17408_v3, %v17407_v13  ;;  %v17409_v6 = vld [vmem:[#allocation188_spill] sm:$0xff] }
 0x592   : >> { %7075 = vmatprep.subr.bf16.mxu0 %v9062_v0  ;;  %v9094_v0 = vcombine.high %v17406_v2, %v17405_v1  ;;  %v17410_v7 = vld [vmem:[#allocation180_spill] sm:$0xff] }
 0x593   : >> { %7117 = vmatpush1.bf16.msra.mxu1 %v9317_v10  ;;  %v9349_v10 = vcombine.low %v17408_v3, %v17407_v13  ;;  %v17416_v3 = vld [vmem:[#allocation438_spill] sm:$0xff] }
 0x594   : >> { %7118 = vmatprep.subr.bf16.mxu1 %v9334_v15  ;;  %v17411_v15 = vld [vmem:[#allocation430_spill] sm:$0xff] }
 0x595   : >> { %7076 = vmatpush1.bf16.msra.mxu0 %v9061_v26  ;;  %v9093_v26 = vcombine.low %v17406_v2, %v17405_v1  ;;  %v9366_v14 = vcombine.high %v17412_v9, %v17411_v15  ;;  %v17413_v1 = vld [vmem:[#allocation204_spill] sm:$0xff] }
 0x596   : >> { %7077 = vmatprep.subr.bf16.mxu0 %v9078_v4  ;;  %v9110_v4 = vcombine.high %v17410_v7, %v17409_v6  ;;  %v17414_v2 = vld [vmem:[#allocation196_spill] sm:$0xff] }
 0x597   : >> { %7119 = vmatpush1.bf16.msra.mxu1 %v9333_v12  ;;  %v9365_v12 = vcombine.low %v17412_v9, %v17411_v15  ;;  %v17420_v9 = vld [vmem:[#allocation453_spill] sm:$0xff] }
 0x598   : >> { %7120 = vmatprep.subr.bf16.mxu1 %v9350_v5  ;;  %v17415_v5 = vld [vmem:[#allocation445_spill] sm:$0xff] }
 0x599   : >> { %7078 = vmatpush1.bf16.msra.mxu0 %v9077_v34  ;;  %v9109_v34 = vcombine.low %v17410_v7, %v17409_v6  ;;  %v9382_v13 = vcombine.high %v17416_v3, %v17415_v5  ;;  %v17417_v6 = vld [vmem:[#allocation220_spill] sm:$0xff] }
 0x59a   : >> { %7079 = vmatprep.subr.bf16.mxu0 %v9094_v0  ;;  %v9126_v0 = vcombine.high %v17414_v2, %v17413_v1  ;;  %v17418_v7 = vld [vmem:[#allocation212_spill] sm:$0xff] }
 0x59b   : >> { %7121 = vmatpush1.bf16.msra.mxu1 %v9349_v10  ;;  %v9381_v10 = vcombine.low %v17416_v3, %v17415_v5  ;;  %v17424_v3 = vld [vmem:[#allocation469_spill] sm:$0xff] }
 0x59c   : >> { %7122 = vmatprep.subr.bf16.mxu1 %v9366_v14  ;;  %v17419_v14 = vld [vmem:[#allocation461_spill] sm:$0xff] }
 0x59d   : >> { %7080 = vmatpush1.bf16.msra.mxu0 %v9093_v26  ;;  %v9125_v26 = vcombine.low %v17414_v2, %v17413_v1  ;;  %v9398_v15 = vcombine.high %v17420_v9, %v17419_v14  ;;  %v17421_v1 = vld [vmem:[#allocation234_spill] sm:$0xff]  ;;  %v17422_v2 = vld [vmem:[#allocation227_spill] sm:$0xff] }
 0x59e   : >> { %7081 = vmatprep.subr.bf16.mxu0 %v9110_v4  ;;  %v9142_v4 = vcombine.high %v17418_v7, %v17417_v6 }
 0x59f   : >> { %7123 = vmatpush1.bf16.msra.mxu1 %v9365_v12  ;;  %v9397_v12 = vcombine.low %v17420_v9, %v17419_v14  ;;  %v17428_v9 = vld [vmem:[#allocation485_spill] sm:$0xff] }
 0x5a0   : >> { %7124 = vmatprep.subr.bf16.mxu1 %v9382_v13  ;;  %v17423_v13 = vld [vmem:[#allocation477_spill] sm:$0xff] }
 0x5a1   : >> { %7082 = vmatpush1.bf16.msra.mxu0 %v9109_v34  ;;  %v9141_v34 = vcombine.low %v17418_v7, %v17417_v6  ;;  %v9414_v5 = vcombine.high %v17424_v3, %v17423_v13  ;;  %v17425_v6 = vld [vmem:[#allocation250_spill] sm:$0xff] }
 0x5a2   : >> { %7083 = vmatprep.subr.bf16.mxu0 %v9126_v0  ;;  %v9158_v0 = vcombine.high %v17422_v2, %v17421_v1  ;;  %v17426_v7 = vld [vmem:[#allocation242_spill] sm:$0xff] }
 0x5a3   : >> { %7125 = vmatpush1.bf16.msra.mxu1 %v9381_v10  ;;  %v9413_v10 = vcombine.low %v17424_v3, %v17423_v13  ;;  %v17432_v3 = vld [vmem:[#allocation501_spill] sm:$0xff] }
 0x5a4   : >> { %7126 = vmatprep.subr.bf16.mxu1 %v9398_v15  ;;  %v17427_v15 = vld [vmem:[#allocation493_spill] sm:$0xff] }
 0x5a5   : >> { %7084 = vmatpush1.bf16.msra.mxu0 %v9125_v26  ;;  %v9157_v26 = vcombine.low %v17422_v2, %v17421_v1  ;;  %v9430_v14 = vcombine.high %v17428_v9, %v17427_v15  ;;  %v17429_v1 = vld [vmem:[#allocation266_spill] sm:$0xff] }
 0x5a6   : >> { %7085 = vmatprep.subr.bf16.mxu0 %v9142_v4  ;;  %v9174_v4 = vcombine.high %v17426_v7, %v17425_v6  ;;  %v17430_v2 = vld [vmem:[#allocation258_spill] sm:$0xff] }
 0x5a7   : >> { %7127 = vmatpush1.bf16.msra.mxu1 %v9397_v12  ;;  %v9429_v12 = vcombine.low %v17428_v9, %v17427_v15  ;;  %v17436_v9 = vld [vmem:[#allocation517_spill] sm:$0xff] }
 0x5a8   : >> { %7128 = vmatprep.subr.bf16.mxu1 %v9414_v5  ;;  %v17431_v5 = vld [vmem:[#allocation509_spill] sm:$0xff] }
 0x5a9   : >> { %7086 = vmatpush1.bf16.msra.mxu0 %v9141_v34  ;;  %v9173_v34 = vcombine.low %v17426_v7, %v17425_v6  ;;  %v9446_v13 = vcombine.high %v17432_v3, %v17431_v5  ;;  %v17433_v6 = vld [vmem:[#allocation282_spill] sm:$0xff] }
 0x5aa   : >> { %7087 = vmatprep.subr.bf16.mxu0 %v9158_v0  ;;  %v9190_v0 = vcombine.high %v17430_v2, %v17429_v1  ;;  %v17434_v7 = vld [vmem:[#allocation274_spill] sm:$0xff] }
 0x5ab   : >> { %7129 = vmatpush1.bf16.msra.mxu1 %v9413_v10  ;;  %v9445_v10 = vcombine.low %v17432_v3, %v17431_v5  ;;  %v17440_v3 = vld [vmem:[#allocation45_spill] sm:$0xff] }
 0x5ac   : >> { %7130 = vmatprep.subr.bf16.mxu1 %v9430_v14  ;;  %v17435_v14 = vld [vmem:[#allocation525_spill] sm:$0xff] }
 0x5ad   : >> { %7088 = vmatpush1.bf16.msra.mxu0 %v9157_v26  ;;  %v9189_v26 = vcombine.low %v17430_v2, %v17429_v1  ;;  %v9462_v15 = vcombine.high %v17436_v9, %v17435_v14  ;;  %v17437_v1 = vld [vmem:[#allocation541_spill] sm:$0xff] }
 0x5ae   : >> { %7089 = vmatprep.subr.bf16.mxu0 %v9174_v4  ;;  %v9206_v4 = vcombine.high %v17434_v7, %v17433_v6  ;;  %v17438_v2 = vld [vmem:[#allocation533_spill] sm:$0xff] }
 0x5af   : >> { %7131 = vmatpush1.bf16.msra.mxu1 %v9429_v12  ;;  %v9461_v12 = vcombine.low %v17436_v9, %v17435_v14  ;;  %v17444_v9 = vld [vmem:[#allocation60_spill] sm:$0xff] }
 0x5b0   : >> { %7132 = vmatprep.subr.bf16.mxu1 %v9446_v13  ;;  %v17439_v13 = vld [vmem:[#allocation53_spill] sm:$0xff] }
 0x5b1   : >> { %7090 = vmatpush1.bf16.msra.mxu0 %v9173_v34  ;;  %v9205_v34 = vcombine.low %v17434_v7, %v17433_v6  ;;  %v8968_v5 = vcombine.high %v17440_v3, %v17439_v13  ;;  %v17441_v6 = vld [vmem:[#allocation557_spill] sm:$0xff] }
 0x5b2   : >> { %7091 = vmatprep.subr.bf16.mxu0 %v9190_v0  ;;  %v9478_v0 = vcombine.high %v17438_v2, %v17437_v1  ;;  %v17442_v7 = vld [vmem:[#allocation549_spill] sm:$0xff] }
 0x5b3   : >> { %7133 = vmatpush1.bf16.msra.mxu1 %v9445_v10  ;;  %v8967_v10 = vcombine.low %v17440_v3, %v17439_v13  ;;  %v17448_v3 = vld [vmem:[#allocation76_spill] sm:$0xff] }
 0x5b4   : >> { %7134 = vmatprep.subr.bf16.mxu1 %v9462_v15  ;;  %v17443_v15 = vld [vmem:[#allocation68_spill] sm:$0xff] }
 0x5b5   : >> { %7092 = vmatpush1.bf16.msra.mxu0 %v9189_v26  ;;  %v9477_v26 = vcombine.low %v17438_v2, %v17437_v1  ;;  %v8984_v14 = vcombine.high %v17444_v9, %v17443_v15  ;;  %v17447_v2 = vld [vmem:[#allocation84_spill] sm:$0xff] }
 0x5b6   : >> { %7093 = vmatprep.subr.bf16.mxu0 %v9206_v4  ;;  %v9494_v4 = vcombine.high %v17442_v7, %v17441_v6  ;;  %v9000_v13 = vcombine.high %v17448_v3, %v17447_v2 }
 0x5b7   : >> { %7135 = vmatpush1.bf16.msra.mxu1 %v9461_v12  ;;  %v8983_v12 = vcombine.low %v17444_v9, %v17443_v15  ;;  %v17452_v9 = vld [vmem:[#allocation91_spill] sm:$0xff] }
 0x5b8   : >> { %7186 = vmatprep.subr.bf16.mxu1 %v8968_v5  ;;  %v17445_v5 = vld [vmem:[#allocation573_spill] sm:$0xff] }
 0x5b9   : >> { %7094 = vmatpush1.bf16.msra.mxu0 %v9205_v34  ;;  %v9493_v34 = vcombine.low %v17442_v7, %v17441_v6  ;;  %v17451_v7 = vld [vmem:[#allocation98_spill] sm:$0xff] }
 0x5ba   : >> { %7145 = vmatprep.subr.bf16.mxu0 %v9478_v0  ;;  %7137 = vmatmul.mubr.bf16.vlgmr.msra.gmra.mrb[12].mxu1 %v13218_v8  ;;  %v17446_v0 = vld [vmem:[#allocation565_spill] sm:$0xff]  ;;  %v9016_v15 = vcombine.high %v17452_v9, %v17451_v7 }
 0x5bb   : >> { %7187 = vmatpush1.bf16.msra.mxu1 %v8967_v10  ;;  %v9510_v1 = vcombine.high %v17446_v0, %v17445_v5  ;;  %7218 = vmatprep.mubr.bf16.mxu1 %v13124_v56  ;;  %v8999_v10 = vcombine.low %v17448_v3, %v17447_v2  ;;  %v17454_v2 = vld [vmem:[#allocation597_spill] sm:$0xff]  ;;  %v17456_v3 = vld [vmem:[#allocation106_spill] sm:$0xff] }
 0x5bc   : >> { %7096 = vmatmul.mubr.bf16.vlgmr.msra.gmra.mrb[12].mxu0 %v13218_v8  ;;  %7188 = vmatprep.subr.bf16.mxu1 %v8984_v14  ;;  %v17449_v14 = vld [vmem:[#allocation589_spill] sm:$0xff] }
 0x5bd   : >> { %7146 = vmatpush1.bf16.msra.mxu0 %v9477_v26  ;;  %7177 = vmatprep.mubr.bf16.mxu0 %v13230_v11  ;;  %v9509_v26 = vcombine.low %v17446_v0, %v17445_v5  ;;  %v17453_v0 = vld [vmem:[#allocation605_spill] sm:$0xff] }
 0x5be   : >> { %7147 = vmatprep.subr.bf16.mxu0 %v9494_v4  ;;  %v17450_v4 = vld [vmem:[#allocation581_spill] sm:$0xff] }
 0x5bf   : >> { %7189 = vmatpush1.bf16.msra.mxu1 %v8983_v12  ;;  %v9526_v6 = vcombine.high %v17450_v4, %v17449_v14  ;;  %v9015_v12 = vcombine.low %v17452_v9, %v17451_v7  ;;  %v17458_v7 = vld [vmem:[#allocation613_spill] sm:$0xff]  ;;  %v17460_v9 = vld [vmem:[#allocation122_spill] sm:$0xff] }
 0x5c0   : >> { %7190 = vmatprep.subr.bf16.mxu1 %v9000_v13  ;;  %v17455_v13 = vld [vmem:[#allocation114_spill] sm:$0xff] }
 0x5c1   : >> { %7148 = vmatpush1.bf16.msra.mxu0 %v9493_v34  ;;  %v9525_v34 = vcombine.low %v17450_v4, %v17449_v14  ;;  %v9032_v5 = vcombine.high %v17456_v3, %v17455_v13  ;;  %v17457_v4 = vld [vmem:[#allocation621_spill] sm:$0xff] }
 0x5c2   : >> { %7149 = vmatprep.subr.bf16.mxu0 %v9510_v1  ;;  %v9542_v1 = vcombine.high %v17454_v2, %v17453_v0 }
 0x5c3   : >> { %7191 = vmatpush1.bf16.msra.mxu1 %v8999_v10  ;;  %v9031_v10 = vcombine.low %v17456_v3, %v17455_v13  ;;  %v17464_v3 = vld [vmem:[#allocation137_spill] sm:$0xff] }
 0x5c4   : >> { %7192 = vmatprep.subr.bf16.mxu1 %v9016_v15  ;;  %v17459_v15 = vld [vmem:[#allocation130_spill] sm:$0xff] }
 0x5c5   : >> { %7150 = vmatpush1.bf16.msra.mxu0 %v9509_v26  ;;  %v9541_v26 = vcombine.low %v17454_v2, %v17453_v0  ;;  %v9048_v14 = vcombine.high %v17460_v9, %v17459_v15  ;;  %v17461_v0 = vld [vmem:[#allocation637_spill] sm:$0xff] }
 0x5c6   : >> { %7151 = vmatprep.subr.bf16.mxu0 %v9526_v6  ;;  %v9558_v6 = vcombine.high %v17458_v7, %v17457_v4  ;;  %v17462_v2 = vld [vmem:[#allocation629_spill] sm:$0xff] }
 0x5c7   : >> { %7193 = vmatpush1.bf16.msra.mxu1 %v9015_v12  ;;  %v9047_v12 = vcombine.low %v17460_v9, %v17459_v15 }
 0x5c8   : >> { %7194 = vmatprep.subr.bf16.mxu1 %v9032_v5  ;;  %v17463_v5 = vld [vmem:[#allocation144_spill] sm:$0xff] }
 0x5c9   : >> { %7152 = vmatpush1.bf16.msra.mxu0 %v9525_v34  ;;  %v9557_v34 = vcombine.low %v17458_v7, %v17457_v4  ;;  %v9064_v13 = vcombine.high %v17464_v3, %v17463_v5 }
 0x5ca   : >> { %7153 = vmatprep.subr.bf16.mxu0 %v9542_v1  ;;  %v9574_v1 = vcombine.high %v17462_v2, %v17461_v0 }
 0x5cb   : >> { %7195 = vmatpush1.bf16.msra.mxu1 %v9031_v10 }
 0x5cc   : >> { %7196 = vmatprep.subr.bf16.mxu1 %v9048_v14  ;;  %v9573_v14 = vcombine.low %v17462_v2, %v17461_v0  ;;  %v17476_v2 = vld [vmem:[#allocation677_spill] sm:$0xff] }
 0x5cd   : >> { %7154 = vmatpush1.bf16.msra.mxu0 %v9541_v26  ;;  %v6892_v17 = vpop.f32.mrb[0].mxu1 }
 0x5ce   : >> { %7155 = vmatprep.subr.bf16.mxu0 %v9558_v6  ;;  %v6894_v10 = vpop.f32.mrb[1].mxu1  ;;  %v9063_v6 = vcombine.low %v17464_v3, %v17463_v5  ;;  %v17478_v3 = vld [vmem:[#allocation181_spill] sm:$0xff] }
 0x5cf   : >> { %v6851_v16 = vpop.f32.mrb[0].mxu0  ;;  %v6896_v7 = vpop.f32.mrb[2].mxu1  ;;  %7197 = vmatpush1.bf16.msra.mxu1 %v9047_v12  ;;  %v17473_v12 = vld [vmem:[#allocation166_spill] sm:$0xff] }
 0x5d0   : >> { %v13676_v18 = vadd.f32 %v6892_v17, %v6851_v16  ;;  %v6853_v26 = vpop.f32.mrb[1].mxu0  ;;  %v6897_v15 = vpop.f32.mrb[3].mxu1  ;;  %7198 = vmatprep.subr.bf16.mxu1 %v9064_v13  ;;  %v17465_v16 = vld [vmem:[#allocation653_spill] sm:$0xff] }
 0x5d1   : >> { %v13678_v19 = vadd.f32 %v6894_v10, %v6853_v26  ;;  %v6855_v4 = vpop.f32.mrb[2].mxu0  ;;  %7156 = vmatpush1.bf16.msra.mxu0 %v9557_v34  ;;  %v17466_v17 = vld [vmem:[#allocation645_spill] sm:$0xff]  ;;  %v17468_v26 = vld [vmem:[#allocation152_spill] sm:$0xff] }
 0x5d2   : >> { %v6856_v9 = vpop.f32.mrb[3].mxu0  ;;  %7157 = vmatprep.subr.bf16.mxu0 %v9574_v1  ;;  %v9590_v20 = vcombine.high %v17466_v17, %v17465_v16  ;;  %v17469_v10 = vmov %v17468_v26  ;;  %v9080_v22 = vcombine.high %v17468_v26, %v17467_v21  ;;  %v9589_v7 = vcombine.low %v17466_v17, %v17465_v16  ;;  %v17471_v15 = vld [vmem:[#allocation661_spill] sm:$0xff] }
 0x5d3   : >> { %7199 = vmatpush1.bf16.msra.mxu1 %v9063_v6  ;;  %v9079_v4 = vcombine.low %v17469_v10, %v17467_v21  ;;  %v17470_v9 = vld [vmem:[#allocation669_spill] sm:$0xff] }
 0x5d4   : >> { %7200 = vmatprep.subr.bf16.mxu1 %v9080_v22  ;;  %v9606_v34 = vcombine.high %v17471_v15, %v17470_v9  ;;  %v17472_v13 = vld [vmem:[#allocation173_spill] sm:$0xff] }
 0x5d5   : >> { %7158 = vmatpush1.bf16.msra.mxu0 %v9573_v14  ;;  %v9096_v1 = vcombine.high %v17473_v12, %v17472_v13  ;;  %v9605_v14 = vcombine.low %v17471_v15, %v17470_v9  ;;  %v9095_v6 = vcombine.low %v17473_v12, %v17472_v13  ;;  %v17474_v26 = vld [vmem:[#allocation685_spill] sm:$0xff] }
 0x5d6   : >> { %7159 = vmatprep.subr.bf16.mxu0 %v9590_v20  ;;  %v17475_v0 = vmov %v17474_v26  ;;  %v9622_v20 = vcombine.high %v17476_v2, %v17474_v26  ;;  %v17477_v22 = vld [vmem:[#allocation189_spill] sm:$0xff] }
 0x5d7   : >> { %7201 = vmatpush1.bf16.msra.mxu1 %v9079_v4  ;;  %v9112_v5 = vcombine.high %v17478_v3, %v17477_v22  ;;  %v9111_v4 = vcombine.low %v17478_v3, %v17477_v22  ;;  %v17479_v9 = vld [vmem:[#allocation701_spill] sm:$0xff] }
 0x5d8   : >> { %7202 = vmatprep.subr.bf16.mxu1 %v9096_v1  ;;  %v17480_v10 = vld [vmem:[#allocation693_spill] sm:$0xff] }
 0x5d9   : >> { %7160 = vmatpush1.bf16.msra.mxu0 %v9589_v7  ;;  %v9621_v7 = vcombine.low %v17476_v2, %v17475_v0  ;;  %v17481_v1 = vld [vmem:[#allocation205_spill] sm:$0xff] }
 0x5da   : >> { %7161 = vmatprep.subr.bf16.mxu0 %v9606_v34  ;;  %v9638_v34 = vcombine.high %v17480_v10, %v17479_v9  ;;  %v17482_v12 = vld [vmem:[#allocation197_spill] sm:$0xff] }
 0x5db   : >> { %7203 = vmatpush1.bf16.msra.mxu1 %v9095_v6  ;;  %v9128_v13 = vcombine.high %v17482_v12, %v17481_v1  ;;  %v9127_v6 = vcombine.low %v17482_v12, %v17481_v1  ;;  %v17483_v26 = vld [vmem:[#allocation717_spill] sm:$0xff] }
 0x5dc   : >> { %7204 = vmatprep.subr.bf16.mxu1 %v9112_v5  ;;  %v17484_v0 = vmov %v17483_v26  ;;  %v17485_v2 = vld [vmem:[#allocation709_spill] sm:$0xff] }
 0x5dd   : >> { %7162 = vmatpush1.bf16.msra.mxu0 %v9605_v14  ;;  %v9637_v14 = vcombine.low %v17480_v10, %v17479_v9  ;;  %v17486_v5 = vld [vmem:[#allocation221_spill] sm:$0xff]  ;;  %v17491_v10 = vld [vmem:[#allocation228_spill] sm:$0xff] }
 0x5de   : >> { %7163 = vmatprep.subr.bf16.mxu0 %v9622_v20  ;;  %v9654_v20 = vcombine.high %v17485_v2, %v17483_v26  ;;  %v17487_v3 = vld [vmem:[#allocation213_spill] sm:$0xff] }
 0x5df   : >> { %7205 = vmatpush1.bf16.msra.mxu1 %v9111_v4  ;;  %v9144_v15 = vcombine.high %v17487_v3, %v17486_v5  ;;  %v9143_v4 = vcombine.low %v17487_v3, %v17486_v5  ;;  %v17488_v9 = vld [vmem:[#allocation733_spill] sm:$0xff]  ;;  %v17496_v3 = vld [vmem:[#allocation243_spill] sm:$0xff] }
 0x5e0   : >> { %7206 = vmatprep.subr.bf16.mxu1 %v9128_v13  ;;  %v17489_v1 = vld [vmem:[#allocation725_spill] sm:$0xff]  ;;  %v17490_v13 = vld [vmem:[#allocation235_spill] sm:$0xff] }
 0x5e1   : >> { %7164 = vmatpush1.bf16.msra.mxu0 %v9621_v7  ;;  %v9653_v7 = vcombine.low %v17485_v2, %v17484_v0  ;;  %v9160_v12 = vcombine.high %v17491_v10, %v17490_v13  ;;  %v17492_v26 = vld [vmem:[#allocation749_spill] sm:$0xff] }
 0x5e2   : >> { %7165 = vmatprep.subr.bf16.mxu0 %v9638_v34  ;;  %v9670_v34 = vcombine.high %v17489_v1, %v17488_v9  ;;  %v17493_v0 = vmov %v17492_v26  ;;  %v17494_v2 = vld [vmem:[#allocation741_spill] sm:$0xff] }
 0x5e3   : >> { %7207 = vmatpush1.bf16.msra.mxu1 %v9127_v6  ;;  %v9159_v6 = vcombine.low %v17491_v10, %v17490_v13  ;;  %v17500_v10 = vld [vmem:[#allocation259_spill] sm:$0xff] }
 0x5e4   : >> { %7208 = vmatprep.subr.bf16.mxu1 %v9144_v15  ;;  %v17495_v15 = vld [vmem:[#allocation251_spill] sm:$0xff] }
 0x5e5   : >> { %7166 = vmatpush1.bf16.msra.mxu0 %v9637_v14  ;;  %v9669_v14 = vcombine.low %v17489_v1, %v17488_v9  ;;  %v9176_v5 = vcombine.high %v17496_v3, %v17495_v15  ;;  %v17497_v1 = vld [vmem:[#allocation765_spill] sm:$0xff] }
 0x5e6   : >> { %7167 = vmatprep.subr.bf16.mxu0 %v9654_v20  ;;  %v9686_v20 = vcombine.high %v17494_v2, %v17492_v26  ;;  %v17498_v9 = vld [vmem:[#allocation757_spill] sm:$0xff] }
 0x5e7   : >> { %7209 = vmatpush1.bf16.msra.mxu1 %v9143_v4  ;;  %v9175_v4 = vcombine.low %v17496_v3, %v17495_v15  ;;  %v17501_v26 = vld [vmem:[#allocation781_spill] sm:$0xff]  ;;  %v17505_v3 = vld [vmem:[#allocation275_spill] sm:$0xff] }
 0x5e8   : >> { %7210 = vmatprep.subr.bf16.mxu1 %v9160_v12  ;;  %v17499_v12 = vld [vmem:[#allocation267_spill] sm:$0xff] }
 0x5e9   : >> { %7168 = vmatpush1.bf16.msra.mxu0 %v9653_v7  ;;  %v9685_v7 = vcombine.low %v17494_v2, %v17493_v0  ;;  %v9192_v13 = vcombine.high %v17500_v10, %v17499_v12  ;;  %v17502_v0 = vmov %v17501_v26  ;;  %v17503_v2 = vld [vmem:[#allocation773_spill] sm:$0xff] }
 0x5ea   : >> { %7169 = vmatprep.subr.bf16.mxu0 %v9670_v34  ;;  %v9702_v34 = vcombine.high %v17498_v9, %v17497_v1 }
 0x5eb   : >> { %7211 = vmatpush1.bf16.msra.mxu1 %v9159_v6  ;;  %v9191_v6 = vcombine.low %v17500_v10, %v17499_v12  ;;  %v17509_v10 = vld [vmem:[#allocation534_spill] sm:$0xff] }
 0x5ec   : >> { %7212 = vmatprep.subr.bf16.mxu1 %v9176_v5  ;;  %v17504_v5 = vld [vmem:[#allocation283_spill] sm:$0xff] }
 0x5ed   : >> { %7170 = vmatpush1.bf16.msra.mxu0 %v9669_v14  ;;  %v9701_v14 = vcombine.low %v17498_v9, %v17497_v1  ;;  %v9208_v15 = vcombine.high %v17505_v3, %v17504_v5  ;;  %v17506_v1 = vld [vmem:[#allocation298_spill] sm:$0xff]  ;;  %v17507_v9 = vld [vmem:[#allocation291_spill] sm:$0xff] }
 0x5ee   : >> { %7171 = vmatprep.subr.bf16.mxu0 %v9686_v20  ;;  %v9718_v20 = vcombine.high %v17503_v2, %v17501_v26  ;;  %v17510_v26 = vld [vmem:[#allocation313_spill] sm:$0xff] }
 0x5ef   : >> { %7213 = vmatpush1.bf16.msra.mxu1 %v9175_v4  ;;  %v9207_v4 = vcombine.low %v17505_v3, %v17504_v5  ;;  %v17514_v3 = vld [vmem:[#allocation550_spill] sm:$0xff] }
 0x5f0   : >> { %7214 = vmatprep.subr.bf16.mxu1 %v9192_v13  ;;  %v17508_v13 = vld [vmem:[#allocation542_spill] sm:$0xff] }
 0x5f1   : >> { %7172 = vmatpush1.bf16.msra.mxu0 %v9685_v7  ;;  %v9717_v7 = vcombine.low %v17503_v2, %v17502_v0  ;;  %v9480_v12 = vcombine.high %v17509_v10, %v17508_v13  ;;  %v17511_v0 = vmov %v17510_v26  ;;  %v17512_v2 = vld [vmem:[#allocation306_spill] sm:$0xff] }
 0x5f2   : >> { %7173 = vmatprep.subr.bf16.mxu0 %v9702_v34  ;;  %v9224_v34 = vcombine.high %v17507_v9, %v17506_v1 }
 0x5f3   : >> { %7215 = vmatpush1.bf16.msra.mxu1 %v9191_v6  ;;  %v9479_v6 = vcombine.low %v17509_v10, %v17508_v13  ;;  %v17519_v10 = vld [vmem:[#allocation566_spill] sm:$0xff] }
 0x5f4   : >> { %7216 = vmatprep.subr.bf16.mxu1 %v9208_v15  ;;  %v17513_v15 = vld [vmem:[#allocation558_spill] sm:$0xff] }
 0x5f5   : >> { %7174 = vmatpush1.bf16.msra.mxu0 %v9701_v14  ;;  %v9223_v14 = vcombine.low %v17507_v9, %v17506_v1  ;;  %v9496_v5 = vcombine.high %v17514_v3, %v17513_v15  ;;  %v17518_v9 = vld [vmem:[#allocation574_spill] sm:$0xff] }
 0x5f6   : >> { %7175 = vmatprep.subr.bf16.mxu0 %v9718_v20  ;;  %v9240_v20 = vcombine.high %v17512_v2, %v17510_v26  ;;  %v9512_v13 = vcombine.high %v17519_v10, %v17518_v9 }
 0x5f7   : >> { %7217 = vmatpush1.bf16.msra.mxu1 %v9207_v4  ;;  %v9495_v4 = vcombine.low %v17514_v3, %v17513_v15 }
 0x5f8   : >> { %7268 = vmatprep.subr.bf16.mxu1 %v9480_v12  ;;  %v17515_v12 = vld [vmem:[#allocation328_spill] sm:$0xff] }
 0x5f9   : >> { %7176 = vmatpush1.bf16.msra.mxu0 %v9717_v7  ;;  %v9239_v7 = vcombine.low %v17512_v2, %v17511_v0  ;;  %v17522_v0 = vld [vmem:[#allocation590_spill] sm:$0xff] }
 0x5fa   : >> { %7227 = vmatprep.subr.bf16.mxu0 %v9224_v34  ;;  %7219 = vmatmul.mubr.bf16.vlgmr.msra.gmra.mrb[16].mxu1 %v13218_v8  ;;  %v17516_v34 = vld [vmem:[#allocation320_spill] sm:$0xff]  ;;  %v17523_v2 = vld [vmem:[#allocation582_spill] sm:$0xff] }
 0x5fb   : >> { %7269 = vmatpush1.bf16.msra.mxu1 %v9479_v6  ;;  %v17517_v1 = vmov %v17516_v34  ;;  %v9256_v26 = vcombine.high %v17516_v34, %v17515_v12  ;;  %7300 = vmatprep.mubr.bf16.mxu1 %v13230_v11  ;;  %v9511_v6 = vcombine.low %v17519_v10, %v17518_v9  ;;  %v9528_v3 = vcombine.high %v17523_v2, %v17522_v0  ;;  %v17525_v9 = vld [vmem:[#allocation350_spill] sm:$0xff] }
 0x5fc   : >> { %7178 = vmatmul.mubr.bf16.vlgmr.msra.gmra.mrb[16].mxu0 %v13358_v61  ;;  %7270 = vmatprep.subr.bf16.mxu1 %v9496_v5  ;;  %v17520_v5 = vld [vmem:[#allocation343_spill] sm:$0xff]  ;;  %v17527_v10 = vld [vmem:[#allocation598_spill] sm:$0xff] }
 0x5fd   : >> { %7228 = vmatpush1.bf16.msra.mxu0 %v9223_v14  ;;  %7259 = vmatprep.mubr.bf16.mxu0 %v13124_v56  ;;  %v9255_v14 = vcombine.low %v17517_v1, %v17515_v12  ;;  %v17524_v1 = vld [vmem:[#allocation357_spill] sm:$0xff] }
 0x5fe   : >> { %7229 = vmatprep.subr.bf16.mxu0 %v9240_v20  ;;  %v17521_v20 = vld [vmem:[#allocation336_spill] sm:$0xff] }
 0x5ff   : >> { %7271 = vmatpush1.bf16.msra.mxu1 %v9495_v4  ;;  %v9272_v34 = vcombine.high %v17521_v20, %v17520_v5  ;;  %v9527_v4 = vcombine.low %v17523_v2, %v17522_v0  ;;  %v17529_v0 = vld [vmem:[#allocation364_spill] sm:$0xff]  ;;  %v17531_v2 = vld [vmem:[#allocation614_spill] sm:$0xff] }
 0x600   : >> { %7272 = vmatprep.subr.bf16.mxu1 %v9512_v13  ;;  %v17526_v13 = vld [vmem:[#allocation606_spill] sm:$0xff] }
 0x601   : >> { %7230 = vmatpush1.bf16.msra.mxu0 %v9239_v7  ;;  %v9271_v7 = vcombine.low %v17521_v20, %v17520_v5  ;;  %v9544_v12 = vcombine.high %v17527_v10, %v17526_v13  ;;  %v17528_v5 = vld [vmem:[#allocation372_spill] sm:$0xff] }
 0x602   : >> { %7231 = vmatprep.subr.bf16.mxu0 %v9256_v26  ;;  %v9288_v26 = vcombine.high %v17525_v9, %v17524_v1 }
 0x603   : >> { %7273 = vmatpush1.bf16.msra.mxu1 %v9511_v6  ;;  %v9543_v6 = vcombine.low %v17527_v10, %v17526_v13  ;;  %v17535_v10 = vld [vmem:[#allocation630_spill] sm:$0xff] }
 0x604   : >> { %7274 = vmatprep.subr.bf16.mxu1 %v9528_v3  ;;  %v17530_v3 = vld [vmem:[#allocation622_spill] sm:$0xff] }
 0x605   : >> { %7232 = vmatpush1.bf16.msra.mxu0 %v9255_v14  ;;  %v9287_v14 = vcombine.low %v17525_v9, %v17524_v1  ;;  %v9560_v15 = vcombine.high %v17531_v2, %v17530_v3  ;;  %v17532_v1 = vld [vmem:[#allocation388_spill] sm:$0xff] }
 0x606   : >> { %7233 = vmatprep.subr.bf16.mxu0 %v9272_v34  ;;  %v9304_v34 = vcombine.high %v17529_v0, %v17528_v5  ;;  %v17533_v9 = vld [vmem:[#allocation380_spill] sm:$0xff] }
 0x607   : >> { %7275 = vmatpush1.bf16.msra.mxu1 %v9527_v4  ;;  %v9559_v4 = vcombine.low %v17531_v2, %v17530_v3  ;;  %v9319_v2 = vcombine.low %v17533_v9, %v17532_v1 }
 0x608   : >> { %7276 = vmatprep.subr.bf16.mxu1 %v9544_v12  ;;  %v17534_v12 = vld [vmem:[#allocation638_spill] sm:$0xff] }
 0x609   : >> { %7234 = vmatpush1.bf16.msra.mxu0 %v9271_v7  ;;  %v9303_v7 = vcombine.low %v17529_v0, %v17528_v5  ;;  %v9576_v13 = vcombine.high %v17535_v10, %v17534_v12  ;;  %v9575_v3 = vcombine.low %v17535_v10, %v17534_v12  ;;  %v17546_v10 = vld [vmem:[#allocation424_spill] sm:$0xff]  ;;  %v17548_v12 = vld [vmem:[#allocation678_spill] sm:$0xff] }
 0x60a   : >> { %7235 = vmatprep.subr.bf16.mxu0 %v9288_v26  ;;  %v9320_v26 = vcombine.high %v17533_v9, %v17532_v1  ;;  %v17545_v9 = vld [vmem:[#allocation431_spill] sm:$0xff] }
 0x60b   : >> { %7277 = vmatpush1.bf16.msra.mxu1 %v9543_v6 }
 0x60c   : >> { %7278 = vmatprep.subr.bf16.mxu1 %v9560_v15 }
 0x60d   : >> { %7236 = vmatpush1.bf16.msra.mxu0 %v9287_v14  ;;  %v13812_v17 = vpop.f32.mrb[4].mxu1 }
 0x60e   : >> { %7237 = vmatprep.subr.bf16.mxu0 %v9304_v34  ;;  %v13817_v20 = vpop.f32.mrb[5].mxu1 }
 0x60f   : >> { %v6933_v16 = vpop.f32.mrb[4].mxu0  ;;  %v6978_v15 = vpop.f32.mrb[6].mxu1  ;;  %7279 = vmatpush1.bf16.msra.mxu1 %v9559_v4 }
 0x610   : >> { %v13815_v14 = vadd.f32 %v6933_v16, %v13676_v18  ;;  %v6935_v6 = vpop.f32.mrb[5].mxu0  ;;  %v6979_v21 = vpop.f32.mrb[7].mxu1  ;;  %7280 = vmatprep.subr.bf16.mxu1 %v9576_v13  ;;  %v17536_v18 = vld [vmem:[#allocation402_spill] sm:$0xff]  ;;  %v17537_v16 = vld [vmem:[#allocation395_spill] sm:$0xff] }
 0x611   : >> { %v13820_v0 = vadd.f32 %v6935_v6, %v13678_v19  ;;  %v6937_v34 = vpop.f32.mrb[6].mxu0  ;;  %7238 = vmatpush1.bf16.msra.mxu0 %v9303_v7  ;;  %v9336_v22 = vcombine.high %v17537_v16, %v17536_v18  ;;  %v17539_v19 = vld [vmem:[#allocation646_spill] sm:$0xff]  ;;  %v9335_v7 = vcombine.low %v17537_v16, %v17536_v18  ;;  %v17541_v21 = vld [vmem:[#allocation409_spill] sm:$0xff] }
 0x612   : >> { %v6938_v5 = vpop.f32.mrb[7].mxu0  ;;  %7239 = vmatprep.subr.bf16.mxu0 %v9320_v26  ;;  %v9592_v6 = vcombine.high %v17539_v19, %v17538_v23  ;;  %v9591_v4 = vcombine.low %v17539_v19, %v17538_v23  ;;  %v17542_v13 = vld [vmem:[#allocation670_spill] sm:$0xff] }
 0x613   : >> { %7281 = vmatpush1.bf16.msra.mxu1 %v9575_v3  ;;  %v17540_v5 = vld [vmem:[#allocation417_spill] sm:$0xff]  ;;  %v17543_v34 = vld [vmem:[#allocation662_spill] sm:$0xff] }
 0x614   : >> { %7282 = vmatprep.subr.bf16.mxu1 %v9592_v6  ;;  %v9352_v26 = vcombine.high %v17541_v21, %v17540_v5  ;;  %v17544_v15 = vmov %v17543_v34  ;;  %v9608_v1 = vcombine.high %v17543_v34, %v17542_v13  ;;  %v17547_v6 = vld [vmem:[#allocation686_spill] sm:$0xff] }
 0x615   : >> { %7240 = vmatpush1.bf16.msra.mxu0 %v9319_v2  ;;  %v9351_v2 = vcombine.low %v17541_v21, %v17540_v5  ;;  %v9607_v3 = vcombine.low %v17544_v15, %v17542_v13  ;;  %v9624_v16 = vcombine.high %v17548_v12, %v17547_v6  ;;  %v17549_v34 = vld [vmem:[#allocation446_spill] sm:$0xff]  ;;  %v17551_v13 = vld [vmem:[#allocation439_spill] sm:$0xff] }
 0x616   : >> { %7241 = vmatprep.subr.bf16.mxu0 %v9336_v22  ;;  %v9368_v22 = vcombine.high %v17546_v10, %v17545_v9  ;;  %v17550_v5 = vmov %v17549_v34  ;;  %v17553_v15 = vld [vmem:[#allocation694_spill] sm:$0xff] }
 0x617   : >> { %7283 = vmatpush1.bf16.msra.mxu1 %v9591_v4  ;;  %v9623_v4 = vcombine.low %v17548_v12, %v17547_v6  ;;  %v17555_v6 = vld [vmem:[#allocation454_spill] sm:$0xff] }
 0x618   : >> { %7284 = vmatprep.subr.bf16.mxu1 %v9608_v1  ;;  %v17552_v1 = vld [vmem:[#allocation702_spill] sm:$0xff] }
 0x619   : >> { %7242 = vmatpush1.bf16.msra.mxu0 %v9335_v7  ;;  %v9367_v7 = vcombine.low %v17546_v10, %v17545_v9  ;;  %v9640_v18 = vcombine.high %v17553_v15, %v17552_v1  ;;  %v17554_v9 = vld [vmem:[#allocation462_spill] sm:$0xff] }
 0x61a   : >> { %7243 = vmatprep.subr.bf16.mxu0 %v9352_v26  ;;  %v9384_v26 = vcombine.high %v17551_v13, %v17549_v34  ;;  %v17557_v10 = vld [vmem:[#allocation710_spill] sm:$0xff] }
 0x61b   : >> { %7285 = vmatpush1.bf16.msra.mxu1 %v9607_v3  ;;  %v9639_v3 = vcombine.low %v17553_v15, %v17552_v1  ;;  %v17558_v34 = vld [vmem:[#allocation478_spill] sm:$0xff] }
 0x61c   : >> { %7286 = vmatprep.subr.bf16.mxu1 %v9624_v16  ;;  %v17556_v16 = vld [vmem:[#allocation718_spill] sm:$0xff] }
 0x61d   : >> { %7244 = vmatpush1.bf16.msra.mxu0 %v9351_v2  ;;  %v9383_v2 = vcombine.low %v17551_v13, %v17550_v5  ;;  %v9656_v12 = vcombine.high %v17557_v10, %v17556_v16  ;;  %v17559_v5 = vmov %v17558_v34  ;;  %v17560_v1 = vld [vmem:[#allocation470_spill] sm:$0xff] }
 0x61e   : >> { %7245 = vmatprep.subr.bf16.mxu0 %v9368_v22  ;;  %v9400_v22 = vcombine.high %v17555_v6, %v17554_v9  ;;  %v17562_v13 = vld [vmem:[#allocation726_spill] sm:$0xff] }
 0x61f   : >> { %7287 = vmatpush1.bf16.msra.mxu1 %v9623_v4  ;;  %v9655_v4 = vcombine.low %v17557_v10, %v17556_v16  ;;  %v17566_v10 = vld [vmem:[#allocation742_spill] sm:$0xff] }
 0x620   : >> { %7288 = vmatprep.subr.bf16.mxu1 %v9640_v18  ;;  %v17561_v18 = vld [vmem:[#allocation734_spill] sm:$0xff] }
 0x621   : >> { %7246 = vmatpush1.bf16.msra.mxu0 %v9367_v7  ;;  %v9399_v7 = vcombine.low %v17555_v6, %v17554_v9  ;;  %v9672_v15 = vcombine.high %v17562_v13, %v17561_v18  ;;  %v17563_v6 = vld [vmem:[#allocation494_spill] sm:$0xff] }
 0x622   : >> { %7247 = vmatprep.subr.bf16.mxu0 %v9384_v26  ;;  %v9416_v26 = vcombine.high %v17560_v1, %v17558_v34  ;;  %v17564_v9 = vld [vmem:[#allocation486_spill] sm:$0xff] }
 0x623   : >> { %7289 = vmatpush1.bf16.msra.mxu1 %v9639_v3  ;;  %v9671_v3 = vcombine.low %v17562_v13, %v17561_v18  ;;  %v17567_v34 = vld [vmem:[#allocation510_spill] sm:$0xff] }
 0x624   : >> { %7290 = vmatprep.subr.bf16.mxu1 %v9656_v12  ;;  %v17565_v12 = vld [vmem:[#allocation750_spill] sm:$0xff] }
 0x625   : >> { %7248 = vmatpush1.bf16.msra.mxu0 %v9383_v2  ;;  %v9415_v2 = vcombine.low %v17560_v1, %v17559_v5  ;;  %v9688_v16 = vcombine.high %v17566_v10, %v17565_v12  ;;  %v17568_v1 = vmov %v17567_v34  ;;  %v17569_v5 = vld [vmem:[#allocation502_spill] sm:$0xff] }
 0x626   : >> { %7249 = vmatprep.subr.bf16.mxu0 %v9400_v22  ;;  %v9432_v22 = vcombine.high %v17564_v9, %v17563_v6  ;;  %v17571_v13 = vld [vmem:[#allocation758_spill] sm:$0xff] }
 0x627   : >> { %7291 = vmatpush1.bf16.msra.mxu1 %v9655_v4  ;;  %v9687_v4 = vcombine.low %v17566_v10, %v17565_v12  ;;  %v17579_v12 = vld [vmem:[#allocation292_spill] sm:$0xff] }
 0x628   : >> { %7292 = vmatprep.subr.bf16.mxu1 %v9672_v15  ;;  %v17570_v15 = vld [vmem:[#allocation766_spill] sm:$0xff] }
 0x629   : >> { %7250 = vmatpush1.bf16.msra.mxu0 %v9399_v7  ;;  %v9431_v7 = vcombine.low %v17564_v9, %v17563_v6  ;;  %v9704_v18 = vcombine.high %v17571_v13, %v17570_v15  ;;  %v17572_v6 = vld [vmem:[#allocation526_spill] sm:$0xff] }
 0x62a   : >> { %7251 = vmatprep.subr.bf16.mxu0 %v9416_v26  ;;  %v9448_v26 = vcombine.high %v17569_v5, %v17567_v34  ;;  %v17573_v9 = vld [vmem:[#allocation518_spill] sm:$0xff] }
 0x62b   : >> { %7293 = vmatpush1.bf16.msra.mxu1 %v9671_v3  ;;  %v9703_v3 = vcombine.low %v17571_v13, %v17570_v15  ;;  %v17575_v34 = vld [vmem:[#allocation54_spill] sm:$0xff]  ;;  %v17583_v15 = vld [vmem:[#allocation307_spill] sm:$0xff] }
 0x62c   : >> { %7294 = vmatprep.subr.bf16.mxu1 %v9688_v16  ;;  %v17574_v16 = vld [vmem:[#allocation774_spill] sm:$0xff] }
 0x62d   : >> { %7252 = vmatpush1.bf16.msra.mxu0 %v9415_v2  ;;  %v9447_v2 = vcombine.low %v17569_v5, %v17568_v1  ;;  %v9720_v10 = vcombine.high %v17574_v16, %v13021_v40  ;;  %v17576_v1 = vmov %v17575_v34  ;;  %v17577_v5 = vld [vmem:[#allocation46_spill] sm:$0xff] }
 0x62e   : >> { %7253 = vmatprep.subr.bf16.mxu0 %v9432_v22  ;;  %v9464_v22 = vcombine.high %v17573_v9, %v17572_v6 }
 0x62f   : >> { %7295 = vmatpush1.bf16.msra.mxu1 %v9687_v4  ;;  %v9719_v4 = vcombine.low %v17574_v16, %v13021_v40  ;;  %v10223_v40 = vld [vmem:[#allocation23 + $0x90] ss:$8 sps:$4 sm:$0xff] (%p2957_p10)  }
 0x630   : >> { %7296 = vmatprep.subr.bf16.mxu1 %v9704_v18  ;;  %v17578_v18 = vld [vmem:[#allocation299_spill] sm:$0xff] }
 0x631   : >> { %7254 = vmatpush1.bf16.msra.mxu0 %v9431_v7  ;;  %v9463_v7 = vcombine.low %v17573_v9, %v17572_v6  ;;  %v9226_v13 = vcombine.high %v17579_v12, %v17578_v18  ;;  %v17580_v6 = vld [vmem:[#allocation69_spill] sm:$0xff] }
 0x632   : >> { %7255 = vmatprep.subr.bf16.mxu0 %v9448_v26  ;;  %v8970_v26 = vcombine.high %v17577_v5, %v17575_v34  ;;  %v17581_v9 = vld [vmem:[#allocation61_spill] sm:$0xff] }
 0x633   : >> { %7297 = vmatpush1.bf16.msra.mxu1 %v9703_v3  ;;  %v9225_v3 = vcombine.low %v17579_v12, %v17578_v18  ;;  %v17585_v34 = vld [vmem:[#allocation77_spill] sm:$0xff] }
 0x634   : >> { %7298 = vmatprep.subr.bf16.mxu1 %v9720_v10  ;;  %v17582_v10 = vld [vmem:[#allocation314_spill] sm:$0xff]  ;;  %v17588_v12 = vld [vmem:[#allocation321_spill] sm:$0xff] }
 0x635   : >> { %7256 = vmatpush1.bf16.msra.mxu0 %v9447_v2  ;;  %v8969_v2 = vcombine.low %v17577_v5, %v17576_v1  ;;  %v9242_v16 = vcombine.high %v17583_v15, %v17582_v10  ;;  %v17586_v1 = vmov %v17585_v34  ;;  %v17587_v5 = vld [vmem:[#allocation329_spill] sm:$0xff] }
 0x636   : >> { %7257 = vmatprep.subr.bf16.mxu0 %v9464_v22  ;;  %v8986_v22 = vcombine.high %v17581_v9, %v17580_v6  ;;  %v9258_v18 = vcombine.high %v17588_v12, %v17587_v5 }
 0x637   : >> { %7299 = vmatpush1.bf16.msra.mxu1 %v9719_v4  ;;  %v9241_v4 = vcombine.low %v17583_v15, %v17582_v10  ;;  %v17597_v15 = vld [vmem:[#allocation131_spill] sm:$0xff] }
 0x638   : >> { %7350 = vmatprep.subr.bf16.mxu1 %v9226_v13  ;;  %v17584_v13 = vld [vmem:[#allocation85_spill] sm:$0xff] }
 0x639   : >> { %7258 = vmatpush1.bf16.msra.mxu0 %v9463_v7  ;;  %v8985_v7 = vcombine.low %v17581_v9, %v17580_v6  ;;  %v17591_v6 = vld [vmem:[#allocation344_spill] sm:$0xff]  ;;  %v17592_v9 = vld [vmem:[#allocation337_spill] sm:$0xff] }
 0x63a   : >> { %7309 = vmatprep.subr.bf16.mxu0 %v8970_v26  ;;  %7301 = vmatmul.mubr.bf16.vlgmr.msra.gmra.mrb[20].mxu1 %v13358_v61  ;;  %v9002_v26 = vcombine.high %v17585_v34, %v17584_v13  ;;  %v9274_v10 = vcombine.high %v17592_v9, %v17591_v6 }
 0x63b   : >> { %7351 = vmatpush1.bf16.msra.mxu1 %v9225_v3  ;;  %7382 = vmatprep.mubr.bf16.mxu1 %v13124_v56  ;;  %v9257_v3 = vcombine.low %v17588_v12, %v17587_v5  ;;  %v17594_v5 = vld [vmem:[#allocation107_spill] sm:$0xff] }
 0x63c   : >> { %7260 = vmatmul.mubr.bf16.vlgmr.msra.gmra.mrb[20].mxu0 %v13218_v8  ;;  %7352 = vmatprep.subr.bf16.mxu1 %v9242_v16  ;;  %v17589_v16 = vld [vmem:[#allocation99_spill] sm:$0xff] }
 0x63d   : >> { %7310 = vmatpush1.bf16.msra.mxu0 %v8969_v2  ;;  %7341 = vmatprep.mubr.bf16.mxu0 %v13124_v56  ;;  %v9001_v2 = vcombine.low %v17586_v1, %v17584_v13  ;;  %v17593_v1 = vld [vmem:[#allocation115_spill] sm:$0xff] }
 0x63e   : >> { %7311 = vmatprep.subr.bf16.mxu0 %v8986_v22  ;;  %v17590_v22 = vld [vmem:[#allocation92_spill] sm:$0xff]  ;;  %v17596_v12 = vld [vmem:[#allocation351_spill] sm:$0xff] }
 0x63f   : >> { %7353 = vmatpush1.bf16.msra.mxu1 %v9241_v4  ;;  %v9018_v34 = vcombine.high %v17590_v22, %v17589_v16  ;;  %v9273_v4 = vcombine.low %v17592_v9, %v17591_v6  ;;  %v17598_v6 = vld [vmem:[#allocation123_spill] sm:$0xff]  ;;  %v17600_v9 = vld [vmem:[#allocation365_spill] sm:$0xff] }
 0x640   : >> { %7354 = vmatprep.subr.bf16.mxu1 %v9258_v18  ;;  %v17595_v18 = vld [vmem:[#allocation358_spill] sm:$0xff] }
 0x641   : >> { %7312 = vmatpush1.bf16.msra.mxu0 %v8985_v7  ;;  %v9017_v7 = vcombine.low %v17590_v22, %v17589_v16  ;;  %v9290_v13 = vcombine.high %v17596_v12, %v17595_v18 }
 0x642   : >> { %7313 = vmatprep.subr.bf16.mxu0 %v9002_v26  ;;  %v9034_v26 = vcombine.high %v17594_v5, %v17593_v1 }
 0x643   : >> { %7355 = vmatpush1.bf16.msra.mxu1 %v9257_v3  ;;  %v9289_v3 = vcombine.low %v17596_v12, %v17595_v18  ;;  %v17604_v12 = vld [vmem:[#allocation381_spill] sm:$0xff] }
 0x644   : >> { %7356 = vmatprep.subr.bf16.mxu1 %v9274_v10  ;;  %v17599_v10 = vld [vmem:[#allocation373_spill] sm:$0xff] }
 0x645   : >> { %7314 = vmatpush1.bf16.msra.mxu0 %v9001_v2  ;;  %v9033_v2 = vcombine.low %v17594_v5, %v17593_v1  ;;  %v9306_v16 = vcombine.high %v17600_v9, %v17599_v10  ;;  %v17601_v1 = vld [vmem:[#allocation145_spill] sm:$0xff]  ;;  %v17602_v5 = vld [vmem:[#allocation138_spill] sm:$0xff] }
 0x646   : >> { %7315 = vmatprep.subr.bf16.mxu0 %v9018_v34  ;;  %v9050_v34 = vcombine.high %v17598_v6, %v17597_v15 }
 0x647   : >> { %7357 = vmatpush1.bf16.msra.mxu1 %v9273_v4  ;;  %v9305_v4 = vcombine.low %v17600_v9, %v17599_v10 }
 0x648   : >> { %7358 = vmatprep.subr.bf16.mxu1 %v9290_v13  ;;  %v17603_v13 = vld [vmem:[#allocation389_spill] sm:$0xff] }
 0x649   : >> { %7316 = vmatpush1.bf16.msra.mxu0 %v9017_v7  ;;  %v9049_v7 = vcombine.low %v17598_v6, %v17597_v15  ;;  %v9322_v18 = vcombine.high %v17604_v12, %v17603_v13 }
 0x64a   : >> { %7317 = vmatprep.subr.bf16.mxu0 %v9034_v26  ;;  %v9066_v26 = vcombine.high %v17602_v5, %v17601_v1 }
 0x64b   : >> { %7359 = vmatpush1.bf16.msra.mxu1 %v9289_v3 }
 0x64c   : >> { %7360 = vmatprep.subr.bf16.mxu1 %v9306_v16  ;;  %v9065_v16 = vcombine.low %v17602_v5, %v17601_v1 }
 0x64d   : >> { %7318 = vmatpush1.bf16.msra.mxu0 %v9033_v2  ;;  %v7056_v21 = vpop.f32.mrb[8].mxu1 }
 0x64e   : >> { %7319 = vmatprep.subr.bf16.mxu0 %v9050_v34  ;;  %v7058_v3 = vpop.f32.mrb[9].mxu1  ;;  %v9321_v34 = vcombine.low %v17604_v12, %v17603_v13 }
 0x64f   : >> { %v7015_v19 = vpop.f32.mrb[8].mxu0  ;;  %v7060_v15 = vpop.f32.mrb[10].mxu1  ;;  %7361 = vmatpush1.bf16.msra.mxu1 %v9305_v4 }
 0x650   : >> { %v7016_v22 = vadd.f32 %v7015_v19, %v13812_v17  ;;  %v7017_v2 = vpop.f32.mrb[9].mxu0  ;;  %v7061_v24 = vpop.f32.mrb[11].mxu1  ;;  %7362 = vmatprep.subr.bf16.mxu1 %v9322_v18  ;;  %v17605_v17 = vld [vmem:[#allocation160_spill] sm:$0xff]  ;;  %v17606_v19 = vld [vmem:[#allocation153_spill] sm:$0xff] }
 0x651   : >> { %v7018_v23 = vadd.f32 %v7017_v2, %v13817_v20  ;;  %v7019_v6 = vpop.f32.mrb[10].mxu0  ;;  %7320 = vmatpush1.bf16.msra.mxu0 %v9049_v7  ;;  %v9082_v25 = vcombine.high %v17606_v19, %v17605_v17  ;;  %v17607_v20 = vld [vmem:[#allocation403_spill] sm:$0xff]  ;;  %v9081_v4 = vcombine.low %v17606_v19, %v17605_v17  ;;  %v17609_v24 = vld [vmem:[#allocation174_spill] sm:$0xff] }
 0x652   : >> { %v13960_v9 = vadd.f32 %v7056_v21, %v7016_v22  ;;  %v7020_v10 = vpop.f32.mrb[11].mxu0  ;;  %7321 = vmatprep.subr.bf16.mxu0 %v9066_v26  ;;  %v17608_v6 = vld [vmem:[#allocation396_spill] sm:$0xff]  ;;  %v17610_v22 = vld [vmem:[#allocation167_spill] sm:$0xff]  ;;  %v17612_v26 = vld [vmem:[#allocation410_spill] sm:$0xff] }
 0x653   : >> { %v9338_v15 = vcombine.high %v17608_v6, %v17607_v20  ;;  %v13966_v7 = vadd.f32 %v7058_v3, %v7018_v23  ;;  %7363 = vmatpush1.bf16.msra.mxu1 %v9321_v34  ;;  %v9337_v21 = vcombine.low %v17608_v6, %v17607_v20  ;;  %v9098_v18 = vcombine.high %v17610_v22, %v17609_v24  ;;  %v17611_v10 = vld [vmem:[#allocation418_spill] sm:$0xff]  ;;  %v17618_v6 = vld [vmem:[#allocation425_spill] sm:$0xff] }
 0x654   : >> { %v17613_v2 = vmov %v17612_v26  ;;  %v9354_v1 = vcombine.high %v17612_v26, %v17611_v10  ;;  %v9097_v23 = vcombine.low %v17610_v22, %v17609_v24  ;;  %v17615_v34 = vld [vmem:[#allocation182_spill] sm:$0xff] }
 0x655   : >> { %7322 = vmatpush1.bf16.msra.mxu0 %v9065_v16  ;;  %7364 = vmatprep.subr.bf16.mxu1 %v9338_v15  ;;  %v9353_v3 = vcombine.low %v17613_v2, %v17611_v10  ;;  %v17614_v16 = vld [vmem:[#allocation190_spill] sm:$0xff]  ;;  %v17616_v5 = vmov %v17615_v34  ;;  %v17617_v15 = vld [vmem:[#allocation432_spill] sm:$0xff] }
 0x656   : >> { %7323 = vmatprep.subr.bf16.mxu0 %v9082_v25  ;;  %v9114_v25 = vcombine.high %v17615_v34, %v17614_v16  ;;  %v9370_v12 = vcombine.high %v17618_v6, %v17617_v15  ;;  %v17619_v26 = vld [vmem:[#allocation206_spill] sm:$0xff]  ;;  %v17623_v10 = vld [vmem:[#allocation440_spill] sm:$0xff] }
 0x657   : >> { %7365 = vmatpush1.bf16.msra.mxu1 %v9337_v21  ;;  %v9369_v21 = vcombine.low %v17618_v6, %v17617_v15  ;;  %v17620_v13 = vmov %v17619_v26  ;;  %v17621_v2 = vld [vmem:[#allocation198_spill] sm:$0xff]  ;;  %v17628_v15 = vld [vmem:[#allocation455_spill] sm:$0xff] }
 0x658   : >> { %7366 = vmatprep.subr.bf16.mxu1 %v9354_v1  ;;  %v17622_v1 = vld [vmem:[#allocation447_spill] sm:$0xff]  ;;  %v17624_v34 = vld [vmem:[#allocation222_spill] sm:$0xff] }
 0x659   : >> { %7324 = vmatpush1.bf16.msra.mxu0 %v9081_v4  ;;  %v9113_v4 = vcombine.low %v17616_v5, %v17614_v16  ;;  %v9386_v17 = vcombine.high %v17623_v10, %v17622_v1  ;;  %v17625_v5 = vmov %v17624_v34  ;;  %v17626_v6 = vld [vmem:[#allocation214_spill] sm:$0xff] }
 0x65a   : >> { %7325 = vmatprep.subr.bf16.mxu0 %v9098_v18  ;;  %v9130_v18 = vcombine.high %v17621_v2, %v17619_v26  ;;  %v17629_v26 = vld [vmem:[#allocation236_spill] sm:$0xff] }
 0x65b   : >> { %7367 = vmatpush1.bf16.msra.mxu1 %v9353_v3  ;;  %v9385_v3 = vcombine.low %v17623_v10, %v17622_v1  ;;  %v17631_v1 = vld [vmem:[#allocation229_spill] sm:$0xff]  ;;  %v17633_v10 = vld [vmem:[#allocation471_spill] sm:$0xff] }
 0x65c   : >> { %7368 = vmatprep.subr.bf16.mxu1 %v9370_v12  ;;  %v17627_v12 = vld [vmem:[#allocation463_spill] sm:$0xff] }
 0x65d   : >> { %7326 = vmatpush1.bf16.msra.mxu0 %v9097_v23  ;;  %v9129_v23 = vcombine.low %v17621_v2, %v17620_v13  ;;  %v9402_v16 = vcombine.high %v17628_v15, %v17627_v12  ;;  %v17630_v2 = vmov %v17629_v26 }
 0x65e   : >> { %7327 = vmatprep.subr.bf16.mxu0 %v9114_v25  ;;  %v9146_v25 = vcombine.high %v17626_v6, %v17624_v34  ;;  %v17634_v34 = vld [vmem:[#allocation252_spill] sm:$0xff] }
 0x65f   : >> { %7369 = vmatpush1.bf16.msra.mxu1 %v9369_v21  ;;  %v9401_v21 = vcombine.low %v17628_v15, %v17627_v12  ;;  %v17638_v12 = vld [vmem:[#allocation487_spill] sm:$0xff] }
 0x660   : >> { %7370 = vmatprep.subr.bf16.mxu1 %v9386_v17  ;;  %v17632_v17 = vld [vmem:[#allocation479_spill] sm:$0xff] }
 0x661   : >> { %7328 = vmatpush1.bf16.msra.mxu0 %v9113_v4  ;;  %v9145_v4 = vcombine.low %v17626_v6, %v17625_v5  ;;  %v9418_v13 = vcombine.high %v17633_v10, %v17632_v17  ;;  %v17635_v5 = vmov %v17634_v34  ;;  %v17636_v6 = vld [vmem:[#allocation244_spill] sm:$0xff] }
 0x662   : >> { %7329 = vmatprep.subr.bf16.mxu0 %v9130_v18  ;;  %v9162_v18 = vcombine.high %v17631_v1, %v17629_v26  ;;  %v17639_v26 = vld [vmem:[#allocation268_spill] sm:$0xff] }
 0x663   : >> { %7371 = vmatpush1.bf16.msra.mxu1 %v9385_v3  ;;  %v9417_v3 = vcombine.low %v17633_v10, %v17632_v17  ;;  %v17643_v10 = vld [vmem:[#allocation503_spill] sm:$0xff] }
 0x664   : >> { %7372 = vmatprep.subr.bf16.mxu1 %v9402_v16  ;;  %v17637_v16 = vld [vmem:[#allocation495_spill] sm:$0xff] }
 0x665   : >> { %7330 = vmatpush1.bf16.msra.mxu0 %v9129_v23  ;;  %v9161_v23 = vcombine.low %v17631_v1, %v17630_v2  ;;  %v9434_v15 = vcombine.high %v17638_v12, %v17637_v16  ;;  %v17640_v1 = vmov %v17639_v26  ;;  %v17641_v2 = vld [vmem:[#allocation260_spill] sm:$0xff] }
 0x666   : >> { %7331 = vmatprep.subr.bf16.mxu0 %v9146_v25  ;;  %v9178_v25 = vcombine.high %v17636_v6, %v17634_v34  ;;  %v17644_v34 = vld [vmem:[#allocation284_spill] sm:$0xff] }
 0x667   : >> { %7373 = vmatpush1.bf16.msra.mxu1 %v9401_v21  ;;  %v9433_v21 = vcombine.low %v17638_v12, %v17637_v16  ;;  %v17648_v12 = vld [vmem:[#allocation519_spill] sm:$0xff] }
 0x668   : >> { %7374 = vmatprep.subr.bf16.mxu1 %v9418_v13  ;;  %v17642_v13 = vld [vmem:[#allocation511_spill] sm:$0xff] }
 0x669   : >> { %7332 = vmatpush1.bf16.msra.mxu0 %v9145_v4  ;;  %v9177_v4 = vcombine.low %v17636_v6, %v17635_v5  ;;  %v9450_v17 = vcombine.high %v17643_v10, %v17642_v13  ;;  %v17645_v5 = vmov %v17644_v34  ;;  %v17646_v6 = vld [vmem:[#allocation276_spill] sm:$0xff] }
 0x66a   : >> { %7333 = vmatprep.subr.bf16.mxu0 %v9162_v18  ;;  %v9194_v18 = vcombine.high %v17641_v2, %v17639_v26  ;;  %v17649_v26 = vld [vmem:[#allocation543_spill] sm:$0xff] }
 0x66b   : >> { %7375 = vmatpush1.bf16.msra.mxu1 %v9417_v3  ;;  %v9449_v3 = vcombine.low %v17643_v10, %v17642_v13  ;;  %v17653_v10 = vld [vmem:[#allocation47_spill] sm:$0xff] }
 0x66c   : >> { %7376 = vmatprep.subr.bf16.mxu1 %v9434_v15  ;;  %v17647_v15 = vld [vmem:[#allocation527_spill] sm:$0xff] }
 0x66d   : >> { %7334 = vmatpush1.bf16.msra.mxu0 %v9161_v23  ;;  %v9193_v23 = vcombine.low %v17641_v2, %v17640_v1  ;;  %v9466_v16 = vcombine.high %v17648_v12, %v17647_v15  ;;  %v17650_v1 = vmov %v17649_v26  ;;  %v17651_v2 = vld [vmem:[#allocation535_spill] sm:$0xff] }
 0x66e   : >> { %7335 = vmatprep.subr.bf16.mxu0 %v9178_v25  ;;  %v9210_v25 = vcombine.high %v17646_v6, %v17644_v34  ;;  %v17654_v34 = vld [vmem:[#allocation559_spill] sm:$0xff] }
 0x66f   : >> { %7377 = vmatpush1.bf16.msra.mxu1 %v9433_v21  ;;  %v9465_v21 = vcombine.low %v17648_v12, %v17647_v15  ;;  %v17658_v12 = vld [vmem:[#allocation62_spill] sm:$0xff] }
 0x670   : >> { %7378 = vmatprep.subr.bf16.mxu1 %v9450_v17  ;;  %v17652_v17 = vld [vmem:[#allocation55_spill] sm:$0xff] }
 0x671   : >> { %7336 = vmatpush1.bf16.msra.mxu0 %v9177_v4  ;;  %v9209_v4 = vcombine.low %v17646_v6, %v17645_v5  ;;  %v8972_v13 = vcombine.high %v17653_v10, %v17652_v17  ;;  %v17655_v5 = vmov %v17654_v34  ;;  %v17656_v6 = vld [vmem:[#allocation551_spill] sm:$0xff] }
 0x672   : >> { %7337 = vmatprep.subr.bf16.mxu0 %v9194_v18  ;;  %v9482_v18 = vcombine.high %v17651_v2, %v17649_v26  ;;  %v17660_v26 = vld [vmem:[#allocation567_spill] sm:$0xff] }
 0x673   : >> { %7379 = vmatpush1.bf16.msra.mxu1 %v9449_v3  ;;  %v8971_v3 = vcombine.low %v17653_v10, %v17652_v17 }
 0x674   : >> { %7380 = vmatprep.subr.bf16.mxu1 %v9466_v16  ;;  %v17657_v16 = vld [vmem:[#allocation70_spill] sm:$0xff] }
 0x675   : >> { %7338 = vmatpush1.bf16.msra.mxu0 %v9193_v23  ;;  %v9481_v23 = vcombine.low %v17651_v2, %v17650_v1  ;;  %v8988_v15 = vcombine.high %v17658_v12, %v17657_v16  ;;  %v17662_v1 = vld [vmem:[#allocation86_spill] sm:$0xff] }
 0x676   : >> { %7339 = vmatprep.subr.bf16.mxu0 %v9210_v25  ;;  %v9498_v25 = vcombine.high %v17656_v6, %v17654_v34  ;;  %v17663_v2 = vld [vmem:[#allocation78_spill] sm:$0xff] }
 0x677   : >> { %7381 = vmatpush1.bf16.msra.mxu1 %v9465_v21  ;;  %v8987_v21 = vcombine.low %v17658_v12, %v17657_v16  ;;  %v9004_v10 = vcombine.high %v17663_v2, %v17662_v1 }
 0x678   : >> { %7432 = vmatprep.subr.bf16.mxu1 %v8972_v13  ;;  %v17659_v13 = vld [vmem:[#allocation575_spill] sm:$0xff] }
 0x679   : >> { %7340 = vmatpush1.bf16.msra.mxu0 %v9209_v4  ;;  %v9497_v4 = vcombine.low %v17656_v6, %v17655_v5  ;;  %v9514_v34 = vcombine.high %v17660_v26, %v17659_v13  ;;  %v17666_v5 = vld [vmem:[#allocation100_spill] sm:$0xff]  ;;  %v17667_v6 = vld [vmem:[#allocation93_spill] sm:$0xff] }
 0x67a   : >> { %7391 = vmatprep.subr.bf16.mxu0 %v9482_v18  ;;  %7383 = vmatmul.mubr.bf16.vlgmr.msra.gmra.mrb[24].mxu1 %v13218_v8  ;;  %v17661_v18 = vmov %v17660_v26  ;;  %v9020_v12 = vcombine.high %v17667_v6, %v17666_v5 }
 0x67b   : >> { %7433 = vmatpush1.bf16.msra.mxu1 %v8971_v3  ;;  %7464 = vmatprep.mubr.bf16.mxu1 %v13124_v56  ;;  %v9003_v3 = vcombine.low %v17663_v2, %v17662_v1  ;;  %v17669_v1 = vld [vmem:[#allocation599_spill] sm:$0xff]  ;;  %v17671_v2 = vld [vmem:[#allocation108_spill] sm:$0xff] }
 0x67c   : >> { %7342 = vmatmul.mubr.bf16.vlgmr.msra.gmra.mrb[24].mxu0 %v13218_v8  ;;  %7434 = vmatprep.subr.bf16.mxu1 %v8988_v15  ;;  %v17664_v15 = vld [vmem:[#allocation591_spill] sm:$0xff] }
 0x67d   : >> { %7392 = vmatpush1.bf16.msra.mxu0 %v9481_v23  ;;  %7423 = vmatprep.mubr.bf16.mxu0 %v13230_v11  ;;  %v9513_v23 = vcombine.low %v17661_v18, %v17659_v13  ;;  %v17668_v13 = vld [vmem:[#allocation607_spill] sm:$0xff] }
 0x67e   : >> { %7393 = vmatprep.subr.bf16.mxu0 %v9498_v25  ;;  %v17665_v25 = vld [vmem:[#allocation583_spill] sm:$0xff] }
 0x67f   : >> { %7435 = vmatpush1.bf16.msra.mxu1 %v8987_v21  ;;  %v9530_v26 = vcombine.high %v17665_v25, %v17664_v15  ;;  %v9019_v21 = vcombine.low %v17667_v6, %v17666_v5  ;;  %v17673_v5 = vld [vmem:[#allocation615_spill] sm:$0xff]  ;;  %v17675_v6 = vld [vmem:[#allocation124_spill] sm:$0xff] }
 0x680   : >> { %7436 = vmatprep.subr.bf16.mxu1 %v9004_v10  ;;  %v17670_v10 = vld [vmem:[#allocation116_spill] sm:$0xff] }
 0x681   : >> { %7394 = vmatpush1.bf16.msra.mxu0 %v9497_v4  ;;  %v9529_v4 = vcombine.low %v17665_v25, %v17664_v15  ;;  %v9036_v16 = vcombine.high %v17671_v2, %v17670_v10  ;;  %v17672_v15 = vld [vmem:[#allocation623_spill] sm:$0xff]  ;;  %v17682_v25 = vld [vmem:[#allocation161_spill] sm:$0xff] }
 0x682   : >> { %7395 = vmatprep.subr.bf16.mxu0 %v9514_v34  ;;  %v9546_v34 = vcombine.high %v17669_v1, %v17668_v13 }
 0x683   : >> { %7437 = vmatpush1.bf16.msra.mxu1 %v9003_v3  ;;  %v9035_v3 = vcombine.low %v17671_v2, %v17670_v10  ;;  %v17677_v2 = vld [vmem:[#allocation631_spill] sm:$0xff] }
 0x684   : >> { %7438 = vmatprep.subr.bf16.mxu1 %v9020_v12  ;;  %v17674_v12 = vld [vmem:[#allocation132_spill] sm:$0xff]  ;;  %v17679_v10 = vld [vmem:[#allocation139_spill] sm:$0xff] }
 0x685   : >> { %7396 = vmatpush1.bf16.msra.mxu0 %v9513_v23  ;;  %v9545_v23 = vcombine.low %v17669_v1, %v17668_v13  ;;  %v9052_v17 = vcombine.high %v17675_v6, %v17674_v12  ;;  %v17676_v1 = vld [vmem:[#allocation639_spill] sm:$0xff] }
 0x686   : >> { %7397 = vmatprep.subr.bf16.mxu0 %v9530_v26  ;;  %v9562_v26 = vcombine.high %v17673_v5, %v17672_v15 }
 0x687   : >> { %7439 = vmatpush1.bf16.msra.mxu1 %v9019_v21  ;;  %v9051_v21 = vcombine.low %v17675_v6, %v17674_v12 }
 0x688   : >> { %7440 = vmatprep.subr.bf16.mxu1 %v9036_v16  ;;  %v17678_v16 = vld [vmem:[#allocation146_spill] sm:$0xff] }
 0x689   : >> { %7398 = vmatpush1.bf16.msra.mxu0 %v9529_v4  ;;  %v9561_v4 = vcombine.low %v17673_v5, %v17672_v15  ;;  %v9068_v13 = vcombine.high %v17679_v10, %v17678_v16 }
 0x68a   : >> { %7399 = vmatprep.subr.bf16.mxu0 %v9546_v34  ;;  %v9578_v34 = vcombine.high %v17677_v2, %v17676_v1 }
 0x68b   : >> { %7441 = vmatpush1.bf16.msra.mxu1 %v9035_v3 }
 0x68c   : >> { %7442 = vmatprep.subr.bf16.mxu1 %v9052_v17  ;;  %v9577_v17 = vcombine.low %v17677_v2, %v17676_v1  ;;  %v17688_v1 = vld [vmem:[#allocation687_spill] sm:$0xff] }
 0x68d   : >> { %7400 = vmatpush1.bf16.msra.mxu0 %v9545_v23  ;;  %v7138_v19 = vpop.f32.mrb[12].mxu1  ;;  %v17689_v2 = vld [vmem:[#allocation679_spill] sm:$0xff] }
 0x68e   : >> { %7401 = vmatprep.subr.bf16.mxu0 %v9562_v26  ;;  %v7140_v3 = vpop.f32.mrb[13].mxu1  ;;  %v9067_v26 = vcombine.low %v17679_v10, %v17678_v16  ;;  %v17691_v10 = vld [vmem:[#allocation183_spill] sm:$0xff] }
 0x68f   : >> { %v7097_v18 = vpop.f32.mrb[12].mxu0  ;;  %v7142_v15 = vpop.f32.mrb[14].mxu1  ;;  %7443 = vmatpush1.bf16.msra.mxu1 %v9051_v21  ;;  %v17687_v21 = vld [vmem:[#allocation168_spill] sm:$0xff] }
 0x690   : >> { %v14092_v20 = vadd.f32 %v7138_v19, %v7097_v18  ;;  %v7099_v23 = vpop.f32.mrb[13].mxu0  ;;  %v7143_v12 = vpop.f32.mrb[15].mxu1  ;;  %7444 = vmatprep.subr.bf16.mxu1 %v9068_v13  ;;  %v17680_v19 = vld [vmem:[#allocation655_spill] sm:$0xff] }
 0x691   : >> { %v14094_v22 = vadd.f32 %v7140_v3, %v7099_v23  ;;  %v7101_v5 = vpop.f32.mrb[14].mxu0  ;;  %7402 = vmatpush1.bf16.msra.mxu0 %v9561_v4  ;;  %v17681_v18 = vld [vmem:[#allocation647_spill] sm:$0xff]  ;;  %v17683_v23 = vld [vmem:[#allocation154_spill] sm:$0xff] }
 0x692   : >> { %v7102_v6 = vpop.f32.mrb[15].mxu0  ;;  %7403 = vmatprep.subr.bf16.mxu0 %v9578_v34  ;;  %v9594_v24 = vcombine.high %v17681_v18, %v17680_v19  ;;  %v9084_v3 = vcombine.high %v17683_v23, %v17682_v25  ;;  %v9593_v5 = vcombine.low %v17681_v18, %v17680_v19  ;;  %v9083_v15 = vcombine.low %v17683_v23, %v17682_v25  ;;  %v17685_v12 = vld [vmem:[#allocation663_spill] sm:$0xff]  ;;  %v17721_v23 = vld [vmem:[#allocation536_spill] sm:$0xff] }
 0x693   : >> { %7445 = vmatpush1.bf16.msra.mxu1 %v9067_v26  ;;  %v17684_v6 = vld [vmem:[#allocation671_spill] sm:$0xff] }
 0x694   : >> { %7446 = vmatprep.subr.bf16.mxu1 %v9084_v3  ;;  %v9610_v4 = vcombine.high %v17685_v12, %v17684_v6  ;;  %v17686_v13 = vld [vmem:[#allocation175_spill] sm:$0xff] }
 0x695   : >> { %7404 = vmatpush1.bf16.msra.mxu0 %v9577_v17  ;;  %v9100_v34 = vcombine.high %v17687_v21, %v17686_v13  ;;  %v9609_v17 = vcombine.low %v17685_v12, %v17684_v6  ;;  %v9099_v26 = vcombine.low %v17687_v21, %v17686_v13  ;;  %v17690_v3 = vld [vmem:[#allocation191_spill] sm:$0xff]  ;;  %v17720_v21 = vld [vmem:[#allocation544_spill] sm:$0xff] }
 0x696   : >> { %7405 = vmatprep.subr.bf16.mxu0 %v9594_v24  ;;  %v9626_v24 = vcombine.high %v17689_v2, %v17688_v1  ;;  %v9116_v16 = vcombine.high %v17691_v10, %v17690_v3  ;;  %v17692_v6 = vld [vmem:[#allocation703_spill] sm:$0xff] }
 0x697   : >> { %7447 = vmatpush1.bf16.msra.mxu1 %v9083_v15  ;;  %v9115_v15 = vcombine.low %v17691_v10, %v17690_v3  ;;  %v17694_v12 = vld [vmem:[#allocation207_spill] sm:$0xff] }
 0x698   : >> { %7448 = vmatprep.subr.bf16.mxu1 %v9100_v34  ;;  %v17695_v13 = vld [vmem:[#allocation199_spill] sm:$0xff] }
 0x699   : >> { %7406 = vmatpush1.bf16.msra.mxu0 %v9593_v5  ;;  %v9625_v5 = vcombine.low %v17689_v2, %v17688_v1  ;;  %v9132_v18 = vcombine.high %v17695_v13, %v17694_v12  ;;  %v17696_v1 = vld [vmem:[#allocation719_spill] sm:$0xff] }
 0x69a   : >> { %7407 = vmatprep.subr.bf16.mxu0 %v9610_v4  ;;  %v17693_v4 = vld [vmem:[#allocation695_spill] sm:$0xff] }
 0x69b   : >> { %7449 = vmatpush1.bf16.msra.mxu1 %v9099_v26  ;;  %v9642_v34 = vcombine.high %v17693_v4, %v17692_v6  ;;  %v9131_v26 = vcombine.low %v17695_v13, %v17694_v12  ;;  %v17698_v2 = vld [vmem:[#allocation223_spill] sm:$0xff]  ;;  %v17703_v12 = vld [vmem:[#allocation237_spill] sm:$0xff]  ;;  %v17704_v13 = vld [vmem:[#allocation230_spill] sm:$0xff] }
 0x69c   : >> { %7450 = vmatprep.subr.bf16.mxu1 %v9116_v16  ;;  %v17699_v3 = vld [vmem:[#allocation215_spill] sm:$0xff]  ;;  %v9164_v19 = vcombine.high %v17704_v13, %v17703_v12 }
 0x69d   : >> { %7408 = vmatpush1.bf16.msra.mxu0 %v9609_v17  ;;  %v9641_v17 = vcombine.low %v17693_v4, %v17692_v6  ;;  %v9148_v10 = vcombine.high %v17699_v3, %v17698_v2 }
 0x69e   : >> { %7409 = vmatprep.subr.bf16.mxu0 %v9626_v24  ;;  %v17697_v24 = vld [vmem:[#allocation711_spill] sm:$0xff] }
 0x69f   : >> { %7451 = vmatpush1.bf16.msra.mxu1 %v9115_v15  ;;  %v9658_v16 = vcombine.high %v17697_v24, %v17696_v1  ;;  %v9147_v15 = vcombine.low %v17699_v3, %v17698_v2  ;;  %v17707_v2 = vld [vmem:[#allocation253_spill] sm:$0xff] }
 0x6a0   : >> { %7452 = vmatprep.subr.bf16.mxu1 %v9132_v18  ;;  %v17702_v18 = vld [vmem:[#allocation727_spill] sm:$0xff]  ;;  %v17708_v3 = vld [vmem:[#allocation245_spill] sm:$0xff] }
 0x6a1   : >> { %7410 = vmatpush1.bf16.msra.mxu0 %v9625_v5  ;;  %v9657_v5 = vcombine.low %v17697_v24, %v17696_v1  ;;  %v17705_v1 = vld [vmem:[#allocation751_spill] sm:$0xff]  ;;  %v9484_v24 = vcombine.high %v17721_v23, %v17720_v21 }
 0x6a2   : >> { %7411 = vmatprep.subr.bf16.mxu0 %v9642_v34  ;;  %v17700_v34 = vld [vmem:[#allocation735_spill] sm:$0xff] }
 0x6a3   : >> { %7453 = vmatpush1.bf16.msra.mxu1 %v9131_v26  ;;  %v17701_v4 = vmov %v17700_v34  ;;  %v9674_v6 = vcombine.high %v17702_v18, %v17700_v34  ;;  %v9163_v26 = vcombine.low %v17704_v13, %v17703_v12  ;;  %v9180_v34 = vcombine.high %v17708_v3, %v17707_v2  ;;  %v17711_v12 = vld [vmem:[#allocation269_spill] sm:$0xff] }
 0x6a4   : >> { %7454 = vmatprep.subr.bf16.mxu1 %v9148_v10  ;;  %v17712_v13 = vld [vmem:[#allocation261_spill] sm:$0xff] }
 0x6a5   : >> { %7412 = vmatpush1.bf16.msra.mxu0 %v9641_v17  ;;  %v9673_v17 = vcombine.low %v17702_v18, %v17701_v4  ;;  %v17709_v4 = vld [vmem:[#allocation767_spill] sm:$0xff]  ;;  %v9196_v18 = vcombine.high %v17712_v13, %v17711_v12 }
 0x6a6   : >> { %7413 = vmatprep.subr.bf16.mxu0 %v9658_v16  ;;  %v17706_v16 = vld [vmem:[#allocation743_spill] sm:$0xff] }
 0x6a7   : >> { %7455 = vmatpush1.bf16.msra.mxu1 %v9147_v15  ;;  %v9690_v10 = vcombine.high %v17706_v16, %v17705_v1  ;;  %v9179_v15 = vcombine.low %v17708_v3, %v17707_v2  ;;  %v17716_v3 = vld [vmem:[#allocation277_spill] sm:$0xff] }
 0x6a8   : >> { %7456 = vmatprep.subr.bf16.mxu1 %v9164_v19 }
 0x6a9   : >> { %7414 = vmatpush1.bf16.msra.mxu0 %v9657_v5  ;;  %v9689_v5 = vcombine.low %v17706_v16, %v17705_v1  ;;  %v17713_v1 = vld [vmem:[#allocation775_spill] sm:$0xff] }
 0x6aa   : >> { %7415 = vmatprep.subr.bf16.mxu0 %v9674_v6  ;;  %v17710_v6 = vld [vmem:[#allocation759_spill] sm:$0xff] }
 0x6ab   : >> { %7457 = vmatpush1.bf16.msra.mxu1 %v9163_v26  ;;  %v9706_v19 = vcombine.high %v17710_v6, %v17709_v4  ;;  %v9195_v26 = vcombine.low %v17712_v13, %v17711_v12  ;;  %v17719_v12 = vld [vmem:[#allocation293_spill] sm:$0xff] }
 0x6ac   : >> { %7458 = vmatprep.subr.bf16.mxu1 %v9180_v34  ;;  %v17714_v34 = vld [vmem:[#allocation285_spill] sm:$0xff] }
 0x6ad   : >> { %7416 = vmatpush1.bf16.msra.mxu0 %v9673_v17  ;;  %v9705_v17 = vcombine.low %v17710_v6, %v17709_v4  ;;  %v17715_v2 = vmov %v17714_v34  ;;  %v9212_v16 = vcombine.high %v17716_v3, %v17714_v34  ;;  %v7808_v4 = vld [vmem:[%s14170_s21 + $0x10] sm:$0xff]  ;;  %v17717_v34 = vld [vmem:[#allocation300_spill] sm:$0xff] }
 0x6ae   : >> { %7417 = vmatprep.subr.bf16.mxu0 %v9690_v10  ;;  %v9722_v10 = vcombine.high %v17713_v1, %v13023_v52  ;;  %v17718_v6 = vmov %v17717_v34  ;;  %v9228_v13 = vcombine.high %v17719_v12, %v17717_v34  ;;  %v17722_v34 = vld [vmem:[#allocation315_spill] sm:$0xff] }
 0x6af   : >> { %7459 = vmatpush1.bf16.msra.mxu1 %v9179_v15  ;;  %v7807_v15 = vld [vmem:[%s14170_s21 + $0x8] sm:$0xff] }
 0x6b0   : >> { %7460 = vmatprep.subr.bf16.mxu1 %v9196_v18  ;;  %v9211_v18 = vcombine.low %v17716_v3, %v17715_v2  ;;  %v17723_v2 = vmov %v17722_v34  ;;  %v17724_v3 = vld [vmem:[#allocation308_spill] sm:$0xff] }
 0x6b1   : >> { %7418 = vmatpush1.bf16.msra.mxu0 %v9689_v5  ;;  %v7806_v5 = vld [vmem:[%s14170_s21] sm:$0xff] }
 0x6b2   : >> { %7419 = vmatprep.subr.bf16.mxu0 %v9706_v19  ;;  %v9721_v19 = vcombine.low %v17713_v1, %v13023_v52  ;;  %v7814_v25 = vadd.f32 %v7806_v5, %v13815_v14  ;;  %v9227_v1 = vcombine.low %v17719_v12, %v17718_v6  ;;  %v9244_v14 = vcombine.high %v17724_v3, %v17722_v34  ;;  %v17725_v5 = vld [vmem:[#allocation560_spill] sm:$0xff]  ;;  %v10215_v52 = vld [vmem:[#allocation23 + $0x74] ss:$8 sps:$4 sm:$0xff] (%p2957_p10)  }
 0x6b3   : >> { %7461 = vmatpush1.bf16.msra.mxu1 %v9195_v26  ;;  %v7816_v26 = vadd.f32 %v7808_v4, %v13960_v9  ;;  %v17742_v12 = vld [vmem:[#allocation624_spill] sm:$0xff] }
 0x6b4   : >> { %7462 = vmatprep.subr.bf16.mxu1 %v9212_v16  ;;  %v9483_v16 = vcombine.low %v17721_v23, %v17720_v21  ;;  %v17746_v21 = vld [vmem:[#allocation640_spill] sm:$0xff] }
 0x6b5   : >> { %7420 = vmatpush1.bf16.msra.mxu0 %v9705_v17  ;;  %v7815_v17 = vadd.f32 %v7807_v15, %v13820_v0  ;;  %v9500_v0 = vcombine.high %v17726_v29, %v17725_v5  ;;  %v9731_v15 = vmul.f32 -1.442695, %v7814_v25  ;;  %v9733_v4 = vmul.f32 -1.442695, %v7816_v26  ;;  %v17747_v23 = vld [vmem:[#allocation632_spill] sm:$0xff] }
 0x6b6   : >> { %7421 = vmatprep.subr.bf16.mxu0 %v9722_v10  ;;  %v7817_v10 = vadd.f32 %v7809_v27, %v13966_v7  ;;  %v9243_v27 = vcombine.low %v17724_v3, %v17723_v2  ;;  %v9499_v7 = vcombine.low %v17726_v29, %v17725_v5 }
 0x6b7   : >> { %7463 = vmatpush1.bf16.msra.mxu1 %v9211_v18  ;;  %v9732_v9 = vmul.f32 -1.442695, %v7815_v17  ;;  %v17729_v18 = vld [vmem:[#allocation576_spill] sm:$0xff]  ;;  %10130 = vpow2.f32 %v9731_v15 }
 0x6b8   : >> { %7514 = vmatprep.subr.bf16.mxu1 %v9484_v24  ;;  %v17727_v24 = vld [vmem:[#allocation330_spill] sm:$0xff]  ;;  %v17730_v17 = vld [vmem:[#allocation568_spill] sm:$0xff] }
 0x6b9   : >> { %7422 = vmatpush1.bf16.msra.mxu0 %v9721_v19  ;;  %v17728_v19 = vld [vmem:[#allocation322_spill] sm:$0xff]  ;;  %v9516_v34 = vcombine.high %v17730_v17, %v17729_v18  ;;  %10132 = vpow2.f32 %v9732_v9  ;;  %v9515_v26 = vcombine.low %v17730_v17, %v17729_v18  ;;  %v17734_v15 = vld [vmem:[#allocation584_spill] sm:$0xff] }
 0x6ba   : >> { %7473 = vmatprep.subr.bf16.mxu0 %v9228_v13  ;;  %7465 = vmatmul.mubr.bf16.vlgmr.msra.gmra.mrb[28].mxu1 %v13218_v8  ;;  %v9734_v13 = vmul.f32 -1.442695, %v7817_v10  ;;  %v9260_v25 = vcombine.high %v17728_v19, %v17727_v24  ;;  %10134 = vpow2.f32 %v9733_v4  ;;  %v17732_v10 = vld [vmem:[#allocation338_spill] sm:$0xff] }
 0x6bb   : >> { %7515 = vmatpush1.bf16.msra.mxu1 %v9483_v16  ;;  %7546 = vmatprep.mubr.bf16.mxu1 %v13230_v11  ;;  %v17731_v16 = vld [vmem:[#allocation345_spill] sm:$0xff]  ;;  %v17745_v18 = vld [vmem:[#allocation382_spill] sm:$0xff] }
 0x6bc   : >> { %7424 = vmatmul.mubr.bf16.vlgmr.msra.gmra.mrb[28].mxu0 %v13358_v61  ;;  %7516 = vmatprep.subr.bf16.mxu1 %v9500_v0  ;;  %10136 = vpow2.f32 %v9734_v13  ;;  %v17733_v0 = vld [vmem:[#allocation592_spill] sm:$0xff]  ;;  %v9275_v9 = vcombine.low %v17732_v10, %v17731_v16 }
 0x6bd   : >> { %7474 = vmatpush1.bf16.msra.mxu0 %v9227_v1  ;;  %7505 = vmatprep.mubr.bf16.mxu0 %v13124_v56  ;;  %v9259_v1 = vcombine.low %v17728_v19, %v17727_v24  ;;  %v9532_v2 = vcombine.high %v17734_v15, %v17733_v0  ;;  %v9531_v4 = vcombine.low %v17734_v15, %v17733_v0  ;;  %v17743_v15 = vld [vmem:[#allocation616_spill] sm:$0xff] }
 0x6be   : >> { %7475 = vmatprep.subr.bf16.mxu0 %v9244_v14  ;;  %v9276_v14 = vcombine.high %v17732_v10, %v17731_v16  ;;  %v9564_v16 = vcombine.high %v17743_v15, %v17742_v12  ;;  %v9580_v24 = vcombine.high %v17747_v23, %v17746_v21 }
 0x6bf   : >> { %7517 = vmatpush1.bf16.msra.mxu1 %v9499_v7  ;;  %v17736_v7 = vld [vmem:[#allocation352_spill] sm:$0xff] }
 0x6c0   : >> { %7518 = vmatprep.subr.bf16.mxu1 %v9516_v34  ;;  %v17738_v34 = vld [vmem:[#allocation600_spill] sm:$0xff] }
 0x6c1   : >> { %7476 = vmatpush1.bf16.msra.mxu0 %v9243_v27  ;;  %v17735_v27 = vld [vmem:[#allocation359_spill] sm:$0xff]  ;;  %v17739_v3 = vmov %v17738_v34  ;;  %v10131_v6 = vpop.eup %10130 }
 0x6c2   : >> { %7477 = vmatprep.subr.bf16.mxu0 %v9260_v25  ;;  %v9292_v13 = vcombine.high %v17736_v7, %v17735_v27  ;;  %v17737_v25 = vld [vmem:[#allocation608_spill] sm:$0xff] }
 0x6c3   : >> { %7519 = vmatpush1.bf16.msra.mxu1 %v9515_v26  ;;  %v9548_v5 = vcombine.high %v17738_v34, %v17737_v25  ;;  %v9547_v26 = vcombine.low %v17739_v3, %v17737_v25  ;;  %v10133_v10 = vpop.eup %10132 }
 0x6c4   : >> { %7520 = vmatprep.subr.bf16.mxu1 %v9532_v2  ;;  %v17741_v2 = vld [vmem:[#allocation366_spill] sm:$0xff]  ;;  %v10135_v34 = vpop.eup %10134 }
 0x6c5   : >> { %7478 = vmatpush1.bf16.msra.mxu0 %v9259_v1  ;;  %v9291_v1 = vcombine.low %v17736_v7, %v17735_v27  ;;  %v17744_v7 = vld [vmem:[#allocation390_spill] sm:$0xff]  ;;  %v17749_v27 = vld [vmem:[#allocation397_spill] sm:$0xff] }
 0x6c6   : >> { %7479 = vmatprep.subr.bf16.mxu0 %v9276_v14  ;;  %v17740_v14 = vld [vmem:[#allocation374_spill] sm:$0xff]  ;;  %v10137_v17 = vpop.eup %10136  ;;  %v9324_v19 = vcombine.high %v17745_v18, %v17744_v7 }
 0x6c7   : >> { %7521 = vmatpush1.bf16.msra.mxu1 %v9531_v4  ;;  %v9308_v0 = vcombine.high %v17741_v2, %v17740_v14  ;;  %v7829_v4 = vadd.f32 1.0, %v10133_v10  ;;  %v9307_v3 = vcombine.low %v17741_v2, %v17740_v14  ;;  %v7811_v14 = vld [vmem:[%s14170_s21 + $0x28] sm:$0xff] }
 0x6c8   : >> { %7522 = vmatprep.subr.bf16.mxu1 %v9548_v5  ;;  %v9563_v5 = vcombine.low %v17743_v15, %v17742_v12 }
 0x6c9   : >> { %7480 = vmatpush1.bf16.msra.mxu0 %v9275_v9  ;;  %v7828_v9 = vadd.f32 1.0, %v10131_v6  ;;  %v7841_v6 = vadd.f32 1.0, %v10137_v17  ;;  %v9323_v17 = vcombine.low %v17745_v18, %v17744_v7  ;;  %v17764_v18 = vld [vmem:[#allocation704_spill] sm:$0xff] }
 0x6ca   : >> { %7481 = vmatprep.subr.bf16.mxu0 %v9292_v13  ;;  %v7840_v13 = vadd.f32 1.0, %v10135_v34 }
 0x6cb   : >> { %7523 = vmatpush1.bf16.msra.mxu1 %v9547_v26  ;;  %10138 = vrcp.f32 %v7828_v9  ;;  %v9579_v9 = vcombine.low %v17747_v23, %v17746_v21 }
 0x6cc   : >> { %7524 = vmatprep.subr.bf16.mxu1 %v9564_v16  ;;  %10140 = vrcp.f32 %v7829_v4  ;;  %v17748_v4 = vld [vmem:[#allocation404_spill] sm:$0xff] }
 0x6cd   : >> { %7482 = vmatpush1.bf16.msra.mxu0 %v9291_v1  ;;  %v7810_v1 = vld [vmem:[%s14170_s21 + $0x20] sm:$0xff]  ;;  %v14241_v25 = vpop.f32.mrb[16].mxu1  ;;  %10142 = vrcp.f32 %v7840_v13 }
 0x6ce   : >> { %7483 = vmatprep.subr.bf16.mxu0 %v9308_v0  ;;  %v14245_v12 = vpop.f32.mrb[17].mxu1  ;;  %10144 = vrcp.f32 %v7841_v6 }
 0x6cf   : >> { %v7179_v10 = vpop.f32.mrb[16].mxu0  ;;  %v7224_v34 = vpop.f32.mrb[18].mxu1  ;;  %7525 = vmatpush1.bf16.msra.mxu1 %v9563_v5  ;;  %v9339_v5 = vcombine.low %v17749_v27, %v17748_v4 }
 0x6d0   : >> { %v7180_v26 = vadd.f32 %v7179_v10, %v14092_v20  ;;  %v7181_v2 = vpop.f32.mrb[17].mxu0  ;;  %v7225_v15 = vpop.f32.mrb[19].mxu1  ;;  %7526 = vmatprep.subr.bf16.mxu1 %v9580_v24  ;;  %v17752_v24 = vld [vmem:[#allocation419_spill] sm:$0xff] }
 0x6d1   : >> { %v7182_v16 = vadd.f32 %v7181_v2, %v14094_v22  ;;  %v7183_v0 = vpop.f32.mrb[18].mxu0  ;;  %7484 = vmatpush1.bf16.msra.mxu0 %v9307_v3  ;;  %v9340_v22 = vcombine.high %v17749_v27, %v17748_v4  ;;  %v17750_v2 = vld [vmem:[#allocation656_spill] sm:$0xff]  ;;  %v17753_v15 = vld [vmem:[#allocation411_spill] sm:$0xff]  ;;  %v17767_v27 = vld [vmem:[#allocation789_spill] sm:$0xff] }
 0x6d2   : >> { %v7818_v20 = vadd.f32 %v7810_v1, %v7180_v26  ;;  %v7184_v10 = vpop.f32.mrb[19].mxu0  ;;  %7485 = vmatprep.subr.bf16.mxu0 %v9324_v19  ;;  %v17751_v0 = vld [vmem:[#allocation648_spill] sm:$0xff]  ;;  %v9356_v13 = vcombine.high %v17753_v15, %v17752_v24 }
 0x6d3   : >> { %v9596_v34 = vcombine.high %v17751_v0, %v17750_v2  ;;  %v7819_v3 = vadd.f32 %v7811_v14, %v7182_v16  ;;  %7527 = vmatpush1.bf16.msra.mxu1 %v9579_v9  ;;  %v9595_v19 = vcombine.low %v17751_v0, %v17750_v2  ;;  %v17754_v1 = vld [vmem:[#allocation672_spill] sm:$0xff]  ;;  %v9355_v14 = vcombine.low %v17753_v15, %v17752_v24  ;;  %v17757_v9 = vld [vmem:[#allocation433_spill] sm:$0xff] }
 0x6d4   : >> { %10146 = vtanh.f32 %v7818_v20  ;;  %v17755_v26 = vld [vmem:[#allocation664_spill] sm:$0xff]  ;;  %v17758_v20 = vld [vmem:[#allocation426_spill] sm:$0xff] }
 0x6d5   : >> { %10148 = vtanh.f32 %v7819_v3  ;;  %7486 = vmatpush1.bf16.msra.mxu0 %v9323_v17  ;;  %7528 = vmatprep.subr.bf16.mxu1 %v9596_v34  ;;  %v17756_v10 = vmov %v17755_v26  ;;  %v9612_v6 = vcombine.high %v17755_v26, %v17754_v1  ;;  %v10139_v17 = vpop.eup %10138  ;;  %v17759_v34 = vld [vmem:[#allocation688_spill] sm:$0xff] }
 0x6d6   : >> { %7487 = vmatprep.subr.bf16.mxu0 %v9340_v22  ;;  %v9611_v16 = vcombine.low %v17756_v10, %v17754_v1  ;;  %v9372_v22 = vcombine.high %v17758_v20, %v17757_v9  ;;  %v17760_v3 = vmov %v17759_v34  ;;  %v17761_v0 = vld [vmem:[#allocation680_spill] sm:$0xff]  ;;  %v10141_v4 = vpop.eup %10140  ;;  %v17763_v10 = vld [vmem:[#allocation441_spill] sm:$0xff] }
 0x6d7   : >> { %7529 = vmatpush1.bf16.msra.mxu1 %v9595_v19  ;;  %v9628_v2 = vcombine.high %v17761_v0, %v17759_v34  ;;  %v10143_v26 = vpop.eup %10142  ;;  %v9371_v19 = vcombine.low %v17758_v20, %v17757_v9  ;;  %v9627_v1 = vcombine.low %v17761_v0, %v17760_v3  ;;  %v17765_v34 = vld [vmem:[#allocation696_spill] sm:$0xff] }
 0x6d8   : >> { %7530 = vmatprep.subr.bf16.mxu1 %v9612_v6  ;;  %v10145_v7 = vpop.eup %10144  ;;  %v17762_v6 = vld [vmem:[#allocation448_spill] sm:$0xff]  ;;  %v17766_v21 = vmov %v17765_v34  ;;  %v9644_v23 = vcombine.high %v17765_v34, %v17764_v18  ;;  %v7860_v29 = vmul.f32 %v17767_v27, %v10143_v26 }
 0x6d9   : >> { %7488 = vmatpush1.bf16.msra.mxu0 %v9339_v5  ;;  %v7970_v5 = vstv %s7969_s16  ;;  %v9388_v15 = vcombine.high %v17763_v10, %v17762_v6  ;;  %s10624_s16 = scalar_lea.vmem (%p2957_p10), %s14863_s29, 1024 }
 0x6da   : >> { %7489 = vmatprep.subr.bf16.mxu0 %v9356_v13  ;;  %vm14283_vm1 = vcmp.eq.s32.totalorder %v7970_v5, 1  ;;  %v17773_v5 = vld [vmem:[#allocation720_spill] sm:$0xff]  ;;  %p10625_p5 = scmp.ne.s32.totalorder (%p2957_p10), %s14863_s29, %s10624_s16 }
 0x6db   : >> { %7531 = vmatpush1.bf16.msra.mxu1 %v9611_v16  ;;  %v17768_v16 = vld [vmem:[#allocation788_spill] sm:$0xff] }
 0x6dc   : >> { %7532 = vmatprep.subr.bf16.mxu1 %v9628_v2  ;;  %v7861_v30 = vmul.f32 %v17768_v16, %v10145_v7  ;;  %v9387_v2 = vcombine.low %v17763_v10, %v17762_v6  ;;  %v17771_v7 = vld [vmem:[#allocation464_spill] sm:$0xff]  ;;  %p10626_p11 = pnand (%p2957_p10), %p10625_p5, %p18043_p12 }
 0x6dd   : >> { %7490 = vmatpush1.bf16.msra.mxu0 %v9355_v14  ;;  %v17782_v6 = vld [vmem:[#allocation744_spill] sm:$0xff] }
 0x6de   : >> { %v10147_v13 = vpop.eup %10146  ;;  %7491 = vmatprep.subr.bf16.mxu0 %v9372_v22  ;;  %v9643_v22 = vcombine.low %v17766_v21, %v17764_v18  ;;  %v17783_v10 = vld [vmem:[#allocation512_spill] sm:$0xff]  ;;  %p10627_p13 = pneg (%p2957_p10), %p10626_p11 }
 0x6df   : >> { %v10149_v24 = vpop.eup %10148  ;;  %v7862_v14 = vmul.f32 %v10147_v13, %v10139_v17  ;;  %7533 = vmatpush1.bf16.msra.mxu1 %v9627_v1  ;;  %v17772_v17 = vld [vmem:[#allocation456_spill] sm:$0xff] }
 0x6e0   : >> { %v7863_v0 = vmul.f32 %v10149_v24, %v10141_v4  ;;  %7534 = vmatprep.subr.bf16.mxu1 %v9644_v23  ;;  %v9404_v26 = vcombine.high %v17772_v17, %v17771_v7  ;;  %v17774_v13 = vld [vmem:[#allocation712_spill] sm:$0xff]  ;;  %v9403_v23 = vcombine.low %v17772_v17, %v17771_v7 }
 0x6e1   : >> { %v14287_v3 = vadd.f32 %v7862_v14, %v7860_v29  ;;  %7492 = vmatpush1.bf16.msra.mxu0 %v9371_v19  ;;  %v9660_v4 = vcombine.high %v17774_v13, %v17773_v5  ;;  %v17775_v24 = vld [vmem:[#allocation480_spill] sm:$0xff] }
 0x6e2   : >> { %v14293_v34 = vadd.f32 %v7863_v0, %v7861_v30  ;;  %7493 = vmatprep.subr.bf16.mxu0 %v9388_v15  ;;  %v9659_v0 = vcombine.low %v17774_v13, %v17773_v5  ;;  %v17776_v15 = vld [vmem:[#allocation472_spill] sm:$0xff] }
 0x6e3   : >> { %v14303_v29 = vsel %vm14283_vm1, %v14287_v3, %v17767_v27   ;;  %7535 = vmatpush1.bf16.msra.mxu1 %v9643_v22  ;;  %v9420_v27 = vcombine.high %v17776_v15, %v17775_v24  ;;  %v17777_v1 = vld [vmem:[#allocation736_spill] sm:$0xff] }
 0x6e4   : >> { %v14309_v30 = vsel %vm14283_vm1, %v14293_v34, %v17768_v16   ;;  %7536 = vmatprep.subr.bf16.mxu1 %v9660_v4  ;;  %v17778_v19 = vld [vmem:[#allocation728_spill] sm:$0xff]  ;;  %v9419_v16 = vcombine.low %v17776_v15, %v17775_v24  ;;  %v7813_v24 = vld [vmem:[%s14170_s21 + $0x38] sm:$0xff]  ;;  %7995 = vst [vmem:[#allocation5] sm:$0xff] (%p2957_p10), %v14303_v29 }
 0x6e5   : >> { %7494 = vmatpush1.bf16.msra.mxu0 %v9387_v2  ;;  %v9676_v14 = vcombine.high %v17778_v19, %v17777_v1  ;;  %v9675_v2 = vcombine.low %v17778_v19, %v17777_v1  ;;  %v17779_v22 = vld [vmem:[#allocation496_spill] sm:$0xff]  ;;  %7996 = vst [vmem:[#allocation5 + $0x8] sm:$0xff] (%p2957_p10), %v14309_v30 }
 0x6e6   : >> { %7495 = vmatprep.subr.bf16.mxu0 %v9404_v26  ;;  %v17780_v5 = vld [vmem:[#allocation488_spill] sm:$0xff] }
 0x6e7   : >> { %7537 = vmatpush1.bf16.msra.mxu1 %v9659_v0  ;;  %v9436_v26 = vcombine.high %v17780_v5, %v17779_v22  ;;  %v17781_v4 = vld [vmem:[#allocation752_spill] sm:$0xff] }
 0x6e8   : >> { %7538 = vmatprep.subr.bf16.mxu1 %v9676_v14  ;;  %v9692_v7 = vcombine.high %v17782_v6, %v17781_v4  ;;  %v9691_v0 = vcombine.low %v17782_v6, %v17781_v4  ;;  %v17784_v1 = vld [vmem:[#allocation504_spill] sm:$0xff] }
 0x6e9   : >> { %7496 = vmatpush1.bf16.msra.mxu0 %v9403_v23  ;;  %v9435_v23 = vcombine.low %v17780_v5, %v17779_v22  ;;  %v17785_v14 = vld [vmem:[#allocation768_spill] sm:$0xff]  ;;  %v7812_v22 = vld [vmem:[%s14170_s21 + $0x30] sm:$0xff]  ;;  %s8535_s21 = scalar_lea.sflag (%p2957_p10), [#allocation10], %s11256_s5 }
 0x6ea   : >> { %7497 = vmatprep.subr.bf16.mxu0 %v9420_v27  ;;  %v9452_v27 = vcombine.high %v17784_v1, %v17783_v10  ;;  %v17786_v13 = vld [vmem:[#allocation760_spill] sm:$0xff] }
 0x6eb   : >> { %7539 = vmatpush1.bf16.msra.mxu1 %v9675_v2  ;;  %v9708_v15 = vcombine.high %v17786_v13, %v17785_v14  ;;  %v9707_v2 = vcombine.low %v17786_v13, %v17785_v14  ;;  %v17787_v5 = vld [vmem:[#allocation528_spill] sm:$0xff]  ;;  %v17794_v13 = vld [vmem:[#allocation294_spill] sm:$0xff] }
 0x6ec   : >> { %7540 = vmatprep.subr.bf16.mxu1 %v9692_v7  ;;  %v17788_v4 = vld [vmem:[#allocation520_spill] sm:$0xff]  ;;  %v17789_v7 = vld [vmem:[#allocation782_spill] sm:$0xff] }
 0x6ed   : >> { %7498 = vmatpush1.bf16.msra.mxu0 %v9419_v16  ;;  %v9451_v16 = vcombine.low %v17784_v1, %v17783_v10  ;;  %v17790_v6 = vld [vmem:[#allocation776_spill] sm:$0xff] }
 0x6ee   : >> { %7499 = vmatprep.subr.bf16.mxu0 %v9436_v26  ;;  %v9468_v26 = vcombine.high %v17788_v4, %v17787_v5  ;;  %v9724_v17 = vcombine.high %v17790_v6, %v17789_v7  ;;  %v17791_v1 = vld [vmem:[#allocation56_spill] sm:$0xff] }
 0x6ef   : >> { %7541 = vmatpush1.bf16.msra.mxu1 %v9691_v0  ;;  %v9723_v0 = vcombine.low %v17790_v6, %v17789_v7  ;;  %v17792_v10 = vld [vmem:[#allocation48_spill] sm:$0xff]  ;;  %v17798_v6 = vld [vmem:[#allocation309_spill] sm:$0xff] }
 0x6f0   : >> { %7542 = vmatprep.subr.bf16.mxu1 %v9708_v15  ;;  %v17793_v15 = vld [vmem:[#allocation301_spill] sm:$0xff] }
 0x6f1   : >> { %7500 = vmatpush1.bf16.msra.mxu0 %v9435_v23  ;;  %v9467_v23 = vcombine.low %v17788_v4, %v17787_v5  ;;  %v9230_v14 = vcombine.high %v17794_v13, %v17793_v15  ;;  %v17795_v4 = vld [vmem:[#allocation71_spill] sm:$0xff] }
 0x6f2   : >> { %7501 = vmatprep.subr.bf16.mxu0 %v9452_v27  ;;  %v8974_v27 = vcombine.high %v17792_v10, %v17791_v1  ;;  %v17796_v5 = vld [vmem:[#allocation63_spill] sm:$0xff] }
 0x6f3   : >> { %7543 = vmatpush1.bf16.msra.mxu1 %v9707_v2  ;;  %v9229_v2 = vcombine.low %v17794_v13, %v17793_v15  ;;  %v17802_v13 = vld [vmem:[#allocation323_spill] sm:$0xff] }
 0x6f4   : >> { %7544 = vmatprep.subr.bf16.mxu1 %v9724_v17  ;;  %v17797_v17 = vld [vmem:[#allocation316_spill] sm:$0xff] }
 0x6f5   : >> { %7502 = vmatpush1.bf16.msra.mxu0 %v9451_v16  ;;  %v8973_v16 = vcombine.low %v17792_v10, %v17791_v1  ;;  %v9246_v7 = vcombine.high %v17798_v6, %v17797_v17  ;;  %v17801_v10 = vld [vmem:[#allocation331_spill] sm:$0xff] }
 0x6f6   : >> { %7503 = vmatprep.subr.bf16.mxu0 %v9468_v26  ;;  %v8990_v26 = vcombine.high %v17796_v5, %v17795_v4  ;;  %v9262_v15 = vcombine.high %v17802_v13, %v17801_v10 }
 0x6f7   : >> { %7545 = vmatpush1.bf16.msra.mxu1 %v9723_v0  ;;  %v9245_v0 = vcombine.low %v17798_v6, %v17797_v17  ;;  %v17806_v6 = vld [vmem:[#allocation346_spill] sm:$0xff]  ;;  %v17807_v17 = vld [vmem:[#allocation339_spill] sm:$0xff] }
 0x6f8   : >> { %7596 = vmatprep.subr.bf16.mxu1 %v9230_v14  ;;  %v17799_v14 = vld [vmem:[#allocation87_spill] sm:$0xff]  ;;  %v9278_v18 = vcombine.high %v17807_v17, %v17806_v6 }
 0x6f9   : >> { %7504 = vmatpush1.bf16.msra.mxu0 %v9467_v23  ;;  %v8989_v23 = vcombine.low %v17796_v5, %v17795_v4 }
 0x6fa   : >> { %7555 = vmatprep.subr.bf16.mxu0 %v8974_v27  ;;  %7547 = vmatmul.mubr.bf16.vlgmr.msra.gmra.mrb[32].mxu1 %v13358_v61  ;;  %v17800_v27 = vld [vmem:[#allocation79_spill] sm:$0xff] }
 0x6fb   : >> { %7597 = vmatpush1.bf16.msra.mxu1 %v9229_v2  ;;  %v9006_v1 = vcombine.high %v17800_v27, %v17799_v14  ;;  %7628 = vmatprep.mubr.bf16.mxu1 %v13124_v56  ;;  %v9261_v2 = vcombine.low %v17802_v13, %v17801_v10  ;;  %v17809_v10 = vld [vmem:[#allocation109_spill] sm:$0xff] }
 0x6fc   : >> { %7506 = vmatmul.mubr.bf16.vlgmr.msra.gmra.mrb[32].mxu0 %v13218_v8  ;;  %7598 = vmatprep.subr.bf16.mxu1 %v9246_v7  ;;  %v17803_v7 = vld [vmem:[#allocation101_spill] sm:$0xff] }
 0x6fd   : >> { %7556 = vmatpush1.bf16.msra.mxu0 %v8973_v16  ;;  %7587 = vmatprep.mubr.bf16.mxu0 %v13124_v56  ;;  %v9005_v16 = vcombine.low %v17800_v27, %v17799_v14  ;;  %v17808_v14 = vld [vmem:[#allocation117_spill] sm:$0xff] }
 0x6fe   : >> { %7557 = vmatprep.subr.bf16.mxu0 %v8990_v26  ;;  %v17804_v26 = vld [vmem:[#allocation94_spill] sm:$0xff]  ;;  %v17811_v13 = vld [vmem:[#allocation353_spill] sm:$0xff] }
 0x6ff   : >> { %7599 = vmatpush1.bf16.msra.mxu1 %v9245_v0  ;;  %v17805_v4 = vmov %v17804_v26  ;;  %v9022_v5 = vcombine.high %v17804_v26, %v17803_v7  ;;  %v9277_v0 = vcombine.low %v17807_v17, %v17806_v6  ;;  %v17812_v26 = vld [vmem:[#allocation133_spill] sm:$0xff] }
 0x700   : >> { %7600 = vmatprep.subr.bf16.mxu1 %v9262_v15  ;;  %v17810_v15 = vld [vmem:[#allocation360_spill] sm:$0xff]  ;;  %v17814_v6 = vld [vmem:[#allocation125_spill] sm:$0xff] }
 0x701   : >> { %7558 = vmatpush1.bf16.msra.mxu0 %v8989_v23  ;;  %v9021_v23 = vcombine.low %v17805_v4, %v17803_v7  ;;  %v9294_v19 = vcombine.high %v17811_v13, %v17810_v15  ;;  %v17813_v4 = vmov %v17812_v26  ;;  %v17816_v7 = vld [vmem:[#allocation367_spill] sm:$0xff] }
 0x702   : >> { %7559 = vmatprep.subr.bf16.mxu0 %v9006_v1  ;;  %v9038_v1 = vcombine.high %v17809_v10, %v17808_v14 }
 0x703   : >> { %7601 = vmatpush1.bf16.msra.mxu1 %v9261_v2  ;;  %v9293_v2 = vcombine.low %v17811_v13, %v17810_v15  ;;  %v17819_v13 = vld [vmem:[#allocation391_spill] sm:$0xff] }
 0x704   : >> { %7602 = vmatprep.subr.bf16.mxu1 %v9278_v18  ;;  %v9054_v18 = vcombine.high %v17814_v6, %v17812_v26 }
 0x705   : >> { %7560 = vmatpush1.bf16.msra.mxu0 %v9005_v16  ;;  %v9037_v16 = vcombine.low %v17809_v10, %v17808_v14  ;;  %v17817_v10 = vld [vmem:[#allocation147_spill] sm:$0xff] }
 0x706   : >> { %7561 = vmatprep.subr.bf16.mxu0 %v9022_v5  ;;  %v17815_v5 = vld [vmem:[#allocation375_spill] sm:$0xff] }
 0x707   : >> { %7603 = vmatpush1.bf16.msra.mxu1 %v9277_v0  ;;  %v9310_v17 = vcombine.high %v17816_v7, %v17815_v5  ;;  %v9309_v0 = vcombine.low %v17816_v7, %v17815_v5  ;;  %v17820_v14 = vld [vmem:[#allocation383_spill] sm:$0xff] }
 0x708   : >> { %7604 = vmatprep.subr.bf16.mxu1 %v9294_v19  ;;  %v9326_v26 = vcombine.high %v17820_v14, %v17819_v13 }
 0x709   : >> { %7562 = vmatpush1.bf16.msra.mxu0 %v9021_v23  ;;  %v9053_v23 = vcombine.low %v17814_v6, %v17813_v4 }
 0x70a   : >> { %7563 = vmatprep.subr.bf16.mxu0 %v9038_v1  ;;  %v17818_v1 = vld [vmem:[#allocation140_spill] sm:$0xff] }
 0x70b   : >> { %7605 = vmatpush1.bf16.msra.mxu1 %v9293_v2  ;;  %v9070_v19 = vcombine.high %v17818_v1, %v17817_v10 }
 0x70c   : >> { %7606 = vmatprep.subr.bf16.mxu1 %v9310_v17  ;;  %v9069_v17 = vcombine.low %v17818_v1, %v17817_v10  ;;  %v17828_v10 = vld [vmem:[#allocation412_spill] sm:$0xff] }
 0x70d   : >> { %7564 = vmatpush1.bf16.msra.mxu0 %v9037_v16  ;;  %v7302_v20 = vpop.f32.mrb[20].mxu1 }
 0x70e   : >> { %7565 = vmatprep.subr.bf16.mxu0 %v9054_v18  ;;  %v7304_v21 = vpop.f32.mrb[21].mxu1  ;;  %v9325_v18 = vcombine.low %v17820_v14, %v17819_v13 }
 0x70f   : >> { %v7261_v15 = vpop.f32.mrb[20].mxu0  ;;  %v7306_v5 = vpop.f32.mrb[22].mxu1  ;;  %7607 = vmatpush1.bf16.msra.mxu1 %v9309_v0 }
 0x710   : >> { %v7262_v16 = vadd.f32 %v7261_v15, %v14241_v25  ;;  %v7263_v2 = vpop.f32.mrb[21].mxu0  ;;  %v7307_v31 = vpop.f32.mrb[23].mxu1  ;;  %7608 = vmatprep.subr.bf16.mxu1 %v9326_v26  ;;  %v17821_v25 = vld [vmem:[#allocation162_spill] sm:$0xff]  ;;  %v17822_v15 = vld [vmem:[#allocation155_spill] sm:$0xff] }
 0x711   : >> { %v7264_v4 = vadd.f32 %v7263_v2, %v14245_v12  ;;  %v7265_v6 = vpop.f32.mrb[22].mxu0  ;;  %7566 = vmatpush1.bf16.msra.mxu0 %v9053_v23  ;;  %v9086_v32 = vcombine.high %v17822_v15, %v17821_v25  ;;  %v17823_v12 = vld [vmem:[#allocation405_spill] sm:$0xff]  ;;  %v9085_v1 = vcombine.low %v17822_v15, %v17821_v25 }
 0x712   : >> { %v7303_v7 = vadd.f32 %v7302_v20, %v7262_v16  ;;  %v7266_v27 = vpop.f32.mrb[23].mxu0  ;;  %7567 = vmatprep.subr.bf16.mxu0 %v9070_v19  ;;  %v17824_v6 = vld [vmem:[#allocation398_spill] sm:$0xff]  ;;  %v17826_v19 = vld [vmem:[#allocation169_spill] sm:$0xff]  ;;  %v17827_v16 = vld [vmem:[#allocation420_spill] sm:$0xff] }
 0x713   : >> { %v9342_v5 = vcombine.high %v17824_v6, %v17823_v12  ;;  %v7305_v23 = vadd.f32 %v7304_v21, %v7264_v4  ;;  %7609 = vmatpush1.bf16.msra.mxu1 %v9325_v18  ;;  %v9341_v20 = vcombine.low %v17824_v6, %v17823_v12  ;;  %v17825_v27 = vld [vmem:[#allocation176_spill] sm:$0xff]  ;;  %v9358_v13 = vcombine.high %v17828_v10, %v17827_v16  ;;  %v17832_v18 = vld [vmem:[#allocation427_spill] sm:$0xff]  ;;  %v17839_v6 = vld [vmem:[#allocation465_spill] sm:$0xff] }
 0x714   : >> { %v7820_v0 = vadd.f32 %v7812_v22, %v7303_v7  ;;  %v9102_v26 = vcombine.high %v17826_v19, %v17825_v27  ;;  %v9357_v22 = vcombine.low %v17828_v10, %v17827_v16  ;;  %v17830_v4 = vld [vmem:[#allocation184_spill] sm:$0xff]  ;;  %v17840_v10 = vld [vmem:[#allocation457_spill] sm:$0xff] }
 0x715   : >> { %v7821_v2 = vadd.f32 %v7813_v24, %v7305_v23  ;;  %7568 = vmatpush1.bf16.msra.mxu0 %v9069_v17  ;;  %7610 = vmatprep.subr.bf16.mxu1 %v9342_v5  ;;  %v9101_v24 = vcombine.low %v17826_v19, %v17825_v27  ;;  %v17831_v17 = vld [vmem:[#allocation434_spill] sm:$0xff]  ;;  %v9406_v12 = vcombine.high %v17840_v10, %v17839_v6 }
 0x716   : >> { %v9735_v31 = vmul.f32 -1.442695, %v7820_v0  ;;  %7569 = vmatprep.subr.bf16.mxu0 %v9086_v32  ;;  %v17829_v32 = vld [vmem:[#allocation192_spill] sm:$0xff]  ;;  %v9374_v5 = vcombine.high %v17832_v18, %v17831_v17  ;;  %v9373_v23 = vcombine.low %v17832_v18, %v17831_v17  ;;  %v10227_v25 = vld [vmem:[#allocation23 + $0xb4] ss:$8 sps:$4 sm:$0xff] (%p2957_p10)   ;;  %v10251_v27 = vld [vmem:[#allocation26 + $0x20] sm:$0xff] (%p2957_p10)  }
 0x717   : >> { %v9736_v21 = vmul.f32 -1.442695, %v7821_v2  ;;  %7611 = vmatpush1.bf16.msra.mxu1 %v9341_v20  ;;  %v9118_v7 = vcombine.high %v17830_v4, %v17829_v32  ;;  %v17833_v0 = vld [vmem:[#allocation208_spill] sm:$0xff] }
 0x718   : >> { %10150 = vpow2.f32 %v9735_v31  ;;  %7612 = vmatprep.subr.bf16.mxu1 %v9358_v13  ;;  %v17834_v2 = vld [vmem:[#allocation200_spill] sm:$0xff]  ;;  %v17835_v13 = vld [vmem:[#allocation449_spill] sm:$0xff]  ;;  %v17836_v31 = vld [vmem:[#allocation442_spill] sm:$0xff] }
 0x719   : >> { %10152 = vpow2.f32 %v9736_v21  ;;  %7570 = vmatpush1.bf16.msra.mxu0 %v9085_v1  ;;  %v9117_v1 = vcombine.low %v17830_v4, %v17829_v32  ;;  %v9134_v20 = vcombine.high %v17834_v2, %v17833_v0  ;;  %v9133_v21 = vcombine.low %v17834_v2, %v17833_v0  ;;  %v17837_v4 = vld [vmem:[#allocation224_spill] sm:$0xff]  ;;  %v17841_v0 = vld [vmem:[#allocation238_spill] sm:$0xff]  ;;  %v17842_v2 = vld [vmem:[#allocation231_spill] sm:$0xff] }
 0x71a   : >> { %7571 = vmatprep.subr.bf16.mxu0 %v9102_v26  ;;  %v9390_v26 = vcombine.high %v17836_v31, %v17835_v13  ;;  %10154 = vtanh.f32 %v14287_v3  ;;  %v17843_v3 = vld [vmem:[#allocation481_spill] sm:$0xff] }
 0x71b   : >> { %7613 = vmatpush1.bf16.msra.mxu1 %v9357_v22  ;;  %10156 = vtanh.f32 %v14293_v34  ;;  %v9165_v34 = vcombine.low %v17842_v2, %v17841_v0  ;;  %v10229_v32 = vld [vmem:[#allocation23 + $0xb0] ss:$8 sps:$4 sm:$0xff] (%p2957_p10)  }
 0x71c   : >> { %7614 = vmatprep.subr.bf16.mxu1 %v9374_v5 }
 0x71d   : >> { %7572 = vmatpush1.bf16.msra.mxu0 %v9101_v24  ;;  %v9389_v24 = vcombine.low %v17836_v31, %v17835_v13  ;;  %v9166_v13 = vcombine.high %v17842_v2, %v17841_v0  ;;  %v10252_v31 = vld [vmem:[#allocation26 + $0x68] sm:$0xff] (%p2957_p10)  }
 0x71e   : >> { %7573 = vmatprep.subr.bf16.mxu0 %v9118_v7  ;;  %v17838_v7 = vld [vmem:[#allocation216_spill] sm:$0xff] }
 0x71f   : >> { %7615 = vmatpush1.bf16.msra.mxu1 %v9373_v23  ;;  %v9150_v5 = vcombine.high %v17838_v7, %v17837_v4 }
 0x720   : >> { %7616 = vmatprep.subr.bf16.mxu1 %v9390_v26  ;;  %v9405_v26 = vcombine.low %v17840_v10, %v17839_v6  ;;  %v17852_v6 = vld [vmem:[#allocation505_spill] sm:$0xff] }
 0x721   : >> { %7574 = vmatpush1.bf16.msra.mxu0 %v9117_v1 }
 0x722   : >> { %v10151_v22 = vpop.eup %10150  ;;  %7575 = vmatprep.subr.bf16.mxu0 %v9134_v20  ;;  %v9149_v20 = vcombine.low %v17838_v7, %v17837_v4 }
 0x723   : >> { %v10153_v14 = vpop.eup %10152  ;;  %v7854_v1 = vadd.f32 1.0, %v10151_v22  ;;  %7617 = vmatpush1.bf16.msra.mxu1 %v9389_v24  ;;  %v17844_v22 = vld [vmem:[#allocation473_spill] sm:$0xff]  ;;  %v17846_v24 = vld [vmem:[#allocation246_spill] sm:$0xff] }
 0x724   : >> { %v7855_v23 = vadd.f32 1.0, %v10153_v14  ;;  %7618 = vmatprep.subr.bf16.mxu1 %v9406_v12  ;;  %v9422_v15 = vcombine.high %v17844_v22, %v17843_v3  ;;  %v9421_v14 = vcombine.low %v17844_v22, %v17843_v3  ;;  %v17847_v12 = vld [vmem:[#allocation497_spill] sm:$0xff]  ;;  %v10155_v4 = vpop.eup %10154 }
 0x725   : >> { %10158 = vrcp.f32 %v7854_v1  ;;  %7576 = vmatpush1.bf16.msra.mxu0 %v9133_v21  ;;  %v17845_v21 = vld [vmem:[#allocation254_spill] sm:$0xff]  ;;  %v17848_v1 = vld [vmem:[#allocation489_spill] sm:$0xff]  ;;  %v10157_v0 = vpop.eup %10156 }
 0x726   : >> { %10160 = vrcp.f32 %v7855_v23  ;;  %7577 = vmatprep.subr.bf16.mxu0 %v9150_v5  ;;  %v9182_v5 = vcombine.high %v17846_v24, %v17845_v21  ;;  %v9438_v23 = vcombine.high %v17848_v1, %v17847_v12  ;;  %v17851_v3 = vld [vmem:[#allocation513_spill] sm:$0xff] }
 0x727   : >> { %7619 = vmatpush1.bf16.msra.mxu1 %v9405_v26  ;;  %v9437_v26 = vcombine.low %v17848_v1, %v17847_v12  ;;  %v9454_v7 = vcombine.high %v17852_v6, %v17851_v3  ;;  %v9453_v1 = vcombine.low %v17852_v6, %v17851_v3  ;;  %v17855_v12 = vld [vmem:[#allocation278_spill] sm:$0xff]  ;;  %v17863_v6 = vld [vmem:[#allocation49_spill] sm:$0xff] }
 0x728   : >> { %7620 = vmatprep.subr.bf16.mxu1 %v9422_v15  ;;  %v17850_v15 = vld [vmem:[#allocation262_spill] sm:$0xff] }
 0x729   : >> { %7578 = vmatpush1.bf16.msra.mxu0 %v9149_v20  ;;  %v9181_v20 = vcombine.low %v17846_v24, %v17845_v21  ;;  %v17893_v21 = vld [vmem:[#allocation163_spill] sm:$0xff] }
 0x72a   : >> { %7579 = vmatprep.subr.bf16.mxu0 %v9166_v13  ;;  %v17849_v13 = vld [vmem:[#allocation270_spill] sm:$0xff] }
 0x72b   : >> { %7621 = vmatpush1.bf16.msra.mxu1 %v9421_v14  ;;  %v9198_v2 = vcombine.high %v17850_v15, %v17849_v13  ;;  %v9197_v14 = vcombine.low %v17850_v15, %v17849_v13  ;;  %v10232_v24 = vld [vmem:[#allocation23 + $0xc0] ss:$8 sps:$4 sm:$0xff] (%p2957_p10)  }
 0x72c   : >> { %7622 = vmatprep.subr.bf16.mxu1 %v9438_v23  ;;  %v17854_v23 = vld [vmem:[#allocation286_spill] sm:$0xff] }
 0x72d   : >> { %7580 = vmatpush1.bf16.msra.mxu0 %v9165_v34  ;;  %v9214_v18 = vcombine.high %v17855_v12, %v17854_v23 }
 0x72e   : >> { %7581 = vmatprep.subr.bf16.mxu0 %v9182_v5 }
 0x72f   : >> { %v10159_v10 = vpop.eup %10158  ;;  %7623 = vmatpush1.bf16.msra.mxu1 %v9437_v26  ;;  %v17861_v26 = vld [vmem:[#allocation57_spill] sm:$0xff] }
 0x730   : >> { %v10161_v16 = vpop.eup %10160  ;;  %v7868_v17 = vmul.f32 %v10159_v10, %v10155_v4  ;;  %7624 = vmatprep.subr.bf16.mxu1 %v9454_v7  ;;  %v17856_v10 = vld [vmem:[#allocation529_spill] sm:$0xff]  ;;  %v17862_v3 = vmov %v17861_v26  ;;  %v8976_v13 = vcombine.high %v17863_v6, %v17861_v26 }
 0x731   : >> { %v7869_v34 = vmul.f32 %v10161_v16, %v10157_v0  ;;  %7582 = vmatpush1.bf16.msra.mxu0 %v9181_v20  ;;  %v17857_v16 = vld [vmem:[#allocation521_spill] sm:$0xff]  ;;  %v9213_v20 = vcombine.low %v17855_v12, %v17854_v23  ;;  %v8975_v9 = vcombine.low %v17863_v6, %v17862_v3  ;;  %v17873_v3 = vld [vmem:[#allocation80_spill] sm:$0xff] }
 0x732   : >> { %v14480_v47 = vsel %vm14283_vm1, %v7868_v17, %v10782_v47   ;;  %7583 = vmatprep.subr.bf16.mxu0 %v9198_v2  ;;  %v9470_v4 = vcombine.high %v17857_v16, %v17856_v10  ;;  %v17859_v17 = vld [vmem:[#allocation545_spill] sm:$0xff] }
 0x733   : >> { %v17853_v5 = vmov %v14480_v47  ;;  %v14489_v59 = vsel %vm14283_vm1, %v7869_v34, %v10778_v59   ;;  %7625 = vmatpush1.bf16.msra.mxu1 %v9453_v1  ;;  %v9469_v47 = vcombine.low %v17857_v16, %v17856_v10  ;;  %v17860_v2 = vld [vmem:[#allocation537_spill] sm:$0xff]  ;;  %v17868_v10 = vld [vmem:[#allocation64_spill] sm:$0xff] }
 0x734   : >> { %v17858_v0 = vmov %v14489_v59  ;;  %7626 = vmatprep.subr.bf16.mxu1 %v9470_v4  ;;  %v9486_v7 = vcombine.high %v17860_v2, %v17859_v17  ;;  %v9485_v59 = vcombine.low %v17860_v2, %v17859_v17  ;;  %v17864_v1 = vld [vmem:[#allocation561_spill] sm:$0xff]  ;;  %v17867_v4 = vld [vmem:[#allocation72_spill] sm:$0xff]  ;;  %7993 = vst [vmem:[#allocation4] sm:$0xff] (%p2957_p10), %v17853_v5 }
 0x735   : >> { %7584 = vmatpush1.bf16.msra.mxu0 %v9197_v14  ;;  %v17865_v34 = vld [vmem:[#allocation553_spill] sm:$0xff]  ;;  %v8992_v12 = vcombine.high %v17868_v10, %v17867_v4  ;;  %7994 = vst [vmem:[#allocation4 + $0x8] sm:$0xff] (%p2957_p10), %v17858_v0 }
 0x736   : >> { %7585 = vmatprep.subr.bf16.mxu0 %v9214_v18  ;;  %v17866_v14 = vmov %v17865_v34  ;;  %v9502_v18 = vcombine.high %v17865_v34, %v17864_v1  ;;  %v17871_v34 = vld [vmem:[#allocation88_spill] sm:$0xff] }
 0x737   : >> { %7627 = vmatpush1.bf16.msra.mxu1 %v9469_v47  ;;  %v8991_v47 = vcombine.low %v17868_v10, %v17867_v4  ;;  %v17872_v2 = vmov %v17871_v34  ;;  %v9008_v6 = vcombine.high %v17873_v3, %v17871_v34  ;;  %v17876_v4 = vld [vmem:[#allocation102_spill] sm:$0xff]  ;;  %v17877_v10 = vld [vmem:[#allocation95_spill] sm:$0xff] }
 0x738   : >> { %7678 = vmatprep.subr.bf16.mxu1 %v8976_v13  ;;  %v17869_v13 = vld [vmem:[#allocation577_spill] sm:$0xff]  ;;  %v9024_v34 = vcombine.high %v17877_v10, %v17876_v4 }
 0x739   : >> { %7586 = vmatpush1.bf16.msra.mxu0 %v9213_v20  ;;  %v9501_v20 = vcombine.low %v17866_v14, %v17864_v1  ;;  %v17886_v14 = vld [vmem:[#allocation126_spill] sm:$0xff] }
 0x73a   : >> { %7637 = vmatprep.subr.bf16.mxu0 %v9486_v7  ;;  %7629 = vmatmul.mubr.bf16.vlgmr.msra.gmra.mrb[36].mxu1 %v13218_v8  ;;  %v17870_v7 = vld [vmem:[#allocation569_spill] sm:$0xff] }
 0x73b   : >> { %7679 = vmatpush1.bf16.msra.mxu1 %v8975_v9  ;;  %v9518_v26 = vcombine.high %v17870_v7, %v17869_v13  ;;  %7710 = vmatprep.mubr.bf16.mxu1 %v13124_v56  ;;  %v9007_v9 = vcombine.low %v17873_v3, %v17872_v2  ;;  %v17879_v2 = vld [vmem:[#allocation601_spill] sm:$0xff]  ;;  %v17881_v3 = vld [vmem:[#allocation110_spill] sm:$0xff] }
 0x73c   : >> { %7588 = vmatmul.mubr.bf16.vlgmr.msra.gmra.mrb[36].mxu0 %v13218_v8  ;;  %7680 = vmatprep.subr.bf16.mxu1 %v8992_v12  ;;  %v17874_v12 = vld [vmem:[#allocation593_spill] sm:$0xff] }
 0x73d   : >> { %7638 = vmatpush1.bf16.msra.mxu0 %v9485_v59  ;;  %7669 = vmatprep.mubr.bf16.mxu0 %v13230_v11  ;;  %v9517_v59 = vcombine.low %v17870_v7, %v17869_v13  ;;  %v17878_v7 = vld [vmem:[#allocation609_spill] sm:$0xff] }
 0x73e   : >> { %7639 = vmatprep.subr.bf16.mxu0 %v9502_v18  ;;  %v17875_v18 = vld [vmem:[#allocation585_spill] sm:$0xff] }
 0x73f   : >> { %7681 = vmatpush1.bf16.msra.mxu1 %v8991_v47  ;;  %v9534_v1 = vcombine.high %v17875_v18, %v17874_v12  ;;  %v9023_v47 = vcombine.low %v17877_v10, %v17876_v4  ;;  %v17883_v4 = vld [vmem:[#allocation617_spill] sm:$0xff] }
 0x740   : >> { %7682 = vmatprep.subr.bf16.mxu1 %v9008_v6  ;;  %v17880_v6 = vld [vmem:[#allocation118_spill] sm:$0xff] }
 0x741   : >> { %7640 = vmatpush1.bf16.msra.mxu0 %v9501_v20  ;;  %v9533_v20 = vcombine.low %v17875_v18, %v17874_v12  ;;  %v9040_v13 = vcombine.high %v17881_v3, %v17880_v6  ;;  %v17882_v12 = vld [vmem:[#allocation625_spill] sm:$0xff] }
 0x742   : >> { %7641 = vmatprep.subr.bf16.mxu0 %v9518_v26  ;;  %v9550_v26 = vcombine.high %v17879_v2, %v17878_v7 }
 0x743   : >> { %7683 = vmatpush1.bf16.msra.mxu1 %v9007_v9  ;;  %v9039_v9 = vcombine.low %v17881_v3, %v17880_v6  ;;  %v17888_v3 = vld [vmem:[#allocation633_spill] sm:$0xff] }
 0x744   : >> { %7684 = vmatprep.subr.bf16.mxu1 %v9024_v34  ;;  %v17884_v34 = vld [vmem:[#allocation134_spill] sm:$0xff]  ;;  %v17890_v6 = vld [vmem:[#allocation141_spill] sm:$0xff] }
 0x745   : >> { %7642 = vmatpush1.bf16.msra.mxu0 %v9517_v59  ;;  %v9549_v59 = vcombine.low %v17879_v2, %v17878_v7  ;;  %v17885_v10 = vmov %v17884_v34  ;;  %v9056_v15 = vcombine.high %v17886_v14, %v17884_v34  ;;  %v17887_v2 = vld [vmem:[#allocation641_spill] sm:$0xff] }
 0x746   : >> { %7643 = vmatprep.subr.bf16.mxu0 %v9534_v1  ;;  %v9566_v1 = vcombine.high %v17883_v4, %v17882_v12 }
 0x747   : >> { %7685 = vmatpush1.bf16.msra.mxu1 %v9023_v47  ;;  %v9055_v47 = vcombine.low %v17886_v14, %v17885_v10 }
 0x748   : >> { %7686 = vmatprep.subr.bf16.mxu1 %v9040_v13  ;;  %v17889_v13 = vld [vmem:[#allocation148_spill] sm:$0xff] }
 0x749   : >> { %7644 = vmatpush1.bf16.msra.mxu0 %v9533_v20  ;;  %v9565_v20 = vcombine.low %v17883_v4, %v17882_v12  ;;  %v9072_v7 = vcombine.high %v17890_v6, %v17889_v13 }
 0x74a   : >> { %7645 = vmatprep.subr.bf16.mxu0 %v9550_v26  ;;  %v9582_v26 = vcombine.high %v17888_v3, %v17887_v2 }
 0x74b   : >> { %7687 = vmatpush1.bf16.msra.mxu1 %v9039_v9 }
 0x74c   : >> { %7688 = vmatprep.subr.bf16.mxu1 %v9056_v15  ;;  %v9581_v15 = vcombine.low %v17888_v3, %v17887_v2 }
 0x74d   : >> { %7646 = vmatpush1.bf16.msra.mxu0 %v9549_v59  ;;  %v7384_v17 = vpop.f32.mrb[24].mxu1 }
 0x74e   : >> { %7647 = vmatprep.subr.bf16.mxu0 %v9566_v1  ;;  %v7386_v9 = vpop.f32.mrb[25].mxu1  ;;  %v9071_v1 = vcombine.low %v17890_v6, %v17889_v13  ;;  %v17903_v6 = vld [vmem:[#allocation681_spill] sm:$0xff] }
 0x74f   : >> { %v7343_v16 = vpop.f32.mrb[24].mxu0  ;;  %v7388_v12 = vpop.f32.mrb[26].mxu1  ;;  %7689 = vmatpush1.bf16.msra.mxu1 %v9055_v47  ;;  %v17899_v47 = vld [vmem:[#allocation170_spill] sm:$0xff] }
 0x750   : >> { %v14551_v18 = vadd.f32 %v7384_v17, %v7343_v16  ;;  %v7345_v59 = vpop.f32.mrb[25].mxu0  ;;  %v7389_v14 = vpop.f32.mrb[27].mxu1  ;;  %7690 = vmatprep.subr.bf16.mxu1 %v9072_v7  ;;  %v17891_v16 = vld [vmem:[#allocation657_spill] sm:$0xff]  ;;  %v17900_v2 = vmov %v17899_v47 }
 0x751   : >> { %v14553_v34 = vadd.f32 %v7386_v9, %v7345_v59  ;;  %v7347_v4 = vpop.f32.mrb[26].mxu0  ;;  %7648 = vmatpush1.bf16.msra.mxu0 %v9565_v20  ;;  %v17892_v17 = vld [vmem:[#allocation649_spill] sm:$0xff]  ;;  %v17894_v59 = vld [vmem:[#allocation156_spill] sm:$0xff] }
 0x752   : >> { %v7348_v10 = vpop.f32.mrb[27].mxu0  ;;  %7649 = vmatprep.subr.bf16.mxu0 %v9582_v26  ;;  %v9598_v19 = vcombine.high %v17892_v17, %v17891_v16  ;;  %v17895_v9 = vmov %v17894_v59  ;;  %v9088_v22 = vcombine.high %v17894_v59, %v17893_v21  ;;  %v9597_v4 = vcombine.low %v17892_v17, %v17891_v16  ;;  %v17897_v14 = vld [vmem:[#allocation665_spill] sm:$0xff] }
 0x753   : >> { %7691 = vmatpush1.bf16.msra.mxu1 %v9071_v1  ;;  %v9087_v12 = vcombine.low %v17895_v9, %v17893_v21  ;;  %v17896_v10 = vld [vmem:[#allocation673_spill] sm:$0xff]  ;;  %v17975_v21 = vld [vmem:[#allocation658_spill] sm:$0xff] }
 0x754   : >> { %7692 = vmatprep.subr.bf16.mxu1 %v9088_v22  ;;  %v9614_v20 = vcombine.high %v17897_v14, %v17896_v10  ;;  %v17898_v7 = vld [vmem:[#allocation177_spill] sm:$0xff] }
 0x755   : >> { %7650 = vmatpush1.bf16.msra.mxu0 %v9581_v15  ;;  %v9104_v26 = vcombine.high %v17899_v47, %v17898_v7  ;;  %v9613_v15 = vcombine.low %v17897_v14, %v17896_v10  ;;  %v9103_v1 = vcombine.low %v17900_v2, %v17898_v7  ;;  %v17901_v59 = vld [vmem:[#allocation689_spill] sm:$0xff] }
 0x756   : >> { %7651 = vmatprep.subr.bf16.mxu0 %v9598_v19  ;;  %v17902_v3 = vmov %v17901_v59  ;;  %v9630_v19 = vcombine.high %v17903_v6, %v17901_v59  ;;  %v17904_v22 = vld [vmem:[#allocation193_spill] sm:$0xff] }
 0x757   : >> { %7693 = vmatpush1.bf16.msra.mxu1 %v9087_v12  ;;  %v17905_v9 = vld [vmem:[#allocation185_spill] sm:$0xff] }
 0x758   : >> { %7694 = vmatprep.subr.bf16.mxu1 %v9104_v26  ;;  %v9120_v13 = vcombine.high %v17905_v9, %v17904_v22  ;;  %v9119_v12 = vcombine.low %v17905_v9, %v17904_v22  ;;  %v17906_v47 = vld [vmem:[#allocation705_spill] sm:$0xff] }
 0x759   : >> { %7652 = vmatpush1.bf16.msra.mxu0 %v9597_v4  ;;  %v9629_v4 = vcombine.low %v17903_v6, %v17902_v3  ;;  %v17907_v10 = vmov %v17906_v47  ;;  %v17908_v2 = vld [vmem:[#allocation697_spill] sm:$0xff] }
 0x75a   : >> { %7653 = vmatprep.subr.bf16.mxu0 %v9614_v20  ;;  %v9646_v20 = vcombine.high %v17908_v2, %v17906_v47  ;;  %v17909_v26 = vld [vmem:[#allocation209_spill] sm:$0xff] }
 0x75b   : >> { %7695 = vmatpush1.bf16.msra.mxu1 %v9103_v1  ;;  %v17910_v7 = vmov %v17909_v26  ;;  %v17911_v14 = vld [vmem:[#allocation201_spill] sm:$0xff] }
 0x75c   : >> { %7696 = vmatprep.subr.bf16.mxu1 %v9120_v13  ;;  %v9136_v16 = vcombine.high %v17911_v14, %v17909_v26  ;;  %v9135_v1 = vcombine.low %v17911_v14, %v17910_v7  ;;  %v17912_v59 = vld [vmem:[#allocation721_spill] sm:$0xff] }
 0x75d   : >> { %7654 = vmatpush1.bf16.msra.mxu0 %v9613_v15  ;;  %v9645_v15 = vcombine.low %v17908_v2, %v17907_v10  ;;  %v17913_v3 = vmov %v17912_v59  ;;  %v17914_v6 = vld [vmem:[#allocation713_spill] sm:$0xff]  ;;  %v17922_v10 = vld [vmem:[#allocation232_spill] sm:$0xff] }
 0x75e   : >> { %7655 = vmatprep.subr.bf16.mxu0 %v9630_v19  ;;  %v9662_v19 = vcombine.high %v17914_v6, %v17912_v59  ;;  %v17915_v13 = vld [vmem:[#allocation225_spill] sm:$0xff] }
 0x75f   : >> { %7697 = vmatpush1.bf16.msra.mxu1 %v9119_v12  ;;  %v17916_v9 = vld [vmem:[#allocation217_spill] sm:$0xff] }
 0x760   : >> { %7698 = vmatprep.subr.bf16.mxu1 %v9136_v16  ;;  %v9152_v17 = vcombine.high %v17916_v9, %v17915_v13  ;;  %v9151_v12 = vcombine.low %v17916_v9, %v17915_v13  ;;  %v17917_v47 = vld [vmem:[#allocation737_spill] sm:$0xff]  ;;  %v17921_v16 = vld [vmem:[#allocation239_spill] sm:$0xff] }
 0x761   : >> { %7656 = vmatpush1.bf16.msra.mxu0 %v9629_v4  ;;  %v9661_v4 = vcombine.low %v17914_v6, %v17913_v3  ;;  %v17918_v2 = vmov %v17917_v47  ;;  %v17919_v26 = vld [vmem:[#allocation729_spill] sm:$0xff]  ;;  %v9168_v14 = vcombine.high %v17922_v10, %v17921_v16  ;;  %v17927_v9 = vld [vmem:[#allocation247_spill] sm:$0xff] }
 0x762   : >> { %7657 = vmatprep.subr.bf16.mxu0 %v9646_v20  ;;  %v17920_v7 = vmov %v17919_v26  ;;  %v9678_v20 = vcombine.high %v17919_v26, %v17917_v47  ;;  %v17923_v59 = vld [vmem:[#allocation753_spill] sm:$0xff] }
 0x763   : >> { %7699 = vmatpush1.bf16.msra.mxu1 %v9135_v1  ;;  %v9167_v1 = vcombine.low %v17922_v10, %v17921_v16  ;;  %v17924_v3 = vmov %v17923_v59  ;;  %v17925_v6 = vld [vmem:[#allocation745_spill] sm:$0xff]  ;;  %v17933_v10 = vld [vmem:[#allocation263_spill] sm:$0xff] }
 0x764   : >> { %7700 = vmatprep.subr.bf16.mxu1 %v9152_v17  ;;  %v17926_v17 = vld [vmem:[#allocation255_spill] sm:$0xff]  ;;  %v17928_v47 = vld [vmem:[#allocation769_spill] sm:$0xff] }
 0x765   : >> { %7658 = vmatpush1.bf16.msra.mxu0 %v9645_v15  ;;  %v9677_v15 = vcombine.low %v17920_v7, %v17918_v2  ;;  %v9184_v13 = vcombine.high %v17927_v9, %v17926_v17  ;;  %v17929_v2 = vmov %v17928_v47  ;;  %v17930_v26 = vld [vmem:[#allocation761_spill] sm:$0xff] }
 0x766   : >> { %7659 = vmatprep.subr.bf16.mxu0 %v9662_v19  ;;  %v9694_v19 = vcombine.high %v17925_v6, %v17923_v59  ;;  %v17931_v7 = vmov %v17930_v26  ;;  %v17934_v59 = vld [vmem:[#allocation783_spill] sm:$0xff] }
 0x767   : >> { %7701 = vmatpush1.bf16.msra.mxu1 %v9151_v12  ;;  %v9183_v12 = vcombine.low %v17927_v9, %v17926_v17  ;;  %v17938_v9 = vld [vmem:[#allocation279_spill] sm:$0xff] }
 0x768   : >> { %7702 = vmatprep.subr.bf16.mxu1 %v9168_v14  ;;  %v17932_v14 = vld [vmem:[#allocation271_spill] sm:$0xff] }
 0x769   : >> { %7660 = vmatpush1.bf16.msra.mxu0 %v9661_v4  ;;  %v9693_v4 = vcombine.low %v17925_v6, %v17924_v3  ;;  %v9200_v16 = vcombine.high %v17933_v10, %v17932_v14  ;;  %v17935_v3 = vmov %v17934_v59  ;;  %v17936_v6 = vld [vmem:[#allocation777_spill] sm:$0xff] }
 0x76a   : >> { %7661 = vmatprep.subr.bf16.mxu0 %v9678_v20  ;;  %v9710_v20 = vcombine.high %v17930_v26, %v17928_v47  ;;  %v17939_v47 = vld [vmem:[#allocation302_spill] sm:$0xff]  ;;  %v17941_v26 = vld [vmem:[#allocation295_spill] sm:$0xff] }
 0x76b   : >> { %7703 = vmatpush1.bf16.msra.mxu1 %v9167_v1  ;;  %v9199_v1 = vcombine.low %v17933_v10, %v17932_v14  ;;  %v17944_v10 = vld [vmem:[#allocation538_spill] sm:$0xff] }
 0x76c   : >> { %7704 = vmatprep.subr.bf16.mxu1 %v9184_v13  ;;  %v17937_v13 = vld [vmem:[#allocation287_spill] sm:$0xff] }
 0x76d   : >> { %7662 = vmatpush1.bf16.msra.mxu0 %v9677_v15  ;;  %v9709_v15 = vcombine.low %v17931_v7, %v17929_v2  ;;  %v9216_v17 = vcombine.high %v17938_v9, %v17937_v13  ;;  %v17940_v2 = vmov %v17939_v47  ;;  %v17942_v7 = vmov %v17941_v26 }
 0x76e   : >> { %7663 = vmatprep.subr.bf16.mxu0 %v9694_v19  ;;  %v9726_v19 = vcombine.high %v17936_v6, %v17934_v59  ;;  %v17945_v59 = vld [vmem:[#allocation317_spill] sm:$0xff] }
 0x76f   : >> { %7705 = vmatpush1.bf16.msra.mxu1 %v9183_v12  ;;  %v9215_v12 = vcombine.low %v17938_v9, %v17937_v13  ;;  %v17949_v9 = vld [vmem:[#allocation554_spill] sm:$0xff] }
 0x770   : >> { %7706 = vmatprep.subr.bf16.mxu1 %v9200_v16  ;;  %v17943_v16 = vld [vmem:[#allocation546_spill] sm:$0xff] }
 0x771   : >> { %7664 = vmatpush1.bf16.msra.mxu0 %v9693_v4  ;;  %v9725_v4 = vcombine.low %v17936_v6, %v17935_v3  ;;  %v9488_v14 = vcombine.high %v17944_v10, %v17943_v16  ;;  %v17946_v3 = vmov %v17945_v59  ;;  %v17947_v6 = vld [vmem:[#allocation310_spill] sm:$0xff] }
 0x772   : >> { %7665 = vmatprep.subr.bf16.mxu0 %v9710_v20  ;;  %v9232_v20 = vcombine.high %v17941_v26, %v17939_v47  ;;  %v17951_v47 = vld [vmem:[#allocation324_spill] sm:$0xff] }
 0x773   : >> { %7707 = vmatpush1.bf16.msra.mxu1 %v9199_v1  ;;  %v9487_v1 = vcombine.low %v17944_v10, %v17943_v16 }
 0x774   : >> { %7708 = vmatprep.subr.bf16.mxu1 %v9216_v17  ;;  %v17948_v17 = vld [vmem:[#allocation562_spill] sm:$0xff] }
 0x775   : >> { %7666 = vmatpush1.bf16.msra.mxu0 %v9709_v15  ;;  %v9231_v15 = vcombine.low %v17942_v7, %v17940_v2  ;;  %v9504_v13 = vcombine.high %v17949_v9, %v17948_v17  ;;  %v17955_v7 = vld [vmem:[#allocation570_spill] sm:$0xff] }
 0x776   : >> { %7667 = vmatprep.subr.bf16.mxu0 %v9726_v19  ;;  %v9248_v19 = vcombine.high %v17947_v6, %v17945_v59  ;;  %v17953_v59 = vld [vmem:[#allocation578_spill] sm:$0xff] }
 0x777   : >> { %7709 = vmatpush1.bf16.msra.mxu1 %v9215_v12  ;;  %v9503_v12 = vcombine.low %v17949_v9, %v17948_v17  ;;  %v17954_v2 = vmov %v17953_v59  ;;  %v9520_v10 = vcombine.high %v17955_v7, %v17953_v59  ;;  %v17964_v9 = vld [vmem:[#allocation376_spill] sm:$0xff] }
 0x778   : >> { %7760 = vmatprep.subr.bf16.mxu1 %v9488_v14  ;;  %v17950_v14 = vld [vmem:[#allocation332_spill] sm:$0xff] }
 0x779   : >> { %7668 = vmatpush1.bf16.msra.mxu0 %v9725_v4  ;;  %v9247_v4 = vcombine.low %v17947_v6, %v17946_v3  ;;  %v9264_v26 = vcombine.high %v17951_v47, %v17950_v14  ;;  %v17958_v3 = vld [vmem:[#allocation594_spill] sm:$0xff] }
 0x77a   : >> { %7719 = vmatprep.subr.bf16.mxu0 %v9232_v20  ;;  %7711 = vmatmul.mubr.bf16.vlgmr.msra.gmra.mrb[40].mxu1 %v13218_v8  ;;  %v17952_v20 = vmov %v17951_v47  ;;  %v17959_v6 = vld [vmem:[#allocation586_spill] sm:$0xff] }
 0x77b   : >> { %7761 = vmatpush1.bf16.msra.mxu1 %v9487_v1  ;;  %7792 = vmatprep.mubr.bf16.mxu1 %v13230_v11  ;;  %v9519_v1 = vcombine.low %v17955_v7, %v17954_v2  ;;  %v9536_v59 = vcombine.high %v17959_v6, %v17958_v3  ;;  %v9535_v11 = vcombine.low %v17959_v6, %v17958_v3  ;;  %v17963_v2 = vld [vmem:[#allocation602_spill] sm:$0xff]  ;;  %v17965_v3 = vld [vmem:[#allocation368_spill] sm:$0xff] }
 0x77c   : >> { %7670 = vmatmul.mubr.bf16.vlgmr.msra.gmra.mrb[40].mxu0 %v13358_v61  ;;  %7762 = vmatprep.subr.bf16.mxu1 %v9504_v13  ;;  %v17956_v13 = vld [vmem:[#allocation347_spill] sm:$0xff] }
 0x77d   : >> { %7720 = vmatpush1.bf16.msra.mxu0 %v9231_v15  ;;  %7751 = vmatprep.mubr.bf16.mxu0 %v13124_v56  ;;  %v9263_v15 = vcombine.low %v17952_v20, %v17950_v14 }
 0x77e   : >> { %7721 = vmatprep.subr.bf16.mxu0 %v9248_v19  ;;  %v17957_v19 = vld [vmem:[#allocation340_spill] sm:$0xff] }
 0x77f   : >> { %7763 = vmatpush1.bf16.msra.mxu1 %v9503_v12  ;;  %v9280_v47 = vcombine.high %v17957_v19, %v17956_v13  ;;  %v9279_v56 = vcombine.low %v17957_v19, %v17956_v13  ;;  %v17961_v12 = vld [vmem:[#allocation354_spill] sm:$0xff] }
 0x780   : >> { %7764 = vmatprep.subr.bf16.mxu1 %v9520_v10  ;;  %v17962_v10 = vld [vmem:[#allocation610_spill] sm:$0xff] }
 0x781   : >> { %7722 = vmatpush1.bf16.msra.mxu0 %v9247_v4  ;;  %v17960_v4 = vld [vmem:[#allocation361_spill] sm:$0xff]  ;;  %v9552_v7 = vcombine.high %v17963_v2, %v17962_v10  ;;  %v17968_v13 = vld [vmem:[#allocation618_spill] sm:$0xff] }
 0x782   : >> { %7723 = vmatprep.subr.bf16.mxu0 %v9264_v26  ;;  %v9296_v26 = vcombine.high %v17961_v12, %v17960_v4 }
 0x783   : >> { %7765 = vmatpush1.bf16.msra.mxu1 %v9519_v1  ;;  %v9551_v1 = vcombine.low %v17963_v2, %v17962_v10  ;;  %v17970_v2 = vld [vmem:[#allocation384_spill] sm:$0xff]  ;;  %v17972_v10 = vld [vmem:[#allocation634_spill] sm:$0xff] }
 0x784   : >> { %7766 = vmatprep.subr.bf16.mxu1 %v9536_v59  ;;  %v17966_v59 = vld [vmem:[#allocation626_spill] sm:$0xff] }
 0x785   : >> { %7724 = vmatpush1.bf16.msra.mxu0 %v9263_v15  ;;  %v9295_v15 = vcombine.low %v17961_v12, %v17960_v4  ;;  %v17967_v6 = vmov %v17966_v59  ;;  %v9568_v14 = vcombine.high %v17968_v13, %v17966_v59  ;;  %v17969_v4 = vld [vmem:[#allocation392_spill] sm:$0xff] }
 0x786   : >> { %7725 = vmatprep.subr.bf16.mxu0 %v9280_v47  ;;  %v9312_v47 = vcombine.high %v17965_v3, %v17964_v9 }
 0x787   : >> { %7767 = vmatpush1.bf16.msra.mxu1 %v9535_v11  ;;  %v9567_v11 = vcombine.low %v17968_v13, %v17967_v6  ;;  %v9327_v6 = vcombine.low %v17970_v2, %v17969_v4 }
 0x788   : >> { %7768 = vmatprep.subr.bf16.mxu1 %v9552_v7  ;;  %v17971_v7 = vld [vmem:[#allocation642_spill] sm:$0xff] }
 0x789   : >> { %7726 = vmatpush1.bf16.msra.mxu0 %v9279_v56  ;;  %v9311_v56 = vcombine.low %v17965_v3, %v17964_v9  ;;  %v9584_v12 = vcombine.high %v17972_v10, %v17971_v7  ;;  %v9583_v9 = vcombine.low %v17972_v10, %v17971_v7  ;;  %v17987_v7 = vld [vmem:[#allocation682_spill] sm:$0xff] }
 0x78a   : >> { %7727 = vmatprep.subr.bf16.mxu0 %v9296_v26  ;;  %v9328_v26 = vcombine.high %v17970_v2, %v17969_v4 }
 0x78b   : >> { %7769 = vmatpush1.bf16.msra.mxu1 %v9551_v1 }
 0x78c   : >> { %7770 = vmatprep.subr.bf16.mxu1 %v9568_v14 }
 0x78d   : >> { %7728 = vmatpush1.bf16.msra.mxu0 %v9295_v15  ;;  %v14687_v17 = vpop.f32.mrb[28].mxu1 }
 0x78e   : >> { %7729 = vmatprep.subr.bf16.mxu0 %v9312_v47  ;;  %v14692_v59 = vpop.f32.mrb[29].mxu1 }
 0x78f   : >> { %v7425_v16 = vpop.f32.mrb[28].mxu0  ;;  %v7470_v14 = vpop.f32.mrb[30].mxu1  ;;  %7771 = vmatpush1.bf16.msra.mxu1 %v9567_v11 }
 0x790   : >> { %v14690_v15 = vadd.f32 %v7425_v16, %v14551_v18  ;;  %v7427_v1 = vpop.f32.mrb[29].mxu0  ;;  %v7471_v19 = vpop.f32.mrb[31].mxu1  ;;  %7772 = vmatprep.subr.bf16.mxu1 %v9584_v12  ;;  %v17973_v18 = vld [vmem:[#allocation406_spill] sm:$0xff]  ;;  %v17974_v16 = vld [vmem:[#allocation399_spill] sm:$0xff] }
 0x791   : >> { %v14695_v3 = vadd.f32 %v7427_v1, %v14553_v34  ;;  %v7429_v47 = vpop.f32.mrb[30].mxu0  ;;  %7730 = vmatpush1.bf16.msra.mxu0 %v9311_v56  ;;  %v9344_v20 = vcombine.high %v17974_v16, %v17973_v18  ;;  %v17976_v34 = vld [vmem:[#allocation650_spill] sm:$0xff]  ;;  %v9343_v56 = vcombine.low %v17974_v16, %v17973_v18  ;;  %v17979_v19 = vld [vmem:[#allocation413_spill] sm:$0xff] }
 0x792   : >> { %v7430_v13 = vpop.f32.mrb[31].mxu0  ;;  %7731 = vmatprep.subr.bf16.mxu0 %v9328_v26  ;;  %v17977_v1 = vmov %v17976_v34  ;;  %v9600_v22 = vcombine.high %v17976_v34, %v17975_v21  ;;  %v17980_v12 = vld [vmem:[#allocation674_spill] sm:$0xff]  ;;  %v17983_v34 = vld [vmem:[#allocation435_spill] sm:$0xff] }
 0x793   : >> { %7773 = vmatpush1.bf16.msra.mxu1 %v9583_v9  ;;  %v9599_v11 = vcombine.low %v17977_v1, %v17975_v21  ;;  %v17978_v13 = vld [vmem:[#allocation421_spill] sm:$0xff]  ;;  %v17981_v47 = vld [vmem:[#allocation666_spill] sm:$0xff]  ;;  %v17984_v4 = vmov %v17983_v34  ;;  %v17985_v1 = vld [vmem:[#allocation428_spill] sm:$0xff] }
 0x794   : >> { %7774 = vmatprep.subr.bf16.mxu1 %v9600_v22  ;;  %v9360_v26 = vcombine.high %v17979_v19, %v17978_v13  ;;  %v17982_v14 = vmov %v17981_v47  ;;  %v9616_v2 = vcombine.high %v17981_v47, %v17980_v12  ;;  %v17986_v22 = vld [vmem:[#allocation690_spill] sm:$0xff]  ;;  %v18019_v21 = vld [vmem:[#allocation785_spill] sm:$0xff] }
 0x795   : >> { %7732 = vmatpush1.bf16.msra.mxu0 %v9327_v6  ;;  %v9359_v6 = vcombine.low %v17979_v19, %v17978_v13  ;;  %v9615_v9 = vcombine.low %v17982_v14, %v17980_v12  ;;  %v9632_v10 = vcombine.high %v17987_v7, %v17986_v22  ;;  %v17988_v47 = vld [vmem:[#allocation450_spill] sm:$0xff]  ;;  %v17990_v12 = vld [vmem:[#allocation443_spill] sm:$0xff] }
 0x796   : >> { %7733 = vmatprep.subr.bf16.mxu0 %v9344_v20  ;;  %v9376_v20 = vcombine.high %v17985_v1, %v17983_v34  ;;  %v17989_v13 = vmov %v17988_v47  ;;  %v17992_v14 = vld [vmem:[#allocation698_spill] sm:$0xff] }
 0x797   : >> { %7775 = vmatpush1.bf16.msra.mxu1 %v9599_v11  ;;  %v9631_v11 = vcombine.low %v17987_v7, %v17986_v22  ;;  %v17993_v34 = vld [vmem:[#allocation466_spill] sm:$0xff] }
 0x798   : >> { %7776 = vmatprep.subr.bf16.mxu1 %v9616_v2  ;;  %v17991_v2 = vld [vmem:[#allocation706_spill] sm:$0xff] }
 0x799   : >> { %7734 = vmatpush1.bf16.msra.mxu0 %v9343_v56  ;;  %v9375_v56 = vcombine.low %v17985_v1, %v17984_v4  ;;  %v9648_v16 = vcombine.high %v17992_v14, %v17991_v2  ;;  %v17994_v1 = vmov %v17993_v34  ;;  %v17995_v4 = vld [vmem:[#allocation458_spill] sm:$0xff] }
 0x79a   : >> { %7735 = vmatprep.subr.bf16.mxu0 %v9360_v26  ;;  %v9392_v26 = vcombine.high %v17990_v12, %v17988_v47  ;;  %v17997_v7 = vld [vmem:[#allocation714_spill] sm:$0xff] }
 0x79b   : >> { %7777 = vmatpush1.bf16.msra.mxu1 %v9615_v9  ;;  %v9647_v9 = vcombine.low %v17992_v14, %v17991_v2  ;;  %v17998_v47 = vld [vmem:[#allocation482_spill] sm:$0xff] }
 0x79c   : >> { %7778 = vmatprep.subr.bf16.mxu1 %v9632_v10  ;;  %v17996_v10 = vld [vmem:[#allocation722_spill] sm:$0xff] }
 0x79d   : >> { %7736 = vmatpush1.bf16.msra.mxu0 %v9359_v6  ;;  %v9391_v6 = vcombine.low %v17990_v12, %v17989_v13  ;;  %v9664_v18 = vcombine.high %v17997_v7, %v17996_v10  ;;  %v17999_v12 = vmov %v17998_v47  ;;  %v18000_v2 = vld [vmem:[#allocation474_spill] sm:$0xff] }
 0x79e   : >> { %7737 = vmatprep.subr.bf16.mxu0 %v9376_v20  ;;  %v9408_v20 = vcombine.high %v17995_v4, %v17993_v34  ;;  %v18002_v13 = vld [vmem:[#allocation730_spill] sm:$0xff] }
 0x79f   : >> { %7779 = vmatpush1.bf16.msra.mxu1 %v9631_v11  ;;  %v9663_v11 = vcombine.low %v17997_v7, %v17996_v10  ;;  %v18003_v34 = vld [vmem:[#allocation498_spill] sm:$0xff] }
 0x7a0   : >> { %7780 = vmatprep.subr.bf16.mxu1 %v9648_v16  ;;  %v18001_v16 = vld [vmem:[#allocation738_spill] sm:$0xff] }
 0x7a1   : >> { %7738 = vmatpush1.bf16.msra.mxu0 %v9375_v56  ;;  %v9407_v56 = vcombine.low %v17995_v4, %v17994_v1  ;;  %v9680_v14 = vcombine.high %v18002_v13, %v18001_v16  ;;  %v18004_v1 = vmov %v18003_v34  ;;  %v18005_v4 = vld [vmem:[#allocation490_spill] sm:$0xff] }
 0x7a2   : >> { %7739 = vmatprep.subr.bf16.mxu0 %v9392_v26  ;;  %v9424_v26 = vcombine.high %v18000_v2, %v17998_v47  ;;  %v18007_v7 = vld [vmem:[#allocation746_spill] sm:$0xff] }
 0x7a3   : >> { %7781 = vmatpush1.bf16.msra.mxu1 %v9647_v9  ;;  %v9679_v9 = vcombine.low %v18002_v13, %v18001_v16  ;;  %v18008_v47 = vld [vmem:[#allocation514_spill] sm:$0xff] }
 0x7a4   : >> { %7782 = vmatprep.subr.bf16.mxu1 %v9664_v18  ;;  %v18006_v18 = vld [vmem:[#allocation754_spill] sm:$0xff] }
 0x7a5   : >> { %7740 = vmatpush1.bf16.msra.mxu0 %v9391_v6  ;;  %v9423_v6 = vcombine.low %v18000_v2, %v17999_v12  ;;  %v9696_v10 = vcombine.high %v18007_v7, %v18006_v18  ;;  %v18009_v2 = vmov %v18008_v47  ;;  %v18010_v12 = vld [vmem:[#allocation506_spill] sm:$0xff] }
 0x7a6   : >> { %7741 = vmatprep.subr.bf16.mxu0 %v9408_v20  ;;  %v9440_v20 = vcombine.high %v18005_v4, %v18003_v34  ;;  %v18012_v13 = vld [vmem:[#allocation762_spill] sm:$0xff] }
 0x7a7   : >> { %7783 = vmatpush1.bf16.msra.mxu1 %v9663_v11  ;;  %v9695_v11 = vcombine.low %v18007_v7, %v18006_v18  ;;  %v18013_v34 = vld [vmem:[#allocation530_spill] sm:$0xff] }
 0x7a8   : >> { %7784 = vmatprep.subr.bf16.mxu1 %v9680_v14  ;;  %v18011_v14 = vld [vmem:[#allocation770_spill] sm:$0xff] }
 0x7a9   : >> { %7742 = vmatpush1.bf16.msra.mxu0 %v9407_v56  ;;  %v9439_v56 = vcombine.low %v18005_v4, %v18004_v1  ;;  %v9712_v16 = vcombine.high %v18012_v13, %v18011_v14  ;;  %v18014_v1 = vmov %v18013_v34  ;;  %v18015_v4 = vld [vmem:[#allocation522_spill] sm:$0xff] }
 0x7aa   : >> { %7743 = vmatprep.subr.bf16.mxu0 %v9424_v26  ;;  %v9456_v26 = vcombine.high %v18010_v12, %v18008_v47  ;;  %v18017_v7 = vld [vmem:[#allocation778_spill] sm:$0xff] }
 0x7ab   : >> { %7785 = vmatpush1.bf16.msra.mxu1 %v9679_v9  ;;  %v9711_v9 = vcombine.low %v18012_v13, %v18011_v14 }
 0x7ac   : >> { %7786 = vmatprep.subr.bf16.mxu1 %v9696_v10  ;;  %v18016_v10 = vld [vmem:[#allocation784_spill] sm:$0xff] }
 0x7ad   : >> { %7744 = vmatpush1.bf16.msra.mxu0 %v9423_v6  ;;  %v9455_v6 = vcombine.low %v18010_v12, %v18009_v2  ;;  %v9728_v18 = vcombine.high %v18017_v7, %v18016_v10 }
 0x7ae   : >> { %7745 = vmatprep.subr.bf16.mxu0 %v9440_v20  ;;  %v9472_v20 = vcombine.high %v18015_v4, %v18013_v34 }
 0x7af   : >> { %7787 = vmatpush1.bf16.msra.mxu1 %v9695_v11  ;;  %v9727_v11 = vcombine.low %v18017_v7, %v18016_v10 }
 0x7b0   : >> { %7788 = vmatprep.subr.bf16.mxu1 %v9712_v16 }
 0x7b1   : >> { %7746 = vmatpush1.bf16.msra.mxu0 %v9439_v56  ;;  %v9471_v56 = vcombine.low %v18015_v4, %v18014_v1 }
 0x7b2   : >> { %7747 = vmatprep.subr.bf16.mxu0 %v9456_v26 }
 0x7b3   : >> { %7789 = vmatpush1.bf16.msra.mxu1 %v9711_v9 }
 0x7b4   : >> { %7790 = vmatprep.subr.bf16.mxu1 %v9728_v18 }
 0x7b5   : >> { %7748 = vmatpush1.bf16.msra.mxu0 %v9455_v6 }
 0x7b6   : >> { %7749 = vmatprep.subr.bf16.mxu0 %v9472_v20 }
 0x7b7   : >> { %7791 = vmatpush1.bf16.msra.mxu1 %v9727_v11 }
 0x7b8   : > { %9804 = vmatprep.subr.bf16.mxu1 (%p2957_p10), %v10242_v33 }
 0x7b9   : >> { %7750 = vmatpush1.bf16.msra.mxu0 %v9471_v56 }
 0x7ba   : >> { %7793 = vmatmul.mubr.bf16.vlgmr.msra.gmra.mrb[44].mxu1 %v13358_v61 }
 0x7bb   : > { %9805 = vmatpush3.bf16.msra.mxu1 (%p2957_p10), %v10243_v39 }
 0x7bc   : >> { %7752 = vmatmul.mubr.bf16.vlgmr.msra.gmra.mrb[44].mxu0 %v13218_v8  ;;  %9806 = vmatprep.subr.bf16.mxu1 (%p2957_p10), %v10244_v35 }
 0x7bf   : > { %9807 = vmatpush3.bf16.msra.mxu1 (%p2957_p10), %v10245_v55 }
 0x7c0   : > { %9808 = vmatprep.subr.bf16.mxu1 (%p2957_p10), %v10246_v51 }
 0x7cd   : >> { %v7548_v47 = vpop.f32.mrb[32].mxu1 }
 0x7ce   : >> { %v7550_v9 = vpop.f32.mrb[33].mxu1 }
 0x7cf   : >> { %v7507_v16 = vpop.f32.mrb[32].mxu0  ;;  %v7552_v2 = vpop.f32.mrb[34].mxu1 }
 0x7d0   : >> { %v7508_v26 = vadd.f32 %v7507_v16, %v14687_v17  ;;  %v7509_v6 = vpop.f32.mrb[33].mxu0  ;;  %v7553_v20 = vpop.f32.mrb[35].mxu1  ;;  %v18018_v16 = vld [vmem:[#allocation40_spill] sm:$0xff]  ;;  %v18021_v2 = vld [vmem:[#allocation39_spill] sm:$0xff] }
 0x7d1   : >> { %v7510_v34 = vadd.f32 %v7509_v6, %v14692_v59  ;;  %v7511_v1 = vpop.f32.mrb[34].mxu0  ;;  %v7874_v22 = vrot.slane %v18019_v21, %v18018_v16  ;;  %v18020_v59 = vld [vmem:[#allocation41_spill] sm:$0xff] }
 0x7d2   : >> { %v7549_v4 = vadd.f32 %v7548_v47, %v7508_v26  ;;  %v7512_v7 = vpop.f32.mrb[35].mxu0  ;;  %v7878_v1 = vrot.slane %v18019_v21, %v18020_v59  ;;  %v18023_v26 = vsub.s32 3, %v18021_v2 }
 0x7d3   : >> { %v7551_v18 = vadd.f32 %v7550_v9, %v7510_v34  ;;  %v18022_v7 = vsub.s32 2, %v18021_v2 }
 0x7d4   : >> { %v7886_v6 = vrot.slane %v18019_v21, %v18023_v26 }
 0x7d5   : >> { %v7882_v47 = vrot.slane %v18019_v21, %v18022_v7 }
 0x80d   : >> { %v7630_v11 = vpop.f32.mrb[36].mxu1 }
 0x80e   : >> { %v7632_v12 = vpop.f32.mrb[37].mxu1 }
 0x80f   : >> { %v7589_v56 = vpop.f32.mrb[36].mxu0  ;;  %v7634_v14 = vpop.f32.mrb[38].mxu1 }
 0x810   : >> { %v7631_v10 = vadd.f32 %v7630_v11, %v7589_v56  ;;  %v7591_v8 = vpop.f32.mrb[37].mxu0  ;;  %v7635_v17 = vpop.f32.mrb[39].mxu1  ;;  %v7914_v14 = vadd.f32 %v7886_v6, %v7551_v18 }
 0x811   : >> { %v7633_v61 = vadd.f32 %v7632_v12, %v7591_v8  ;;  %v7593_v13 = vpop.f32.mrb[38].mxu0  ;;  %v7911_v12 = vadd.f32 %v7874_v22, %v14690_v15  ;;  %v18024_v15 = vsub.s32 4, %v18021_v2 }
 0x812   : >> { %v7594_v19 = vpop.f32.mrb[39].mxu0  ;;  %v7912_v13 = vadd.f32 %v7878_v1, %v14695_v3  ;;  %v9740_v56 = vmul.f32 -1.442695, %v7914_v14  ;;  %v18025_v1 = vsub.s32 5, %v18021_v2 }
 0x813   : >> { %v7913_v19 = vadd.f32 %v7882_v47, %v7549_v4  ;;  %v9737_v9 = vmul.f32 -1.442695, %v7911_v12  ;;  %v7890_v3 = vrot.slane %v18019_v21, %v18024_v15 }
 0x814   : >> { %v9738_v34 = vmul.f32 -1.442695, %v7912_v13  ;;  %v7894_v47 = vrot.slane %v18019_v21, %v18025_v1 }
 0x815   : >> { %v9739_v20 = vmul.f32 -1.442695, %v7913_v19  ;;  %10162 = vpow2.f32 %v9737_v9 }
 0x816   : >> { %10164 = vpow2.f32 %v9738_v34 }
 0x817   : >> { %10166 = vpow2.f32 %v9739_v20 }
 0x818   : >> { %10168 = vpow2.f32 %v9740_v56 }
 0x81f   : >> { %v10163_v11 = vpop.eup %10162 }
 0x820   : >> { %v10165_v8 = vpop.eup %10164  ;;  %v7925_v59 = vadd.f32 1.0, %v10163_v11 }
 0x821   : >> { %v10167_v17 = vpop.eup %10166  ;;  %v7926_v7 = vadd.f32 1.0, %v10165_v8 }
 0x822   : >> { %v10169_v16 = vpop.eup %10168  ;;  %v7937_v26 = vadd.f32 1.0, %v10167_v17  ;;  %10170 = vrcp.f32 %v7925_v59  ;;  %v7977_v59 = vstv %s7976_s7  ;;  %s10628_s7 = sshll.u32 (%p2957_p10), %s10810_s14, 4  ;;  %s10629_s7 = int_to_ptr.vmem [resolvable:$false] %s10628_s7 }
 0x823   : >> { %v7938_v4 = vadd.f32 1.0, %v10169_v16  ;;  %10172 = vrcp.f32 %v7926_v7  ;;  %vm14798_vm2 = vcmp.eq.s32.totalorder %v7977_v59, 1  ;;  %s10630_s19 = scalar_lea.vmem (%p2957_p10), %s10629_s7, 2048  ;;  %p10631_p6 = scmp.lt.s32.totalorder (%p2957_p10), %s14863_s29, %s10629_s7 }
 0x824   : >> { %10174 = vrcp.f32 %v7937_v26  ;;  %v18027_v26 = vld [vmem:[#allocation786_spill] sm:$0xff]  ;;  %p10632_p8 = scmp.lt.s32.totalorder (%p2957_p10), %s10630_s19, %s10624_s16 }
 0x825   : >> { %10176 = vrcp.f32 %v7938_v4 }
 0x826   : > { %p10633_p3 = por (%p2957_p10), %p10632_p8, %p10631_p6 }
 0x828   : > { %p10634_p1 = pnand (%p2957_p10), %p10633_p3, %p10627_p13 }
 0x82c   : >> { %v10171_v8 = vpop.eup %10170 }
 0x82d   : >> { %v10173_v17 = vpop.eup %10172 }
 0x82e   : >> { %v10175_v16 = vpop.eup %10174 }
 0x84d   : >> { %v7712_v18 = vpop.f32.mrb[40].mxu1 }
 0x84e   : >> { %v7714_v13 = vpop.f32.mrb[41].mxu1 }
 0x84f   : >> { %v7671_v22 = vpop.f32.mrb[40].mxu0  ;;  %v7716_v9 = vpop.f32.mrb[42].mxu1 }
 0x850   : >> { %v7672_v6 = vadd.f32 %v7671_v22, %v7631_v10  ;;  %v7673_v12 = vpop.f32.mrb[41].mxu0  ;;  %v7717_v56 = vpop.f32.mrb[43].mxu1 }
 0x851   : >> { %v7674_v19 = vadd.f32 %v7673_v12, %v7633_v61  ;;  %v7675_v14 = vpop.f32.mrb[42].mxu0  ;;  %v10177_v10 = vpop.eup %10176  ;;  %v18026_v61 = vld [vmem:[#allocation787_spill] sm:$0xff]  ;;  %v18030_v56 = vsub.s32 6, %v18021_v2 }
 0x852   : >> { %v7915_v34 = vadd.f32 %v7890_v3, %v7672_v6  ;;  %v7676_v20 = vpop.f32.mrb[43].mxu0  ;;  %v7957_v22 = vmul.f32 %v18026_v61, %v10175_v16  ;;  %v7958_v3 = vmul.f32 %v18027_v26, %v10177_v10  ;;  %v18031_v10 = vsub.s32 7, %v18021_v2  ;;  %v10194_v6 = vld [vmem:[#allocation23 + $0x4] ss:$8 sps:$4 sm:$0xff] (%p2957_p10)  }
 0x853   : >> { %v7916_v11 = vadd.f32 %v7894_v47, %v7674_v19  ;;  %8229 = vmatprep.subr.bf16.mxu0 (%p2957_p10), %v10194_v6  ;;  %v10236_v2 = vld [vmem:[#allocation23 + $0xe4] ss:$8 sps:$4 sm:$0xff] (%p2957_p10)  }
 0x854   : >> { %10178 = vtanh.f32 %v7915_v34  ;;  %v7902_v59 = vrot.slane %v18019_v21, %v18031_v10 }
 0x855   : >> { %10180 = vtanh.f32 %v7916_v11  ;;  %v7898_v11 = vrot.slane %v18019_v21, %v18030_v56  ;;  %v10230_v21 = vld [vmem:[#allocation23 + $0xc4] ss:$8 sps:$4 sm:$0xff] (%p2957_p10)  }
 0x85e   : >> { %v10179_v15 = vpop.eup %10178 }
 0x85f   : >> { %v10181_v7 = vpop.eup %10180  ;;  %v7959_v1 = vmul.f32 %v10179_v15, %v10171_v8 }
 0x860   : >> { %v7960_v4 = vmul.f32 %v10181_v7, %v10173_v17 }
 0x861   : >> { %v7961_v47 = vadd.f32 %v7959_v1, %v7957_v22 }
 0x862   : >> { %v7962_v12 = vadd.f32 %v7960_v4, %v7958_v3 }
 0x863   : >> { %v7981_v19 = vsel %vm14798_vm2, %v7961_v47, %v18026_v61  }
 0x864   : >> { %v7982_v14 = vsel %vm14798_vm2, %v7962_v12, %v18027_v26   ;;  %7999 = vst [vmem:[#allocation7] sm:$0xff] (%p2957_p10), %v7981_v19 }
 0x865   : > { %8000 = vst [vmem:[#allocation7 + $0x8] sm:$0xff] (%p2957_p10), %v7982_v14 }
 0x88d   : >> { %v7794_v34 = vpop.f32.mrb[44].mxu1 }
 0x88e   : >> { %v7796_v16 = vpop.f32.mrb[45].mxu1 }
 0x88f   : >> { %v7753_v9 = vpop.f32.mrb[44].mxu0  ;;  %v7798_v7 = vpop.f32.mrb[46].mxu1 }
 0x890   : >> { %v7754_v20 = vadd.f32 %v7753_v9, %v7712_v18  ;;  %v7755_v8 = vpop.f32.mrb[45].mxu0  ;;  %v7799_v1 = vpop.f32.mrb[47].mxu1  ;;  %v10199_v7 = vld [vmem:[#allocation23 + $0x10] ss:$8 sps:$4 sm:$0xff] (%p2957_p10)  }
 0x891   : >> { %v7756_v17 = vadd.f32 %v7755_v8, %v7714_v13  ;;  %v7757_v15 = vpop.f32.mrb[46].mxu0 }
 0x892   : >> { %v7795_v61 = vadd.f32 %v7794_v34, %v7754_v20  ;;  %v7758_v22 = vpop.f32.mrb[47].mxu0 }
 0x893   : >> { %v7797_v26 = vadd.f32 %v7796_v16, %v7756_v17  ;;  %v10200_v22 = vld [vmem:[#allocation23 + $0x24] ss:$8 sps:$4 sm:$0xff] (%p2957_p10)  }
 0x894   : >> { %v7917_v3 = vadd.f32 %v7898_v11, %v7795_v61  ;;  %v18036_v61 = vmov %v14309_v30  ;;  %v10250_v30 = vld [vmem:[#allocation26 + $0x60] sm:$0xff] (%p2957_p10)  }
 0x895   : >> { %v7918_v18 = vadd.f32 %v7902_v59, %v7797_v26  ;;  %v18037_v26 = vmov %v14303_v29  ;;  %v18038_v59 = vmov %v17858_v0  ;;  %v10249_v29 = vld [vmem:[#allocation26 + $0x18] sm:$0xff] (%p2957_p10)  }
 0x896   : >> { %v9741_v4 = vmul.f32 -1.442695, %v7917_v3  ;;  %v10235_v0 = vld [vmem:[#allocation23 + $0xd0] ss:$8 sps:$4 sm:$0xff] (%p2957_p10)  }
 0x897   : >> { %v9742_v9 = vmul.f32 -1.442695, %v7918_v18  ;;  %v10241_v59 = vld [vmem:[#allocation23 + $0xf0] ss:$8 sps:$4 sm:$0xff] (%p2957_p10)  }
 0x898   : >> { %10182 = vpow2.f32 %v9741_v4 }
 0x899   : >> { %10184 = vpow2.f32 %v9742_v9 }
 0x89a   : >> { %10186 = vtanh.f32 %v7961_v47  ;;  %v18039_v47 = vmov %v17853_v5  ;;  %v10233_v5 = vld [vmem:[#allocation23 + $0xd4] ss:$8 sps:$4 sm:$0xff] (%p2957_p10)  }
 0x89b   : >> { %10188 = vtanh.f32 %v7962_v12  ;;  %v10196_v47 = vld [vmem:[#allocation23] ss:$8 sps:$4 sm:$0xff] (%p2957_p10)   ;;  %v10197_v12 = vld [vmem:[#allocation23 + $0x14] ss:$8 sps:$4 sm:$0xff] (%p2957_p10)  }
 0x89c   : > { %8230 = vmatpush1.bf16.msra.mxu0 (%p2957_p10), %v10196_v47 }
 0x89d   : > { %8231 = vmatprep.subr.bf16.mxu0 (%p2957_p10), %v10197_v12 }
 0x8a0   : > { %8232 = vmatpush1.bf16.msra.mxu0 (%p2957_p10), %v10199_v7  ;;  %v10253_v7 = vld [vmem:[#allocation26 + $0x28] sm:$0xff] (%p2957_p10)  }
 0x8a1   : > { %8233 = vmatprep.subr.bf16.mxu0 (%p2957_p10), %v10200_v22  ;;  %v10254_v22 = vld [vmem:[#allocation26 + $0x70] sm:$0xff] (%p2957_p10)  }
 0x8a2   : >> { %v10183_v56 = vpop.eup %10182 }
 0x8a3   : >> { %v10185_v23 = vpop.eup %10184  ;;  %v7951_v13 = vadd.f32 1.0, %v10183_v56 }
 0x8a4   : >> { %v7952_v8 = vadd.f32 1.0, %v10185_v23  ;;  %v10187_v34 = vpop.eup %10186  ;;  %8234 = vmatpush1.bf16.msra.mxu0 (%p2957_p10), %v10202_v57  ;;  %v10255_v57 = vld [vmem:[#allocation26 + $0x30] sm:$0xff] (%p2957_p10)  }
 0x8a5   : >> { %10190 = vrcp.f32 %v7951_v13  ;;  %v10189_v20 = vpop.eup %10188  ;;  %8235 = vmatprep.subr.bf16.mxu0 (%p2957_p10), %v10203_v63  ;;  %v10256_v63 = vld [vmem:[#allocation26 + $0x78] sm:$0xff] (%p2957_p10)  }
 0x8a6   : >> { %10192 = vrcp.f32 %v7952_v8  ;;  %v18032_v8 = vmov %v7982_v14  ;;  %v10239_v14 = vld [vmem:[#allocation23 + $0xf4] ss:$8 sps:$4 sm:$0xff] (%p2957_p10)  }
 0x8a8   : > { %8236 = vmatpush1.bf16.msra.mxu0 (%p2957_p10), %v10205_v60  ;;  %v10257_v60 = vld [vmem:[#allocation26 + $0x38] sm:$0xff] (%p2957_p10)  }
 0x8a9   : > { %8237 = vmatprep.subr.bf16.mxu0 (%p2957_p10), %v10206_v42  ;;  %v8057_v42 = vld [vmem:[#allocation25] sm:$0x3] (%p2957_p10) }
 0x8ac   : > { %8238 = vmatpush1.bf16.msra.mxu0 (%p2957_p10), %v10208_v46  ;;  %v18040_v46 = vld [vmem:[#allocation40_spill] sm:$0xff] (%p2957_p10) }
 0x8ad   : > { %8239 = vmatprep.subr.bf16.mxu0 (%p2957_p10), %v10209_v37  ;;  %v8062_v37 = vrot.slane (%p2957_p10), %v8057_v42, %v18040_v46 }
 0x8ae   : > { %2959 = sbr.rel (!%p2957_p10) target bundleno = 1200 (0x4b0), region = 178 }
 0x8af   : >> { %v10191_v11 = vpop.eup %10190 }
 0x8b0   : >> { %v10193_v16 = vpop.eup %10192  ;;  %v7965_v17 = vmul.f32 %v10191_v11, %v10187_v34  ;;  %v18033_v34 = vmov %v7981_v19  ;;  %8240 = vmatpush1.bf16.msra.mxu0 (%p2957_p10), %v10211_v54  ;;  %v10238_v19 = vld [vmem:[#allocation23 + $0xe0] ss:$8 sps:$4 sm:$0xff] (%p2957_p10)   ;;  %v18041_v54 = vld [vmem:[#allocation41_spill] sm:$0xff] (%p2957_p10) }
 0x8b1   : >> { %v7966_v10 = vmul.f32 %v10193_v16, %v10189_v20  ;;  %8241 = vmatprep.subr.bf16.mxu0 (%p2957_p10), %v10212_v62  ;;  %v8066_v62 = vrot.slane (%p2957_p10), %v8057_v42, %v18041_v54 }
 0x8b2   : >> { %v7979_v15 = vsel %vm14798_vm2, %v7965_v17, %v10766_v28  }
 0x8b3   : >> { %7989 = vst [vmem:[%s7988_s30] sm:$0xff] %v7979_v15  ;;  %v7980_v23 = vsel %vm14798_vm2, %v7966_v10, %v10762_v49   ;;  %v18035_v28 = vmov %v7979_v15  ;;  %7997 = vst [vmem:[#allocation6] sm:$0xff] (%p2957_p10), %v7979_v15 }
 0x8b4   : >> { %7990 = vst [vmem:[%s7988_s30 + $0x8] sm:$0xff] %v7980_v23  ;;  %v18034_v49 = vmov %v7980_v23  ;;  %7998 = vst [vmem:[#allocation6 + $0x8] sm:$0xff] (%p2957_p10), %v7980_v23  ;;  %8242 = vmatpush1.bf16.msra.mxu0 (%p2957_p10), %v10214_v50  ;;  %v10247_v28 = vld [vmem:[#allocation26 + $0x10] sm:$0xff] (%p2957_p10)  }
 0x8b5   : > { %8243 = vmatprep.subr.bf16.mxu0 %v10215_v52  ;;  %v10224_v49 = vld [vmem:[#allocation23 + $0xa4] ss:$8 sps:$4 sm:$0xff]   ;;  %9809 = vmatpush3.bf16.msra.mxu1 %v10247_v28 }
 0x8b6   : > { %9810 = vmatprep.subr.bf16.mxu1 %v10248_v43 }
 0x8b8   : > { %8244 = vmatpush1.bf16.msra.mxu0 %v10217_v53 }
 0x8b9   : > { %8245 = vmatprep.subr.bf16.mxu0 %v10218_v45  ;;  %9811 = vmatpush3.bf16.msra.mxu1 %v10249_v29 }
 0x8ba   : > { %9812 = vmatprep.subr.bf16.mxu1 %v10250_v30 }
 0x8bb   : > { %v8002_v38 = vld [vmem:[#allocation3 + $0x8] sm:$0xff]  ;;  %v8004_v41 = vld [vmem:[#allocation3 + $0x18] sm:$0xff]  ;;  %v8001_v61 = vld [vmem:[#allocation3] sm:$0xff] }
 0x8bc   : > { %v8018_v44 = vpack.c.bf16 %v8004_v41, %v8002_v38  ;;  %8246 = vmatpush1.bf16.msra.mxu0 %v10220_v48  ;;  %v8003_v1 = vld [vmem:[#allocation3 + $0x10] sm:$0xff]  ;;  %v8006_v26 = vld [vmem:[#allocation3 + $0x28] sm:$0xff]  ;;  %v8008_v3 = vld [vmem:[#allocation3 + $0x38] sm:$0xff] }
 0x8bd   : > { %8247 = vmatprep.subr.bf16.mxu0 %v10221_v36  ;;  %9813 = vmatpush3.bf16.msra.mxu1 %v10251_v27  ;;  %v8017_v18 = vpack.c.bf16 %v8003_v1, %v8001_v61  ;;  %v8020_v4 = vpack.c.bf16 %v8008_v3, %v8006_v26  ;;  %v8005_v9 = vld [vmem:[#allocation3 + $0x20] sm:$0xff]  ;;  %v8007_v56 = vld [vmem:[#allocation3 + $0x30] sm:$0xff]  ;;  %v8010_v13 = vld [vmem:[#allocation3 + $0x48] sm:$0xff] }
 0x8be   : > { %8261 = vmatprep.mubr.bf16.mxu0 %v8018_v44  ;;  %9814 = vmatprep.subr.bf16.mxu1 %v10252_v31  ;;  %v8012_v8 = vld [vmem:[#allocation3 + $0x58] sm:$0xff]  ;;  %v8019_v34 = vpack.c.bf16 %v8007_v56, %v8005_v9  ;;  %v8009_v11 = vld [vmem:[#allocation3 + $0x40] sm:$0xff]  ;;  %v8011_v16 = vld [vmem:[#allocation3 + $0x50] sm:$0xff] }
 0x8bf   : > { %v8022_v20 = vpack.c.bf16 %v8012_v8, %v8010_v13  ;;  %v8014_v17 = vld [vmem:[#allocation3 + $0x68] sm:$0xff]  ;;  %v8016_v10 = vld [vmem:[#allocation3 + $0x78] sm:$0xff]  ;;  %v8021_v15 = vpack.c.bf16 %v8011_v16, %v8009_v11  ;;  %v8013_v6 = vld [vmem:[#allocation3 + $0x60] sm:$0xff] }
 0x8c0   : > { %8248 = vmatpush1.bf16.msra.mxu0 %v10223_v40  ;;  %v8024_v23 = vpack.c.bf16 %v8016_v10, %v8014_v17  ;;  %v8015_v47 = vld [vmem:[#allocation3 + $0x70] sm:$0xff] }
 0x8c1   : > { %8249 = vmatprep.subr.bf16.mxu0 %v10224_v49  ;;  %v8023_v12 = vpack.c.bf16 %v8015_v47, %v8013_v6  ;;  %9815 = vmatpush3.bf16.msra.mxu1 %v10253_v7 }
 0x8c2   : > { %9816 = vmatprep.subr.bf16.mxu1 %v10254_v22 }
 0x8c4   : > { %8250 = vmatpush1.bf16.msra.mxu0 %v10226_v58 }
 0x8c5   : > { %8251 = vmatprep.subr.bf16.mxu0 %v10227_v25  ;;  %9817 = vmatpush3.bf16.msra.mxu1 %v10255_v57 }
 0x8c6   : > { %9818 = vmatprep.subr.bf16.mxu1 %v10256_v63  ;;  %v9778_v63 = vld [vmem:[#allocation28] ss:$0 sm:$0xff] }
 0x8c8   : > { %8252 = vmatpush1.bf16.msra.mxu0 %v10229_v32 }
 0x8c9   : > { %8253 = vmatprep.subr.bf16.mxu0 %v10230_v21  ;;  %9819 = vmatpush3.bf16.msra.mxu1 %v10257_v60 }
 0x8cc   : > { %8254 = vmatpush1.bf16.msra.mxu0 %v10232_v24 }
 0x8cd   : > { %8255 = vmatprep.subr.bf16.mxu0 %v10233_v5 }
 0x8d0   : > { %8256 = vmatpush1.bf16.msra.mxu0 %v10235_v0 }
 0x8d1   : > { %8257 = vmatprep.subr.bf16.mxu0 %v10236_v2 }
 0x8d4   : > { %8258 = vmatpush1.bf16.msra.mxu0 %v10238_v19 }
 0x8d5   : > { %8259 = vmatprep.subr.bf16.mxu0 %v10239_v14 }
 0x8d8   : > { %8260 = vmatpush1.bf16.msra.mxu0 %v10241_v59 }
 0x8db   : > { %8262 = vmatmul.mubr.bf16.vlgmr.msra.gmra.mrb[0].mxu0 %v8017_v18 }
 0x8dc   : > { %8271 = vmatprep.mubr.bf16.mxu0 %v8020_v4 }
 0x8e3   : > { %8272 = vmatmul.mubr.bf16.gmra.mrb[4].mxu0 %v8019_v34 }
 0x8e4   : > { %8281 = vmatprep.mubr.bf16.mxu0 %v8022_v20 }
 0x8eb   : > { %8282 = vmatmul.mubr.bf16.gmra.mrb[8].mxu0 %v8021_v15 }
 0x8ec   : > { %8291 = vmatprep.mubr.bf16.mxu0 %v8024_v23 }
 0x8f3   : > { %8292 = vmatmul.mubr.bf16.gmra.mrb[12].mxu0 %v8023_v12 }
 0x9ae   : > { %v8263_v38 = vpop.f32.mrb[0].mxu0 }
 0x9af   : > { %v8264_v41 = vadd.f32 %v8263_v38, %v8062_v37  ;;  %v8265_v44 = vpop.f32.mrb[1].mxu0 }
 0x9b0   : > { %v8266_v50 = vadd.f32 %v8265_v44, %v8066_v62  ;;  %v8267_v52 = vpop.f32.mrb[2].mxu0 }
 0x9b1   : > { %v8268_v53 = vadd.f32 %v8267_v52, %v8062_v37  ;;  %v8269_v45 = vpop.f32.mrb[3].mxu0  ;;  %v8302_v39 = vmax.f32 %v8264_v41, 0.0 }
 0x9b2   : > { %v8270_v33 = vadd.f32 %v8269_v45, %v8066_v62  ;;  %v8303_v35 = vmax.f32 %v8266_v50, 0.0 }
 0x9b3   : > { %v8304_v48 = vmax.f32 %v8268_v53, 0.0 }
 0x9b4   : > { %v8305_v55 = vmax.f32 %v8270_v33, 0.0 }
 0x9b5   : > { %v8318_v51 = vpack.c.bf16 %v8304_v48, %v8302_v39 }
 0x9b6   : > { %v8273_v36 = vpop.f32.mrb[4].mxu0  ;;  %v8319_v40 = vpack.c.bf16 %v8305_v55, %v8303_v35 }
 0x9b7   : > { %v8274_v28 = vadd.f32 %v8273_v36, %v8062_v37  ;;  %v8275_v43 = vpop.f32.mrb[5].mxu0 }
 0x9b8   : > { %v8276_v49 = vadd.f32 %v8275_v43, %v8066_v62  ;;  %v8277_v58 = vpop.f32.mrb[6].mxu0  ;;  %8493 = vmatprep.mubr.bf16.mxu1 %v8319_v40 }
 0x9b9   : > { %v8278_v29 = vadd.f32 %v8277_v58, %v8062_v37  ;;  %v8279_v30 = vpop.f32.mrb[7].mxu0  ;;  %8494 = vmatmul.mubr.bf16.vlgmr.msra.gmra.mrb[0].mxu1 %v8318_v51  ;;  %v8306_v27 = vmax.f32 %v8274_v28, 0.0 }
 0x9ba   : > { %v8280_v25 = vadd.f32 %v8279_v30, %v8066_v62  ;;  %v8307_v31 = vmax.f32 %v8276_v49, 0.0 }
 0x9bb   : > { %v8308_v32 = vmax.f32 %v8278_v29, 0.0 }
 0x9bc   : > { %v8309_v21 = vmax.f32 %v8280_v25, 0.0 }
 0x9bd   : > { %v8320_v24 = vpack.c.bf16 %v8308_v32, %v8306_v27 }
 0x9be   : > { %v8321_v5 = vpack.c.bf16 %v8309_v21, %v8307_v31  ;;  %v8283_v0 = vpop.f32.mrb[8].mxu0 }
 0x9bf   : > { %v8284_v2 = vadd.f32 %v8283_v0, %v8062_v37  ;;  %v8285_v19 = vpop.f32.mrb[9].mxu0 }
 0x9c0   : > { %v8286_v14 = vadd.f32 %v8285_v19, %v8066_v62  ;;  %v8287_v59 = vpop.f32.mrb[10].mxu0  ;;  %8501 = vmatprep.mubr.bf16.mxu1 %v8321_v5 }
 0x9c1   : > { %v8288_v61 = vadd.f32 %v8287_v59, %v8062_v37  ;;  %v8289_v1 = vpop.f32.mrb[11].mxu0  ;;  %8502 = vmatmul.mubr.bf16.gmra.mrb[4].mxu1 %v8320_v24  ;;  %v8310_v3 = vmax.f32 %v8284_v2, 0.0 }
 0x9c2   : > { %v8290_v26 = vadd.f32 %v8289_v1, %v8066_v62  ;;  %v8311_v4 = vmax.f32 %v8286_v14, 0.0 }
 0x9c3   : > { %v8312_v18 = vmax.f32 %v8288_v61, 0.0 }
 0x9c4   : > { %v8313_v9 = vmax.f32 %v8290_v26, 0.0 }
 0x9c5   : > { %v8322_v56 = vpack.c.bf16 %v8312_v18, %v8310_v3 }
 0x9c6   : > { %v8323_v13 = vpack.c.bf16 %v8313_v9, %v8311_v4  ;;  %v8293_v8 = vpop.f32.mrb[12].mxu0 }
 0x9c7   : > { %v8294_v34 = vadd.f32 %v8293_v8, %v8062_v37  ;;  %v8295_v20 = vpop.f32.mrb[13].mxu0 }
 0x9c8   : > { %v8296_v11 = vadd.f32 %v8295_v20, %v8066_v62  ;;  %v8297_v16 = vpop.f32.mrb[14].mxu0  ;;  %8509 = vmatprep.mubr.bf16.mxu1 %v8323_v13 }
 0x9c9   : > { %v8298_v17 = vadd.f32 %v8297_v16, %v8062_v37  ;;  %v8299_v10 = vpop.f32.mrb[15].mxu0  ;;  %8510 = vmatmul.mubr.bf16.gmra.mrb[8].mxu1 %v8322_v56  ;;  %v8314_v23 = vmax.f32 %v8294_v34, 0.0 }
 0x9ca   : > { %v8300_v15 = vadd.f32 %v8299_v10, %v8066_v62  ;;  %v8315_v47 = vmax.f32 %v8296_v11, 0.0 }
 0x9cb   : > { %v8316_v6 = vmax.f32 %v8298_v17, 0.0 }
 0x9cc   : > { %v8317_v12 = vmax.f32 %v8300_v15, 0.0 }
 0x9cd   : > { %v8324_v7 = vpack.c.bf16 %v8316_v6, %v8314_v23 }
 0x9ce   : > { %v8325_v22 = vpack.c.bf16 %v8317_v12, %v8315_v47 }
 0x9d0   : > { %8517 = vmatprep.mubr.bf16.mxu1 %v8325_v22 }
 0x9d1   : > { %8518 = vmatmul.mubr.bf16.gmra.mrb[12].mxu1 %v8324_v7 }
 0xa8c   : > { %v9820_v57 = vpop.f32.mrb[0].mxu1 }
 0xa8d   : > { %v9821_v60 = vpop.f32.mrb[1].mxu1 }
 0xa8e   : > { %v9822_v42 = vadd.f32 %v9821_v60, %v9820_v57  ;;  %v9823_v46 = vpop.f32.mrb[2].mxu1 }
 0xa8f   : > { %v9824_v37 = vpop.f32.mrb[3].mxu1 }
 0xa90   : > { %v8496_v54 = vadd.f32 %v9822_v42, %v9778_v63  ;;  %v9825_v62 = vadd.f32 %v9824_v37, %v9823_v46 }
 0xa92   : > { %8526 = vst [vmem:[%s11290_s0] sm:$0xff] %v8496_v54  ;;  %v8499_v38 = vadd.f32 %v9825_v62, %v9778_v63 }
 0xa94   : > { %8527 = vst [vmem:[%s11290_s0 + $0x8] sm:$0xff] %v8499_v38  ;;  %v9826_v41 = vpop.f32.mrb[4].mxu1 }
 0xa95   : > { %v9827_v44 = vpop.f32.mrb[5].mxu1 }
 0xa96   : > { %v9828_v50 = vadd.f32 %v9827_v44, %v9826_v41  ;;  %v9829_v52 = vpop.f32.mrb[6].mxu1 }
 0xa97   : > { %v9830_v53 = vpop.f32.mrb[7].mxu1 }
 0xa98   : > { %v8504_v45 = vadd.f32 %v9828_v50, %v9778_v63  ;;  %v9831_v33 = vadd.f32 %v9830_v53, %v9829_v52 }
 0xa9a   : > { %8528 = vst [vmem:[%s11290_s0 + $0x10] sm:$0xff] %v8504_v45  ;;  %v8507_v39 = vadd.f32 %v9831_v33, %v9778_v63 }
 0xa9c   : > { %8529 = vst [vmem:[%s11290_s0 + $0x18] sm:$0xff] %v8507_v39  ;;  %v9832_v48 = vpop.f32.mrb[8].mxu1 }
 0xa9d   : > { %v9833_v35 = vpop.f32.mrb[9].mxu1 }
 0xa9e   : > { %v9834_v55 = vadd.f32 %v9833_v35, %v9832_v48  ;;  %v9835_v51 = vpop.f32.mrb[10].mxu1 }
 0xa9f   : > { %v9836_v36 = vpop.f32.mrb[11].mxu1 }
 0xaa0   : > { %v8512_v40 = vadd.f32 %v9834_v55, %v9778_v63  ;;  %v9837_v28 = vadd.f32 %v9836_v36, %v9835_v51 }
 0xaa2   : > { %8530 = vst [vmem:[%s11290_s0 + $0x20] sm:$0xff] %v8512_v40  ;;  %v8515_v43 = vadd.f32 %v9837_v28, %v9778_v63 }
 0xaa4   : > { %8531 = vst [vmem:[%s11290_s0 + $0x28] sm:$0xff] %v8515_v43  ;;  %v9838_v49 = vpop.f32.mrb[12].mxu1 }
 0xaa5   : > { %v9839_v58 = vpop.f32.mrb[13].mxu1 }
 0xaa6   : > { %v9840_v29 = vadd.f32 %v9839_v58, %v9838_v49  ;;  %v9841_v30 = vpop.f32.mrb[14].mxu1 }
 0xaa7   : > { %v9842_v25 = vpop.f32.mrb[15].mxu1 }
 0xaa8   : > { %v8520_v27 = vadd.f32 %v9840_v29, %v9778_v63  ;;  %v9843_v32 = vadd.f32 %v9842_v25, %v9841_v30 }
 0xaaa   : > { %8532 = vst [vmem:[%s11290_s0 + $0x30] sm:$0xff] %v8520_v27  ;;  %v8523_v31 = vadd.f32 %v9843_v32, %v9778_v63 }
 0xaac   : > { %8533 = vst [vmem:[%s11290_s0 + $0x38] sm:$0xff] %v8523_v31 }
 0xaad   : > { %10637 = shalt.err (!%p10634_p1)
}
 0xaae   : > { %s10638_s0 = scalar_lea.hbm %s14861_s3, 1024  ;;  %s10642_s13 = scalar_lea.hbm %s18042_s20, 2048 }
 0xaaf   : > { %p10639_p4 = scmp.ne.s32.totalorder %s14861_s3, %s10638_s0  ;;  %p10643_p0 = scmp.lt.u32.totalorder %s14861_s3, %s18042_s20 }
 0xab0   : > { %p10644_p2 = scmp.lt.u32.totalorder %s10642_s13, %s10638_s0  ;;  %p10646_p5 = scmp.lt.u32.totalorder %s10638_s0, %s14861_s3 }
 0xab1   : > { %p10640_p9 = pnand %p10639_p4, %p18043_p12 }
 0xab2   : > { %p10645_p10 = por %p10644_p2, %p10643_p0 }
 0xab3   : > { %p10641_p7 = pneg %p10640_p9 }
 0xab4   : > { %p10647_p11 = por %p10646_p5, %p10645_p10 }
 0xab6   : > { %p10648_p13 = pnand %p10647_p11, %p10641_p7 }
 0xab8   : > { %10651 = shalt.err (!%p10648_p13)
}
 0xab9   : > { %s10811_s16 = smov 128   ;;  %s10812_s14 = smov 8  }
 0xaba   : > { %9894 = dma.vmem_to_hbm [thread:$0]  (%p18043_p12), %s14863_s29, 1024, %s14861_s3, %s8535_s21, %s10811_s16, %s10811_s16, %s10812_s14  }
 0xabb PF: > { %s8563_s7 = sand.u32 1, %s10738_s25   ;;  %p18044_p6 = scmp.ne.s32.totalorder %s16417_s15, 0 }
 0xabc   : > { %p18045_p8 = scmp.ge.s32.totalorder %s10750_s28, 2  ;;  %s8564_s19 = scalar_lea.sflag [#allocation10], %s8563_s7 }
 0xabe   : > { %p9938_p3 = pnand %p18045_p8, %p18044_p6 }
 0xac0   : > { %10733 = dma.done.wait (!%p9938_p3), %s8564_s19, 1024  }
 0xac1   : > { %10735 = vsyncadd (!%p9938_p3), %s8564_s19, 4294966272  ;;  %p32_p1 = scmp.ge.s32.totalorder %s11180_s18, 4   ;;  %s18046_s25 = smov %s10742_s26 }
 0xac2   : > { %s18047_s26 = smov %s10746_s27  ;;  %s18048_s27 = smov %s11192_s22 }
 0xac3   : > { %s18049_s28 = smov %s11180_s18  ;;  %34 = sbr.rel (!%p32_p1) target bundleno = 19 (0x13), region = 189 }
 0xaca   :  { %8569 = vsyncpa [#allocation9], 1 }
 0xacb   :  { %8571 = vsyncpa [#allocation9 + $0x1], 1 }
 0xacc   :  { %8572 = vsyncpa [#allocation12], 1 }
 0xacd   :  { %8573 = vsyncpa [#allocation15], 1 }
 0xace   :  { %8574 = vsyncpa [#allocation18], 1 }
 0xacf   :  { %8575 = vsyncpa [#allocation21], 1 }
 0xad0   :  { %8576 = vsyncpa [#allocation24], 1 }
 0xad1   :  { %8577 = vsyncpa [#allocation27], 1 }
 0xad2   :  { %8578 = vsyncpa [#allocation10], 1 }
 0xad3   :  { %8580 = vsyncpa [#allocation10 + $0x1], 1 }

</bundles_post_ra>
